<compile_context>
chip_gen: v5e
topology: v5e:2x2
jax: 0.10.0
libtpu: 0.0.40
codegen_flags: <defaults>
</compile_context>

<pallas_src>
import functools
import math

import jax
import jax.numpy as jnp
from jax import lax
from jax.experimental import pallas as pl
from jax.experimental.pallas import tpu as pltpu

# ----------------------- small synthetic configuration -----------------------
B = 2                      # batch
IMG_C, IMG_H, IMG_W = 3, 16, 16
C_T, C_ROT = 16, 32        # backbone.num_channels[0], [1]
D = 32                     # decoder_dim (transformer d_model)
NHEAD = 4
HEAD_DIM = D // NHEAD
FFN = 64                   # transformer dim_feedforward
NUM_LAYERS = 2             # encoder layers per transformer
NUM_SCENES = 4
REG_HIDDEN = 64            # PoseRegressor hidden width ("ch")
EPS = 1e-5
NEG_INF = -1e9


# ------------------------------ Pallas kernel --------------------------------
def _layer_norm(x, gamma, beta):
    m = jnp.mean(x, axis=-1, keepdims=True)
    v = jnp.mean(jnp.square(x - m), axis=-1, keepdims=True)
    return (x - m) * lax.rsqrt(v + EPS) * gamma + beta


def _encode_stream(stream, src_ref, pos_ref, bias_ref,
                   wqkv_ref, bqkv_ref, wo_ref, bo_ref, ln1_ref,
                   w1_ref, b1_ref, w2_ref, b2_ref, ln2_ref):
    """All NUM_LAYERS post-norm encoder layers of one stream, batch folded.

    Weights are stacked stream-major on axis 0: index = stream*NUM_LAYERS + l.
    bias_ref is an additive key mask [1, 1, S] (0 valid / -1e9 padded key).
    Returns the pose-token (token 0) descriptor [B, D].
    """
    Bz, S, _ = src_ref.shape
    scale = 1.0 / math.sqrt(HEAD_DIM)
    pos = pos_ref[...]                           # [S, D], identical across batch
    bias = bias_ref[...]                         # [1, 1, S]
    x0 = src_ref[...].reshape(Bz * S, D)         # batch folded into M

    def layer(l, x):
        i = stream * NUM_LAYERS + l              # dynamic index on leading axis only
        wqkv = wqkv_ref[i]                       # [D, 3D]
        # ONE batch-folded QKV matmul ...
        qkv = jnp.dot(x, wqkv, preferred_element_type=jnp.float32) + bqkv_ref[i]
        # ... plus one positional projection shared by the whole batch (q=k=src+pos).
        pqk = jnp.dot(pos, wqkv[:, :2 * D], preferred_element_type=jnp.float32)
        qkv3 = qkv.reshape(Bz, S, 3 * D)

        heads = []
        for h in range(NHEAD):                   # heads static; each op batched over B
            q = (qkv3[:, :, h * HEAD_DIM:(h + 1) * HEAD_DIM]
                 + pqk[None, :, h * HEAD_DIM:(h + 1) * HEAD_DIM])
            k = (qkv3[:, :, D + h * HEAD_DIM:D + (h + 1) * HEAD_DIM]
                 + pqk[None, :, D + h * HEAD_DIM:D + (h + 1) * HEAD_DIM])
            v = qkv3[:, :, 2 * D + h * HEAD_DIM:2 * D + (h + 1) * HEAD_DIM]
            s = jnp.einsum('bqd,bkd->bqk', q, k,
                           preferred_element_type=jnp.float32) * scale + bias
            s = s - jnp.max(s, axis=-1, keepdims=True)
            p = jnp.exp(s)
            p = p * pl.reciprocal(jnp.sum(p, axis=-1, keepdims=True), approx=True)
            heads.append(jnp.einsum('bqk,bkd->bqd', p, v,
                                    preferred_element_type=jnp.float32))
        attn = jnp.concatenate(heads, axis=-1).reshape(Bz * S, D)
        attn = jnp.dot(attn, wo_ref[i], preferred_element_type=jnp.float32) + bo_ref[i]

        # TODO(synk): src_key_padding_mask of the NestedTensor is all-False;
        # dropout is identity (eval mode).
        ln1 = ln1_ref[i]
        y = _layer_norm(x + attn, ln1[0:1, :], ln1[1:2, :])
        ff = jnp.dot(y, w1_ref[i], preferred_element_type=jnp.float32) + b1_ref[i]
        ff = jax.nn.gelu(ff, approximate=True)   # TODO(synk): torch default GELU is exact erf
        ff = jnp.dot(ff, w2_ref[i], preferred_element_type=jnp.float32) + b2_ref[i]
        ln2 = ln2_ref[i]
        return _layer_norm(y + ff, ln2[0:1, :], ln2[1:2, :])

    x = lax.fori_loop(0, NUM_LAYERS, layer, x0)
    return x.reshape(Bz, S, D)[:, 0, :]          # pose-token descriptor [B, D]


def _model_kernel(src_t_ref, pos_t_ref, bias_t_ref,
                  src_r_ref, pos_r_ref, bias_r_ref,
                  wqkv_ref, bqkv_ref, wo_ref, bo_ref, ln1_ref,
                  w1_ref, b1_ref, w2_ref, b2_ref, ln2_ref,
                  scw_ref, scb_ref,
                  w1t_ref, b1t_ref, w2t_ref, b2t_ref,
                  w1r_ref, b1r_ref, w2r_ref, b2r_ref,
                  prov_ref, out_ref, *, use_provided):
    """Both encoder streams + scene classifier + PoseRegressor heads, fused.

    Output slab [B, 128]: cols 0:D global_t | D:2D global_rot | 2D:2D+7 pose |
    next NUM_SCENES scene log-softmax | next col selected scene index (float).
    """
    enc = functools.partial(
        _encode_stream,
        wqkv_ref=wqkv_ref, bqkv_ref=bqkv_ref, wo_ref=wo_ref, bo_ref=bo_ref,
        ln1_ref=ln1_ref, w1_ref=w1_ref, b1_ref=b1_ref, w2_ref=w2_ref,
        b2_ref=b2_ref, ln2_ref=ln2_ref)
    gt = enc(0, src_t_ref, pos_t_ref, bias_t_ref)          # [B, D]
    gr = enc(1, src_r_ref, pos_r_ref, bias_r_ref)          # [B, D]
    Bz = gt.shape[0]

    # ---- scene classifier (log-softmax + argmax / provided index) ----
    cat = jnp.concatenate([gt, gr], axis=1)                 # [B, 2D]
    logits = jnp.dot(cat, scw_ref[...],
                     preferred_element_type=jnp.float32) + scb_ref[...]
    z = logits - jnp.max(logits, axis=1, keepdims=True)
    logd = z - jnp.log(jnp.sum(jnp.exp(z), axis=1, keepdims=True))

    ids = lax.broadcasted_iota(jnp.int32, logits.shape, 1)
    if use_provided:
        onehot = prov_ref[...]                              # [B, NS] one-hot
        idxf = jnp.sum(onehot * ids.astype(jnp.float32), axis=1, keepdims=True)
    else:
        is_max = logd >= jnp.max(logd, axis=1, keepdims=True)
        idx = jnp.min(jnp.where(is_max, ids, NUM_SCENES), axis=1, keepdims=True)
        onehot = (ids == idx).astype(jnp.float32)
        idxf = idx.astype(jnp.float32)

    # ---- all-scene regressor heads: stacked L1 + block-diagonal L2 ----
    ht = jax.nn.gelu(jnp.dot(gt, w1t_ref[...], preferred_element_type=jnp.float32)
                     + b1t_ref[...], approximate=True)      # [B, NS*H]
    xt_all = jnp.dot(ht, w2t_ref[...],
                     preferred_element_type=jnp.float32) + b2t_ref[...]   # [B, NS*3]
    hr = jax.nn.gelu(jnp.dot(gr, w1r_ref[...], preferred_element_type=jnp.float32)
                     + b1r_ref[...], approximate=True)
    xr_all = jnp.dot(hr, w2r_ref[...],
                     preferred_element_type=jnp.float32) + b2r_ref[...]   # [B, NS*4]

    xt = jnp.zeros((Bz, 3), jnp.float32)
    xr = jnp.zeros((Bz, 4), jnp.float32)
    for sc in range(NUM_SCENES):                            # one-hot scene selection
        sel = onehot[:, sc:sc + 1]
        xt = xt + sel * xt_all[:, sc * 3:(sc + 1) * 3]
        xr = xr + sel * xr_all[:, sc * 4:(sc + 1) * 4]

    pad = jnp.zeros((Bz, 128 - (2 * D + 7 + NUM_SCENES + 1)), jnp.float32)
    out_ref[...] = jnp.concatenate([gt, gr, xt, xr, logd, idxf, pad], axis=1)


def run_model(src_t, pos_t, bias_t, src_r, pos_r, bias_r, prov, p, use_provided):
    Bz = src_t.shape[0]
    kernel = functools.partial(_model_kernel, use_provided=use_provided)
    args = (src_t, pos_t, bias_t, src_r, pos_r, bias_r,
            p['wqkv'], p['bqkv'], p['wo'], p['bo'], p['ln1'],
            p['w1'], p['b1'], p['w2'], p['b2'], p['ln2'],
            p['scene_w'], p['scene_b'],
            p['w1_t'], p['b1_t'], p['w2_t'], p['b2_t'],
            p['w1_r'], p['b1_r'], p['w2_r'], p['b2_r'],
            prov)
    vmem_spec = pl.BlockSpec(memory_space=pltpu.MemorySpace.VMEM)
    return pl.pallas_call(
        kernel,
        in_specs=[vmem_spec] * len(args),
        out_specs=vmem_spec,
        out_shape=jax.ShapeDtypeStruct((Bz, 128), jnp.float32),
    )(*args)


# --------------------------------- JAX glue ----------------------------------
def sine_position_encoding(H, W, dim):
    npf = dim // 2
    scale = 2.0 * math.pi
    y = (jnp.arange(H, dtype=jnp.float32) + 1.0) / H * scale
    x = (jnp.arange(W, dtype=jnp.float32) + 1.0) / W * scale
    dim_t = 10000.0 ** (2.0 * (jnp.arange(npf, dtype=jnp.float32) // 2) / npf)
    pos_x = x[None, :, None] / dim_t            # [1, W, npf]
    pos_y = y[:, None, None] / dim_t            # [H, 1, npf]
    pos_x = jnp.stack([jnp.sin(pos_x[..., 0::2]), jnp.cos(pos_x[..., 1::2])],
                      axis=-1).reshape(1, W, npf)
    pos_y = jnp.stack([jnp.sin(pos_y[..., 0::2]), jnp.cos(pos_y[..., 1::2])],
                      axis=-1).reshape(H, 1, npf)
    pos = jnp.concatenate([jnp.broadcast_to(pos_y, (H, W, npf)),
                           jnp.broadcast_to(pos_x, (H, W, npf))], axis=-1)
    return pos.reshape(H * W, dim)              # batch-independent [HW, dim]


def backbone_standin(img, p):
    # TODO(synk): the real (pretrained EfficientNet) backbone is external; the
    # stand-in is avg-pool downsample + deterministic 1x1 conv, done in XLA.
    Bz, C, H, W = img.shape

    def reduce_and_project(stride, pw, pb):
        x = img.reshape(Bz, C, H // stride, stride, W // stride, stride).mean(axis=(3, 5))
        return jnp.einsum('bchw,cd->bdhw', x, pw) + pb.reshape(1, -1, 1, 1)

    feat_t = reduce_and_project(2, p['bb_w_t'], p['bb_b_t'])
    feat_rot = reduce_and_project(4, p['bb_w_r'], p['bb_b_r'])
    return feat_t, feat_rot


def tokens_with_pose_token(feat_nchw, pos_flat, proj_w, proj_b, pose_token):
    Bz, C, H, W = feat_nchw.shape
    tok = (jnp.einsum('bchw,cd->bhwd', feat_nchw, proj_w)
           + proj_b[None, None, None, :]).reshape(Bz, H * W, D)   # input_proj (1x1 conv)
    pt = jnp.broadcast_to(pose_token[None, :, :], (Bz, 1, D))
    src = jnp.concatenate([pt, tok], axis=1)                      # [B, 1+HW, D]
    pos = jnp.concatenate([pose_token, pos_flat], axis=0)         # [1+HW, D]
    return src, pos


def pad_stream(src, pos):
    """Pad a stream's sequence length to the next multiple of 8; build key bias."""
    S0 = src.shape[1]
    S = ((S0 + 7) // 8) * 8
    src_p = jnp.pad(src, ((0, 0), (0, S - S0), (0, 0)))
    pos_p = jnp.pad(pos, ((0, S - S0), (0, 0)))
    bias = jnp.where(jnp.arange(S) < S0, 0.0, NEG_INF).astype(jnp.float32)
    return src_p, pos_p, bias.reshape(1, 1, S)


def _block_diag(blocks):
    n = len(blocks)
    r, c = blocks[0].shape
    out = jnp.zeros((n * r, n * c), blocks[0].dtype)
    for i, b in enumerate(blocks):
        out = out.at[i * r:(i + 1) * r, i * c:(i + 1) * c].set(b)
    return out


def init_params(key):
    ks = iter(jax.random.split(key, 40))

    def nrm(shape, s=0.02):
        return jax.random.normal(next(ks), shape, jnp.float32) * s

    L2 = 2 * NUM_LAYERS   # stream-major layer stack: [t.l0, t.l1, rot.l0, rot.l1]
    ln = jnp.concatenate([jnp.ones((L2, 1, D), jnp.float32),
                          jnp.zeros((L2, 1, D), jnp.float32)], axis=1)   # [L2, 2, D]

    # per-scene regressor weights, repacked for the fused head
    w1t_s, w2t_s = nrm((NUM_SCENES, D, REG_HIDDEN)), nrm((NUM_SCENES, REG_HIDDEN, 3))
    w1r_s, w2r_s = nrm((NUM_SCENES, D, REG_HIDDEN)), nrm((NUM_SCENES, REG_HIDDEN, 4))

    return {
        'bb_w_t': nrm((IMG_C, C_T)), 'bb_b_t': jnp.zeros((C_T,), jnp.float32),
        'bb_w_r': nrm((IMG_C, C_ROT)), 'bb_b_r': jnp.zeros((C_ROT,), jnp.float32),
        'proj_w_t': nrm((C_T, D)), 'proj_b_t': jnp.zeros((D,), jnp.float32),
        'proj_w_r': nrm((C_ROT, D)), 'proj_b_r': jnp.zeros((D,), jnp.float32),
        'pose_token_t': jnp.zeros((1, D), jnp.float32),   # torch.zeros init
        'pose_token_r': jnp.zeros((1, D), jnp.float32),
        # stacked encoder weights, axis 0 = stream*NUM_LAYERS + layer
        'wqkv': nrm((L2, D, 3 * D)), 'bqkv': jnp.zeros((L2, 1, 3 * D), jnp.float32),
        'wo': nrm((L2, D, D)), 'bo': jnp.zeros((L2, 1, D), jnp.float32),
        'ln1': ln, 'ln2': ln,
        'w1': nrm((L2, D, FFN)), 'b1': jnp.zeros((L2, 1, FFN), jnp.float32),
        'w2': nrm((L2, FFN, D)), 'b2': jnp.zeros((L2, 1, D), jnp.float32),
        'scene_w': nrm((2 * D, NUM_SCENES)),
        'scene_b': jnp.zeros((1, NUM_SCENES), jnp.float32),
        # fused per-scene regressor heads (stacked L1, block-diagonal L2)
        'w1_t': jnp.concatenate([w1t_s[s] for s in range(NUM_SCENES)], axis=1),
        'b1_t': jnp.zeros((1, NUM_SCENES * REG_HIDDEN), jnp.float32),
        'w2_t': _block_diag([w2t_s[s] for s in range(NUM_SCENES)]),
        'b2_t': jnp.zeros((1, NUM_SCENES * 3), jnp.float32),
        'w1_r': jnp.concatenate([w1r_s[s] for s in range(NUM_SCENES)], axis=1),
        'b1_r': jnp.zeros((1, NUM_SCENES * REG_HIDDEN), jnp.float32),
        'w2_r': _block_diag([w2r_s[s] for s in range(NUM_SCENES)]),
        'b2_r': jnp.zeros((1, NUM_SCENES * 4), jnp.float32),
    }


def forward(params, img, scene_indices=None):
    Bz = img.shape[0]
    feat_t, feat_rot = backbone_standin(img, params)
    pos_t = sine_position_encoding(feat_t.shape[2], feat_t.shape[3], D)
    pos_r = sine_position_encoding(feat_rot.shape[2], feat_rot.shape[3], D)

    src_t, ptok_t = tokens_with_pose_token(feat_t, pos_t, params['proj_w_t'],
                                           params['proj_b_t'], params['pose_token_t'])
    src_r, ptok_r = tokens_with_pose_token(feat_rot, pos_r, params['proj_w_r'],
                                           params['proj_b_r'], params['pose_token_r'])

    # Each stream keeps its own (exact) sequence length, padded only to the
    # next multiple of 8 for alignment; padded keys are masked additively.
    src_t, pos_t, bias_t = pad_stream(src_t, ptok_t)
    src_r, pos_r, bias_r = pad_stream(src_r, ptok_r)

    if scene_indices is None:
        prov = jnp.zeros((Bz, NUM_SCENES), jnp.float32)
        use_provided = False
    else:
        prov = jax.nn.one_hot(scene_indices.astype(jnp.int32), NUM_SCENES,
                              dtype=jnp.float32)
        use_provided = True

    slab = run_model(src_t, pos_t, bias_t, src_r, pos_r, bias_r, prov,
                     params, use_provided)                     # [B, 128]
    global_t = slab[:, 0:D]
    global_r = slab[:, D:2 * D]
    pose = slab[:, 2 * D:2 * D + 7]
    scene_log_distr = slab[:, 2 * D + 7:2 * D + 7 + NUM_SCENES]
    max_indices = slab[:, 2 * D + 7 + NUM_SCENES].astype(jnp.int32)
    return {'pose': pose, 'scene_log_distr': scene_log_distr,
            'global_desc_t': global_t, 'global_desc_rot': global_r,
            'max_indices': max_indices}


if __name__ == "__main__":
    key = jax.random.PRNGKey(0)
    pkey, ikey = jax.random.split(key)
    params = init_params(pkey)
    img = jax.random.normal(ikey, (B, IMG_C, IMG_H, IMG_W), jnp.float32)
    fwd = jax.jit(forward)
    out = fwd(params, img)
    jax.block_until_ready(out['pose'])
    assert out['pose'].shape == (B, 7)
    assert out['scene_log_distr'].shape == (B, NUM_SCENES)
    assert out['max_indices'].shape == (B,)
    assert out['global_desc_t'].shape == (B, D)
    assert out['global_desc_rot'].shape == (B, D)
    assert bool(jnp.all(jnp.isfinite(out['pose'])))
    assert bool(jnp.all(jnp.isfinite(out['scene_log_distr'])))
    print("KERNEL_OK")
</pallas_src>

<mosaic_0001>
module attributes {stable_mosaic.version = 11 : i64} {
  func.func @_model_kernel(%arg0: memref<2x72x32xf32, #tpu.memory_space<vmem>>, %arg1: memref<72x32xf32, #tpu.memory_space<vmem>>, %arg2: memref<1x1x72xf32, #tpu.memory_space<vmem>>, %arg3: memref<2x24x32xf32, #tpu.memory_space<vmem>>, %arg4: memref<24x32xf32, #tpu.memory_space<vmem>>, %arg5: memref<1x1x24xf32, #tpu.memory_space<vmem>>, %arg6: memref<4x32x96xf32, #tpu.memory_space<vmem>>, %arg7: memref<4x1x96xf32, #tpu.memory_space<vmem>>, %arg8: memref<4x32x32xf32, #tpu.memory_space<vmem>>, %arg9: memref<4x1x32xf32, #tpu.memory_space<vmem>>, %arg10: memref<4x2x32xf32, #tpu.memory_space<vmem>>, %arg11: memref<4x32x64xf32, #tpu.memory_space<vmem>>, %arg12: memref<4x1x64xf32, #tpu.memory_space<vmem>>, %arg13: memref<4x64x32xf32, #tpu.memory_space<vmem>>, %arg14: memref<4x1x32xf32, #tpu.memory_space<vmem>>, %arg15: memref<4x2x32xf32, #tpu.memory_space<vmem>>, %arg16: memref<64x4xf32, #tpu.memory_space<vmem>>, %arg17: memref<1x4xf32, #tpu.memory_space<vmem>>, %arg18: memref<32x256xf32, #tpu.memory_space<vmem>>, %arg19: memref<1x256xf32, #tpu.memory_space<vmem>>, %arg20: memref<256x12xf32, #tpu.memory_space<vmem>>, %arg21: memref<1x12xf32, #tpu.memory_space<vmem>>, %arg22: memref<32x256xf32, #tpu.memory_space<vmem>>, %arg23: memref<1x256xf32, #tpu.memory_space<vmem>>, %arg24: memref<256x16xf32, #tpu.memory_space<vmem>>, %arg25: memref<1x16xf32, #tpu.memory_space<vmem>>, %arg26: memref<2x4xf32, #tpu.memory_space<vmem>>, %arg27: memref<2x128xf32, #tpu.memory_space<vmem>>) attributes {dimension_semantics = [], scalar_prefetch = 0 : i64, scratch_operands = 0 : i64, tpu.core_type = #tpu.core_type<tc>} {
    %c0 = arith.constant 0 : index
    %c0_0 = arith.constant 0 : index
    %0 = vector.load %arg1[%c0, %c0_0] : memref<72x32xf32, #tpu.memory_space<vmem>>, vector<72x32xf32>
    %c0_1 = arith.constant 0 : index
    %c0_2 = arith.constant 0 : index
    %c0_3 = arith.constant 0 : index
    %1 = vector.load %arg2[%c0_1, %c0_2, %c0_3] : memref<1x1x72xf32, #tpu.memory_space<vmem>>, vector<1x1x72xf32>
    %c0_4 = arith.constant 0 : index
    %c0_5 = arith.constant 0 : index
    %c0_6 = arith.constant 0 : index
    %2 = vector.load %arg0[%c0_4, %c0_5, %c0_6] : memref<2x72x32xf32, #tpu.memory_space<vmem>>, vector<2x72x32xf32>
    %3 = vector.shape_cast %2 : vector<2x72x32xf32> to vector<144x32xf32>
    %c0_i32 = arith.constant 0 : i32
    %c2_i32 = arith.constant 2 : i32
    %4 = arith.addi %c0_i32, %c2_i32 : i32
    %c1_i32 = arith.constant 1 : i32
    %5 = scf.for %arg28 = %c0_i32 to %4 step %c1_i32 iter_args(%arg29 = %3) -> (vector<144x32xf32>)  : i32 {
      %c0_i32_61 = arith.constant 0 : i32
      %135 = arith.addi %c0_i32_61, %arg28 : i32
      %136 = arith.index_cast %135 : i32 to index
      %c0_62 = arith.constant 0 : index
      %c0_63 = arith.constant 0 : index
      %137 = vector.load %arg6[%136, %c0_62, %c0_63] : memref<4x32x96xf32, #tpu.memory_space<vmem>>, vector<1x32x96xf32>
      %138 = vector.shape_cast %137 : vector<1x32x96xf32> to vector<32x96xf32>
      %cst_64 = arith.constant dense<0.000000e+00> : vector<144x96xf32>
      %139 = tpu.matmul %arg29, %138, %cst_64 {dimension_numbers = #tpu.dot_dimension_numbers<[1], [0], [0], [1], [0, 0, 1, 1], [], []>} : vector<144x32xf32>, vector<32x96xf32>, vector<144x96xf32> -> vector<144x96xf32>
      %140 = arith.index_cast %135 : i32 to index
      %c0_65 = arith.constant 0 : index
      %c0_66 = arith.constant 0 : index
      %141 = vector.load %arg7[%140, %c0_65, %c0_66] : memref<4x1x96xf32, #tpu.memory_space<vmem>>, vector<1x1x96xf32>
      %142 = vector.shape_cast %141 : vector<1x1x96xf32> to vector<1x96xf32>
      %143 = vector.broadcast %142 : vector<1x96xf32> to vector<144x96xf32>
      %144 = arith.addf %139, %143 : vector<144x96xf32>
      %145 = vector.extract_strided_slice %138 {offsets = [0, 0], sizes = [32, 64], strides = [1, 1]} : vector<32x96xf32> to vector<32x64xf32>
      %cst_67 = arith.constant dense<0.000000e+00> : vector<72x64xf32>
      %146 = tpu.matmul %0, %145, %cst_67 {dimension_numbers = #tpu.dot_dimension_numbers<[1], [0], [0], [1], [0, 0, 1, 1], [], []>} : vector<72x32xf32>, vector<32x64xf32>, vector<72x64xf32> -> vector<72x64xf32>
      %147 = vector.shape_cast %144 : vector<144x96xf32> to vector<2x72x96xf32>
      %148 = vector.extract_strided_slice %147 {offsets = [0, 0, 0], sizes = [2, 72, 8], strides = [1, 1, 1]} : vector<2x72x96xf32> to vector<2x72x8xf32>
      %149 = vector.extract_strided_slice %146 {offsets = [0, 0], sizes = [72, 8], strides = [1, 1]} : vector<72x64xf32> to vector<72x8xf32>
      %150 = vector.shape_cast %149 : vector<72x8xf32> to vector<1x72x8xf32>
      %151 = vector.broadcast %150 : vector<1x72x8xf32> to vector<2x72x8xf32>
      %152 = arith.addf %148, %151 : vector<2x72x8xf32>
      %153 = vector.extract_strided_slice %147 {offsets = [0, 0, 32], sizes = [2, 72, 8], strides = [1, 1, 1]} : vector<2x72x96xf32> to vector<2x72x8xf32>
      %154 = vector.extract_strided_slice %146 {offsets = [0, 32], sizes = [72, 8], strides = [1, 1]} : vector<72x64xf32> to vector<72x8xf32>
      %155 = vector.shape_cast %154 : vector<72x8xf32> to vector<1x72x8xf32>
      %156 = vector.broadcast %155 : vector<1x72x8xf32> to vector<2x72x8xf32>
      %157 = arith.addf %153, %156 : vector<2x72x8xf32>
      %158 = vector.extract_strided_slice %147 {offsets = [0, 0, 64], sizes = [2, 72, 8], strides = [1, 1, 1]} : vector<2x72x96xf32> to vector<2x72x8xf32>
      "tpu.trace_start"() <{level = 10 : i32, message = "bqd,bkd->bqk"}> : () -> ()
      %cst_68 = arith.constant dense<0.000000e+00> : vector<2x72x72xf32>
      %159 = tpu.matmul %152, %157, %cst_68 {dimension_numbers = #tpu.dot_dimension_numbers<[2], [2], [1], [1], [0, 0, 0, 1, 1, 1], [0], [0]>} : vector<2x72x8xf32>, vector<2x72x8xf32>, vector<2x72x72xf32> -> vector<2x72x72xf32>
      "tpu.trace_stop"() : () -> ()
      %cst_69 = arith.constant 0.353553385 : f32
      %160 = vector.broadcast %cst_69 : f32 to vector<2x72x72xf32>
      %161 = arith.mulf %159, %160 : vector<2x72x72xf32>
      %162 = vector.broadcast %1 : vector<1x1x72xf32> to vector<2x72x72xf32>
      %163 = arith.addf %161, %162 : vector<2x72x72xf32>
      %cst_70 = arith.constant dense<0xFF800000> : vector<2x72xf32>
      %164 = vector.multi_reduction <maximumf>, %163, %cst_70 [2] : vector<2x72x72xf32> to vector<2x72xf32>
      %165 = vector.shape_cast %164 : vector<2x72xf32> to vector<2x72x1xf32>
      %166 = vector.broadcast %165 : vector<2x72x1xf32> to vector<2x72x72xf32>
      %167 = arith.subf %163, %166 : vector<2x72x72xf32>
      %168 = math.exp %167 : vector<2x72x72xf32>
      %cst_71 = arith.constant dense<0.000000e+00> : vector<2x72xf32>
      %169 = vector.multi_reduction <add>, %168, %cst_71 [2] : vector<2x72x72xf32> to vector<2x72xf32>
      %170 = vector.shape_cast %169 : vector<2x72xf32> to vector<2x72x1xf32>
      %171 = tpu.reciprocal %170 {approx = true} : vector<2x72x1xf32> -> vector<2x72x1xf32>
      %172 = vector.broadcast %171 : vector<2x72x1xf32> to vector<2x72x72xf32>
      %173 = arith.mulf %168, %172 : vector<2x72x72xf32>
      "tpu.trace_start"() <{level = 10 : i32, message = "bqk,bkd->bqd"}> : () -> ()
      %cst_72 = arith.constant dense<0.000000e+00> : vector<2x72x8xf32>
      %174 = tpu.matmul %173, %158, %cst_72 {dimension_numbers = #tpu.dot_dimension_numbers<[2], [1], [1], [2], [0, 0, 0, 1, 1, 2], [0], [0]>} : vector<2x72x72xf32>, vector<2x72x8xf32>, vector<2x72x8xf32> -> vector<2x72x8xf32>
      "tpu.trace_stop"() : () -> ()
      %175 = vector.extract_strided_slice %147 {offsets = [0, 0, 8], sizes = [2, 72, 8], strides = [1, 1, 1]} : vector<2x72x96xf32> to vector<2x72x8xf32>
      %176 = vector.extract_strided_slice %146 {offsets = [0, 8], sizes = [72, 8], strides = [1, 1]} : vector<72x64xf32> to vector<72x8xf32>
      %177 = vector.shape_cast %176 : vector<72x8xf32> to vector<1x72x8xf32>
      %178 = vector.broadcast %177 : vector<1x72x8xf32> to vector<2x72x8xf32>
      %179 = arith.addf %175, %178 : vector<2x72x8xf32>
      %180 = vector.extract_strided_slice %147 {offsets = [0, 0, 40], sizes = [2, 72, 8], strides = [1, 1, 1]} : vector<2x72x96xf32> to vector<2x72x8xf32>
      %181 = vector.extract_strided_slice %146 {offsets = [0, 40], sizes = [72, 8], strides = [1, 1]} : vector<72x64xf32> to vector<72x8xf32>
      %182 = vector.shape_cast %181 : vector<72x8xf32> to vector<1x72x8xf32>
      %183 = vector.broadcast %182 : vector<1x72x8xf32> to vector<2x72x8xf32>
      %184 = arith.addf %180, %183 : vector<2x72x8xf32>
      %185 = vector.extract_strided_slice %147 {offsets = [0, 0, 72], sizes = [2, 72, 8], strides = [1, 1, 1]} : vector<2x72x96xf32> to vector<2x72x8xf32>
      "tpu.trace_start"() <{level = 10 : i32, message = "bqd,bkd->bqk"}> : () -> ()
      %cst_73 = arith.constant dense<0.000000e+00> : vector<2x72x72xf32>
      %186 = tpu.matmul %179, %184, %cst_73 {dimension_numbers = #tpu.dot_dimension_numbers<[2], [2], [1], [1], [0, 0, 0, 1, 1, 1], [0], [0]>} : vector<2x72x8xf32>, vector<2x72x8xf32>, vector<2x72x72xf32> -> vector<2x72x72xf32>
      "tpu.trace_stop"() : () -> ()
      %cst_74 = arith.constant 0.353553385 : f32
      %187 = vector.broadcast %cst_74 : f32 to vector<2x72x72xf32>
      %188 = arith.mulf %186, %187 : vector<2x72x72xf32>
      %189 = vector.broadcast %1 : vector<1x1x72xf32> to vector<2x72x72xf32>
      %190 = arith.addf %188, %189 : vector<2x72x72xf32>
      %cst_75 = arith.constant dense<0xFF800000> : vector<2x72xf32>
      %191 = vector.multi_reduction <maximumf>, %190, %cst_75 [2] : vector<2x72x72xf32> to vector<2x72xf32>
      %192 = vector.shape_cast %191 : vector<2x72xf32> to vector<2x72x1xf32>
      %193 = vector.broadcast %192 : vector<2x72x1xf32> to vector<2x72x72xf32>
      %194 = arith.subf %190, %193 : vector<2x72x72xf32>
      %195 = math.exp %194 : vector<2x72x72xf32>
      %cst_76 = arith.constant dense<0.000000e+00> : vector<2x72xf32>
      %196 = vector.multi_reduction <add>, %195, %cst_76 [2] : vector<2x72x72xf32> to vector<2x72xf32>
      %197 = vector.shape_cast %196 : vector<2x72xf32> to vector<2x72x1xf32>
      %198 = tpu.reciprocal %197 {approx = true} : vector<2x72x1xf32> -> vector<2x72x1xf32>
      %199 = vector.broadcast %198 : vector<2x72x1xf32> to vector<2x72x72xf32>
      %200 = arith.mulf %195, %199 : vector<2x72x72xf32>
      "tpu.trace_start"() <{level = 10 : i32, message = "bqk,bkd->bqd"}> : () -> ()
      %cst_77 = arith.constant dense<0.000000e+00> : vector<2x72x8xf32>
      %201 = tpu.matmul %200, %185, %cst_77 {dimension_numbers = #tpu.dot_dimension_numbers<[2], [1], [1], [2], [0, 0, 0, 1, 1, 2], [0], [0]>} : vector<2x72x72xf32>, vector<2x72x8xf32>, vector<2x72x8xf32> -> vector<2x72x8xf32>
      "tpu.trace_stop"() : () -> ()
      %202 = vector.extract_strided_slice %147 {offsets = [0, 0, 16], sizes = [2, 72, 8], strides = [1, 1, 1]} : vector<2x72x96xf32> to vector<2x72x8xf32>
      %203 = vector.extract_strided_slice %146 {offsets = [0, 16], sizes = [72, 8], strides = [1, 1]} : vector<72x64xf32> to vector<72x8xf32>
      %204 = vector.shape_cast %203 : vector<72x8xf32> to vector<1x72x8xf32>
      %205 = vector.broadcast %204 : vector<1x72x8xf32> to vector<2x72x8xf32>
      %206 = arith.addf %202, %205 : vector<2x72x8xf32>
      %207 = vector.extract_strided_slice %147 {offsets = [0, 0, 48], sizes = [2, 72, 8], strides = [1, 1, 1]} : vector<2x72x96xf32> to vector<2x72x8xf32>
      %208 = vector.extract_strided_slice %146 {offsets = [0, 48], sizes = [72, 8], strides = [1, 1]} : vector<72x64xf32> to vector<72x8xf32>
      %209 = vector.shape_cast %208 : vector<72x8xf32> to vector<1x72x8xf32>
      %210 = vector.broadcast %209 : vector<1x72x8xf32> to vector<2x72x8xf32>
      %211 = arith.addf %207, %210 : vector<2x72x8xf32>
      %212 = vector.extract_strided_slice %147 {offsets = [0, 0, 80], sizes = [2, 72, 8], strides = [1, 1, 1]} : vector<2x72x96xf32> to vector<2x72x8xf32>
      "tpu.trace_start"() <{level = 10 : i32, message = "bqd,bkd->bqk"}> : () -> ()
      %cst_78 = arith.constant dense<0.000000e+00> : vector<2x72x72xf32>
      %213 = tpu.matmul %206, %211, %cst_78 {dimension_numbers = #tpu.dot_dimension_numbers<[2], [2], [1], [1], [0, 0, 0, 1, 1, 1], [0], [0]>} : vector<2x72x8xf32>, vector<2x72x8xf32>, vector<2x72x72xf32> -> vector<2x72x72xf32>
      "tpu.trace_stop"() : () -> ()
      %cst_79 = arith.constant 0.353553385 : f32
      %214 = vector.broadcast %cst_79 : f32 to vector<2x72x72xf32>
      %215 = arith.mulf %213, %214 : vector<2x72x72xf32>
      %216 = vector.broadcast %1 : vector<1x1x72xf32> to vector<2x72x72xf32>
      %217 = arith.addf %215, %216 : vector<2x72x72xf32>
      %cst_80 = arith.constant dense<0xFF800000> : vector<2x72xf32>
      %218 = vector.multi_reduction <maximumf>, %217, %cst_80 [2] : vector<2x72x72xf32> to vector<2x72xf32>
      %219 = vector.shape_cast %218 : vector<2x72xf32> to vector<2x72x1xf32>
      %220 = vector.broadcast %219 : vector<2x72x1xf32> to vector<2x72x72xf32>
      %221 = arith.subf %217, %220 : vector<2x72x72xf32>
      %222 = math.exp %221 : vector<2x72x72xf32>
      %cst_81 = arith.constant dense<0.000000e+00> : vector<2x72xf32>
      %223 = vector.multi_reduction <add>, %222, %cst_81 [2] : vector<2x72x72xf32> to vector<2x72xf32>
      %224 = vector.shape_cast %223 : vector<2x72xf32> to vector<2x72x1xf32>
      %225 = tpu.reciprocal %224 {approx = true} : vector<2x72x1xf32> -> vector<2x72x1xf32>
      %226 = vector.broadcast %225 : vector<2x72x1xf32> to vector<2x72x72xf32>
      %227 = arith.mulf %222, %226 : vector<2x72x72xf32>
      "tpu.trace_start"() <{level = 10 : i32, message = "bqk,bkd->bqd"}> : () -> ()
      %cst_82 = arith.constant dense<0.000000e+00> : vector<2x72x8xf32>
      %228 = tpu.matmul %227, %212, %cst_82 {dimension_numbers = #tpu.dot_dimension_numbers<[2], [1], [1], [2], [0, 0, 0, 1, 1, 2], [0], [0]>} : vector<2x72x72xf32>, vector<2x72x8xf32>, vector<2x72x8xf32> -> vector<2x72x8xf32>
      "tpu.trace_stop"() : () -> ()
      %229 = vector.extract_strided_slice %147 {offsets = [0, 0, 24], sizes = [2, 72, 8], strides = [1, 1, 1]} : vector<2x72x96xf32> to vector<2x72x8xf32>
      %230 = vector.extract_strided_slice %146 {offsets = [0, 24], sizes = [72, 8], strides = [1, 1]} : vector<72x64xf32> to vector<72x8xf32>
      %231 = vector.shape_cast %230 : vector<72x8xf32> to vector<1x72x8xf32>
      %232 = vector.broadcast %231 : vector<1x72x8xf32> to vector<2x72x8xf32>
      %233 = arith.addf %229, %232 : vector<2x72x8xf32>
      %234 = vector.extract_strided_slice %147 {offsets = [0, 0, 56], sizes = [2, 72, 8], strides = [1, 1, 1]} : vector<2x72x96xf32> to vector<2x72x8xf32>
      %235 = vector.extract_strided_slice %146 {offsets = [0, 56], sizes = [72, 8], strides = [1, 1]} : vector<72x64xf32> to vector<72x8xf32>
      %236 = vector.shape_cast %235 : vector<72x8xf32> to vector<1x72x8xf32>
      %237 = vector.broadcast %236 : vector<1x72x8xf32> to vector<2x72x8xf32>
      %238 = arith.addf %234, %237 : vector<2x72x8xf32>
      %239 = vector.extract_strided_slice %147 {offsets = [0, 0, 88], sizes = [2, 72, 8], strides = [1, 1, 1]} : vector<2x72x96xf32> to vector<2x72x8xf32>
      "tpu.trace_start"() <{level = 10 : i32, message = "bqd,bkd->bqk"}> : () -> ()
      %cst_83 = arith.constant dense<0.000000e+00> : vector<2x72x72xf32>
      %240 = tpu.matmul %233, %238, %cst_83 {dimension_numbers = #tpu.dot_dimension_numbers<[2], [2], [1], [1], [0, 0, 0, 1, 1, 1], [0], [0]>} : vector<2x72x8xf32>, vector<2x72x8xf32>, vector<2x72x72xf32> -> vector<2x72x72xf32>
      "tpu.trace_stop"() : () -> ()
      %cst_84 = arith.constant 0.353553385 : f32
      %241 = vector.broadcast %cst_84 : f32 to vector<2x72x72xf32>
      %242 = arith.mulf %240, %241 : vector<2x72x72xf32>
      %243 = vector.broadcast %1 : vector<1x1x72xf32> to vector<2x72x72xf32>
      %244 = arith.addf %242, %243 : vector<2x72x72xf32>
      %cst_85 = arith.constant dense<0xFF800000> : vector<2x72xf32>
      %245 = vector.multi_reduction <maximumf>, %244, %cst_85 [2] : vector<2x72x72xf32> to vector<2x72xf32>
      %246 = vector.shape_cast %245 : vector<2x72xf32> to vector<2x72x1xf32>
      %247 = vector.broadcast %246 : vector<2x72x1xf32> to vector<2x72x72xf32>
      %248 = arith.subf %244, %247 : vector<2x72x72xf32>
      %249 = math.exp %248 : vector<2x72x72xf32>
      %cst_86 = arith.constant dense<0.000000e+00> : vector<2x72xf32>
      %250 = vector.multi_reduction <add>, %249, %cst_86 [2] : vector<2x72x72xf32> to vector<2x72xf32>
      %251 = vector.shape_cast %250 : vector<2x72xf32> to vector<2x72x1xf32>
      %252 = tpu.reciprocal %251 {approx = true} : vector<2x72x1xf32> -> vector<2x72x1xf32>
      %253 = vector.broadcast %252 : vector<2x72x1xf32> to vector<2x72x72xf32>
      %254 = arith.mulf %249, %253 : vector<2x72x72xf32>
      "tpu.trace_start"() <{level = 10 : i32, message = "bqk,bkd->bqd"}> : () -> ()
      %cst_87 = arith.constant dense<0.000000e+00> : vector<2x72x8xf32>
      %255 = tpu.matmul %254, %239, %cst_87 {dimension_numbers = #tpu.dot_dimension_numbers<[2], [1], [1], [2], [0, 0, 0, 1, 1, 2], [0], [0]>} : vector<2x72x72xf32>, vector<2x72x8xf32>, vector<2x72x8xf32> -> vector<2x72x8xf32>
      "tpu.trace_stop"() : () -> ()
      %256 = tpu.concatenate %174, %201, %228, %255 in 2 : vector<2x72x8xf32>, vector<2x72x8xf32>, vector<2x72x8xf32>, vector<2x72x8xf32> -> vector<2x72x32xf32>
      %257 = vector.shape_cast %256 : vector<2x72x32xf32> to vector<144x32xf32>
      %258 = arith.index_cast %135 : i32 to index
      %c0_88 = arith.constant 0 : index
      %c0_89 = arith.constant 0 : index
      %259 = vector.load %arg8[%258, %c0_88, %c0_89] : memref<4x32x32xf32, #tpu.memory_space<vmem>>, vector<1x32x32xf32>
      %260 = vector.shape_cast %259 : vector<1x32x32xf32> to vector<32x32xf32>
      %cst_90 = arith.constant dense<0.000000e+00> : vector<144x32xf32>
      %261 = tpu.matmul %257, %260, %cst_90 {dimension_numbers = #tpu.dot_dimension_numbers<[1], [0], [0], [1], [0, 0, 1, 1], [], []>} : vector<144x32xf32>, vector<32x32xf32>, vector<144x32xf32> -> vector<144x32xf32>
      %262 = arith.index_cast %135 : i32 to index
      %c0_91 = arith.constant 0 : index
      %c0_92 = arith.constant 0 : index
      %263 = vector.load %arg9[%262, %c0_91, %c0_92] : memref<4x1x32xf32, #tpu.memory_space<vmem>>, vector<1x1x32xf32>
      %264 = vector.shape_cast %263 : vector<1x1x32xf32> to vector<1x32xf32>
      %265 = vector.broadcast %264 : vector<1x32xf32> to vector<144x32xf32>
      %266 = arith.addf %261, %265 : vector<144x32xf32>
      %267 = arith.index_cast %135 : i32 to index
      %c0_93 = arith.constant 0 : index
      %c0_94 = arith.constant 0 : index
      %268 = vector.load %arg10[%267, %c0_93, %c0_94] : memref<4x2x32xf32, #tpu.memory_space<vmem>>, vector<1x2x32xf32>
      %269 = vector.shape_cast %268 : vector<1x2x32xf32> to vector<2x32xf32>
      %270 = arith.addf %arg29, %266 : vector<144x32xf32>
      %271 = vector.extract_strided_slice %269 {offsets = [0, 0], sizes = [1, 32], strides = [1, 1]} : vector<2x32xf32> to vector<1x32xf32>
      %272 = vector.extract_strided_slice %269 {offsets = [1, 0], sizes = [1, 32], strides = [1, 1]} : vector<2x32xf32> to vector<1x32xf32>
      %cst_95 = arith.constant dense<0.000000e+00> : vector<144xf32>
      %273 = vector.multi_reduction <add>, %270, %cst_95 [1] : vector<144x32xf32> to vector<144xf32>
      %274 = vector.shape_cast %273 : vector<144xf32> to vector<144x1xf32>
      %cst_96 = arith.constant 3.200000e+01 : f32
      %275 = vector.broadcast %cst_96 : f32 to vector<144x1xf32>
      %276 = arith.divf %274, %275 : vector<144x1xf32>
      %277 = vector.broadcast %276 : vector<144x1xf32> to vector<144x32xf32>
      %278 = arith.subf %270, %277 : vector<144x32xf32>
      %279 = arith.mulf %278, %278 : vector<144x32xf32>
      %cst_97 = arith.constant dense<0.000000e+00> : vector<144xf32>
      %280 = vector.multi_reduction <add>, %279, %cst_97 [1] : vector<144x32xf32> to vector<144xf32>
      %281 = vector.shape_cast %280 : vector<144xf32> to vector<144x1xf32>
      %cst_98 = arith.constant 3.200000e+01 : f32
      %282 = vector.broadcast %cst_98 : f32 to vector<144x1xf32>
      %283 = arith.divf %281, %282 : vector<144x1xf32>
      %284 = vector.broadcast %276 : vector<144x1xf32> to vector<144x32xf32>
      %285 = arith.subf %270, %284 : vector<144x32xf32>
      %cst_99 = arith.constant 9.99999974E-6 : f32
      %286 = vector.broadcast %cst_99 : f32 to vector<144x1xf32>
      %287 = arith.addf %283, %286 : vector<144x1xf32>
      %288 = math.rsqrt %287 : vector<144x1xf32>
      %289 = vector.broadcast %288 : vector<144x1xf32> to vector<144x32xf32>
      %290 = arith.mulf %285, %289 : vector<144x32xf32>
      %291 = vector.broadcast %271 : vector<1x32xf32> to vector<144x32xf32>
      %292 = arith.mulf %290, %291 : vector<144x32xf32>
      %293 = vector.broadcast %272 : vector<1x32xf32> to vector<144x32xf32>
      %294 = arith.addf %292, %293 : vector<144x32xf32>
      %295 = arith.index_cast %135 : i32 to index
      %c0_100 = arith.constant 0 : index
      %c0_101 = arith.constant 0 : index
      %296 = vector.load %arg11[%295, %c0_100, %c0_101] : memref<4x32x64xf32, #tpu.memory_space<vmem>>, vector<1x32x64xf32>
      %297 = vector.shape_cast %296 : vector<1x32x64xf32> to vector<32x64xf32>
      %cst_102 = arith.constant dense<0.000000e+00> : vector<144x64xf32>
      %298 = tpu.matmul %294, %297, %cst_102 {dimension_numbers = #tpu.dot_dimension_numbers<[1], [0], [0], [1], [0, 0, 1, 1], [], []>} : vector<144x32xf32>, vector<32x64xf32>, vector<144x64xf32> -> vector<144x64xf32>
      %299 = arith.index_cast %135 : i32 to index
      %c0_103 = arith.constant 0 : index
      %c0_104 = arith.constant 0 : index
      %300 = vector.load %arg12[%299, %c0_103, %c0_104] : memref<4x1x64xf32, #tpu.memory_space<vmem>>, vector<1x1x64xf32>
      %301 = vector.shape_cast %300 : vector<1x1x64xf32> to vector<1x64xf32>
      %302 = vector.broadcast %301 : vector<1x64xf32> to vector<144x64xf32>
      %303 = arith.addf %298, %302 : vector<144x64xf32>
      %304 = arith.mulf %303, %303 : vector<144x64xf32>
      %305 = arith.mulf %303, %304 : vector<144x64xf32>
      %cst_105 = arith.constant 4.471500e-02 : f32
      %306 = vector.broadcast %cst_105 : f32 to vector<144x64xf32>
      %307 = arith.mulf %306, %305 : vector<144x64xf32>
      %308 = arith.addf %303, %307 : vector<144x64xf32>
      %cst_106 = arith.constant 0.797884583 : f32
      %309 = vector.broadcast %cst_106 : f32 to vector<144x64xf32>
      %310 = arith.mulf %309, %308 : vector<144x64xf32>
      %311 = math.tanh %310 : vector<144x64xf32>
      %cst_107 = arith.constant 1.000000e+00 : f32
      %312 = vector.broadcast %cst_107 : f32 to vector<144x64xf32>
      %313 = arith.addf %312, %311 : vector<144x64xf32>
      %cst_108 = arith.constant 5.000000e-01 : f32
      %314 = vector.broadcast %cst_108 : f32 to vector<144x64xf32>
      %315 = arith.mulf %314, %313 : vector<144x64xf32>
      %316 = arith.mulf %303, %315 : vector<144x64xf32>
      %317 = arith.index_cast %135 : i32 to index
      %c0_109 = arith.constant 0 : index
      %c0_110 = arith.constant 0 : index
      %318 = vector.load %arg13[%317, %c0_109, %c0_110] : memref<4x64x32xf32, #tpu.memory_space<vmem>>, vector<1x64x32xf32>
      %319 = vector.shape_cast %318 : vector<1x64x32xf32> to vector<64x32xf32>
      %cst_111 = arith.constant dense<0.000000e+00> : vector<144x32xf32>
      %320 = tpu.matmul %316, %319, %cst_111 {dimension_numbers = #tpu.dot_dimension_numbers<[1], [0], [0], [1], [0, 0, 1, 1], [], []>} : vector<144x64xf32>, vector<64x32xf32>, vector<144x32xf32> -> vector<144x32xf32>
      %321 = arith.index_cast %135 : i32 to index
      %c0_112 = arith.constant 0 : index
      %c0_113 = arith.constant 0 : index
      %322 = vector.load %arg14[%321, %c0_112, %c0_113] : memref<4x1x32xf32, #tpu.memory_space<vmem>>, vector<1x1x32xf32>
      %323 = vector.shape_cast %322 : vector<1x1x32xf32> to vector<1x32xf32>
      %324 = vector.broadcast %323 : vector<1x32xf32> to vector<144x32xf32>
      %325 = arith.addf %320, %324 : vector<144x32xf32>
      %326 = arith.index_cast %135 : i32 to index
      %c0_114 = arith.constant 0 : index
      %c0_115 = arith.constant 0 : index
      %327 = vector.load %arg15[%326, %c0_114, %c0_115] : memref<4x2x32xf32, #tpu.memory_space<vmem>>, vector<1x2x32xf32>
      %328 = vector.shape_cast %327 : vector<1x2x32xf32> to vector<2x32xf32>
      %329 = arith.addf %294, %325 : vector<144x32xf32>
      %330 = vector.extract_strided_slice %328 {offsets = [0, 0], sizes = [1, 32], strides = [1, 1]} : vector<2x32xf32> to vector<1x32xf32>
      %331 = vector.extract_strided_slice %328 {offsets = [1, 0], sizes = [1, 32], strides = [1, 1]} : vector<2x32xf32> to vector<1x32xf32>
      %cst_116 = arith.constant dense<0.000000e+00> : vector<144xf32>
      %332 = vector.multi_reduction <add>, %329, %cst_116 [1] : vector<144x32xf32> to vector<144xf32>
      %333 = vector.shape_cast %332 : vector<144xf32> to vector<144x1xf32>
      %cst_117 = arith.constant 3.200000e+01 : f32
      %334 = vector.broadcast %cst_117 : f32 to vector<144x1xf32>
      %335 = arith.divf %333, %334 : vector<144x1xf32>
      %336 = vector.broadcast %335 : vector<144x1xf32> to vector<144x32xf32>
      %337 = arith.subf %329, %336 : vector<144x32xf32>
      %338 = arith.mulf %337, %337 : vector<144x32xf32>
      %cst_118 = arith.constant dense<0.000000e+00> : vector<144xf32>
      %339 = vector.multi_reduction <add>, %338, %cst_118 [1] : vector<144x32xf32> to vector<144xf32>
      %340 = vector.shape_cast %339 : vector<144xf32> to vector<144x1xf32>
      %cst_119 = arith.constant 3.200000e+01 : f32
      %341 = vector.broadcast %cst_119 : f32 to vector<144x1xf32>
      %342 = arith.divf %340, %341 : vector<144x1xf32>
      %343 = vector.broadcast %335 : vector<144x1xf32> to vector<144x32xf32>
      %344 = arith.subf %329, %343 : vector<144x32xf32>
      %cst_120 = arith.constant 9.99999974E-6 : f32
      %345 = vector.broadcast %cst_120 : f32 to vector<144x1xf32>
      %346 = arith.addf %342, %345 : vector<144x1xf32>
      %347 = math.rsqrt %346 : vector<144x1xf32>
      %348 = vector.broadcast %347 : vector<144x1xf32> to vector<144x32xf32>
      %349 = arith.mulf %344, %348 : vector<144x32xf32>
      %350 = vector.broadcast %330 : vector<1x32xf32> to vector<144x32xf32>
      %351 = arith.mulf %349, %350 : vector<144x32xf32>
      %352 = vector.broadcast %331 : vector<1x32xf32> to vector<144x32xf32>
      %353 = arith.addf %351, %352 : vector<144x32xf32>
      scf.yield %353 : vector<144x32xf32>
    }
    %c2_i32_7 = arith.constant 2 : i32
    %6 = vector.shape_cast %5 : vector<144x32xf32> to vector<2x72x32xf32>
    %7 = vector.extract_strided_slice %6 {offsets = [0, 0, 0], sizes = [2, 1, 32], strides = [1, 1, 1]} : vector<2x72x32xf32> to vector<2x1x32xf32>
    %8 = vector.shape_cast %7 : vector<2x1x32xf32> to vector<2x32xf32>
    %c0_8 = arith.constant 0 : index
    %c0_9 = arith.constant 0 : index
    %9 = vector.load %arg4[%c0_8, %c0_9] : memref<24x32xf32, #tpu.memory_space<vmem>>, vector<24x32xf32>
    %c0_10 = arith.constant 0 : index
    %c0_11 = arith.constant 0 : index
    %c0_12 = arith.constant 0 : index
    %10 = vector.load %arg5[%c0_10, %c0_11, %c0_12] : memref<1x1x24xf32, #tpu.memory_space<vmem>>, vector<1x1x24xf32>
    %c0_13 = arith.constant 0 : index
    %c0_14 = arith.constant 0 : index
    %c0_15 = arith.constant 0 : index
    %11 = vector.load %arg3[%c0_13, %c0_14, %c0_15] : memref<2x24x32xf32, #tpu.memory_space<vmem>>, vector<2x24x32xf32>
    %12 = vector.shape_cast %11 : vector<2x24x32xf32> to vector<48x32xf32>
    %c0_i32_16 = arith.constant 0 : i32
    %c2_i32_17 = arith.constant 2 : i32
    %13 = arith.addi %c0_i32_16, %c2_i32_17 : i32
    %c1_i32_18 = arith.constant 1 : i32
    %14 = scf.for %arg28 = %c0_i32_16 to %13 step %c1_i32_18 iter_args(%arg29 = %12) -> (vector<48x32xf32>)  : i32 {
      %c2_i32_61 = arith.constant 2 : i32
      %135 = arith.addi %c2_i32_61, %arg28 : i32
      %136 = arith.index_cast %135 : i32 to index
      %c0_62 = arith.constant 0 : index
      %c0_63 = arith.constant 0 : index
      %137 = vector.load %arg6[%136, %c0_62, %c0_63] : memref<4x32x96xf32, #tpu.memory_space<vmem>>, vector<1x32x96xf32>
      %138 = vector.shape_cast %137 : vector<1x32x96xf32> to vector<32x96xf32>
      %cst_64 = arith.constant dense<0.000000e+00> : vector<48x96xf32>
      %139 = tpu.matmul %arg29, %138, %cst_64 {dimension_numbers = #tpu.dot_dimension_numbers<[1], [0], [0], [1], [0, 0, 1, 1], [], []>} : vector<48x32xf32>, vector<32x96xf32>, vector<48x96xf32> -> vector<48x96xf32>
      %140 = arith.index_cast %135 : i32 to index
      %c0_65 = arith.constant 0 : index
      %c0_66 = arith.constant 0 : index
      %141 = vector.load %arg7[%140, %c0_65, %c0_66] : memref<4x1x96xf32, #tpu.memory_space<vmem>>, vector<1x1x96xf32>
      %142 = vector.shape_cast %141 : vector<1x1x96xf32> to vector<1x96xf32>
      %143 = vector.broadcast %142 : vector<1x96xf32> to vector<48x96xf32>
      %144 = arith.addf %139, %143 : vector<48x96xf32>
      %145 = vector.extract_strided_slice %138 {offsets = [0, 0], sizes = [32, 64], strides = [1, 1]} : vector<32x96xf32> to vector<32x64xf32>
      %cst_67 = arith.constant dense<0.000000e+00> : vector<24x64xf32>
      %146 = tpu.matmul %9, %145, %cst_67 {dimension_numbers = #tpu.dot_dimension_numbers<[1], [0], [0], [1], [0, 0, 1, 1], [], []>} : vector<24x32xf32>, vector<32x64xf32>, vector<24x64xf32> -> vector<24x64xf32>
      %147 = vector.shape_cast %144 : vector<48x96xf32> to vector<2x24x96xf32>
      %148 = vector.extract_strided_slice %147 {offsets = [0, 0, 0], sizes = [2, 24, 8], strides = [1, 1, 1]} : vector<2x24x96xf32> to vector<2x24x8xf32>
      %149 = vector.extract_strided_slice %146 {offsets = [0, 0], sizes = [24, 8], strides = [1, 1]} : vector<24x64xf32> to vector<24x8xf32>
      %150 = vector.shape_cast %149 : vector<24x8xf32> to vector<1x24x8xf32>
      %151 = vector.broadcast %150 : vector<1x24x8xf32> to vector<2x24x8xf32>
      %152 = arith.addf %148, %151 : vector<2x24x8xf32>
      %153 = vector.extract_strided_slice %147 {offsets = [0, 0, 32], sizes = [2, 24, 8], strides = [1, 1, 1]} : vector<2x24x96xf32> to vector<2x24x8xf32>
      %154 = vector.extract_strided_slice %146 {offsets = [0, 32], sizes = [24, 8], strides = [1, 1]} : vector<24x64xf32> to vector<24x8xf32>
      %155 = vector.shape_cast %154 : vector<24x8xf32> to vector<1x24x8xf32>
      %156 = vector.broadcast %155 : vector<1x24x8xf32> to vector<2x24x8xf32>
      %157 = arith.addf %153, %156 : vector<2x24x8xf32>
      %158 = vector.extract_strided_slice %147 {offsets = [0, 0, 64], sizes = [2, 24, 8], strides = [1, 1, 1]} : vector<2x24x96xf32> to vector<2x24x8xf32>
      "tpu.trace_start"() <{level = 10 : i32, message = "bqd,bkd->bqk"}> : () -> ()
      %cst_68 = arith.constant dense<0.000000e+00> : vector<2x24x24xf32>
      %159 = tpu.matmul %152, %157, %cst_68 {dimension_numbers = #tpu.dot_dimension_numbers<[2], [2], [1], [1], [0, 0, 0, 1, 1, 1], [0], [0]>} : vector<2x24x8xf32>, vector<2x24x8xf32>, vector<2x24x24xf32> -> vector<2x24x24xf32>
      "tpu.trace_stop"() : () -> ()
      %cst_69 = arith.constant 0.353553385 : f32
      %160 = vector.broadcast %cst_69 : f32 to vector<2x24x24xf32>
      %161 = arith.mulf %159, %160 : vector<2x24x24xf32>
      %162 = vector.broadcast %10 : vector<1x1x24xf32> to vector<2x24x24xf32>
      %163 = arith.addf %161, %162 : vector<2x24x24xf32>
      %cst_70 = arith.constant dense<0xFF800000> : vector<2x24xf32>
      %164 = vector.multi_reduction <maximumf>, %163, %cst_70 [2] : vector<2x24x24xf32> to vector<2x24xf32>
      %165 = vector.shape_cast %164 : vector<2x24xf32> to vector<2x24x1xf32>
      %166 = vector.broadcast %165 : vector<2x24x1xf32> to vector<2x24x24xf32>
      %167 = arith.subf %163, %166 : vector<2x24x24xf32>
      %168 = math.exp %167 : vector<2x24x24xf32>
      %cst_71 = arith.constant dense<0.000000e+00> : vector<2x24xf32>
      %169 = vector.multi_reduction <add>, %168, %cst_71 [2] : vector<2x24x24xf32> to vector<2x24xf32>
      %170 = vector.shape_cast %169 : vector<2x24xf32> to vector<2x24x1xf32>
      %171 = tpu.reciprocal %170 {approx = true} : vector<2x24x1xf32> -> vector<2x24x1xf32>
      %172 = vector.broadcast %171 : vector<2x24x1xf32> to vector<2x24x24xf32>
      %173 = arith.mulf %168, %172 : vector<2x24x24xf32>
      "tpu.trace_start"() <{level = 10 : i32, message = "bqk,bkd->bqd"}> : () -> ()
      %cst_72 = arith.constant dense<0.000000e+00> : vector<2x24x8xf32>
      %174 = tpu.matmul %173, %158, %cst_72 {dimension_numbers = #tpu.dot_dimension_numbers<[2], [1], [1], [2], [0, 0, 0, 1, 1, 2], [0], [0]>} : vector<2x24x24xf32>, vector<2x24x8xf32>, vector<2x24x8xf32> -> vector<2x24x8xf32>
      "tpu.trace_stop"() : () -> ()
      %175 = vector.extract_strided_slice %147 {offsets = [0, 0, 8], sizes = [2, 24, 8], strides = [1, 1, 1]} : vector<2x24x96xf32> to vector<2x24x8xf32>
      %176 = vector.extract_strided_slice %146 {offsets = [0, 8], sizes = [24, 8], strides = [1, 1]} : vector<24x64xf32> to vector<24x8xf32>
      %177 = vector.shape_cast %176 : vector<24x8xf32> to vector<1x24x8xf32>
      %178 = vector.broadcast %177 : vector<1x24x8xf32> to vector<2x24x8xf32>
      %179 = arith.addf %175, %178 : vector<2x24x8xf32>
      %180 = vector.extract_strided_slice %147 {offsets = [0, 0, 40], sizes = [2, 24, 8], strides = [1, 1, 1]} : vector<2x24x96xf32> to vector<2x24x8xf32>
      %181 = vector.extract_strided_slice %146 {offsets = [0, 40], sizes = [24, 8], strides = [1, 1]} : vector<24x64xf32> to vector<24x8xf32>
      %182 = vector.shape_cast %181 : vector<24x8xf32> to vector<1x24x8xf32>
      %183 = vector.broadcast %182 : vector<1x24x8xf32> to vector<2x24x8xf32>
      %184 = arith.addf %180, %183 : vector<2x24x8xf32>
      %185 = vector.extract_strided_slice %147 {offsets = [0, 0, 72], sizes = [2, 24, 8], strides = [1, 1, 1]} : vector<2x24x96xf32> to vector<2x24x8xf32>
      "tpu.trace_start"() <{level = 10 : i32, message = "bqd,bkd->bqk"}> : () -> ()
      %cst_73 = arith.constant dense<0.000000e+00> : vector<2x24x24xf32>
      %186 = tpu.matmul %179, %184, %cst_73 {dimension_numbers = #tpu.dot_dimension_numbers<[2], [2], [1], [1], [0, 0, 0, 1, 1, 1], [0], [0]>} : vector<2x24x8xf32>, vector<2x24x8xf32>, vector<2x24x24xf32> -> vector<2x24x24xf32>
      "tpu.trace_stop"() : () -> ()
      %cst_74 = arith.constant 0.353553385 : f32
      %187 = vector.broadcast %cst_74 : f32 to vector<2x24x24xf32>
      %188 = arith.mulf %186, %187 : vector<2x24x24xf32>
      %189 = vector.broadcast %10 : vector<1x1x24xf32> to vector<2x24x24xf32>
      %190 = arith.addf %188, %189 : vector<2x24x24xf32>
      %cst_75 = arith.constant dense<0xFF800000> : vector<2x24xf32>
      %191 = vector.multi_reduction <maximumf>, %190, %cst_75 [2] : vector<2x24x24xf32> to vector<2x24xf32>
      %192 = vector.shape_cast %191 : vector<2x24xf32> to vector<2x24x1xf32>
      %193 = vector.broadcast %192 : vector<2x24x1xf32> to vector<2x24x24xf32>
      %194 = arith.subf %190, %193 : vector<2x24x24xf32>
      %195 = math.exp %194 : vector<2x24x24xf32>
      %cst_76 = arith.constant dense<0.000000e+00> : vector<2x24xf32>
      %196 = vector.multi_reduction <add>, %195, %cst_76 [2] : vector<2x24x24xf32> to vector<2x24xf32>
      %197 = vector.shape_cast %196 : vector<2x24xf32> to vector<2x24x1xf32>
      %198 = tpu.reciprocal %197 {approx = true} : vector<2x24x1xf32> -> vector<2x24x1xf32>
      %199 = vector.broadcast %198 : vector<2x24x1xf32> to vector<2x24x24xf32>
      %200 = arith.mulf %195, %199 : vector<2x24x24xf32>
      "tpu.trace_start"() <{level = 10 : i32, message = "bqk,bkd->bqd"}> : () -> ()
      %cst_77 = arith.constant dense<0.000000e+00> : vector<2x24x8xf32>
      %201 = tpu.matmul %200, %185, %cst_77 {dimension_numbers = #tpu.dot_dimension_numbers<[2], [1], [1], [2], [0, 0, 0, 1, 1, 2], [0], [0]>} : vector<2x24x24xf32>, vector<2x24x8xf32>, vector<2x24x8xf32> -> vector<2x24x8xf32>
      "tpu.trace_stop"() : () -> ()
      %202 = vector.extract_strided_slice %147 {offsets = [0, 0, 16], sizes = [2, 24, 8], strides = [1, 1, 1]} : vector<2x24x96xf32> to vector<2x24x8xf32>
      %203 = vector.extract_strided_slice %146 {offsets = [0, 16], sizes = [24, 8], strides = [1, 1]} : vector<24x64xf32> to vector<24x8xf32>
      %204 = vector.shape_cast %203 : vector<24x8xf32> to vector<1x24x8xf32>
      %205 = vector.broadcast %204 : vector<1x24x8xf32> to vector<2x24x8xf32>
      %206 = arith.addf %202, %205 : vector<2x24x8xf32>
      %207 = vector.extract_strided_slice %147 {offsets = [0, 0, 48], sizes = [2, 24, 8], strides = [1, 1, 1]} : vector<2x24x96xf32> to vector<2x24x8xf32>
      %208 = vector.extract_strided_slice %146 {offsets = [0, 48], sizes = [24, 8], strides = [1, 1]} : vector<24x64xf32> to vector<24x8xf32>
      %209 = vector.shape_cast %208 : vector<24x8xf32> to vector<1x24x8xf32>
      %210 = vector.broadcast %209 : vector<1x24x8xf32> to vector<2x24x8xf32>
      %211 = arith.addf %207, %210 : vector<2x24x8xf32>
      %212 = vector.extract_strided_slice %147 {offsets = [0, 0, 80], sizes = [2, 24, 8], strides = [1, 1, 1]} : vector<2x24x96xf32> to vector<2x24x8xf32>
      "tpu.trace_start"() <{level = 10 : i32, message = "bqd,bkd->bqk"}> : () -> ()
      %cst_78 = arith.constant dense<0.000000e+00> : vector<2x24x24xf32>
      %213 = tpu.matmul %206, %211, %cst_78 {dimension_numbers = #tpu.dot_dimension_numbers<[2], [2], [1], [1], [0, 0, 0, 1, 1, 1], [0], [0]>} : vector<2x24x8xf32>, vector<2x24x8xf32>, vector<2x24x24xf32> -> vector<2x24x24xf32>
      "tpu.trace_stop"() : () -> ()
      %cst_79 = arith.constant 0.353553385 : f32
      %214 = vector.broadcast %cst_79 : f32 to vector<2x24x24xf32>
      %215 = arith.mulf %213, %214 : vector<2x24x24xf32>
      %216 = vector.broadcast %10 : vector<1x1x24xf32> to vector<2x24x24xf32>
      %217 = arith.addf %215, %216 : vector<2x24x24xf32>
      %cst_80 = arith.constant dense<0xFF800000> : vector<2x24xf32>
      %218 = vector.multi_reduction <maximumf>, %217, %cst_80 [2] : vector<2x24x24xf32> to vector<2x24xf32>
      %219 = vector.shape_cast %218 : vector<2x24xf32> to vector<2x24x1xf32>
      %220 = vector.broadcast %219 : vector<2x24x1xf32> to vector<2x24x24xf32>
      %221 = arith.subf %217, %220 : vector<2x24x24xf32>
      %222 = math.exp %221 : vector<2x24x24xf32>
      %cst_81 = arith.constant dense<0.000000e+00> : vector<2x24xf32>
      %223 = vector.multi_reduction <add>, %222, %cst_81 [2] : vector<2x24x24xf32> to vector<2x24xf32>
      %224 = vector.shape_cast %223 : vector<2x24xf32> to vector<2x24x1xf32>
      %225 = tpu.reciprocal %224 {approx = true} : vector<2x24x1xf32> -> vector<2x24x1xf32>
      %226 = vector.broadcast %225 : vector<2x24x1xf32> to vector<2x24x24xf32>
      %227 = arith.mulf %222, %226 : vector<2x24x24xf32>
      "tpu.trace_start"() <{level = 10 : i32, message = "bqk,bkd->bqd"}> : () -> ()
      %cst_82 = arith.constant dense<0.000000e+00> : vector<2x24x8xf32>
      %228 = tpu.matmul %227, %212, %cst_82 {dimension_numbers = #tpu.dot_dimension_numbers<[2], [1], [1], [2], [0, 0, 0, 1, 1, 2], [0], [0]>} : vector<2x24x24xf32>, vector<2x24x8xf32>, vector<2x24x8xf32> -> vector<2x24x8xf32>
      "tpu.trace_stop"() : () -> ()
      %229 = vector.extract_strided_slice %147 {offsets = [0, 0, 24], sizes = [2, 24, 8], strides = [1, 1, 1]} : vector<2x24x96xf32> to vector<2x24x8xf32>
      %230 = vector.extract_strided_slice %146 {offsets = [0, 24], sizes = [24, 8], strides = [1, 1]} : vector<24x64xf32> to vector<24x8xf32>
      %231 = vector.shape_cast %230 : vector<24x8xf32> to vector<1x24x8xf32>
      %232 = vector.broadcast %231 : vector<1x24x8xf32> to vector<2x24x8xf32>
      %233 = arith.addf %229, %232 : vector<2x24x8xf32>
      %234 = vector.extract_strided_slice %147 {offsets = [0, 0, 56], sizes = [2, 24, 8], strides = [1, 1, 1]} : vector<2x24x96xf32> to vector<2x24x8xf32>
      %235 = vector.extract_strided_slice %146 {offsets = [0, 56], sizes = [24, 8], strides = [1, 1]} : vector<24x64xf32> to vector<24x8xf32>
      %236 = vector.shape_cast %235 : vector<24x8xf32> to vector<1x24x8xf32>
      %237 = vector.broadcast %236 : vector<1x24x8xf32> to vector<2x24x8xf32>
      %238 = arith.addf %234, %237 : vector<2x24x8xf32>
      %239 = vector.extract_strided_slice %147 {offsets = [0, 0, 88], sizes = [2, 24, 8], strides = [1, 1, 1]} : vector<2x24x96xf32> to vector<2x24x8xf32>
      "tpu.trace_start"() <{level = 10 : i32, message = "bqd,bkd->bqk"}> : () -> ()
      %cst_83 = arith.constant dense<0.000000e+00> : vector<2x24x24xf32>
      %240 = tpu.matmul %233, %238, %cst_83 {dimension_numbers = #tpu.dot_dimension_numbers<[2], [2], [1], [1], [0, 0, 0, 1, 1, 1], [0], [0]>} : vector<2x24x8xf32>, vector<2x24x8xf32>, vector<2x24x24xf32> -> vector<2x24x24xf32>
      "tpu.trace_stop"() : () -> ()
      %cst_84 = arith.constant 0.353553385 : f32
      %241 = vector.broadcast %cst_84 : f32 to vector<2x24x24xf32>
      %242 = arith.mulf %240, %241 : vector<2x24x24xf32>
      %243 = vector.broadcast %10 : vector<1x1x24xf32> to vector<2x24x24xf32>
      %244 = arith.addf %242, %243 : vector<2x24x24xf32>
      %cst_85 = arith.constant dense<0xFF800000> : vector<2x24xf32>
      %245 = vector.multi_reduction <maximumf>, %244, %cst_85 [2] : vector<2x24x24xf32> to vector<2x24xf32>
      %246 = vector.shape_cast %245 : vector<2x24xf32> to vector<2x24x1xf32>
      %247 = vector.broadcast %246 : vector<2x24x1xf32> to vector<2x24x24xf32>
      %248 = arith.subf %244, %247 : vector<2x24x24xf32>
      %249 = math.exp %248 : vector<2x24x24xf32>
      %cst_86 = arith.constant dense<0.000000e+00> : vector<2x24xf32>
      %250 = vector.multi_reduction <add>, %249, %cst_86 [2] : vector<2x24x24xf32> to vector<2x24xf32>
      %251 = vector.shape_cast %250 : vector<2x24xf32> to vector<2x24x1xf32>
      %252 = tpu.reciprocal %251 {approx = true} : vector<2x24x1xf32> -> vector<2x24x1xf32>
      %253 = vector.broadcast %252 : vector<2x24x1xf32> to vector<2x24x24xf32>
      %254 = arith.mulf %249, %253 : vector<2x24x24xf32>
      "tpu.trace_start"() <{level = 10 : i32, message = "bqk,bkd->bqd"}> : () -> ()
      %cst_87 = arith.constant dense<0.000000e+00> : vector<2x24x8xf32>
      %255 = tpu.matmul %254, %239, %cst_87 {dimension_numbers = #tpu.dot_dimension_numbers<[2], [1], [1], [2], [0, 0, 0, 1, 1, 2], [0], [0]>} : vector<2x24x24xf32>, vector<2x24x8xf32>, vector<2x24x8xf32> -> vector<2x24x8xf32>
      "tpu.trace_stop"() : () -> ()
      %256 = tpu.concatenate %174, %201, %228, %255 in 2 : vector<2x24x8xf32>, vector<2x24x8xf32>, vector<2x24x8xf32>, vector<2x24x8xf32> -> vector<2x24x32xf32>
      %257 = vector.shape_cast %256 : vector<2x24x32xf32> to vector<48x32xf32>
      %258 = arith.index_cast %135 : i32 to index
      %c0_88 = arith.constant 0 : index
      %c0_89 = arith.constant 0 : index
      %259 = vector.load %arg8[%258, %c0_88, %c0_89] : memref<4x32x32xf32, #tpu.memory_space<vmem>>, vector<1x32x32xf32>
      %260 = vector.shape_cast %259 : vector<1x32x32xf32> to vector<32x32xf32>
      %cst_90 = arith.constant dense<0.000000e+00> : vector<48x32xf32>
      %261 = tpu.matmul %257, %260, %cst_90 {dimension_numbers = #tpu.dot_dimension_numbers<[1], [0], [0], [1], [0, 0, 1, 1], [], []>} : vector<48x32xf32>, vector<32x32xf32>, vector<48x32xf32> -> vector<48x32xf32>
      %262 = arith.index_cast %135 : i32 to index
      %c0_91 = arith.constant 0 : index
      %c0_92 = arith.constant 0 : index
      %263 = vector.load %arg9[%262, %c0_91, %c0_92] : memref<4x1x32xf32, #tpu.memory_space<vmem>>, vector<1x1x32xf32>
      %264 = vector.shape_cast %263 : vector<1x1x32xf32> to vector<1x32xf32>
      %265 = vector.broadcast %264 : vector<1x32xf32> to vector<48x32xf32>
      %266 = arith.addf %261, %265 : vector<48x32xf32>
      %267 = arith.index_cast %135 : i32 to index
      %c0_93 = arith.constant 0 : index
      %c0_94 = arith.constant 0 : index
      %268 = vector.load %arg10[%267, %c0_93, %c0_94] : memref<4x2x32xf32, #tpu.memory_space<vmem>>, vector<1x2x32xf32>
      %269 = vector.shape_cast %268 : vector<1x2x32xf32> to vector<2x32xf32>
      %270 = arith.addf %arg29, %266 : vector<48x32xf32>
      %271 = vector.extract_strided_slice %269 {offsets = [0, 0], sizes = [1, 32], strides = [1, 1]} : vector<2x32xf32> to vector<1x32xf32>
      %272 = vector.extract_strided_slice %269 {offsets = [1, 0], sizes = [1, 32], strides = [1, 1]} : vector<2x32xf32> to vector<1x32xf32>
      %cst_95 = arith.constant dense<0.000000e+00> : vector<48xf32>
      %273 = vector.multi_reduction <add>, %270, %cst_95 [1] : vector<48x32xf32> to vector<48xf32>
      %274 = vector.shape_cast %273 : vector<48xf32> to vector<48x1xf32>
      %cst_96 = arith.constant 3.200000e+01 : f32
      %275 = vector.broadcast %cst_96 : f32 to vector<48x1xf32>
      %276 = arith.divf %274, %275 : vector<48x1xf32>
      %277 = vector.broadcast %276 : vector<48x1xf32> to vector<48x32xf32>
      %278 = arith.subf %270, %277 : vector<48x32xf32>
      %279 = arith.mulf %278, %278 : vector<48x32xf32>
      %cst_97 = arith.constant dense<0.000000e+00> : vector<48xf32>
      %280 = vector.multi_reduction <add>, %279, %cst_97 [1] : vector<48x32xf32> to vector<48xf32>
      %281 = vector.shape_cast %280 : vector<48xf32> to vector<48x1xf32>
      %cst_98 = arith.constant 3.200000e+01 : f32
      %282 = vector.broadcast %cst_98 : f32 to vector<48x1xf32>
      %283 = arith.divf %281, %282 : vector<48x1xf32>
      %284 = vector.broadcast %276 : vector<48x1xf32> to vector<48x32xf32>
      %285 = arith.subf %270, %284 : vector<48x32xf32>
      %cst_99 = arith.constant 9.99999974E-6 : f32
      %286 = vector.broadcast %cst_99 : f32 to vector<48x1xf32>
      %287 = arith.addf %283, %286 : vector<48x1xf32>
      %288 = math.rsqrt %287 : vector<48x1xf32>
      %289 = vector.broadcast %288 : vector<48x1xf32> to vector<48x32xf32>
      %290 = arith.mulf %285, %289 : vector<48x32xf32>
      %291 = vector.broadcast %271 : vector<1x32xf32> to vector<48x32xf32>
      %292 = arith.mulf %290, %291 : vector<48x32xf32>
      %293 = vector.broadcast %272 : vector<1x32xf32> to vector<48x32xf32>
      %294 = arith.addf %292, %293 : vector<48x32xf32>
      %295 = arith.index_cast %135 : i32 to index
      %c0_100 = arith.constant 0 : index
      %c0_101 = arith.constant 0 : index
      %296 = vector.load %arg11[%295, %c0_100, %c0_101] : memref<4x32x64xf32, #tpu.memory_space<vmem>>, vector<1x32x64xf32>
      %297 = vector.shape_cast %296 : vector<1x32x64xf32> to vector<32x64xf32>
      %cst_102 = arith.constant dense<0.000000e+00> : vector<48x64xf32>
      %298 = tpu.matmul %294, %297, %cst_102 {dimension_numbers = #tpu.dot_dimension_numbers<[1], [0], [0], [1], [0, 0, 1, 1], [], []>} : vector<48x32xf32>, vector<32x64xf32>, vector<48x64xf32> -> vector<48x64xf32>
      %299 = arith.index_cast %135 : i32 to index
      %c0_103 = arith.constant 0 : index
      %c0_104 = arith.constant 0 : index
      %300 = vector.load %arg12[%299, %c0_103, %c0_104] : memref<4x1x64xf32, #tpu.memory_space<vmem>>, vector<1x1x64xf32>
      %301 = vector.shape_cast %300 : vector<1x1x64xf32> to vector<1x64xf32>
      %302 = vector.broadcast %301 : vector<1x64xf32> to vector<48x64xf32>
      %303 = arith.addf %298, %302 : vector<48x64xf32>
      %304 = arith.mulf %303, %303 : vector<48x64xf32>
      %305 = arith.mulf %303, %304 : vector<48x64xf32>
      %cst_105 = arith.constant 4.471500e-02 : f32
      %306 = vector.broadcast %cst_105 : f32 to vector<48x64xf32>
      %307 = arith.mulf %306, %305 : vector<48x64xf32>
      %308 = arith.addf %303, %307 : vector<48x64xf32>
      %cst_106 = arith.constant 0.797884583 : f32
      %309 = vector.broadcast %cst_106 : f32 to vector<48x64xf32>
      %310 = arith.mulf %309, %308 : vector<48x64xf32>
      %311 = math.tanh %310 : vector<48x64xf32>
      %cst_107 = arith.constant 1.000000e+00 : f32
      %312 = vector.broadcast %cst_107 : f32 to vector<48x64xf32>
      %313 = arith.addf %312, %311 : vector<48x64xf32>
      %cst_108 = arith.constant 5.000000e-01 : f32
      %314 = vector.broadcast %cst_108 : f32 to vector<48x64xf32>
      %315 = arith.mulf %314, %313 : vector<48x64xf32>
      %316 = arith.mulf %303, %315 : vector<48x64xf32>
      %317 = arith.index_cast %135 : i32 to index
      %c0_109 = arith.constant 0 : index
      %c0_110 = arith.constant 0 : index
      %318 = vector.load %arg13[%317, %c0_109, %c0_110] : memref<4x64x32xf32, #tpu.memory_space<vmem>>, vector<1x64x32xf32>
      %319 = vector.shape_cast %318 : vector<1x64x32xf32> to vector<64x32xf32>
      %cst_111 = arith.constant dense<0.000000e+00> : vector<48x32xf32>
      %320 = tpu.matmul %316, %319, %cst_111 {dimension_numbers = #tpu.dot_dimension_numbers<[1], [0], [0], [1], [0, 0, 1, 1], [], []>} : vector<48x64xf32>, vector<64x32xf32>, vector<48x32xf32> -> vector<48x32xf32>
      %321 = arith.index_cast %135 : i32 to index
      %c0_112 = arith.constant 0 : index
      %c0_113 = arith.constant 0 : index
      %322 = vector.load %arg14[%321, %c0_112, %c0_113] : memref<4x1x32xf32, #tpu.memory_space<vmem>>, vector<1x1x32xf32>
      %323 = vector.shape_cast %322 : vector<1x1x32xf32> to vector<1x32xf32>
      %324 = vector.broadcast %323 : vector<1x32xf32> to vector<48x32xf32>
      %325 = arith.addf %320, %324 : vector<48x32xf32>
      %326 = arith.index_cast %135 : i32 to index
      %c0_114 = arith.constant 0 : index
      %c0_115 = arith.constant 0 : index
      %327 = vector.load %arg15[%326, %c0_114, %c0_115] : memref<4x2x32xf32, #tpu.memory_space<vmem>>, vector<1x2x32xf32>
      %328 = vector.shape_cast %327 : vector<1x2x32xf32> to vector<2x32xf32>
      %329 = arith.addf %294, %325 : vector<48x32xf32>
      %330 = vector.extract_strided_slice %328 {offsets = [0, 0], sizes = [1, 32], strides = [1, 1]} : vector<2x32xf32> to vector<1x32xf32>
      %331 = vector.extract_strided_slice %328 {offsets = [1, 0], sizes = [1, 32], strides = [1, 1]} : vector<2x32xf32> to vector<1x32xf32>
      %cst_116 = arith.constant dense<0.000000e+00> : vector<48xf32>
      %332 = vector.multi_reduction <add>, %329, %cst_116 [1] : vector<48x32xf32> to vector<48xf32>
      %333 = vector.shape_cast %332 : vector<48xf32> to vector<48x1xf32>
      %cst_117 = arith.constant 3.200000e+01 : f32
      %334 = vector.broadcast %cst_117 : f32 to vector<48x1xf32>
      %335 = arith.divf %333, %334 : vector<48x1xf32>
      %336 = vector.broadcast %335 : vector<48x1xf32> to vector<48x32xf32>
      %337 = arith.subf %329, %336 : vector<48x32xf32>
      %338 = arith.mulf %337, %337 : vector<48x32xf32>
      %cst_118 = arith.constant dense<0.000000e+00> : vector<48xf32>
      %339 = vector.multi_reduction <add>, %338, %cst_118 [1] : vector<48x32xf32> to vector<48xf32>
      %340 = vector.shape_cast %339 : vector<48xf32> to vector<48x1xf32>
      %cst_119 = arith.constant 3.200000e+01 : f32
      %341 = vector.broadcast %cst_119 : f32 to vector<48x1xf32>
      %342 = arith.divf %340, %341 : vector<48x1xf32>
      %343 = vector.broadcast %335 : vector<48x1xf32> to vector<48x32xf32>
      %344 = arith.subf %329, %343 : vector<48x32xf32>
      %cst_120 = arith.constant 9.99999974E-6 : f32
      %345 = vector.broadcast %cst_120 : f32 to vector<48x1xf32>
      %346 = arith.addf %342, %345 : vector<48x1xf32>
      %347 = math.rsqrt %346 : vector<48x1xf32>
      %348 = vector.broadcast %347 : vector<48x1xf32> to vector<48x32xf32>
      %349 = arith.mulf %344, %348 : vector<48x32xf32>
      %350 = vector.broadcast %330 : vector<1x32xf32> to vector<48x32xf32>
      %351 = arith.mulf %349, %350 : vector<48x32xf32>
      %352 = vector.broadcast %331 : vector<1x32xf32> to vector<48x32xf32>
      %353 = arith.addf %351, %352 : vector<48x32xf32>
      scf.yield %353 : vector<48x32xf32>
    }
    %c2_i32_19 = arith.constant 2 : i32
    %15 = vector.shape_cast %14 : vector<48x32xf32> to vector<2x24x32xf32>
    %16 = vector.extract_strided_slice %15 {offsets = [0, 0, 0], sizes = [2, 1, 32], strides = [1, 1, 1]} : vector<2x24x32xf32> to vector<2x1x32xf32>
    %17 = vector.shape_cast %16 : vector<2x1x32xf32> to vector<2x32xf32>
    %18 = tpu.concatenate %8, %17 in 1 : vector<2x32xf32>, vector<2x32xf32> -> vector<2x64xf32>
    %c0_20 = arith.constant 0 : index
    %c0_21 = arith.constant 0 : index
    %19 = vector.load %arg16[%c0_20, %c0_21] : memref<64x4xf32, #tpu.memory_space<vmem>>, vector<64x4xf32>
    %cst = arith.constant dense<0.000000e+00> : vector<2x4xf32>
    %20 = tpu.matmul %18, %19, %cst {dimension_numbers = #tpu.dot_dimension_numbers<[1], [0], [0], [1], [0, 0, 1, 1], [], []>} : vector<2x64xf32>, vector<64x4xf32>, vector<2x4xf32> -> vector<2x4xf32>
    %c0_22 = arith.constant 0 : index
    %c0_23 = arith.constant 0 : index
    %21 = vector.load %arg17[%c0_22, %c0_23] : memref<1x4xf32, #tpu.memory_space<vmem>>, vector<1x4xf32>
    %22 = vector.broadcast %21 : vector<1x4xf32> to vector<2x4xf32>
    %23 = arith.addf %20, %22 : vector<2x4xf32>
    %cst_24 = arith.constant dense<0xFF800000> : vector<2xf32>
    %24 = vector.multi_reduction <maximumf>, %23, %cst_24 [1] : vector<2x4xf32> to vector<2xf32>
    %25 = vector.shape_cast %24 : vector<2xf32> to vector<2x1xf32>
    %26 = vector.broadcast %25 : vector<2x1xf32> to vector<2x4xf32>
    %27 = arith.subf %23, %26 : vector<2x4xf32>
    %28 = math.exp %27 : vector<2x4xf32>
    %cst_25 = arith.constant dense<0.000000e+00> : vector<2xf32>
    %29 = vector.multi_reduction <add>, %28, %cst_25 [1] : vector<2x4xf32> to vector<2xf32>
    %30 = vector.shape_cast %29 : vector<2xf32> to vector<2x1xf32>
    %31 = math.log %30 : vector<2x1xf32>
    %32 = vector.broadcast %31 : vector<2x1xf32> to vector<2x4xf32>
    %33 = arith.subf %27, %32 : vector<2x4xf32>
    %34 = tpu.iota {dimensions = array<i32: 1>} : vector<2x4xi32>
    %cst_26 = arith.constant dense<0xFF800000> : vector<2xf32>
    %35 = vector.multi_reduction <maximumf>, %33, %cst_26 [1] : vector<2x4xf32> to vector<2xf32>
    %36 = vector.shape_cast %35 : vector<2xf32> to vector<2x1xf32>
    %37 = vector.broadcast %36 : vector<2x1xf32> to vector<2x4xf32>
    %38 = arith.cmpf oge, %33, %37 : vector<2x4xf32>
    %c4_i32 = arith.constant 4 : i32
    %39 = vector.broadcast %c4_i32 : i32 to vector<2x4xi32>
    %40 = arith.select %38, %34, %39 : vector<2x4xi1>, vector<2x4xi32>
    %cst_27 = arith.constant dense<2147483647> : vector<2xi32>
    %41 = vector.multi_reduction <minsi>, %40, %cst_27 [1] : vector<2x4xi32> to vector<2xi32>
    %42 = vector.shape_cast %41 : vector<2xi32> to vector<2x1xi32>
    %43 = vector.broadcast %42 : vector<2x1xi32> to vector<2x4xi32>
    %44 = arith.cmpi eq, %34, %43 : vector<2x4xi32>
    %45 = arith.extui %44 : vector<2x4xi1> to vector<2x4xi32>
    %46 = arith.sitofp %45 : vector<2x4xi32> to vector<2x4xf32>
    %47 = arith.sitofp %42 : vector<2x1xi32> to vector<2x1xf32>
    %c0_28 = arith.constant 0 : index
    %c0_29 = arith.constant 0 : index
    %48 = vector.load %arg18[%c0_28, %c0_29] : memref<32x256xf32, #tpu.memory_space<vmem>>, vector<32x256xf32>
    %cst_30 = arith.constant dense<0.000000e+00> : vector<2x256xf32>
    %49 = tpu.matmul %8, %48, %cst_30 {dimension_numbers = #tpu.dot_dimension_numbers<[1], [0], [0], [1], [0, 0, 1, 1], [], []>} : vector<2x32xf32>, vector<32x256xf32>, vector<2x256xf32> -> vector<2x256xf32>
    %c0_31 = arith.constant 0 : index
    %c0_32 = arith.constant 0 : index
    %50 = vector.load %arg19[%c0_31, %c0_32] : memref<1x256xf32, #tpu.memory_space<vmem>>, vector<1x256xf32>
    %51 = vector.broadcast %50 : vector<1x256xf32> to vector<2x256xf32>
    %52 = arith.addf %49, %51 : vector<2x256xf32>
    %53 = arith.mulf %52, %52 : vector<2x256xf32>
    %54 = arith.mulf %52, %53 : vector<2x256xf32>
    %cst_33 = arith.constant 4.471500e-02 : f32
    %55 = vector.broadcast %cst_33 : f32 to vector<2x256xf32>
    %56 = arith.mulf %55, %54 : vector<2x256xf32>
    %57 = arith.addf %52, %56 : vector<2x256xf32>
    %cst_34 = arith.constant 0.797884583 : f32
    %58 = vector.broadcast %cst_34 : f32 to vector<2x256xf32>
    %59 = arith.mulf %58, %57 : vector<2x256xf32>
    %60 = math.tanh %59 : vector<2x256xf32>
    %cst_35 = arith.constant 1.000000e+00 : f32
    %61 = vector.broadcast %cst_35 : f32 to vector<2x256xf32>
    %62 = arith.addf %61, %60 : vector<2x256xf32>
    %cst_36 = arith.constant 5.000000e-01 : f32
    %63 = vector.broadcast %cst_36 : f32 to vector<2x256xf32>
    %64 = arith.mulf %63, %62 : vector<2x256xf32>
    %65 = arith.mulf %52, %64 : vector<2x256xf32>
    %c0_37 = arith.constant 0 : index
    %c0_38 = arith.constant 0 : index
    %66 = vector.load %arg20[%c0_37, %c0_38] : memref<256x12xf32, #tpu.memory_space<vmem>>, vector<256x12xf32>
    %cst_39 = arith.constant dense<0.000000e+00> : vector<2x12xf32>
    %67 = tpu.matmul %65, %66, %cst_39 {dimension_numbers = #tpu.dot_dimension_numbers<[1], [0], [0], [1], [0, 0, 1, 1], [], []>} : vector<2x256xf32>, vector<256x12xf32>, vector<2x12xf32> -> vector<2x12xf32>
    %c0_40 = arith.constant 0 : index
    %c0_41 = arith.constant 0 : index
    %68 = vector.load %arg21[%c0_40, %c0_41] : memref<1x12xf32, #tpu.memory_space<vmem>>, vector<1x12xf32>
    %69 = vector.broadcast %68 : vector<1x12xf32> to vector<2x12xf32>
    %70 = arith.addf %67, %69 : vector<2x12xf32>
    %c0_42 = arith.constant 0 : index
    %c0_43 = arith.constant 0 : index
    %71 = vector.load %arg22[%c0_42, %c0_43] : memref<32x256xf32, #tpu.memory_space<vmem>>, vector<32x256xf32>
    %cst_44 = arith.constant dense<0.000000e+00> : vector<2x256xf32>
    %72 = tpu.matmul %17, %71, %cst_44 {dimension_numbers = #tpu.dot_dimension_numbers<[1], [0], [0], [1], [0, 0, 1, 1], [], []>} : vector<2x32xf32>, vector<32x256xf32>, vector<2x256xf32> -> vector<2x256xf32>
    %c0_45 = arith.constant 0 : index
    %c0_46 = arith.constant 0 : index
    %73 = vector.load %arg23[%c0_45, %c0_46] : memref<1x256xf32, #tpu.memory_space<vmem>>, vector<1x256xf32>
    %74 = vector.broadcast %73 : vector<1x256xf32> to vector<2x256xf32>
    %75 = arith.addf %72, %74 : vector<2x256xf32>
    %76 = arith.mulf %75, %75 : vector<2x256xf32>
    %77 = arith.mulf %75, %76 : vector<2x256xf32>
    %cst_47 = arith.constant 4.471500e-02 : f32
    %78 = vector.broadcast %cst_47 : f32 to vector<2x256xf32>
    %79 = arith.mulf %78, %77 : vector<2x256xf32>
    %80 = arith.addf %75, %79 : vector<2x256xf32>
    %cst_48 = arith.constant 0.797884583 : f32
    %81 = vector.broadcast %cst_48 : f32 to vector<2x256xf32>
    %82 = arith.mulf %81, %80 : vector<2x256xf32>
    %83 = math.tanh %82 : vector<2x256xf32>
    %cst_49 = arith.constant 1.000000e+00 : f32
    %84 = vector.broadcast %cst_49 : f32 to vector<2x256xf32>
    %85 = arith.addf %84, %83 : vector<2x256xf32>
    %cst_50 = arith.constant 5.000000e-01 : f32
    %86 = vector.broadcast %cst_50 : f32 to vector<2x256xf32>
    %87 = arith.mulf %86, %85 : vector<2x256xf32>
    %88 = arith.mulf %75, %87 : vector<2x256xf32>
    %c0_51 = arith.constant 0 : index
    %c0_52 = arith.constant 0 : index
    %89 = vector.load %arg24[%c0_51, %c0_52] : memref<256x16xf32, #tpu.memory_space<vmem>>, vector<256x16xf32>
    %cst_53 = arith.constant dense<0.000000e+00> : vector<2x16xf32>
    %90 = tpu.matmul %88, %89, %cst_53 {dimension_numbers = #tpu.dot_dimension_numbers<[1], [0], [0], [1], [0, 0, 1, 1], [], []>} : vector<2x256xf32>, vector<256x16xf32>, vector<2x16xf32> -> vector<2x16xf32>
    %c0_54 = arith.constant 0 : index
    %c0_55 = arith.constant 0 : index
    %91 = vector.load %arg25[%c0_54, %c0_55] : memref<1x16xf32, #tpu.memory_space<vmem>>, vector<1x16xf32>
    %92 = vector.broadcast %91 : vector<1x16xf32> to vector<2x16xf32>
    %93 = arith.addf %90, %92 : vector<2x16xf32>
    %cst_56 = arith.constant 0.000000e+00 : f32
    %94 = vector.broadcast %cst_56 : f32 to vector<2x3xf32>
    %cst_57 = arith.constant 0.000000e+00 : f32
    %95 = vector.broadcast %cst_57 : f32 to vector<2x4xf32>
    %96 = vector.extract_strided_slice %46 {offsets = [0, 0], sizes = [2, 1], strides = [1, 1]} : vector<2x4xf32> to vector<2x1xf32>
    %97 = vector.extract_strided_slice %70 {offsets = [0, 0], sizes = [2, 3], strides = [1, 1]} : vector<2x12xf32> to vector<2x3xf32>
    %98 = vector.broadcast %96 : vector<2x1xf32> to vector<2x3xf32>
    %99 = arith.mulf %98, %97 : vector<2x3xf32>
    %100 = arith.addf %94, %99 : vector<2x3xf32>
    %101 = vector.extract_strided_slice %93 {offsets = [0, 0], sizes = [2, 4], strides = [1, 1]} : vector<2x16xf32> to vector<2x4xf32>
    %102 = vector.broadcast %96 : vector<2x1xf32> to vector<2x4xf32>
    %103 = arith.mulf %102, %101 : vector<2x4xf32>
    %104 = arith.addf %95, %103 : vector<2x4xf32>
    %105 = vector.extract_strided_slice %46 {offsets = [0, 1], sizes = [2, 1], strides = [1, 1]} : vector<2x4xf32> to vector<2x1xf32>
    %106 = vector.extract_strided_slice %70 {offsets = [0, 3], sizes = [2, 3], strides = [1, 1]} : vector<2x12xf32> to vector<2x3xf32>
    %107 = vector.broadcast %105 : vector<2x1xf32> to vector<2x3xf32>
    %108 = arith.mulf %107, %106 : vector<2x3xf32>
    %109 = arith.addf %100, %108 : vector<2x3xf32>
    %110 = vector.extract_strided_slice %93 {offsets = [0, 4], sizes = [2, 4], strides = [1, 1]} : vector<2x16xf32> to vector<2x4xf32>
    %111 = vector.broadcast %105 : vector<2x1xf32> to vector<2x4xf32>
    %112 = arith.mulf %111, %110 : vector<2x4xf32>
    %113 = arith.addf %104, %112 : vector<2x4xf32>
    %114 = vector.extract_strided_slice %46 {offsets = [0, 2], sizes = [2, 1], strides = [1, 1]} : vector<2x4xf32> to vector<2x1xf32>
    %115 = vector.extract_strided_slice %70 {offsets = [0, 6], sizes = [2, 3], strides = [1, 1]} : vector<2x12xf32> to vector<2x3xf32>
    %116 = vector.broadcast %114 : vector<2x1xf32> to vector<2x3xf32>
    %117 = arith.mulf %116, %115 : vector<2x3xf32>
    %118 = arith.addf %109, %117 : vector<2x3xf32>
    %119 = vector.extract_strided_slice %93 {offsets = [0, 8], sizes = [2, 4], strides = [1, 1]} : vector<2x16xf32> to vector<2x4xf32>
    %120 = vector.broadcast %114 : vector<2x1xf32> to vector<2x4xf32>
    %121 = arith.mulf %120, %119 : vector<2x4xf32>
    %122 = arith.addf %113, %121 : vector<2x4xf32>
    %123 = vector.extract_strided_slice %46 {offsets = [0, 3], sizes = [2, 1], strides = [1, 1]} : vector<2x4xf32> to vector<2x1xf32>
    %124 = vector.extract_strided_slice %70 {offsets = [0, 9], sizes = [2, 3], strides = [1, 1]} : vector<2x12xf32> to vector<2x3xf32>
    %125 = vector.broadcast %123 : vector<2x1xf32> to vector<2x3xf32>
    %126 = arith.mulf %125, %124 : vector<2x3xf32>
    %127 = arith.addf %118, %126 : vector<2x3xf32>
    %128 = vector.extract_strided_slice %93 {offsets = [0, 12], sizes = [2, 4], strides = [1, 1]} : vector<2x16xf32> to vector<2x4xf32>
    %129 = vector.broadcast %123 : vector<2x1xf32> to vector<2x4xf32>
    %130 = arith.mulf %129, %128 : vector<2x4xf32>
    %131 = arith.addf %122, %130 : vector<2x4xf32>
    %cst_58 = arith.constant 0.000000e+00 : f32
    %132 = vector.broadcast %cst_58 : f32 to vector<2x52xf32>
    %133 = tpu.concatenate %8, %17, %127, %131, %33, %47, %132 in 1 : vector<2x32xf32>, vector<2x32xf32>, vector<2x3xf32>, vector<2x4xf32>, vector<2x4xf32>, vector<2x1xf32>, vector<2x52xf32> -> vector<2x128xf32>
    %c0_59 = arith.constant 0 : index
    %c0_60 = arith.constant 0 : index
    %134 = vector.load %arg27[%c0_59, %c0_60] : memref<2x128xf32, #tpu.memory_space<vmem>>, vector<2x128xf32>
    tpu.vector_store %arg27[%c0_59, %c0_60], %133 {strides = array<i32>} : memref<2x128xf32, #tpu.memory_space<vmem>>, vector<2x128xf32>,
    return
  }
}

</mosaic_0001>

<bundles_post_ra>
// kernel: forward.1
= control target key start
LH: loop header
LB: loop body
LE: loop exit
PB: predicated region body
PF: predicated region fallthrough
CT: control target
= control target key end

     0   :  { %s13772_s1 = inlined_call_operand.vmem [shape: f32[72,32], index: 1, kind: input, shape index: {}]   ;;  %s13773_s3 = inlined_call_operand.vmem [shape: f32[2,24,32], index: 3, kind: input, shape index: {}]   ;;  %s13774_s4 = inlined_call_operand.vmem [shape: f32[24,32], index: 4, kind: input, shape index: {}]   ;;  %s13775_s5 = inlined_call_operand.vmem [shape: f32[1,1,24], index: 5, kind: input, shape index: {}]   ;;  %s13776_s6 = inlined_call_operand.vmem [shape: f32[4,32,96], index: 6, kind: input, shape index: {}]   ;;  %s13777_s7 = inlined_call_operand.vmem [shape: f32[4,1,96], index: 7, kind: input, shape index: {}]   ;;  %s13778_s8 = inlined_call_operand.vmem [shape: f32[4,32,32], index: 8, kind: input, shape index: {}]   ;;  %s13779_s9 = inlined_call_operand.vmem [shape: f32[4,1,32], index: 9, kind: input, shape index: {}]   ;;  %s13780_s10 = inlined_call_operand.vmem [shape: f32[4,2,32], index: 10, kind: input, shape index: {}]   ;;  %s13781_s11 = inlined_call_operand.vmem [shape: f32[4,32,64], index: 11, kind: input, shape index: {}]   ;;  %s13782_s12 = inlined_call_operand.vmem [shape: f32[4,1,64], index: 12, kind: input, shape index: {}]   ;;  %s13783_s13 = inlined_call_operand.vmem [shape: f32[4,64,32], index: 13, kind: input, shape index: {}]   ;;  %s13784_s14 = inlined_call_operand.vmem [shape: f32[4,1,32], index: 14, kind: input, shape index: {}]   ;;  %s13785_s15 = inlined_call_operand.vmem [shape: f32[4,2,32], index: 15, kind: input, shape index: {}]   ;;  %s13786_s16 = inlined_call_operand.vmem [shape: f32[64,4], index: 16, kind: input, shape index: {}]   ;;  %s13787_s17 = inlined_call_operand.vmem [shape: f32[1,4], index: 17, kind: input, shape index: {}]   ;;  %s13788_s18 = inlined_call_operand.vmem [shape: f32[32,256], index: 18, kind: input, shape index: {}]   ;;  %s13789_s19 = inlined_call_operand.vmem [shape: f32[1,256], index: 19, kind: input, shape index: {}]   ;;  %s13790_s20 = inlined_call_operand.vmem [shape: f32[256,12], index: 20, kind: input, shape index: {}]   ;;  %s13791_s21 = inlined_call_operand.vmem [shape: f32[1,12], index: 21, kind: input, shape index: {}]   ;;  %s13792_s22 = inlined_call_operand.vmem [shape: f32[32,256], index: 22, kind: input, shape index: {}]   ;;  %s13793_s23 = inlined_call_operand.vmem [shape: f32[1,256], index: 23, kind: input, shape index: {}]   ;;  %s13794_s24 = inlined_call_operand.vmem [shape: f32[256,16], index: 24, kind: input, shape index: {}]   ;;  %s13795_s25 = inlined_call_operand.vmem [shape: f32[1,16], index: 25, kind: input, shape index: {}]   ;;  %s13796_s26 = inlined_call_operand.vmem [shape: f32[2,4], index: 26, kind: input, shape index: {}]   ;;  %s13797_s27 = inlined_call_operand.vmem [shape: f32[2,128], index: 27, kind: output, shape index: {}]   ;;  %s13798_s0 = inlined_call_operand.vmem [shape: f32[2,72,32], index: 0, kind: input, shape index: {}]   ;;  %s13799_s2 = inlined_call_operand.vmem [shape: f32[1,1,72], index: 2, kind: input, shape index: {}]  }
   0x1   :  { %13878 = sst [smem:[#allocation86_spill]] %s13772_s1  ;;  %v9171_v9 = vld [vmem:[%s13799_s2] sm:$0x1]  ;;  %v97_v11 = vld [vmem:[%s13798_s0 + $0x8] sm:$0xff]   ;;  %v98_v12 = vld [vmem:[%s13798_s0 + $0x10] sm:$0xff]  }
   0x2   :  { %13879 = sst [smem:[#allocation87_spill]] %s13773_s3  ;;  %13902 = vst [vmem:[#allocation11_spill] sm:$0xff] %v9171_v9  ;;  %v96_v10 = vld [vmem:[%s13798_s0] sm:$0xff]   ;;  %v99_v13 = vld [vmem:[%s13798_s0 + $0x18] sm:$0xff]   ;;  %v101_v15 = vld [vmem:[%s13798_s0 + $0x28] sm:$0xff]  }
   0x3   :  { %13880 = sst [smem:[#allocation88_spill]] %s13774_s4  ;;  %v100_v14 = vld [vmem:[%s13798_s0 + $0x20] sm:$0xff]   ;;  %v102_v16 = vld [vmem:[%s13798_s0 + $0x30] sm:$0xff]   ;;  %v103_v17 = vld [vmem:[%s13798_s0 + $0x38] sm:$0xff]  }
   0x4   :  { %13881 = sst [smem:[#allocation89_spill]] %s13775_s5  ;;  %v104_v18 = vld [vmem:[%s13798_s0 + $0x40] sm:$0xff]   ;;  %v105_v19 = vld [vmem:[%s13798_s0 + $0x48] sm:$0xff]   ;;  %v106_v20 = vld [vmem:[%s13798_s0 + $0x50] sm:$0xff]  }
   0x5   :  { %13882 = sst [smem:[#allocation90_spill]] %s13776_s6  ;;  %v107_v21 = vld [vmem:[%s13798_s0 + $0x58] sm:$0xff]   ;;  %v108_v22 = vld [vmem:[%s13798_s0 + $0x60] sm:$0xff]   ;;  %v109_v23 = vld [vmem:[%s13798_s0 + $0x68] sm:$0xff]  }
   0x6   :  { %13883 = sst [smem:[#allocation91_spill]] %s13777_s7  ;;  %v110_v24 = vld [vmem:[%s13798_s0 + $0x70] sm:$0xff]   ;;  %v111_v25 = vld [vmem:[%s13798_s0 + $0x78] sm:$0xff]   ;;  %v112_v26 = vld [vmem:[%s13798_s0 + $0x80] sm:$0xff]  }
   0x7   :  { %13884 = sst [smem:[#allocation92_spill]] %s13778_s8  ;;  %v113_v27 = vld [vmem:[%s13798_s0 + $0x88] sm:$0xff]   ;;  %s9263_s0 = smov 0  }
   0x8   :  { %13885 = sst [smem:[#allocation93_spill]] %s13779_s9 }
   0x9   :  { %13886 = sst [smem:[#allocation94_spill]] %s13780_s10 }
   0xa   :  { %13887 = sst [smem:[#allocation95_spill]] %s13781_s11 }
   0xb   :  { %13888 = sst [smem:[#allocation96_spill]] %s13782_s12 }
   0xc   :  { %13889 = sst [smem:[#allocation97_spill]] %s13783_s13 }
   0xd   :  { %13890 = sst [smem:[#allocation98_spill]] %s13795_s25 }
   0xe   :  { %13891 = sst [smem:[#allocation99_spill]] %s13797_s27 }
   0xf   :  { %s13892_s10 = sld [smem:[#allocation86_spill]] }
  0x15   :  { %v9126_v0 = vld [vmem:[%s13892_s10] sm:$0xff]  ;;  %v9131_v1 = vld [vmem:[%s13892_s10 + $0x8] sm:$0xff]  ;;  %v9136_v2 = vld [vmem:[%s13892_s10 + $0x10] sm:$0xff] }
  0x16   :  { %13893 = vst [vmem:[#allocation2_spill] sm:$0xff] %v9126_v0  ;;  %v9141_v3 = vld [vmem:[%s13892_s10 + $0x18] sm:$0xff]  ;;  %v9146_v4 = vld [vmem:[%s13892_s10 + $0x20] sm:$0xff]  ;;  %v9151_v5 = vld [vmem:[%s13892_s10 + $0x28] sm:$0xff] }
  0x17   :  { %13894 = vst [vmem:[#allocation3_spill] sm:$0xff] %v9131_v1  ;;  %v9156_v6 = vld [vmem:[%s13892_s10 + $0x30] sm:$0xff]  ;;  %v9161_v7 = vld [vmem:[%s13892_s10 + $0x38] sm:$0xff]  ;;  %v9166_v8 = vld [vmem:[%s13892_s10 + $0x40] sm:$0xff] }
  0x18   :  { %13895 = vst [vmem:[#allocation4_spill] sm:$0xff] %v9136_v2 }
  0x19   :  { %13896 = vst [vmem:[#allocation5_spill] sm:$0xff] %v9141_v3 }
  0x1a   :  { %13897 = vst [vmem:[#allocation6_spill] sm:$0xff] %v9146_v4 }
  0x1b   :  { %13898 = vst [vmem:[#allocation7_spill] sm:$0xff] %v9151_v5 }
  0x1c   :  { %13899 = vst [vmem:[#allocation8_spill] sm:$0xff] %v9156_v6 }
  0x1d   :  { %13900 = vst [vmem:[#allocation9_spill] sm:$0xff] %v9161_v7 }
  0x1e   :  { %13901 = vst [vmem:[#allocation10_spill] sm:$0xff] %v9166_v8 }
  0x1f LB: > { %13903 = vst [vmem:[#allocation12_spill] sm:$0xff] %v8837_v27  ;;  %s9323_s1 = sshll.u32 %s8909_s0, 5  ;;  %s13921_s3 = sld [smem:[#allocation91_spill]]  ;;  %vm149_vm0 = vcmask 261120   ;;  %v13925_v0 = vld [vmem:[#allocation2_spill] sm:$0xff]  ;;  %v13927_v1 = vld [vmem:[#allocation3_spill] sm:$0xff]  ;;  %s8909_s0 = sphi %s9263_s0, %s119_s0   ;;  %v8905_v10 = vphi %v96_v10, %v14110_v10   ;;  %v8901_v11 = vphi %v97_v11, %v14109_v11   ;;  %v8897_v12 = vphi %v98_v12, %v14108_v12   ;;  %v8893_v13 = vphi %v99_v13, %v14107_v13   ;;  %v8889_v14 = vphi %v100_v14, %v14106_v14   ;;  %v8885_v15 = vphi %v101_v15, %v14105_v15   ;;  %v8881_v16 = vphi %v102_v16, %v12307_v16   ;;  %v8877_v17 = vphi %v103_v17, %v12392_v17   ;;  %v8873_v18 = vphi %v104_v18, %v12400_v18   ;;  %v8869_v19 = vphi %v105_v19, %v14104_v19   ;;  %v8865_v20 = vphi %v106_v20, %v14103_v20   ;;  %v8861_v21 = vphi %v107_v21, %v12411_v21   ;;  %v8857_v22 = vphi %v108_v22, %v14102_v22   ;;  %v8853_v23 = vphi %v109_v23, %v14101_v23   ;;  %v8849_v24 = vphi %v110_v24, %v4774_v24   ;;  %v8845_v25 = vphi %v111_v25, %v4775_v25   ;;  %v8841_v26 = vphi %v112_v26, %v4776_v26   ;;  %v8837_v27 = vphi %v113_v27, %v4777_v27  }
  0x20   : > { %13904 = vst [vmem:[#allocation13_spill] sm:$0xff] %v8841_v26  ;;  %s13922_s4 = sld [smem:[#allocation90_spill]]  ;;  %s4193_s12 = scalar_lea.vmem %s13784_s14, %s8909_s0  ;;  %v13929_v2 = vld [vmem:[#allocation4_spill] sm:$0xff]  ;;  %v13931_v3 = vld [vmem:[#allocation5_spill] sm:$0xff]  ;;  %vm391_vm1 = vcmask 64512   ;;  %v13990_v9 = vld [vmem:[#allocation11_spill] sm:$0xff] }
  0x21   : > { %13905 = vst [vmem:[#allocation14_spill] sm:$0xff] %v8845_v25  ;;  %s13923_s6 = sld [smem:[#allocation93_spill]]  ;;  %v13926_v4 = vld [vmem:[#allocation6_spill] sm:$0xff]  ;;  %s8939_s29 = smov 96   ;;  %vm618_vm2 = vcmask 588800   ;;  %vm3251_vm3 = vcmask 130048  }
  0x22   : > { %13906 = vst [vmem:[#allocation15_spill] sm:$0xff] %v8849_v24  ;;  %s13924_s7 = sld [smem:[#allocation96_spill]]  ;;  %v13928_v5 = vld [vmem:[#allocation7_spill] sm:$0xff]  ;;  %s8942_s10 = smov 80   ;;  %vm3270_vm4 = vcmask 195584  }
  0x23   : > { %13907 = vst [vmem:[#allocation16_spill] sm:$0xff] %v8853_v23  ;;  %v13930_v6 = vld [vmem:[#allocation8_spill] sm:$0xff]  ;;  %s8943_s13 = smov 64   ;;  %s8946_s5 = smov 72  }
  0x24   : > { %13908 = vst [vmem:[#allocation17_spill] sm:$0xff] %v8857_v22  ;;  %v13932_v7 = vld [vmem:[#allocation9_spill] sm:$0xff]  ;;  %s8947_s9 = smov 48   ;;  %s8948_s11 = smov 104  }
  0x25   : > { %13909 = vst [vmem:[#allocation18_spill] sm:$0xff] %v8861_v21  ;;  %s144_s8 = scalar_lea.vmem %s13921_s3, %s8909_s0  ;;  %v13933_v8 = vld [vmem:[#allocation10_spill] sm:$0xff]  ;;  %s8940_s3 = smov 88  }
  0x26   : > { %13910 = vst [vmem:[#allocation19_spill] sm:$0xff] %v8865_v20  ;;  %s139_s2 = scalar_lea.vmem %s13922_s4, %s9323_s1  ;;  %v9400_v32 = vld [vmem:[%s144_s8] ss:$0 sm:$0xff]  ;;  %s8941_s8 = smov 120  }
  0x27   : > { %13911 = vst [vmem:[#allocation20_spill] sm:$0xff] %v8869_v19  ;;  %s3294_s30 = scalar_lea.vmem %s13923_s6, %s8909_s0  ;;  %v143_v28 = vld [vmem:[%s139_s2 + $0x18] sm:$0xff]  ;;  %v142_v29 = vld [vmem:[%s139_s2 + $0x10] sm:$0xff]  ;;  %v141_v30 = vld [vmem:[%s139_s2 + $0x8] sm:$0xff]  ;;  %s8944_s4 = smov 112  }
  0x28   : > { %13912 = vst [vmem:[#allocation21_spill] sm:$0xff] %v8873_v18  ;;  %s3891_s28 = scalar_lea.vmem %s13924_s7, %s8909_s0  ;;  %216 = vmatpush.msra.mxu0 %v143_v28  ;;  %314 = vmatpush.msra.mxu1 %v143_v28  ;;  %v140_v31 = vld [vmem:[%s139_s2] sm:$0xff]  ;;  %s8945_s2 = smov 56  }
  0x29   : > { %13913 = vst [vmem:[#allocation22_spill] sm:$0xff] %v8877_v17  ;;  %7666 = vmatpush.msra.mxu2 %v143_v28  ;;  %s8949_s26 = smov 40   ;;  %s8950_s25 = smov 8  }
  0x2a   : > { %13914 = vst [vmem:[#allocation23_spill] sm:$0xff] %v8881_v16  ;;  %217 = vmatpush.msra.mxu0 %v142_v29  ;;  %315 = vmatpush.msra.mxu1 %v142_v29  ;;  %s8951_s27 = smov 16  }
  0x2b   : > { %13915 = vst [vmem:[#allocation24_spill] sm:$0xff] %v8885_v15  ;;  %7667 = vmatpush.msra.mxu2 %v142_v29 }
  0x2c   : > { %13916 = vst [vmem:[#allocation25_spill] sm:$0xff] %v8889_v14  ;;  %218 = vmatpush.msra.mxu0 %v141_v30  ;;  %316 = vmatpush.msra.mxu1 %v141_v30 }
  0x2d   : > { %13917 = vst [vmem:[#allocation26_spill] sm:$0xff] %v8893_v13  ;;  %7668 = vmatpush.msra.mxu2 %v141_v30 }
  0x2e   : > { %13918 = vst [vmem:[#allocation27_spill] sm:$0xff] %v8897_v12  ;;  %219 = vmatpush.msra.mxu0 %v140_v31  ;;  %317 = vmatpush.msra.mxu1 %v140_v31 }
  0x2f   : > { %13919 = vst [vmem:[#allocation28_spill] sm:$0xff] %v8901_v11  ;;  %7230 = vmatmul.msk.f32.vlgmr.msra.gmra.mxu0 %vm149_vm0, %v8905_v10  ;;  %7248 = vmatmul.msk.f32.vlgmr.msra.gmra.mxu1 %vm149_vm0, %v13925_v0 }
  0x30   : > { %13920 = vst [vmem:[#allocation29_spill] sm:$0xff] %v8905_v10  ;;  %7669 = vmatpush.msra.mxu2 %v140_v31 }
  0x31   : > { %7252 = vmatmul.msk.f32.vlgmr.msra.gmra.mxu2 %vm149_vm0, %v13926_v4 }
  0x37   : > { %7231 = vmatmul.msk.f32.gmra.mxu0 %vm149_vm0, %v8901_v11  ;;  %7249 = vmatmul.msk.f32.gmra.mxu1 %vm149_vm0, %v13927_v1 }
  0x39   : > { %7253 = vmatmul.msk.f32.gmra.mxu2 %vm149_vm0, %v13928_v5 }
  0x3f   : > { %7232 = vmatmul.msk.f32.gmra.mxu0 %vm149_vm0, %v8897_v12  ;;  %7250 = vmatmul.msk.f32.gmra.mxu1 %vm149_vm0, %v13929_v2 }
  0x41   : > { %7254 = vmatmul.msk.f32.gmra.mxu2 %vm149_vm0, %v13930_v6 }
  0x47   : > { %7233 = vmatmul.msk.f32.gmra.mxu0 %vm149_vm0, %v8893_v13  ;;  %7251 = vmatmul.msk.f32.gmra.mxu1 %vm149_vm0, %v13931_v3 }
  0x49   : > { %7255 = vmatmul.msk.f32.gmra.mxu2 %vm149_vm0, %v13932_v7 }
  0x4f   : > { %7234 = vmatmul.msk.f32.gmra.mxu0 %vm149_vm0, %v8889_v14 }
  0x51   : > { %7256 = vmatmul.msk.f32.gmra.mxu2 %vm149_vm0, %v13933_v8 }
  0x57   : > { %7235 = vmatmul.msk.f32.gmra.mxu0 %vm149_vm0, %v8885_v15 }
  0x5f   : > { %7236 = vmatmul.msk.f32.gmra.mxu0 %vm149_vm0, %v8881_v16 }
  0x67   : > { %7237 = vmatmul.msk.f32.gmra.mxu0 %vm149_vm0, %v8877_v17 }
  0x6f   : > { %7238 = vmatmul.msk.f32.gmra.mxu0 %vm149_vm0, %v8873_v18 }
  0x77   : > { %7239 = vmatmul.msk.f32.gmra.mxu0 %vm149_vm0, %v8869_v19 }
  0x7f   : > { %7240 = vmatmul.msk.f32.gmra.mxu0 %vm149_vm0, %v8865_v20 }
  0x87   : > { %7241 = vmatmul.msk.f32.gmra.mxu0 %vm149_vm0, %v8861_v21 }
  0x8f   : > { %7242 = vmatmul.msk.f32.gmra.mxu0 %vm149_vm0, %v8857_v22 }
  0x97   : > { %7243 = vmatmul.msk.f32.gmra.mxu0 %vm149_vm0, %v8853_v23 }
  0x9f   : > { %7244 = vmatmul.msk.f32.gmra.mxu0 %vm149_vm0, %v8849_v24 }
  0xa7   : > { %7245 = vmatmul.msk.f32.gmra.mxu0 %vm149_vm0, %v8845_v25 }
  0xac   : > { %v221_v33 = vpop.f32.mrf.mxu0  ;;  %v9402_v34 = vpop.f32.mrf.mxu1 }
  0xad   : > { %v9405_v35 = vadd.f32 %v9400_v32, %v221_v33 }
  0xaf   : > { %13934 = vst [vmem:[#allocation30_spill] sm:$0xff] %v9405_v35  ;;  %v9409_v36 = vadd.f32 %v9402_v34, %v9405_v35  ;;  %7246 = vmatmul.msk.f32.gmra.mxu0 %vm149_vm0, %v8841_v26 }
  0xb1   : > { %13935 = vst [vmem:[#allocation31_spill] sm:$0xff] %v9409_v36  ;;  %373 = vrot.lane.b32.xlu1 %v9409_v36, %s8939_s29 }
  0xb4   : > { %v224_v37 = vpop.f32.mrf.mxu0  ;;  %v9415_v38 = vpop.f32.mrf.mxu1 }
  0xb5   : > { %v9418_v39 = vadd.f32 %v9400_v32, %v224_v37  ;;  %v9447_v46 = vpop.f32.mrf.mxu2 }
  0xb7   : > { %13936 = vst [vmem:[#allocation32_spill] sm:$0xff] %v9418_v39  ;;  %v9422_v40 = vadd.f32 %v9415_v38, %v9418_v39  ;;  %7247 = vmatmul.msk.f32.gmra.mxu0 %vm149_vm0, %v8837_v27 }
  0xb9   : > { %13937 = vst [vmem:[#allocation33_spill] sm:$0xff] %v9422_v40  ;;  %1049 = vrot.lane.b32.xlu1 %v9409_v36, %s8940_s3  ;;  %1033 = vrot.lane.b32.xlu0 %v9422_v40, %s8941_s8 }
  0xba   : > { %375 = vrot.lane.b32.xlu2 %v9422_v40, %s8939_s29 }
  0xbc   : > { %v227_v41 = vpop.f32.mrf.mxu0  ;;  %v9432_v42 = vpop.f32.mrf.mxu1 }
  0xbd   : > { %v9435_v43 = vadd.f32 %v9400_v32, %v227_v41  ;;  %v9471_v54 = vpop.f32.mrf.mxu2 }
  0xbf   : > { %13938 = vst [vmem:[#allocation34_spill] sm:$0xff] %v9435_v43  ;;  %v9439_v44 = vadd.f32 %v9432_v42, %v9435_v43 }
  0xc1   : > { %13939 = vst [vmem:[#allocation35_spill] sm:$0xff] %v9439_v44  ;;  %1031 = vrot.lane.b32.xlu1 %v9409_v36, %s8941_s8 }
  0xc2   : > { %1035 = vrot.lane.b32.xlu2 %v9439_v44, %s8941_s8 }
  0xc4   : > { %v230_v47 = vpop.f32.mrf.mxu0  ;;  %v9449_v48 = vpop.f32.mrf.mxu1 }
  0xc5   : > { %v9452_v49 = vadd.f32 %v9400_v32, %v230_v47  ;;  %v9492_v60 = vpop.f32.mrf.mxu2 }
  0xc7   : > { %13940 = vst [vmem:[#allocation36_spill] sm:$0xff] %v9452_v49  ;;  %v9456_v50 = vadd.f32 %v9449_v48, %v9452_v49  ;;  %v9460_v51 = vpack.i.bf16 %v9435_v43, %v9452_v49 }
  0xc9   : > { %13941 = vst [vmem:[#allocation37_spill] sm:$0xff] %v9456_v50  ;;  %1051 = vrot.lane.b32.xlu1 %v9422_v40, %s8940_s3  ;;  %1055 = vrot.lane.b32.xlu0 %v9456_v50, %s8940_s3 }
  0xca   : > { %13942 = vst [vmem:[#allocation38_spill] sm:$0xff] %v9460_v51  ;;  %379 = vrot.lane.b32.xlu2 %v9456_v50, %s8939_s29 }
  0xcc   : > { %v233_v52 = vpop.f32.mrf.mxu0 }
  0xcd   : > { %v9469_v53 = vadd.f32 %v9400_v32, %v233_v52  ;;  %v9515_v29 = vpop.f32.mrf.mxu2 }
  0xcf   : > { %13943 = vst [vmem:[#allocation39_spill] sm:$0xff] %v9469_v53  ;;  %v9475_v55 = vadd.f32 %v9447_v46, %v9469_v53 }
  0xd1   : > { %13944 = vst [vmem:[#allocation40_spill] sm:$0xff] %v9475_v55  ;;  %377 = vrot.lane.b32.xlu1 %v9439_v44, %s8939_s29  ;;  %381 = vrot.lane.b32.xlu0 %v9475_v55, %s8939_s29 }
  0xd2   : > { %1037 = vrot.lane.b32.xlu2 %v9456_v50, %s8941_s8 }
  0xd4   : > { %v236_v57 = vpop.f32.mrf.mxu0 }
  0xd5   : > { %v9486_v58 = vadd.f32 %v9400_v32, %v236_v57  ;;  %v9534_v47 = vpop.f32.mrf.mxu2 }
  0xd7   : > { %13945 = vst [vmem:[#allocation41_spill] sm:$0xff] %v9486_v58  ;;  %v9490_v59 = vpack.i.bf16 %v9469_v53, %v9486_v58  ;;  %v9502_v62 = vadd.f32 %v9471_v54, %v9486_v58 }
  0xd9   : > { %13946 = vst [vmem:[#allocation42_spill] sm:$0xff] %v9490_v59  ;;  %1053 = vrot.lane.b32.xlu1 %v9439_v44, %s8940_s3  ;;  %1057 = vrot.lane.b32.xlu0 %v9475_v55, %s8940_s3 }
  0xda   : > { %1719 = vrot.lane.b32.xlu2 %v9475_v55, %s8942_s10  ;;  %13947 = vst [vmem:[#allocation43_spill] sm:$0xff] %v9502_v62 }
  0xdc   : > { %v239_v61 = vpop.f32.mrf.mxu0 }
  0xdd   : > { %v9505_v63 = vadd.f32 %v9400_v32, %v239_v61 }
  0xdf   : > { %13948 = vst [vmem:[#allocation44_spill] sm:$0xff] %v9505_v63  ;;  %v9538_v52 = vadd.f32 %v9492_v60, %v9505_v63 }
  0xe1   : > { %1039 = vrot.lane.b32.xlu0 %v9475_v55, %s8941_s8  ;;  %1041 = vrot.lane.b32.xlu1 %v9502_v62, %s8941_s8  ;;  %13952 = vst [vmem:[#allocation48_spill] sm:$0xff] %v9538_v52 }
  0xe2   : > { %1059 = vrot.lane.b32.xlu2 %v9502_v62, %s8940_s3 }
  0xe4   : > { %v242_v30 = vpop.f32.mrf.mxu0 }
  0xe5   : > { %v9518_v31 = vadd.f32 %v9400_v32, %v242_v30 }
  0xe7   : > { %13949 = vst [vmem:[#allocation45_spill] sm:$0xff] %v9518_v31  ;;  %v9522_v33 = vadd.f32 %v9515_v29, %v9518_v31  ;;  %v9526_v37 = vpack.i.bf16 %v9505_v63, %v9518_v31 }
  0xe9   : > { %13950 = vst [vmem:[#allocation46_spill] sm:$0xff] %v9522_v33  ;;  %1721 = vrot.lane.b32.xlu1 %v9502_v62, %s8942_s10  ;;  %383 = vrot.lane.b32.xlu0 %v9502_v62, %s8939_s29 }
  0xea   : > { %13951 = vst [vmem:[#allocation47_spill] sm:$0xff] %v9526_v37  ;;  %1725 = vrot.lane.b32.xlu2 %v9522_v33, %s8942_s10 }
  0xec   : > { %v245_v41 = vpop.f32.mrf.mxu0 }
  0xed   : > { %v9541_v57 = vadd.f32 %v9400_v32, %v245_v41 }
  0xef   : > { %13953 = vst [vmem:[#allocation49_spill] sm:$0xff] %v9541_v57  ;;  %v9545_v61 = vadd.f32 %v9534_v47, %v9541_v57 }
  0xf1   : > { %13954 = vst [vmem:[#allocation50_spill] sm:$0xff] %v9545_v61  ;;  %1061 = vrot.lane.b32.xlu0 %v9538_v52, %s8940_s3  ;;  %385 = vrot.lane.b32.xlu1 %v9538_v52, %s8939_s29 }
  0xf2   : > { %389 = vrot.lane.b32.xlu2 %v9545_v61, %s8939_s29 }
  0xf4   : > { %v248_v56 = vpop.f32.mrf.mxu0 }
  0xf5   : > { %v9556_v41 = vadd.f32 %v9400_v32, %v248_v56 }
  0xf7   : > { %13955 = vst [vmem:[#allocation51_spill] sm:$0xff] %v9556_v41  ;;  %v9560_v45 = vpack.i.bf16 %v9541_v57, %v9556_v41  ;;  %v9575_v0 = vadd.f32 %v9402_v34, %v9556_v41 }
  0xf9   : > { %13956 = vst [vmem:[#allocation52_spill] sm:$0xff] %v9560_v45  ;;  %1723 = vrot.lane.b32.xlu0 %v9538_v52, %s8942_s10  ;;  %387 = vrot.lane.b32.xlu1 %v9522_v33, %s8939_s29 }
  0xfa   : > { %1065 = vrot.lane.b32.xlu2 %v9545_v61, %s8940_s3 }
  0xfc   : > { %v251_v28 = vpop.f32.mrf.mxu0 }
  0xfd   : > { %v9569_v30 = vadd.f32 %v9400_v32, %v251_v28 }
  0xff   : > { %13957 = vst [vmem:[#allocation53_spill] sm:$0xff] %v9569_v30  ;;  %v9598_v2 = vadd.f32 %v9415_v38, %v9569_v30 }
 0x101   : > { %1043 = vrot.lane.b32.xlu0 %v9538_v52, %s8941_s8  ;;  %1727 = vrot.lane.b32.xlu1 %v9545_v61, %s8942_s10 }
 0x102   : > { %481 = vrot.lane.b32.xlu2 %v9575_v0, %s8939_s29 }
 0x104   : > { %v254_v1 = vpop.f32.mrf.mxu0 }
 0x105   : > { %v9584_v28 = vadd.f32 %v9400_v32, %v254_v1 }
 0x107   : > { %13958 = vst [vmem:[#allocation54_spill] sm:$0xff] %v9584_v28  ;;  %v9588_v56 = vpack.i.bf16 %v9569_v30, %v9584_v28  ;;  %v9615_v38 = vadd.f32 %v9432_v42, %v9584_v28 }
 0x109   : > { %13959 = vst [vmem:[#allocation55_spill] sm:$0xff] %v9588_v56  ;;  %1063 = vrot.lane.b32.xlu0 %v9522_v33, %s8940_s3  ;;  %1827 = vrot.lane.b32.xlu1 %v9575_v0, %s8942_s10 }
 0x10a   : > { %1165 = vrot.lane.b32.xlu2 %v9575_v0, %s8940_s3 }
 0x10c   : > { %v257_v34 = vpop.f32.mrf.mxu0 }
 0x10d   : > { %v9601_v1 = vadd.f32 %v9400_v32, %v257_v34 }
 0x10f   : > { %13960 = vst [vmem:[#allocation56_spill] sm:$0xff] %v9601_v1  ;;  %v9658_v26 = vadd.f32 %v9449_v48, %v9601_v1 }
 0x111   : > { %7939 = vrot.lane.b32.xlu0 %v9560_v45, %s8943_s13  ;;  %483 = vrot.lane.b32.xlu1 %v9598_v2, %s8939_s29 }
 0x112   : > { %1829 = vrot.lane.b32.xlu2 %v9598_v2, %s8942_s10 }
 0x114   : > { %v9611_v4 = vpop.permute.xlu2 %375  ;;  %v260_v34 = vpop.f32.mrf.mxu0 }
 0x115   : > { %v9626_v3 = vadd.f32 %v9400_v32, %v260_v34 }
 0x117   : > { %13962 = vst [vmem:[#allocation58_spill] sm:$0xff] %v9626_v3  ;;  %v9630_v6 = vpack.i.bf16 %v9601_v1, %v9626_v3  ;;  %v9654_v27 = vadd.f32 %v9447_v46, %v9626_v3 }
 0x119   : > { %1147 = vrot.lane.b32.xlu0 %v9575_v0, %s8941_s8  ;;  %1167 = vrot.lane.b32.xlu1 %v9598_v2, %s8940_s3  ;;  %13963 = vst [vmem:[#allocation59_spill] sm:$0xff] %v9630_v6 }
 0x11a   : > { %1151 = vrot.lane.b32.xlu2 %v9615_v38, %s8941_s8 }
 0x11c   : > { %v9623_v5 = vpop.permute.xlu2 %1035  ;;  %v263_v25 = vpop.f32.mrf.mxu0 }
 0x11d   : > { %13961 = vst [vmem:[#allocation57_spill] sm:$0xff] %v9623_v5  ;;  %v9673_v22 = vadd.f32 %v9400_v32, %v263_v25 }
 0x11f   : > { %13968 = vst [vmem:[#allocation64_spill] sm:$0xff] %v9673_v22  ;;  %v9694_v17 = vadd.f32 %v9471_v54, %v9673_v22 }
 0x121   : > { %1809 = vrot.lane.b32.xlu0 %v9575_v0, %s8944_s4  ;;  %1149 = vrot.lane.b32.xlu1 %v9598_v2, %s8941_s8 }
 0x122   : > { %1831 = vrot.lane.b32.xlu2 %v9615_v38, %s8942_s10 }
 0x123   : > { %v9638_v42 = vpop.permute.xlu1 %373 }
 0x124   : > { %v9640_v7 = vpop.permute.xlu2 %379  ;;  %v266_v48 = vpop.f32.mrf.mxu0 }
 0x125   : > { %v9690_v25 = vadd.f32 %v9400_v32, %v266_v48 }
 0x127   : > { %13969 = vst [vmem:[#allocation65_spill] sm:$0xff] %v9690_v25  ;;  %v9698_v15 = vpack.i.bf16 %v9673_v22, %v9690_v25  ;;  %v9721_v11 = vadd.f32 %v9492_v60, %v9690_v25 }
 0x129   : > { %1811 = vrot.lane.b32.xlu0 %v9598_v2, %s8944_s4  ;;  %7944 = vrot.lane.b32.xlu1 %v9588_v56, %s8943_s13  ;;  %13970 = vst [vmem:[#allocation66_spill] sm:$0xff] %v9698_v15 }
 0x12a   : > { %1813 = vrot.lane.b32.xlu2 %v9615_v38, %s8944_s4  ;;  %13971 = vst [vmem:[#allocation67_spill] sm:$0xff] %v9721_v11 }
 0x12b   : > { %v9648_v34 = vpop.permute.xlu1 %1049  ;;  %v9666_v24 = vpop.permute.xlu0 %1033 }
 0x12c   : > { %v9650_v8 = vpop.permute.xlu2 %1037  ;;  %13965 = vst [vmem:[#allocation61_spill] sm:$0xff] %v9666_v24  ;;  %v269_v13 = vpop.f32.mrf.mxu0 }
 0x12d   : > { %13964 = vst [vmem:[#allocation60_spill] sm:$0xff] %v9650_v8  ;;  %v9724_v10 = vadd.f32 %v9400_v32, %v269_v13 }
 0x12f   : > { %13972 = vst [vmem:[#allocation68_spill] sm:$0xff] %v9724_v10  ;;  %v9748_v1 = vadd.f32 %v9515_v29, %v9724_v10 }
 0x131   : > { %485 = vrot.lane.b32.xlu0 %v9615_v38, %s8939_s29  ;;  %1173 = vrot.lane.b32.xlu1 %v9654_v27, %s8940_s3  ;;  %13975 = vst [vmem:[#allocation71_spill] sm:$0xff] %v9748_v1 }
 0x132   : > { %487 = vrot.lane.b32.xlu2 %v9658_v26, %s8939_s29 }
 0x133   : > { %v9668_v23 = vpop.permute.xlu1 %1031 }
 0x134   : > { %13966 = vst [vmem:[#allocation62_spill] sm:$0xff] %v9668_v23  ;;  %v9670_v46 = vpop.permute.xlu2 %1719  ;;  %v272_v30 = vpop.f32.mrf.mxu0 }
 0x135   : > { %13967 = vst [vmem:[#allocation63_spill] sm:$0xff] %v9670_v46  ;;  %v9751_v41 = vadd.f32 %v9400_v32, %v272_v30 }
 0x137   : > { %13976 = vst [vmem:[#allocation72_spill] sm:$0xff] %v9751_v41  ;;  %v9763_v3 = vpack.i.bf16 %v9724_v10, %v9751_v41 }
 0x139   : > { %1169 = vrot.lane.b32.xlu0 %v9615_v38, %s8940_s3  ;;  %1155 = vrot.lane.b32.xlu1 %v9654_v27, %s8941_s8  ;;  %13977 = vst [vmem:[#allocation73_spill] sm:$0xff] %v9763_v3 }
 0x13a   : > { %1171 = vrot.lane.b32.xlu2 %v9658_v26, %s8940_s3 }
 0x13b   : > { %v9683_v20 = vpop.permute.xlu1 %1051  ;;  %v9685_v19 = vpop.permute.xlu0 %1055 }
 0x13c   : > { %v9687_v18 = vpop.permute.xlu2 %1059 }
 0x141   : > { %1153 = vrot.lane.b32.xlu0 %v9658_v26, %s8941_s8  ;;  %491 = vrot.lane.b32.xlu1 %v9694_v17, %s8939_s29 }
 0x142   : > { %7949 = vrot.lane.b32.xlu2 %v9630_v6, %s8943_s13 }
 0x143   : > { %v378_v21 = vpop.permute.xlu1 %377  ;;  %v382_v48 = vpop.permute.xlu0 %381 }
 0x144   : > { %v9706_v16 = vpop.permute.xlu2 %1725 }
 0x149   : > { %1833 = vrot.lane.b32.xlu0 %v9658_v26, %s8942_s10  ;;  %1837 = vrot.lane.b32.xlu1 %v9694_v17, %s8942_s10 }
 0x14a   : > { %489 = vrot.lane.b32.xlu2 %v9654_v27, %s8939_s29 }
 0x14b   : > { %v9714_v54 = vpop.permute.xlu1 %1053  ;;  %v9716_v12 = vpop.permute.xlu0 %1057 }
 0x14c   : > { %v390_v14 = vpop.permute.xlu2 %389 }
 0x14d   : > { %7257 = vmatpush.xpose.msk.msrb.mxu2 %vm391_vm1, %v390_v14 }
 0x151   : > { %1815 = vrot.lane.b32.xlu0 %v9658_v26, %s8944_s4  ;;  %493 = vrot.lane.b32.xlu1 %v9721_v11, %s8939_s29 }
 0x152   : > { %1817 = vrot.lane.b32.xlu2 %v9654_v27, %s8944_s4 }
 0x153   : > { %v9734_v14 = vpop.permute.xlu0 %1039  ;;  %v9736_v28 = vpop.permute.xlu1 %1041 }
 0x154   : > { %13973 = vst [vmem:[#allocation69_spill] sm:$0xff] %v9734_v14  ;;  %v9753_v22 = vpop.permute.xlu2 %1065 }
 0x155   : > { %13974 = vst [vmem:[#allocation70_spill] sm:$0xff] %v9736_v28 }
 0x159   : > { %1835 = vrot.lane.b32.xlu0 %v9654_v27, %s8942_s10  ;;  %1821 = vrot.lane.b32.xlu1 %v9721_v11, %s8944_s4 }
 0x15a   : > { %1819 = vrot.lane.b32.xlu2 %v9694_v17, %s8944_s4 }
 0x15b   : > { %v9744_v13 = vpop.permute.xlu1 %1721  ;;  %v384_v60 = vpop.permute.xlu0 %383 }
 0x15c   : > { %v9771_v32 = vpop.permute.xlu2 %481 }
 0x161   : > { %1175 = vrot.lane.b32.xlu0 %v9694_v17, %s8940_s3  ;;  %1179 = vrot.lane.b32.xlu1 %v9748_v1, %s8940_s3 }
 0x162   : > { %1177 = vrot.lane.b32.xlu2 %v9721_v11, %s8940_s3 }
 0x163   : > { %v9765_v29 = vpop.permute.xlu0 %1061  ;;  %v386_v25 = vpop.permute.xlu1 %385 }
 0x164   : > { %v9788_v49 = vpop.permute.xlu2 %1165 }
 0x169   : > { %1157 = vrot.lane.b32.xlu0 %v9694_v17, %s8941_s8  ;;  %1841 = vrot.lane.b32.xlu1 %v9748_v1, %s8942_s10 }
 0x16a   : > { %1839 = vrot.lane.b32.xlu2 %v9721_v11, %s8942_s10 }
 0x16b   : > { %v9775_v30 = vpop.permute.xlu0 %1723  ;;  %v388_v53 = vpop.permute.xlu1 %387 }
 0x16c   : > { %7258 = vmatpush.xpose.msk.msrb.mxu2 %vm391_vm1, %v388_v53  ;;  %v9792_v53 = vadd.f32 %v9534_v47, %v9751_v41  ;;  %v9807_v47 = vpop.permute.xlu2 %1829 }
 0x16e   : > { %13979 = vst [vmem:[#allocation75_spill] sm:$0xff] %v9792_v53 }
 0x170   : > { %7259 = vmatpush.xpose.msk.msrb.mxu2 %vm391_vm1, %v386_v25 }
 0x171   : > { %7954 = vrot.lane.b32.xlu0 %v9698_v15, %s8943_s13  ;;  %1823 = vrot.lane.b32.xlu1 %v9748_v1, %s8944_s4 }
 0x172   : > { %1161 = vrot.lane.b32.xlu2 %v9748_v1, %s8941_s8 }
 0x173   : > { %v9785_v10 = vpop.permute.xlu0 %1043  ;;  %v9801_v25 = vpop.permute.xlu1 %1727 }
 0x174   : > { %13978 = vst [vmem:[#allocation74_spill] sm:$0xff] %v9785_v10  ;;  %7260 = vmatpush.xpose.msk.msrb.mxu2 %vm391_vm1, %v384_v60 }
 0x178   : > { %7261 = vmatpush.xpose.msk.msrb.mxu2 %vm391_vm1, %v382_v48 }
 0x179   : > { %1159 = vrot.lane.b32.xlu0 %v9721_v11, %s8941_s8  ;;  %1163 = vrot.lane.b32.xlu1 %v9792_v53, %s8941_s8 }
 0x17a   : > { %1843 = vrot.lane.b32.xlu2 %v9792_v53, %s8942_s10 }
 0x17b   : > { %v9803_v60 = vpop.permute.xlu0 %1063  ;;  %v9821_v41 = vpop.permute.xlu1 %1827 }
 0x17c   : > { %7262 = vmatpush.xpose.msk.msrb.mxu2 %vm391_vm1, %v9640_v7 }
 0x180   : > { %7263 = vmatpush.xpose.msk.msrb.mxu2 %vm391_vm1, %v378_v21  ;;  %v9825_v21 = vpop.permute.xlu2 %1151 }
 0x181   : > { %495 = vrot.lane.b32.xlu0 %v9748_v1, %s8939_s29  ;;  %1715 = vrot.lane.b32.xlu1 %v9439_v44, %s8942_s10 }
 0x182   : > { %1045 = vrot.lane.b32.xlu2 %v9522_v33, %s8941_s8 }
 0x183   : > { %v9816_v48 = vpop.permute.xlu0 %7939 }
 0x184   : > { %7264 = vmatpush.xpose.msk.msrb.mxu2 %vm391_vm1, %v9611_v4  ;;  %v7942_v7 = vunpack.i.h.bf16 %v9816_v48 }
 0x186   : > { %887 = vmatpush.msrb.mxu1 %v7942_v7  ;;  %v9837_v7 = vpop.permute.xlu1 %483 }
 0x188   : > { %7265 = vmatpush.xpose.msk.msrb.mxu2 %vm391_vm1, %v9638_v42  ;;  %v9845_v42 = vpop.permute.xlu2 %1831 }
 0x189   : > { %7959 = vrot.lane.b32.xlu0 %v9763_v3, %s8943_s13  ;;  %7974 = vrot.lane.b32.xlu1 %v9630_v6, %s8945_s2 }
 0x18a   : > { %1717 = vrot.lane.b32.xlu2 %v9456_v50, %s8942_s10 }
 0x18b   : > { %7266 = vmatmul.msk.f32.vlgmr.msrb.gmra.mxu2 %vm391_vm1, %v9409_v36  ;;  %v9835_v4 = vpop.permute.xlu0 %1147 }
 0x18e   : > { %v9851_v63 = vpop.permute.xlu1 %1167 }
 0x190   : > { %v9863_v57 = vpop.permute.xlu2 %1813 }
 0x191   : > { %1693 = vrot.lane.b32.xlu1 %v9409_v36, %s8944_s4  ;;  %497 = vrot.lane.b32.xlu0 %v9792_v53, %s8939_s29  ;;  %13982 = vst [vmem:[#allocation78_spill] sm:$0xff] %v9863_v57  ;;  %s8952_s29 = smov 24  }
 0x192   : > { %1713 = vrot.lane.b32.xlu2 %v9422_v40, %s8942_s10 }
 0x193   : > { %7267 = vmatmul.msk.f32.gmra.mxu2 %vm391_vm1, %v9422_v40  ;;  %v9849_v43 = vpop.permute.xlu0 %1809 }
 0x194   : > { %13980 = vst [vmem:[#allocation76_spill] sm:$0xff] %v9849_v43 }
 0x196   : > { %v9869_v31 = vpop.permute.xlu1 %1149 }
 0x198   : > { %v9875_v39 = vpop.permute.xlu2 %487 }
 0x199   : > { %2389 = vrot.lane.b32.xlu1 %v9545_v61, %s8946_s5  ;;  %1181 = vrot.lane.b32.xlu0 %v9792_v53, %s8940_s3 }
 0x19a   : > { %7979 = vrot.lane.b32.xlu2 %v9588_v56, %s8945_s2 }
 0x19b   : > { %7268 = vmatmul.msk.f32.gmra.mxu2 %vm391_vm1, %v9439_v44  ;;  %v9861_v58 = vpop.permute.xlu0 %1811 }
 0x19c   : > { %13981 = vst [vmem:[#allocation77_spill] sm:$0xff] %v9861_v58 }
 0x19e   : > { %v7945_v51 = vpop.permute.xlu1 %7944 }
 0x19f   : > { %v7946_v46 = vunpack.i.l.bf16 %v7945_v51 }
 0x1a0   : > { %v9885_v37 = vpop.permute.xlu2 %1171 }
 0x1a1   : > { %1825 = vrot.lane.b32.xlu0 %v9792_v53, %s8944_s4 }
 0x1a2   : > { %1695 = vrot.lane.b32.xlu2 %v9422_v40, %s8944_s4 }
 0x1a3   : > { %7269 = vmatmul.msk.f32.gmra.mxu2 %vm391_vm1, %v9456_v50  ;;  %v9873_v35 = vpop.permute.xlu0 %485 }
 0x1a6   : > { %v9893_v56 = vpop.permute.xlu1 %1173 }
 0x1a8   : > { %v7950_v40 = vpop.permute.xlu2 %7949 }
 0x1a9   : > { %7964 = vrot.lane.b32.xlu0 %v9763_v3, %s8945_s2  ;;  %v7952_v11 = vunpack.i.h.bf16 %v7950_v40 }
 0x1aa   : > { %1701 = vrot.lane.b32.xlu2 %v9475_v55, %s8944_s4 }
 0x1ab   : > { %7270 = vmatmul.msk.f32.gmra.mxu2 %vm391_vm1, %v9475_v55  ;;  %v9883_v59 = vpop.permute.xlu0 %1169 }
 0x1ae   : > { %v9901_v55 = vpop.permute.xlu1 %1155 }
 0x1b1   : > { %7969 = vrot.lane.b32.xlu0 %v9698_v15, %s8945_s2 }
 0x1b3   : > { %7271 = vmatmul.msk.f32.gmra.mxu2 %vm391_vm1, %v9502_v62  ;;  %v9891_v6 = vpop.permute.xlu0 %1153  ;;  %v490_v62 = vpop.permute.xlu2 %489 }
 0x1b6   : > { %v492_v10 = vpop.permute.xlu1 %491 }
 0x1b9   : > { %1047 = vrot.lane.b32.xlu0 %v9545_v61, %s8941_s8 }
 0x1bb   : > { %7272 = vmatmul.msk.f32.gmra.mxu2 %vm391_vm1, %v9538_v52  ;;  %v9899_v3 = vpop.permute.xlu0 %1833  ;;  %v9915_v28 = vpop.permute.xlu2 %1817 }
 0x1bc   : > { %13984 = vst [vmem:[#allocation80_spill] sm:$0xff] %v9915_v28 }
 0x1be   : > { %v9919_v14 = vpop.permute.xlu1 %1837 }
 0x1c1   : > { %1711 = vrot.lane.b32.xlu0 %v9409_v36, %s8942_s10  ;;  %s14065_s10 = sld [smem:[#allocation92_spill]] }
 0x1c3   : > { %7273 = vmatmul.msk.f32.gmra.mxu2 %vm391_vm1, %v9522_v33  ;;  %v9907_v15 = vpop.permute.xlu0 %1815  ;;  %v9921_v33 = vpop.permute.xlu2 %1819 }
 0x1c4   : > { %13983 = vst [vmem:[#allocation79_spill] sm:$0xff] %v9907_v15 }
 0x1c5   : > { %13985 = vst [vmem:[#allocation81_spill] sm:$0xff] %v9921_v33 }
 0x1c6   : > { %v494_v15 = vpop.permute.xlu1 %493 }
 0x1c9   : > { %7984 = vrot.lane.b32.xlu0 %v9560_v45, %s8945_s2 }
 0x1cb   : > { %7274 = vmatmul.msk.f32.gmra.mxu2 %vm391_vm1, %v9545_v61  ;;  %v9913_v52 = vpop.permute.xlu0 %1835  ;;  %v1178_v57 = vpop.permute.xlu2 %1177 }
 0x1ce   : > { %v9927_v8 = vpop.permute.xlu1 %1821 }
 0x1cf   : > { %13987 = vst [vmem:[#allocation83_spill] sm:$0xff] %v9927_v8 }
 0x1d1   : > { %1697 = vrot.lane.b32.xlu0 %v9439_v44, %s8944_s4 }
 0x1d3   : > { %v1176_v36 = vpop.permute.xlu0 %1175  ;;  %v9931_v28 = vpop.permute.xlu2 %1839 }
 0x1d6   : > { %v1180_v44 = vpop.permute.xlu1 %1179 }
 0x1d9   : > { %1699 = vrot.lane.b32.xlu0 %v9456_v50, %s8944_s4 }
 0x1db   : > { %v9925_v45 = vpop.permute.xlu0 %1157  ;;  %v9933_v43 = vpop.permute.xlu2 %1161 }
 0x1dc   : > { %13986 = vst [vmem:[#allocation82_spill] sm:$0xff] %v9925_v45 }
 0x1dd   : > { %13989 = vst [vmem:[#allocation85_spill] sm:$0xff] %v9933_v43 }
 0x1de   : > { %v9935_v23 = vpop.permute.xlu1 %1841 }
 0x1e3   : > { %v7955_v61 = vpop.permute.xlu0 %7954  ;;  %v9937_v1 = vpop.permute.xlu2 %1843 }
 0x1e4   : > { %v7956_v53 = vunpack.i.l.bf16 %v7955_v61  ;;  %v7957_v45 = vunpack.i.h.bf16 %v7955_v61  ;;  %v7941_v61 = vunpack.i.l.bf16 %v9816_v48 }
 0x1e6   : > { %v9940_v43 = vpop.permute.xlu1 %1823 }
 0x1eb   : > { %v9929_v58 = vpop.permute.xlu0 %1159 }
 0x1ec   : > { %13988 = vst [vmem:[#allocation84_spill] sm:$0xff] %v9929_v58  ;;  %v7951_v58 = vunpack.i.l.bf16 %v7950_v40 }
 0x1f3   : > { %v496_v5 = vpop.permute.xlu0 %495 }
 0x1fb   : > { %v7960_v24 = vpop.permute.xlu0 %7959 }
 0x1fc   : > { %v7961_v33 = vunpack.i.l.bf16 %v7960_v24  ;;  %v7962_v50 = vunpack.i.h.bf16 %v7960_v24  ;;  %v7947_v24 = vunpack.i.h.bf16 %v7945_v51 }
 0x1fe   : > { %994 = vmatpush.msra.mxu2 %v7961_v33 }
 0x200   : > { %995 = vmatpush.msra.mxu2 %v7962_v50  ;;  %v9943_v50 = vpop.permute.xlu2 %1045 }
 0x202   : > { %996 = vmatpush.msra.mxu2 %v7956_v53 }
 0x203   : > { %v498_v8 = vpop.permute.xlu0 %497 }
 0x204   : > { %7275 = vmatpush.xpose.msk.msra.mxu3 %vm391_vm1, %v498_v8  ;;  %997 = vmatpush.msra.mxu2 %v7957_v45  ;;  %v9949_v8 = vperm.slane %v13990_v9, 0 }
 0x206   : > { %998 = vmatpush.msra.mxu2 %v7951_v58 }
 0x208   : > { %7276 = vmatpush.xpose.msk.msra.mxu3 %vm391_vm1, %v496_v5  ;;  %999 = vmatpush.msra.mxu2 %v7952_v11  ;;  %v9952_v5 = vpop.permute.xlu1 %1163  ;;  %v9963_v58 = vpop.permute.xlu2 %1717 }
 0x20a   : > { %1000 = vmatpush.msra.mxu2 %v7946_v46 }
 0x20b   : > { %v1182_v33 = vpop.permute.xlu0 %1181 }
 0x20c   : > { %7277 = vmatpush.xpose.msk.msra.mxu3 %vm391_vm1, %v494_v15  ;;  %1001 = vmatpush.msra.mxu2 %v7947_v24 }
 0x20d   : > { %7329 = vmatpush.xpose.msk.msrb.mxu0 %vm391_vm1, %v1182_v33 }
 0x20e   : > { %v445_v40 = vpop.f32.mrf.mxu2  ;;  %1002 = vmatpush.msra.mxu2 %v7941_v61 }
 0x20f   : > { %v579_v45 = vmul.f32 0.35355338, %v445_v40 }
 0x210   : > { %7278 = vmatpush.xpose.msk.msra.mxu3 %vm391_vm1, %v492_v10  ;;  %v9969_v10 = vpop.permute.xlu1 %1715  ;;  %v9975_v53 = vpop.permute.xlu2 %1713 }
 0x211   : > { %7330 = vmatpush.xpose.msk.msrb.mxu0 %vm391_vm1, %v1180_v44  ;;  %v9956_v11 = vadd.f32 %v9949_v8, %v579_v45 }
 0x213   : > { %v9958_v15 = vpop.permute.xlu0 %1825  ;;  %v619_v51 = vsel %vm618_vm2, %v9956_v11, -inf }
 0x214   : > { %620 = vmax.xlane.f32.xlu0 %v619_v51  ;;  %7279 = vmatpush.xpose.msk.msra.mxu3 %vm391_vm1, %v490_v62 }
 0x215   : > { %7331 = vmatpush.xpose.msk.msrb.mxu0 %vm391_vm1, %v1178_v57 }
 0x218   : > { %7280 = vmatpush.xpose.msk.msra.mxu3 %vm391_vm1, %v9875_v39 }
 0x219   : > { %7332 = vmatpush.xpose.msk.msrb.mxu0 %vm391_vm1, %v1176_v36 }
 0x21b   : > { %v7965_v44 = vpop.permute.xlu0 %7964 }
 0x21c   : > { %v7966_v46 = vunpack.i.l.bf16 %v7965_v44  ;;  %7281 = vmatpush.xpose.msk.msra.mxu3 %vm391_vm1, %v9873_v35  ;;  %v7967_v62 = vunpack.i.h.bf16 %v7965_v44  ;;  %v7975_v35 = vpop.permute.xlu1 %7974 }
 0x21d   : > { %7333 = vmatpush.xpose.msk.msrb.mxu0 %vm391_vm1, %v9893_v56  ;;  %v7976_v56 = vunpack.i.l.bf16 %v7975_v35 }
 0x21e   : > { %1656 = vmatpush.msrb.mxu2 %v7966_v46 }
 0x220   : > { %7282 = vmatpush.xpose.msk.msra.mxu3 %vm391_vm1, %v9837_v7  ;;  %1657 = vmatpush.msrb.mxu2 %v7967_v62 }
 0x221   : > { %7334 = vmatpush.xpose.msk.msrb.mxu0 %vm391_vm1, %v9885_v37  ;;  %v7980_v37 = vpop.permute.xlu2 %7979 }
 0x222   : > { %v7981_v48 = vunpack.i.l.bf16 %v7980_v37 }
 0x223   : > { %v7970_v36 = vpop.permute.xlu0 %7969 }
 0x224   : > { %v7971_v39 = vunpack.i.l.bf16 %v7970_v36  ;;  %7283 = vmatpush.xpose.msk.msra.mxu3 %vm391_vm1, %v9771_v32  ;;  %v7972_v57 = vunpack.i.h.bf16 %v7970_v36  ;;  %v7977_v32 = vunpack.i.h.bf16 %v7975_v35 }
 0x225   : > { %7335 = vmatpush.xpose.msk.msrb.mxu0 %vm391_vm1, %v9883_v59 }
 0x226   : > { %1658 = vmatpush.msrb.mxu2 %v7971_v39 }
 0x227   : > { %7284 = vmatmul.msk.f32.vlgmr.msra.gmra.mxu3 %vm391_vm1, %v9575_v0 }
 0x228   : > { %7311 = vmatpush.xpose.msk.msrb.mxu3 %vm391_vm1, %v9753_v22  ;;  %1659 = vmatpush.msrb.mxu2 %v7972_v57  ;;  %v7982_v22 = vunpack.i.h.bf16 %v7980_v37 }
 0x229   : > { %7336 = vmatpush.xpose.msk.msrb.mxu0 %vm391_vm1, %v9851_v63  ;;  %v13997_v63 = vld [vmem:[#allocation85_spill] sm:$0xff]  ;;  %v1696_v35 = vpop.permute.xlu2 %1695 }
 0x22a   : > { %1660 = vmatpush.msrb.mxu2 %v7976_v56 }
 0x22b   : > { %v9993_v59 = vpop.permute.xlu0 %1047 }
 0x22c   : > { %7312 = vmatpush.xpose.msk.msrb.mxu3 %vm391_vm1, %v9803_v60  ;;  %1661 = vmatpush.msrb.mxu2 %v7977_v32  ;;  %v14009_v60 = vld [vmem:[#allocation74_spill] sm:$0xff] }
 0x22d   : > { %7337 = vmatpush.xpose.msk.msrb.mxu0 %vm391_vm1, %v9788_v49 }
 0x22e   : > { %1662 = vmatpush.msrb.mxu2 %v7981_v48 }
 0x22f   : > { %7285 = vmatmul.msk.f32.gmra.mxu3 %vm391_vm1, %v9598_v2 }
 0x230   : > { %7313 = vmatpush.xpose.msk.msrb.mxu3 %vm391_vm1, %v9765_v29  ;;  %7338 = vmatmul.msk.f32.vlgmr.msrb.gmra.mxu0 %vm391_vm1, %v9835_v4  ;;  %v14006_v29 = vld [vmem:[#allocation79_spill] sm:$0xff] }
 0x231   : > { %7383 = vmatpush.xpose.msk.msra.mxu0 %vm391_vm1, %v9937_v1  ;;  %1663 = vmatpush.msrb.mxu2 %v7982_v22  ;;  %v14001_v1 = vld [vmem:[#allocation57_spill] sm:$0xff] }
 0x233   : > { %v1712_v49 = vpop.permute.xlu0 %1711 }
 0x234   : > { %7314 = vmatpush.xpose.msk.msrb.mxu3 %vm391_vm1, %v9687_v18 }
 0x235   : > { %7384 = vmatpush.xpose.msk.msra.mxu0 %vm391_vm1, %v9935_v23 }
 0x237   : > { %7286 = vmatmul.msk.f32.gmra.mxu3 %vm391_vm1, %v9615_v38 }
 0x238   : > { %7315 = vmatpush.xpose.msk.msrb.mxu3 %vm391_vm1, %v9716_v12  ;;  %7339 = vmatmul.msk.f32.gmra.mxu0 %vm391_vm1, %v9869_v31  ;;  %v13993_v12 = vld [vmem:[#allocation82_spill] sm:$0xff] }
 0x239   : > { %7385 = vmatpush.xpose.msk.msra.mxu0 %vm391_vm1, %v9931_v28  ;;  %v14000_v28 = vld [vmem:[#allocation76_spill] sm:$0xff] }
 0x23b   : > { %v10021_v18 = vpop.permute.xlu0 %7984 }
 0x23c   : > { %7316 = vmatpush.xpose.msk.msrb.mxu3 %vm391_vm1, %v9685_v19  ;;  %v7986_v23 = vunpack.i.l.bf16 %v10021_v18  ;;  %v13995_v19 = vld [vmem:[#allocation84_spill] sm:$0xff] }
 0x23d   : > { %7386 = vmatpush.xpose.msk.msra.mxu0 %vm391_vm1, %v9919_v14  ;;  %v14004_v14 = vld [vmem:[#allocation78_spill] sm:$0xff] }
 0x23e   : > { %1664 = vmatpush.msrb.mxu2 %v7986_v23 }
 0x23f   : > { %7287 = vmatmul.msk.f32.gmra.mxu3 %vm391_vm1, %v9658_v26 }
 0x240   : > { %7317 = vmatpush.xpose.msk.msrb.mxu3 %vm391_vm1, %v9714_v54  ;;  %7340 = vmatmul.msk.f32.gmra.mxu0 %vm391_vm1, %v9825_v21  ;;  %v14003_v54 = vld [vmem:[#allocation60_spill] sm:$0xff]  ;;  %v14011_v21 = vld [vmem:[#allocation83_spill] sm:$0xff] }
 0x241   : > { %7387 = vmatpush.xpose.msk.msra.mxu0 %vm391_vm1, %v9913_v52  ;;  %v13998_v52 = vld [vmem:[#allocation62_spill] sm:$0xff] }
 0x243   : > { %v1698_v48 = vpop.permute.xlu0 %1697 }
 0x244   : > { %7318 = vmatpush.xpose.msk.msrb.mxu3 %vm391_vm1, %v9683_v20  ;;  %v1694_v20 = vpop.permute.xlu1 %1693 }
 0x245   : > { %7388 = vmatpush.xpose.msk.msra.mxu0 %vm391_vm1, %v9899_v3  ;;  %v13991_v3 = vld [vmem:[#allocation63_spill] sm:$0xff] }
 0x247   : > { %7288 = vmatmul.msk.f32.gmra.mxu3 %vm391_vm1, %v9654_v27 }
 0x248   : > { %7319 = vmatpush.xpose.msk.msrb.mxu3 %vm391_vm1, %v9648_v34  ;;  %7341 = vmatmul.msk.f32.gmra.mxu0 %vm391_vm1, %v9891_v6  ;;  %v13992_v6 = vld [vmem:[#allocation67_spill] sm:$0xff]  ;;  %v14002_v34 = vld [vmem:[#allocation77_spill] sm:$0xff] }
 0x249   : > { %7389 = vmatpush.xpose.msk.msra.mxu0 %vm391_vm1, %v9845_v42 }
 0x24c   : > { %7365 = vmatpush.xpose.msk.msra.mxu3 %vm391_vm1, %v9801_v25  ;;  %v2390_v31 = vpop.permute.xlu1 %2389  ;;  %v14008_v25 = vld [vmem:[#allocation80_spill] sm:$0xff] }
 0x24d   : > { %7390 = vmatpush.xpose.msk.msra.mxu0 %vm391_vm1, %v9807_v47  ;;  %v14010_v47 = vld [vmem:[#allocation81_spill] sm:$0xff] }
 0x24f   : > { %7289 = vmatmul.msk.f32.gmra.mxu3 %vm391_vm1, %v9694_v17 }
 0x250   : > { %7366 = vmatpush.xpose.msk.msra.mxu3 %vm391_vm1, %v9706_v16  ;;  %7342 = vmatmul.msk.f32.gmra.mxu0 %vm391_vm1, %v9901_v55  ;;  %v13994_v16 = vld [vmem:[#allocation71_spill] sm:$0xff] }
 0x251   : > { %7391 = vmatpush.xpose.msk.msra.mxu0 %vm391_vm1, %v9821_v41  ;;  %v13996_v55 = vld [vmem:[#allocation75_spill] sm:$0xff]  ;;  %v13999_v41 = vld [vmem:[#allocation61_spill] sm:$0xff] }
 0x254   : > { %7367 = vmatpush.xpose.msk.msra.mxu3 %vm391_vm1, %v9775_v30  ;;  %v14007_v30 = vld [vmem:[#allocation70_spill] sm:$0xff] }
 0x257   : > { %7290 = vmatmul.msk.f32.gmra.mxu3 %vm391_vm1, %v13992_v6 }
 0x258   : > { %7368 = vmatpush.xpose.msk.msra.mxu3 %vm391_vm1, %v9744_v13  ;;  %7343 = vmatmul.msk.f32.gmra.mxu0 %vm391_vm1, %v13993_v12  ;;  %v14005_v13 = vld [vmem:[#allocation69_spill] sm:$0xff] }
 0x25c   : > { %7369 = vmatpush.xpose.msk.msra.mxu3 %vm391_vm1, %v13991_v3 }
 0x25f   : > { %7291 = vmatmul.msk.f32.gmra.mxu3 %vm391_vm1, %v13994_v16 }
 0x260   : > { %7370 = vmatpush.xpose.msk.msra.mxu3 %vm391_vm1, %v9963_v58  ;;  %7344 = vmatmul.msk.f32.gmra.mxu0 %vm391_vm1, %v13995_v19 }
 0x264   : > { %7371 = vmatpush.xpose.msk.msra.mxu3 %vm391_vm1, %v9969_v10 }
 0x267   : > { %7292 = vmatmul.msk.f32.gmra.mxu3 %vm391_vm1, %v13996_v55 }
 0x268   : > { %7372 = vmatpush.xpose.msk.msra.mxu3 %vm391_vm1, %v9975_v53  ;;  %7345 = vmatmul.msk.f32.gmra.mxu0 %vm391_vm1, %v13997_v63 }
 0x26c   : > { %7373 = vmatpush.xpose.msk.msra.mxu3 %vm391_vm1, %v1712_v49 }
 0x26f   : > { %7320 = vmatmul.msk.f32.vlgmr.msrb.gmra.mxu3 %vm391_vm1, %v13998_v52 }
 0x270   : > { %7346 = vmatmul.msk.f32.gmra.mxu0 %vm391_vm1, %v9952_v5  ;;  %7419 = vmatpush.xpose.msk.msrb.mxu3 %vm391_vm1, %v2390_v31  ;;  %v1700_v31 = vpop.permute.xlu0 %1699 }
 0x277   : > { %7321 = vmatmul.msk.f32.gmra.mxu3 %vm391_vm1, %v13999_v41 }
 0x278   : > { %7392 = vmatmul.msk.f32.vlgmr.msra.gmra.mxu0 %vm391_vm1, %v14000_v28 }
 0x27f   : > { %7322 = vmatmul.msk.f32.gmra.mxu3 %vm391_vm1, %v14001_v1 }
 0x280   : > { %7393 = vmatmul.msk.f32.gmra.mxu0 %vm391_vm1, %v14002_v34 }
 0x287   : > { %7323 = vmatmul.msk.f32.gmra.mxu3 %vm391_vm1, %v14003_v54 }
 0x288   : > { %7394 = vmatmul.msk.f32.gmra.mxu0 %vm391_vm1, %v14004_v14 }
 0x28f   : > { %7324 = vmatmul.msk.f32.gmra.mxu3 %vm391_vm1, %v14005_v13 }
 0x290   : > { %7395 = vmatmul.msk.f32.gmra.mxu0 %vm391_vm1, %v14006_v29  ;;  %v1702_v29 = vpop.permute.xlu2 %1701 }
 0x297   : > { %7325 = vmatmul.msk.f32.gmra.mxu3 %vm391_vm1, %v14007_v30 }
 0x298   : > { %7396 = vmatmul.msk.f32.gmra.mxu0 %vm391_vm1, %v14008_v25 }
 0x29f   : > { %7326 = vmatmul.msk.f32.gmra.mxu3 %vm391_vm1, %v14009_v60 }
 0x2a0   : > { %7397 = vmatmul.msk.f32.gmra.mxu0 %vm391_vm1, %v14010_v47 }
 0x2a7   : > { %7327 = vmatmul.msk.f32.gmra.mxu3 %vm391_vm1, %v9943_v50 }
 0x2a8   : > { %7398 = vmatmul.msk.f32.gmra.mxu0 %vm391_vm1, %v14011_v21 }
 0x2aa   : > { %v552_v4 = vpop.f32.mrf.mxu3 }
 0x2ab   : > { %v588_v7 = vmul.f32 0.35355338, %v552_v4 }
 0x2ad   : > { %v1236_v42 = vpop.f32.mrf.mxu0  ;;  %v10115_v24 = vadd.f32 %v9949_v8, %v588_v7 }
 0x2ae   : > { %v1272_v33 = vmul.f32 0.35355338, %v1236_v42 }
 0x2af   : > { %7328 = vmatmul.msk.f32.gmra.mxu3 %vm391_vm1, %v9993_v59  ;;  %v646_v61 = vsel %vm618_vm2, %v10115_v24, -inf }
 0x2b0   : > { %7399 = vmatmul.msk.f32.gmra.mxu0 %vm391_vm1, %v9940_v43  ;;  %647 = vmax.xlane.f32.xlu1 %v646_v61  ;;  %v10124_v50 = vadd.f32 %v1272_v33, %v9949_v8 }
 0x2b2   : > { %v555_v40 = vpop.f32.mrf.mxu3  ;;  %v1326_v45 = vsel %vm618_vm2, %v10124_v50, -inf }
 0x2b3   : > { %v589_v5 = vmul.f32 0.35355338, %v555_v40  ;;  %1327 = vmax.xlane.f32.xlu2 %v1326_v45 }
 0x2b5   : > { %v1239_v51 = vpop.f32.mrf.mxu0  ;;  %v10129_v58 = vadd.f32 %v9949_v8, %v589_v5 }
 0x2b6   : > { %v1273_v10 = vmul.f32 0.35355338, %v1239_v51 }
 0x2b7   : > { %7374 = vmatmul.msk.f32.vlgmr.msra.gmra.mxu3 %vm391_vm1, %v1694_v20  ;;  %v649_v43 = vsel %vm618_vm2, %v10129_v58, -inf }
 0x2b8   : > { %7400 = vmatmul.msk.f32.gmra.mxu0 %vm391_vm1, %v9958_v15  ;;  %650 = vmax.xlane.f32.xlu0 %v649_v43  ;;  %v10137_v44 = vadd.f32 %v1273_v10, %v9949_v8 }
 0x2ba   : > { %v558_v46 = vpop.f32.mrf.mxu3  ;;  %v1329_v62 = vsel %vm618_vm2, %v10137_v44, -inf }
 0x2bb   : > { %v590_v53 = vmul.f32 0.35355338, %v558_v46  ;;  %1330 = vmax.xlane.f32.xlu1 %v1329_v62 }
 0x2bd   : > { %v1242_v36 = vpop.f32.mrf.mxu0  ;;  %v10142_v39 = vadd.f32 %v9949_v8, %v590_v53 }
 0x2be   : > { %v1274_v57 = vmul.f32 0.35355338, %v1242_v36 }
 0x2bf   : > { %7375 = vmatmul.msk.f32.gmra.mxu3 %vm391_vm1, %v1696_v35  ;;  %v652_v15 = vsel %vm618_vm2, %v10142_v39, -inf }
 0x2c0   : > { %653 = vmax.xlane.f32.xlu2 %v652_v15  ;;  %v10148_v56 = vadd.f32 %v1274_v57, %v9949_v8 }
 0x2c2   : > { %v561_v37 = vpop.f32.mrf.mxu3  ;;  %v1332_v32 = vsel %vm618_vm2, %v10148_v56, -inf }
 0x2c3   : > { %v591_v59 = vmul.f32 0.35355338, %v561_v37  ;;  %1333 = vmax.xlane.f32.xlu1 %v1332_v32 }
 0x2c5   : > { %v1245_v22 = vpop.f32.mrf.mxu0  ;;  %v10153_v49 = vadd.f32 %v9949_v8, %v591_v59 }
 0x2c6   : > { %v1275_v23 = vmul.f32 0.35355338, %v1245_v22 }
 0x2c7   : > { %7376 = vmatmul.msk.f32.gmra.mxu3 %vm391_vm1, %v1698_v48  ;;  %v655_v3 = vsel %vm618_vm2, %v10153_v49, -inf }
 0x2c8   : > { %656 = vmax.xlane.f32.xlu0 %v655_v3  ;;  %v10159_v12 = vadd.f32 %v1275_v23, %v9949_v8 }
 0x2ca   : > { %v564_v19 = vpop.f32.mrf.mxu3  ;;  %v1335_v20 = vsel %vm618_vm2, %v10159_v12, -inf }
 0x2cb   : > { %1336 = vmax.xlane.f32.xlu1 %v1335_v20  ;;  %v592_v28 = vmul.f32 0.35355338, %v564_v19 }
 0x2cd   : > { %v1248_v63 = vpop.f32.mrf.mxu0  ;;  %v10173_v25 = vadd.f32 %v9949_v8, %v592_v28 }
 0x2ce   : > { %v1276_v52 = vmul.f32 0.35355338, %v1248_v63 }
 0x2cf   : > { %7377 = vmatmul.msk.f32.gmra.mxu3 %vm391_vm1, %v1700_v31  ;;  %v658_v4 = vsel %vm618_vm2, %v10173_v25, -inf }
 0x2d0   : > { %v10165_v41 = vadd.f32 %v1276_v52, %v9949_v8 }
 0x2d2   : > { %v567_v1 = vpop.f32.mrf.mxu3  ;;  %v1338_v34 = vsel %vm618_vm2, %v10165_v41, -inf }
 0x2d3   : > { %v593_v54 = vmul.f32 0.35355338, %v567_v1  ;;  %1339 = vmax.xlane.f32.xlu1 %v1338_v34 }
 0x2d5   : > { %v1251_v14 = vpop.f32.mrf.mxu0  ;;  %v10170_v13 = vadd.f32 %v9949_v8, %v593_v54 }
 0x2d6   : > { %v1277_v30 = vmul.f32 0.35355338, %v1251_v14 }
 0x2d7   : > { %7378 = vmatmul.msk.f32.gmra.mxu3 %vm391_vm1, %v1702_v29  ;;  %v661_v60 = vsel %vm618_vm2, %v10170_v13, -inf }
 0x2d8   : > { %662 = vmax.xlane.f32.xlu2 %v661_v60  ;;  %v10179_v47 = vadd.f32 %v1277_v30, %v9949_v8 }
 0x2da   : > { %v570_v21 = vpop.f32.mrf.mxu3  ;;  %v1341_v7 = vsel %vm618_vm2, %v10179_v47, -inf }
 0x2db   : > { %v594_v42 = vmul.f32 0.35355338, %v570_v21  ;;  %659 = vmax.xlane.f32.xlu1 %v658_v4  ;;  %1342 = vmax.xlane.f32.xlu0 %v1341_v7 }
 0x2dd   : > { %v1254_v33 = vpop.f32.mrf.mxu0  ;;  %v10186_v40 = vadd.f32 %v9949_v8, %v594_v42 }
 0x2de   : > { %v1278_v61 = vmul.f32 0.35355338, %v1254_v33 }
 0x2df   : > { %v664_v51 = vsel %vm618_vm2, %v10186_v40, -inf }
 0x2e0   : > { %v10189_v45 = vadd.f32 %v1278_v61, %v9949_v8  ;;  %v10235_v61 = vpop.xlane.xlu0 %620 }
 0x2e2   : > { %v573_v5 = vpop.f32.mrf.mxu3  ;;  %v1344_v10 = vsel %vm618_vm2, %v10189_v45, -inf }
 0x2e3   : > { %v595_v43 = vmul.f32 0.35355338, %v573_v5  ;;  %665 = vmax.xlane.f32.xlu1 %v664_v51  ;;  %1345 = vmax.xlane.f32.xlu2 %v1344_v10 }
 0x2e5   : > { %v1257_v46 = vpop.f32.mrf.mxu0  ;;  %v10196_v53 = vadd.f32 %v9949_v8, %v595_v43 }
 0x2e6   : > { %v1279_v62 = vmul.f32 0.35355338, %v1257_v46 }
 0x2e7   : > { %v667_v57 = vsel %vm618_vm2, %v10196_v53, -inf }
 0x2e8   : > { %v10199_v36 = vadd.f32 %v1279_v62, %v9949_v8 }
 0x2ea   : > { %v576_v35 = vpop.f32.mrf.mxu3  ;;  %v1347_v15 = vsel %vm618_vm2, %v10199_v36, -inf }
 0x2eb   : > { %v596_v37 = vmul.f32 0.35355338, %v576_v35  ;;  %668 = vmax.xlane.f32.xlu2 %v667_v57  ;;  %1348 = vmax.xlane.f32.xlu1 %v1347_v15 }
 0x2ed   : > { %v1260_v32 = vpop.f32.mrf.mxu0  ;;  %v10206_v48 = vadd.f32 %v9949_v8, %v596_v37 }
 0x2ee   : > { %v1280_v59 = vmul.f32 0.35355338, %v1260_v32 }
 0x2ef   : > { %v670_v23 = vsel %vm618_vm2, %v10206_v48, -inf }
 0x2f0   : > { %v10209_v22 = vadd.f32 %v1280_v59, %v9949_v8 }
 0x2f2   : > { %v1350_v3 = vsel %vm618_vm2, %v10209_v22, -inf }
 0x2f3   : > { %671 = vmax.xlane.f32.xlu1 %v670_v23  ;;  %1351 = vmax.xlane.f32.xlu0 %v1350_v3 }
 0x2f5   : > { %v1898_v19 = vpop.f32.mrf.mxu0 }
 0x2f6   : > { %v1934_v20 = vmul.f32 0.35355338, %v1898_v19 }
 0x2f8   : > { %v10216_v63 = vadd.f32 %v1934_v20, %v9949_v8 }
 0x2fa   : > { %v1988_v31 = vsel %vm618_vm2, %v10216_v63, -inf }
 0x2fb   : > { %1989 = vmax.xlane.f32.xlu0 %v1988_v31 }
 0x2fd   : > { %v1901_v52 = vpop.f32.mrf.mxu0 }
 0x2fe   : > { %v1935_v28 = vmul.f32 0.35355338, %v1901_v52 }
 0x300   : > { %v10221_v1 = vadd.f32 %v1935_v28, %v9949_v8 }
 0x302   : > { %v1991_v34 = vsel %vm618_vm2, %v10221_v1, -inf }
 0x303   : > { %1992 = vmax.xlane.f32.xlu1 %v1991_v34 }
 0x305   : > { %v1904_v54 = vpop.f32.mrf.mxu0 }
 0x306   : > { %v1936_v14 = vmul.f32 0.35355338, %v1904_v54 }
 0x308   : > { %v10226_v29 = vadd.f32 %v1936_v14, %v9949_v8 }
 0x30a   : > { %v1994_v30 = vsel %vm618_vm2, %v10226_v29, -inf }
 0x30b   : > { %1995 = vmax.xlane.f32.xlu1 %v1994_v30 }
 0x30d   : > { %v1907_v60 = vpop.f32.mrf.mxu0 }
 0x30e   : > { %v1937_v21 = vmul.f32 0.35355338, %v1907_v60 }
 0x310   : > { %v10231_v4 = vadd.f32 %v1937_v21, %v9949_v8 }
 0x312   : > { %v1997_v7 = vsel %vm618_vm2, %v10231_v4, -inf }
 0x313   : > { %1998 = vmax.xlane.f32.xlu1 %v1997_v7 }
 0x323   : > { %v648_v42 = vpop.xlane.xlu1 %647 }
 0x324   : > { %v682_v51 = vsub.f32 %v10115_v24, %v648_v42 }
 0x326   : > { %v1328_v33 = vpop.xlane.xlu2 %1327  ;;  %v709_v43 = vmul.f32 1.442695, %v682_v51 }
 0x327   : > { %v1362_v5 = vsub.f32 %v10124_v50, %v1328_v33 }
 0x329   : > { %v1389_v10 = vmul.f32 1.442695, %v1362_v5 }
 0x32b   : > { %8122 = vpow2.f32 %v1389_v10  ;;  %v651_v62 = vpop.xlane.xlu0 %650 }
 0x32c   : > { %8124 = vpow2.f32 %v709_v43  ;;  %v683_v37 = vsub.f32 %v10129_v58, %v651_v62 }
 0x32e   : > { %v1331_v46 = vpop.xlane.xlu1 %1330  ;;  %v711_v59 = vmul.f32 1.442695, %v683_v37 }
 0x32f   : > { %v1363_v35 = vsub.f32 %v10137_v44, %v1331_v46 }
 0x331   : > { %v10240_v57 = vpop.eup %8122  ;;  %v1391_v15 = vmul.f32 1.442695, %v1363_v35 }
 0x332   : > { %v1434_v32 = vsel %vm618_vm2, %v10240_v57, 0.0  ;;  %v10246_v19 = vpop.eup %8124 }
 0x333   : > { %8126 = vpow2.f32 %v1391_v15  ;;  %1435 = vadd.xlane.f32.xlu0 %v1434_v32  ;;  %v654_v50 = vpop.xlane.xlu2 %653  ;;  %v754_v52 = vsel %vm618_vm2, %v10246_v19, 0.0 }
 0x334   : > { %v684_v24 = vsub.f32 %v10142_v39, %v654_v50 }
 0x336   : > { %v713_v23 = vmul.f32 1.442695, %v684_v24  ;;  %v1334_v3 = vpop.xlane.xlu1 %1333 }
 0x337   : > { %v1364_v44 = vsub.f32 %v10148_v56, %v1334_v3 }
 0x338   : > { %8128 = vpow2.f32 %v713_v23 }
 0x339   : > { %v10249_v20 = vpop.eup %8126  ;;  %v1393_v31 = vmul.f32 1.442695, %v1364_v44  ;;  %8130 = vpow2.f32 %v711_v59 }
 0x33a   : > { %v1437_v58 = vsel %vm618_vm2, %v10249_v20, 0.0 }
 0x33b   : > { %8132 = vpow2.f32 %v1393_v31  ;;  %1438 = vadd.xlane.f32.xlu2 %v1437_v58  ;;  %755 = vadd.xlane.f32.xlu0 %v754_v52  ;;  %v657_v39 = vpop.xlane.xlu0 %656 }
 0x33c   : > { %v685_v28 = vsub.f32 %v10153_v49, %v657_v39 }
 0x33e   : > { %v715_v34 = vmul.f32 1.442695, %v685_v28  ;;  %v1337_v54 = vpop.xlane.xlu1 %1336  ;;  %v10256_v56 = vpop.eup %8128 }
 0x33f   : > { %v1365_v14 = vsub.f32 %v10159_v12, %v1337_v54  ;;  %v10259_v30 = vpop.eup %8130  ;;  %v760_v7 = vsel %vm618_vm2, %v10256_v56, 0.0 }
 0x340   : > { %8134 = vpow2.f32 %v715_v34  ;;  %v757_v49 = vsel %vm618_vm2, %v10259_v30, 0.0 }
 0x341   : > { %v10261_v60 = vpop.eup %8132  ;;  %v1395_v21 = vmul.f32 1.442695, %v1365_v14 }
 0x342   : > { %v1440_v42 = vsel %vm618_vm2, %v10261_v60, 0.0 }
 0x343   : > { %8136 = vpow2.f32 %v1395_v21  ;;  %761 = vadd.xlane.f32.xlu2 %v760_v7  ;;  %1441 = vadd.xlane.f32.xlu1 %v1440_v42 }
 0x344   : > { %758 = vadd.xlane.f32.xlu0 %v757_v49  ;;  %v448_v49 = vpop.f32.mrf.mxu2 }
 0x346   : > { %v1340_v12 = vpop.xlane.xlu1 %1339  ;;  %v10270_v5 = vpop.eup %8134 }
 0x347   : > { %v1366_v33 = vsub.f32 %v10165_v41, %v1340_v12  ;;  %v763_v46 = vsel %vm618_vm2, %v10270_v5, 0.0 }
 0x349   : > { %v10272_v51 = vpop.eup %8136  ;;  %v1397_v10 = vmul.f32 1.442695, %v1366_v33 }
 0x34a   : > { %v1443_v43 = vsel %vm618_vm2, %v10272_v51, 0.0 }
 0x34b   : > { %8138 = vpow2.f32 %v1397_v10  ;;  %1444 = vadd.xlane.f32.xlu2 %v1443_v43  ;;  %v663_v62 = vpop.xlane.xlu2 %662  ;;  %v580_v10 = vmul.f32 0.35355338, %v448_v49 }
 0x34c   : > { %764 = vadd.xlane.f32.xlu0 %v763_v46  ;;  %v687_v35 = vsub.f32 %v10170_v13, %v663_v62  ;;  %v451_v62 = vpop.f32.mrf.mxu2 }
 0x34d   : > { %v10313_v46 = vadd.f32 %v9949_v8, %v580_v10 }
 0x34e   : > { %v719_v15 = vmul.f32 1.442695, %v687_v35  ;;  %v660_v37 = vpop.xlane.xlu1 %659  ;;  %v1343_v41 = vpop.xlane.xlu0 %1342  ;;  %v581_v35 = vmul.f32 0.35355338, %v451_v62 }
 0x34f   : > { %v686_v32 = vsub.f32 %v10173_v25, %v660_v37  ;;  %v1367_v59 = vsub.f32 %v10179_v47, %v1343_v41 }
 0x350   : > { %8140 = vpow2.f32 %v719_v15  ;;  %v622_v15 = vsel %vm618_vm2, %v10313_v46, -inf  ;;  %v10318_v37 = vadd.f32 %v9949_v8, %v581_v35 }
 0x351   : > { %v10280_v50 = vpop.eup %8138  ;;  %v717_v24 = vmul.f32 1.442695, %v686_v32  ;;  %v1399_v3 = vmul.f32 1.442695, %v1367_v59  ;;  %v14012_v32 = vld [vmem:[#allocation43_spill] sm:$0xff] }
 0x352   : > { %v1446_v23 = vsel %vm618_vm2, %v10280_v50, 0.0  ;;  %v625_v41 = vsel %vm618_vm2, %v10318_v37, -inf }
 0x353   : > { %8142 = vpow2.f32 %v717_v24  ;;  %1447 = vadd.xlane.f32.xlu1 %v1446_v23  ;;  %v14013_v24 = vld [vmem:[#allocation46_spill] sm:$0xff]  ;;  %v14014_v23 = vld [vmem:[#allocation48_spill] sm:$0xff] }
 0x354   : > { %8144 = vpow2.f32 %v1399_v3  ;;  %v454_v49 = vpop.f32.mrf.mxu2 }
 0x356   : > { %v10285_v44 = vpop.eup %8140  ;;  %v666_v13 = vpop.xlane.xlu1 %665 }
 0x357   : > { %v1346_v31 = vpop.xlane.xlu2 %1345  ;;  %v688_v58 = vsub.f32 %v10186_v40, %v666_v13  ;;  %v769_v25 = vsel %vm618_vm2, %v10285_v44, 0.0 }
 0x358   : > { %770 = vadd.xlane.f32.xlu2 %v769_v25  ;;  %v1368_v39 = vsub.f32 %v10189_v45, %v1346_v31 }
 0x359   : > { %v10290_v52 = vpop.eup %8142  ;;  %v721_v47 = vmul.f32 1.442695, %v688_v58 }
 0x35a   : > { %v766_v28 = vsel %vm618_vm2, %v10290_v52, 0.0  ;;  %v1401_v34 = vmul.f32 1.442695, %v1368_v39  ;;  %v10295_v14 = vpop.eup %8144 }
 0x35b   : > { %8146 = vpow2.f32 %v721_v47  ;;  %767 = vadd.xlane.f32.xlu1 %v766_v28  ;;  %v1449_v45 = vsel %vm618_vm2, %v10295_v14, 0.0  ;;  %v1910_v28 = vpop.f32.mrf.mxu0 }
 0x35c   : > { %8148 = vpow2.f32 %v1401_v34 }
 0x35e   : > { %v1349_v59 = vpop.xlane.xlu1 %1348 }
 0x35f   : > { %v669_v54 = vpop.xlane.xlu2 %668  ;;  %v1369_v47 = vsub.f32 %v10199_v36, %v1349_v59 }
 0x360   : > { %v689_v40 = vsub.f32 %v10196_v53, %v669_v54 }
 0x361   : > { %v10298_v21 = vpop.eup %8146  ;;  %v1403_v54 = vmul.f32 1.442695, %v1369_v47 }
 0x362   : > { %v723_v7 = vmul.f32 1.442695, %v689_v40  ;;  %v772_v42 = vsel %vm618_vm2, %v10298_v21, 0.0  ;;  %v10304_v12 = vpop.eup %8148  ;;  %v1938_v40 = vmul.f32 0.35355338, %v1910_v28 }
 0x363   : > { %773 = vadd.xlane.f32.xlu0 %v772_v42  ;;  %1450 = vadd.xlane.f32.xlu1 %v1449_v45  ;;  %v1452_v43 = vsel %vm618_vm2, %v10304_v12, 0.0  ;;  %v1913_v62 = vpop.f32.mrf.mxu0 }
 0x364   : > { %8150 = vpow2.f32 %v723_v7  ;;  %v10345_v42 = vadd.f32 %v1938_v40, %v9949_v8 }
 0x366   : > { %v672_v3 = vpop.xlane.xlu1 %671  ;;  %v10331_v31 = vpop.xlane.xlu0 %1351  ;;  %v2000_v10 = vsel %vm618_vm2, %v10345_v42, -inf }
 0x367   : > { %v690_v13 = vsub.f32 %v10206_v48, %v672_v3 }
 0x369   : > { %v725_v58 = vmul.f32 1.442695, %v690_v13 }
 0x36a   : > { %v10306_v33 = vpop.eup %8150 }
 0x36b   : > { %v775_v53 = vsel %vm618_vm2, %v10306_v33, 0.0  ;;  %1453 = vadd.xlane.f32.xlu0 %v1452_v43  ;;  %8152 = vpow2.f32 %v725_v58  ;;  %v582_v43 = vmul.f32 0.35355338, %v454_v49 }
 0x36c   : > { %776 = vadd.xlane.f32.xlu2 %v775_v53  ;;  %8154 = vpow2.f32 %v1403_v54 }
 0x36d   : > { %v10358_v59 = vadd.f32 %v9949_v8, %v582_v43 }
 0x36e   : > { %v10333_v25 = vpop.xlane.xlu0 %1989 }
 0x36f   : > { %v628_v54 = vsel %vm618_vm2, %v10358_v59, -inf }
 0x371   : > { %v10336_v39 = vpop.eup %8152 }
 0x372   : > { %v778_v7 = vsel %vm618_vm2, %v10336_v39, 0.0  ;;  %v10349_v36 = vpop.eup %8154 }
 0x373   : > { %v1455_v35 = vsel %vm618_vm2, %v10349_v36, 0.0 }
 0x374   : > { %623 = vmax.xlane.f32.xlu2 %v622_v15 }
 0x376   : > { %v10338_v34 = vpop.xlane.xlu1 %1992 }
 0x37c   : > { %626 = vmax.xlane.f32.xlu2 %v625_v41  ;;  %1703 = vrot.lane.b32.xlu1 %v14012_v32, %s8944_s4  ;;  %v1939_v41 = vmul.f32 0.35355338, %v1913_v62 }
 0x37e   : > { %v10347_v45 = vpop.xlane.xlu1 %1995  ;;  %v10364_v28 = vadd.f32 %v1939_v41, %v9949_v8 }
 0x37f   : > { %2387 = vrot.lane.b32.xlu0 %v14013_v24, %s8946_s5 }
 0x380   : > { %v2003_v40 = vsel %vm618_vm2, %v10364_v28, -inf }
 0x386   : > { %v10360_v13 = vpop.xlane.xlu1 %1998 }
 0x387   : > { %2385 = vrot.lane.b32.xlu0 %v14014_v23, %s8946_s5 }
 0x394   : > { %1705 = vrot.lane.b32.xlu2 %v14014_v23, %s8944_s4 }
 0x3a6   : > { %779 = vadd.xlane.f32.xlu1 %v778_v7  ;;  %v10342_v48 = vpop.xlane.xlu0 %1435 }
 0x3ae   : > { %2001 = vmax.xlane.f32.xlu1 %v2000_v10  ;;  %v756_v53 = vpop.xlane.xlu0 %755  ;;  %v10355_v15 = vpop.xlane.xlu2 %1438 }
 0x3af   : > { %8156 = vrcp.f32 %v756_v53 }
 0x3b1   : > { %1456 = vadd.xlane.f32.xlu0 %v1455_v35 }
 0x3b5   : > { %v8157_v3 = vpop.eup %8156 }
 0x3b6   : > { %v808_v58 = vmul.f32 %v8157_v3, %v10246_v19  ;;  %v762_v7 = vpop.xlane.xlu2 %761  ;;  %v10371_v49 = vpop.xlane.xlu1 %1441 }
 0x3b7   : > { %v759_v47 = vpop.xlane.xlu0 %758 }
 0x3b8   : > { %8158 = vrcp.f32 %v759_v47  ;;  %7302 = vmatmul.msk.f32.vlgmr.msra.gmra.mxu2 %vm618_vm2, %v808_v58  ;;  %v14015_v58 = vld [vmem:[#allocation40_spill] sm:$0xff] }
 0x3b9   : > { %629 = vmax.xlane.f32.xlu0 %v628_v54  ;;  %8160 = vrcp.f32 %v762_v7  ;;  %v14017_v7 = vld [vmem:[#allocation37_spill] sm:$0xff] }
 0x3bd   : > { %2004 = vmax.xlane.f32.xlu2 %v2003_v40 }
 0x3be   : > { %v8159_v10 = vpop.eup %8158  ;;  %v10381_v41 = vpop.xlane.xlu2 %1444 }
 0x3bf   : > { %v809_v19 = vmul.f32 %v8159_v10, %v10259_v30  ;;  %v765_v53 = vpop.xlane.xlu0 %764  ;;  %v8161_v43 = vpop.eup %8160 }
 0x3c0   : > { %8162 = vrcp.f32 %v765_v53  ;;  %v810_v35 = vmul.f32 %v8161_v43, %v10256_v56  ;;  %v14016_v56 = vld [vmem:[#allocation73_spill] sm:$0xff]  ;;  %v14018_v53 = vld [vmem:[#allocation35_spill] sm:$0xff] }
 0x3c1   : > { %7303 = vmatmul.msk.f32.gmra.mxu2 %vm618_vm2, %v809_v19 }
 0x3c6   : > { %v10375_v62 = vpop.xlane.xlu1 %1447  ;;  %v8163_v3 = vpop.eup %8162 }
 0x3c7   : > { %2383 = vrot.lane.b32.xlu1 %v14012_v32, %s8946_s5  ;;  %v811_v47 = vmul.f32 %v8163_v3, %v10270_v5 }
 0x3c9   : > { %7304 = vmatmul.msk.f32.gmra.mxu2 %vm618_vm2, %v810_v35 }
 0x3cb   : > { %v771_v54 = vpop.xlane.xlu2 %770 }
 0x3cd   : > { %1707 = vrot.lane.b32.xlu0 %v14013_v24, %s8944_s4 }
 0x3ce   : > { %v768_v30 = vpop.xlane.xlu1 %767 }
 0x3cf   : > { %8164 = vrcp.f32 %v768_v30  ;;  %2381 = vrot.lane.b32.xlu1 %v14015_v58, %s8946_s5 }
 0x3d0   : > { %8166 = vrcp.f32 %v771_v54 }
 0x3d1   : > { %7305 = vmatmul.msk.f32.gmra.mxu2 %vm618_vm2, %v811_v47 }
 0x3d5   : > { %7989 = vrot.lane.b32.xlu2 %v14016_v56, %s8947_s9  ;;  %v8165_v40 = vpop.eup %8164  ;;  %2379 = vrot.lane.b32.xlu0 %v14017_v7, %s8946_s5 }
 0x3d6   : > { %v812_v10 = vmul.f32 %v8165_v40, %v10290_v52  ;;  %v774_v19 = vpop.xlane.xlu0 %773  ;;  %v8167_v5 = vpop.eup %8166  ;;  %v1370_v52 = vsub.f32 %v10209_v22, %v10331_v31  ;;  %v2024_v31 = vsub.f32 %v10216_v63, %v10333_v25 }
 0x3d7   : > { %8168 = vrcp.f32 %v774_v19  ;;  %v813_v35 = vmul.f32 %v8167_v5, %v10285_v44  ;;  %v10399_v30 = vpop.xlane.xlu1 %1450  ;;  %v1916_v22 = vpop.f32.mrf.mxu0 }
 0x3d8   : > { %v1405_v40 = vmul.f32 1.442695, %v1370_v52 }
 0x3d9   : > { %7306 = vmatmul.msk.f32.gmra.mxu2 %vm618_vm2, %v812_v10 }
 0x3dd   : > { %2377 = vrot.lane.b32.xlu2 %v14018_v53, %s8946_s5  ;;  %v8169_v3 = vpop.eup %8168 }
 0x3de   : > { %v814_v54 = vmul.f32 %v8169_v3, %v10298_v21  ;;  %v10406_v56 = vpop.xlane.xlu0 %1453 }
 0x3df   : > { %v777_v43 = vpop.xlane.xlu2 %776 }
 0x3e0   : > { %8170 = vrcp.f32 %v777_v43  ;;  %v1940_v43 = vmul.f32 0.35355338, %v1916_v22 }
 0x3e1   : > { %7307 = vmatmul.msk.f32.gmra.mxu2 %vm618_vm2, %v813_v35  ;;  %8172 = vpow2.f32 %v1405_v40 }
 0x3e6   : > { %v8171_v10 = vpop.eup %8170 }
 0x3e7   : > { %v10401_v47 = vpop.xlane.xlu2 %623  ;;  %v815_v5 = vmul.f32 %v8171_v10, %v10306_v33  ;;  %v10415_v21 = vpop.eup %8172  ;;  %v2051_v33 = vmul.f32 1.442695, %v2024_v31  ;;  %v10423_v10 = vadd.f32 %v1940_v43, %v9949_v8  ;;  %v14019_v31 = vld [vmem:[#allocation66_spill] sm:$0xff] }
 0x3e8   : > { %v1458_v52 = vsel %vm618_vm2, %v10415_v21, 0.0 }
 0x3e9   : > { %7308 = vmatmul.msk.f32.gmra.mxu2 %vm618_vm2, %v814_v54  ;;  %v457_v54 = vpop.f32.mrf.mxu2  ;;  %8174 = vpow2.f32 %v2051_v33  ;;  %v2006_v63 = vsel %vm618_vm2, %v10423_v10, -inf }
 0x3ee   : > { %v1704_v19 = vpop.permute.xlu1 %1703 }
 0x3ef   : > { %v10409_v44 = vpop.xlane.xlu2 %626  ;;  %7379 = vmatmul.msk.f32.gmra.mxu3 %vm391_vm1, %v1704_v19  ;;  %v583_v19 = vmul.f32 0.35355338, %v457_v54  ;;  %v14022_v54 = vld [vmem:[#allocation55_spill] sm:$0xff] }
 0x3f1   : > { %v2388_v35 = vpop.permute.xlu0 %2387  ;;  %7309 = vmatmul.msk.f32.gmra.mxu2 %vm618_vm2, %v815_v5  ;;  %v10429_v25 = vadd.f32 %v9949_v8, %v583_v19  ;;  %v10431_v5 = vpop.eup %8174  ;;  %v14023_v19 = vld [vmem:[#allocation59_spill] sm:$0xff] }
 0x3f2   : > { %7420 = vmatpush.xpose.msk.msrb.mxu3 %vm391_vm1, %v2388_v35  ;;  %v2096_v22 = vsel %vm618_vm2, %v10431_v5, 0.0 }
 0x3f3   : > { %v631_v35 = vsel %vm618_vm2, %v10429_v25, -inf }
 0x3f7   : > { %v1706_v3 = vpop.permute.xlu2 %1705 }
 0x3f8   : > { %7380 = vmatmul.msk.f32.gmra.mxu3 %vm391_vm1, %v1706_v3  ;;  %v14020_v3 = vld [vmem:[#allocation50_spill] sm:$0xff] }
 0x3f9   : > { %1459 = vadd.xlane.f32.xlu1 %v1458_v52  ;;  %v2386_v40 = vpop.permute.xlu0 %2385  ;;  %v14021_v52 = vld [vmem:[#allocation33_spill] sm:$0xff] }
 0x3fa   : > { %7421 = vmatpush.xpose.msk.msrb.mxu3 %vm391_vm1, %v2386_v40 }
 0x3ff   : > { %2007 = vmax.xlane.f32.xlu0 %v2006_v63  ;;  %v14024_v63 = vld [vmem:[#allocation31_spill] sm:$0xff] }
 0x406   : > { %632 = vmax.xlane.f32.xlu2 %v631_v35 }
 0x407   : > { %2097 = vadd.xlane.f32.xlu0 %v2096_v22 }
 0x412   : > { %7994 = vrot.lane.b32.xlu1 %v14019_v31, %s8947_s9 }
 0x419   : > { %v780_v43 = vpop.xlane.xlu1 %779 }
 0x41a   : > { %8176 = vrcp.f32 %v780_v43  ;;  %1709 = vrot.lane.b32.xlu1 %v14020_v3, %s8944_s4 }
 0x41b   : > { %2375 = vrot.lane.b32.xlu0 %v14021_v52, %s8946_s5  ;;  %8178 = vrcp.f32 %v10342_v48 }
 0x41c   : > { %8180 = vrcp.f32 %v10355_v15 }
 0x41d   : > { %8182 = vrcp.f32 %v10371_v49 }
 0x41e   : > { %8004 = vrot.lane.b32.xlu2 %v14022_v54, %s8947_s9  ;;  %8184 = vrcp.f32 %v10381_v41  ;;  %v460_v41 = vpop.f32.mrf.mxu2 }
 0x420   : > { %v8177_v33 = vpop.eup %8176 }
 0x421   : > { %v816_v40 = vmul.f32 %v8177_v33, %v10336_v39  ;;  %v8179_v35 = vpop.eup %8178  ;;  %v10458_v39 = vpop.xlane.xlu1 %2001  ;;  %v2025_v33 = vsub.f32 %v10221_v1, %v10338_v34 }
 0x422   : > { %7999 = vrot.lane.b32.xlu1 %v14023_v19, %s8947_s9  ;;  %v1488_v22 = vmul.f32 %v8179_v35, %v10240_v57  ;;  %v8181_v43 = vpop.eup %8180  ;;  %v1919_v34 = vpop.f32.mrf.mxu0 }
 0x423   : > { %2373 = vrot.lane.b32.xlu0 %v14024_v63, %s8946_s5  ;;  %7310 = vmatmul.msk.f32.gmra.mxu2 %vm618_vm2, %v816_v40  ;;  %v1489_v54 = vmul.f32 %v8181_v43, %v10249_v20  ;;  %v8183_v15 = vpop.eup %8182  ;;  %v2053_v19 = vmul.f32 1.442695, %v2025_v33  ;;  %v1941_v33 = vmul.f32 0.35355338, %v1919_v34 }
 0x424   : > { %v1457_v31 = vpop.xlane.xlu0 %1456  ;;  %v1490_v49 = vmul.f32 %v8183_v15, %v10261_v60  ;;  %v8185_v1 = vpop.eup %8184  ;;  %v584_v15 = vmul.f32 0.35355338, %v460_v41 }
 0x425   : > { %8186 = vpow2.f32 %v2053_v19 }
 0x426   : > { %8188 = vrcp.f32 %v10375_v62  ;;  %v10480_v62 = vadd.f32 %v1941_v33, %v9949_v8 }
 0x427   : > { %8190 = vrcp.f32 %v10399_v30 }
 0x428   : > { %8192 = vrcp.f32 %v10406_v56 }
 0x429   : > { %8194 = vrcp.f32 %v1457_v31  ;;  %v2026_v31 = vsub.f32 %v10226_v29, %v10347_v45 }
 0x42b   : > { %7356 = vmatmul.msk.f32.vlgmr.msrb.gmra.mxu2 %vm618_vm2, %v1488_v22  ;;  %v10473_v60 = vpop.eup %8186 }
 0x42c   : > { %v10464_v40 = vpop.xlane.xlu0 %629 }
 0x430   : > { %v10455_v48 = vpop.xlane.xlu2 %2004 }
 0x433   : > { %7357 = vmatmul.msk.f32.gmra.mxu2 %vm618_vm2, %v1489_v54  ;;  %v1491_v54 = vmul.f32 %v8185_v1, %v10272_v51  ;;  %v10485_v51 = vadd.f32 %v9949_v8, %v584_v15  ;;  %v2055_v15 = vmul.f32 1.442695, %v2026_v31 }
 0x435   : > { %v634_v1 = vsel %vm618_vm2, %v10485_v51, -inf }
 0x438   : > { %v7990_v57 = vpop.permute.xlu2 %7989 }
 0x439   : > { %v7991_v35 = vunpack.i.l.bf16 %v7990_v57  ;;  %v2384_v22 = vpop.permute.xlu1 %2383  ;;  %v7992_v9 = vunpack.i.h.bf16 %v7990_v57  ;;  %v8189_v57 = vpop.eup %8188 }
 0x43a   : > { %7422 = vmatpush.xpose.msk.msrb.mxu3 %vm391_vm1, %v2384_v22  ;;  %v8191_v30 = vpop.eup %8190 }
 0x43b   : > { %2318 = vmatpush.msra.mxu2 %v7991_v35  ;;  %v1492_v35 = vmul.f32 %v8189_v57, %v10280_v50  ;;  %v8193_v50 = vpop.eup %8192 }
 0x43c   : > { %7358 = vmatmul.msk.f32.gmra.mxu2 %vm618_vm2, %v1490_v49  ;;  %v2009_v49 = vsel %vm618_vm2, %v10480_v62, -inf  ;;  %v1494_v34 = vmul.f32 %v8193_v50, %v10304_v12  ;;  %v8195_v41 = vpop.eup %8194 }
 0x43d   : > { %2319 = vmatpush.msra.mxu2 %v7992_v9  ;;  %v2099_v9 = vsel %vm618_vm2, %v10473_v60, 0.0  ;;  %v1495_v33 = vmul.f32 %v8195_v41, %v10349_v36  ;;  %v463_v36 = vpop.f32.mrf.mxu2 }
 0x43e   : > { %v585_v57 = vmul.f32 0.35355338, %v463_v36 }
 0x43f   : > { %v1708_v20 = vpop.permute.xlu0 %1707 }
 0x440   : > { %7381 = vmatmul.msk.f32.gmra.mxu3 %vm391_vm1, %v1708_v20  ;;  %v2378_v22 = vpop.permute.xlu2 %2377  ;;  %v1493_v20 = vmul.f32 %v8191_v30, %v10295_v14  ;;  %v10518_v29 = vadd.f32 %v9949_v8, %v585_v57  ;;  %v14027_v57 = vld [vmem:[#allocation38_spill] sm:$0xff] }
 0x441   : > { %v2382_v43 = vpop.permute.xlu1 %2381 }
 0x442   : > { %7423 = vmatpush.xpose.msk.msrb.mxu3 %vm391_vm1, %v2382_v43  ;;  %v14025_v43 = vld [vmem:[#allocation47_spill] sm:$0xff] }
 0x444   : > { %7359 = vmatmul.msk.f32.gmra.mxu2 %vm618_vm2, %v1491_v54  ;;  %v14026_v54 = vld [vmem:[#allocation52_spill] sm:$0xff] }
 0x447   : > { %2100 = vadd.xlane.f32.xlu2 %v2099_v9  ;;  %v2380_v19 = vpop.permute.xlu0 %2379 }
 0x448   : > { %7424 = vmatpush.xpose.msk.msrb.mxu3 %vm391_vm1, %v2380_v19 }
 0x44c   : > { %7360 = vmatmul.msk.f32.gmra.mxu2 %vm618_vm2, %v1492_v35  ;;  %2010 = vmax.xlane.f32.xlu1 %v2009_v49  ;;  %v1922_v35 = vpop.f32.mrf.mxu0 }
 0x44d   : > { %7425 = vmatpush.xpose.msk.msrb.mxu3 %vm391_vm1, %v2378_v22  ;;  %635 = vmax.xlane.f32.xlu0 %v634_v1  ;;  %v1942_v1 = vmul.f32 0.35355338, %v1922_v35  ;;  %v14028_v35 = vld [vmem:[#allocation42_spill] sm:$0xff] }
 0x44f   : > { %v10521_v30 = vadd.f32 %v1942_v1, %v9949_v8  ;;  %v466_v1 = vpop.f32.mrf.mxu2 }
 0x454   : > { %7361 = vmatmul.msk.f32.gmra.mxu2 %vm618_vm2, %v1493_v20  ;;  %v637_v20 = vsel %vm618_vm2, %v10518_v29, -inf }
 0x45c   : > { %7362 = vmatmul.msk.f32.gmra.mxu2 %vm618_vm2, %v1494_v34 }
 0x45f   : > { %8014 = vrot.lane.b32.xlu2 %v14025_v43, %s8943_s13 }
 0x461   : > { %8009 = vrot.lane.b32.xlu0 %v14026_v54, %s8947_s9  ;;  %v2012_v54 = vsel %vm618_vm2, %v10521_v30, -inf }
 0x464   : > { %7363 = vmatmul.msk.f32.gmra.mxu2 %vm618_vm2, %v1495_v33 }
 0x465   : > { %2355 = vrot.lane.b32.xlu1 %v14024_v63, %s8948_s11 }
 0x46c   : > { %v1460_v14 = vpop.xlane.xlu1 %1459 }
 0x46d   : > { %8196 = vrcp.f32 %v1460_v14 }
 0x46e   : > { %8198 = vpow2.f32 %v2055_v15 }
 0x472   : > { %v10511_v9 = vpop.xlane.xlu0 %2007 }
 0x473   : > { %v8197_v12 = vpop.eup %8196 }
 0x474   : > { %v1496_v56 = vmul.f32 %v8197_v12, %v10415_v21  ;;  %v10513_v19 = vpop.eup %8198 }
 0x475   : > { %v2102_v21 = vsel %vm618_vm2, %v10513_v19, 0.0 }
 0x476   : > { %7364 = vmatmul.msk.f32.gmra.mxu2 %vm618_vm2, %v1496_v56 }
 0x479   : > { %v10525_v50 = vpop.xlane.xlu2 %632 }
 0x47a   : > { %v2098_v22 = vpop.xlane.xlu0 %2097 }
 0x481   : > { %v8005_v56 = vpop.permute.xlu2 %8004 }
 0x482   : > { %v8006_v15 = vunpack.i.l.bf16 %v8005_v56  ;;  %v8007_v36 = vunpack.i.h.bf16 %v8005_v56 }
 0x484   : > { %v7995_v63 = vpop.permute.xlu1 %7994 }
 0x485   : > { %v7996_v49 = vunpack.i.l.bf16 %v7995_v63  ;;  %v7997_v45 = vunpack.i.h.bf16 %v7995_v63  ;;  %v2027_v63 = vsub.f32 %v10231_v4, %v10360_v13 }
 0x487   : > { %2320 = vmatpush.msra.mxu2 %v7996_v49 }
 0x488   : > { %2103 = vadd.xlane.f32.xlu2 %v2102_v21  ;;  %v2057_v21 = vmul.f32 1.442695, %v2027_v63 }
 0x489   : > { %2321 = vmatpush.msra.mxu2 %v7997_v45  ;;  %v586_v45 = vmul.f32 0.35355338, %v466_v1 }
 0x48a   : > { %8200 = vpow2.f32 %v2057_v21 }
 0x48b   : > { %638 = vmax.xlane.f32.xlu0 %v637_v20  ;;  %v673_v20 = vsub.f32 %v9956_v11, %v10235_v61 }
 0x48c   : > { %v1710_v34 = vpop.permute.xlu1 %1709 }
 0x48d   : > { %7382 = vmatmul.msk.f32.gmra.mxu3 %vm391_vm1, %v1710_v34  ;;  %v2376_v41 = vpop.permute.xlu0 %2375 }
 0x48e   : > { %7426 = vmatpush.xpose.msk.msrb.mxu3 %vm391_vm1, %v2376_v41 }
 0x48f   : > { %2013 = vmax.xlane.f32.xlu1 %v2012_v54 }
 0x490   : > { %v10542_v54 = vpop.eup %8200 }
 0x491   : > { %v2105_v13 = vsel %vm618_vm2, %v10542_v54, 0.0 }
 0x494   : > { %v8000_v33 = vpop.permute.xlu1 %7999 }
 0x495   : > { %v8001_v14 = vunpack.i.l.bf16 %v8000_v33  ;;  %v2374_v12 = vpop.permute.xlu0 %2373  ;;  %v8002_v31 = vunpack.i.h.bf16 %v8000_v33  ;;  %v469_v33 = vpop.f32.mrf.mxu2 }
 0x496   : > { %7427 = vmatpush.xpose.msk.msrb.mxu3 %vm391_vm1, %v2374_v12  ;;  %v587_v4 = vmul.f32 0.35355338, %v469_v33  ;;  %v14030_v33 = vld [vmem:[#allocation30_spill] sm:$0xff] }
 0x497   : > { %2322 = vmatpush.msra.mxu2 %v8001_v14  ;;  %v691_v14 = vmul.f32 1.442695, %v673_v20 }
 0x498   : > { %v10554_v56 = vadd.f32 %v9949_v8, %v587_v4 }
 0x499   : > { %2323 = vmatpush.msra.mxu2 %v8002_v31  ;;  %8202 = vpow2.f32 %v691_v14 }
 0x49a   : > { %8204 = vrcp.f32 %v2098_v22 }
 0x49b   : > { %2324 = vmatpush.msra.mxu2 %v8006_v15 }
 0x49d   : > { %2325 = vmatpush.msra.mxu2 %v8007_v36  ;;  %v643_v36 = vsel %vm618_vm2, %v10554_v56, -inf }
 0x49f   : > { %8019 = vrot.lane.b32.xlu0 %v14028_v35, %s8943_s13  ;;  %v10556_v31 = vpop.eup %8202 }
 0x4a0   : > { %8024 = vrot.lane.b32.xlu2 %v14027_v57, %s8943_s13  ;;  %v727_v63 = vsel %vm618_vm2, %v10556_v31, 0.0  ;;  %v8205_v1 = vpop.eup %8204 }
 0x4a1   : > { %v2150_v22 = vmul.f32 %v8205_v1, %v10431_v5  ;;  %v2028_v5 = vsub.f32 %v10345_v42, %v10458_v39  ;;  %v2030_v39 = vsub.f32 %v10423_v10, %v10511_v9  ;;  %v1120_v1 = vpop.f32.mrf.mxu3  ;;  %v2029_v10 = vsub.f32 %v10364_v28, %v10455_v48 }
 0x4a8   : > { %2357 = vrot.lane.b32.xlu1 %v14021_v52, %s8948_s11  ;;  %v10545_v52 = vadd.f32 %v9949_v8, %v586_v45 }
 0x4aa   : > { %v640_v11 = vsel %vm618_vm2, %v10545_v52, -inf }
 0x4ba   : > { %v2101_v49 = vpop.xlane.xlu2 %2100 }
 0x4bb   : > { %8206 = vrcp.f32 %v2101_v49 }
 0x4bf   : > { %v10558_v15 = vpop.xlane.xlu1 %2010 }
 0x4c0   : > { %v10551_v61 = vpop.xlane.xlu0 %635 }
 0x4c2   : > { %v8015_v34 = vpop.permute.xlu2 %8014 }
 0x4c3   : > { %v8016_v41 = vunpack.i.l.bf16 %v8015_v34  ;;  %v8017_v12 = vunpack.i.h.bf16 %v8015_v34  ;;  %v8207_v34 = vpop.eup %8206 }
 0x4c4   : > { %v2151_v49 = vmul.f32 %v8207_v34, %v10473_v60  ;;  %v1263_v34 = vmul.f32 0.35355338, %v1120_v1 }
 0x4c5   : > { %888 = vmatpush.msrb.mxu1 %v8016_v41  ;;  %v14029_v41 = vld [vmem:[#allocation32_spill] sm:$0xff] }
 0x4c6   : > { %v10572_v14 = vpack.i.bf16 %v14030_v33, %v14029_v41  ;;  %v10615_v28 = vadd.f32 %v1263_v34, %v9949_v8 }
 0x4c7   : > { %889 = vmatpush.msrb.mxu1 %v8017_v12  ;;  %v2059_v12 = vmul.f32 1.442695, %v2028_v5 }
 0x4c9   : > { %2106 = vadd.xlane.f32.xlu2 %v2105_v13  ;;  %641 = vmax.xlane.f32.xlu0 %v640_v11  ;;  %v675_v13 = vsub.f32 %v10318_v37, %v10409_v44  ;;  %v2063_v44 = vmul.f32 1.442695, %v2030_v39 }
 0x4d1   : > { %644 = vmax.xlane.f32.xlu2 %v643_v36 }
 0x4d2   : > { %728 = vadd.xlane.f32.xlu1 %v727_v63  ;;  %v695_v63 = vmul.f32 1.442695, %v675_v13  ;;  %v2061_v13 = vmul.f32 1.442695, %v2029_v10 }
 0x4d3   : > { %v10564_v21 = vpop.permute.xlu0 %8009 }
 0x4d4   : > { %v8011_v45 = vunpack.i.l.bf16 %v10564_v21 }
 0x4d6   : > { %2326 = vmatpush.msra.mxu2 %v8011_v45 }
 0x4d7   : > { %v2356_v20 = vpop.permute.xlu1 %2355  ;;  %7410 = vmatmul.msk.f32.vlgmr.msra.gmra.mxu2 %vm618_vm2, %v2150_v22 }
 0x4d8   : > { %7428 = vmatmul.msk.f32.vlgmr.msrb.gmra.mxu3 %vm391_vm1, %v2356_v20 }
 0x4dd   : > { %8029 = vrot.lane.b32.xlu0 %v10572_v14, %s8943_s13  ;;  %s3289_s13 = scalar_lea.vmem %s14065_s10, %s9323_s1  ;;  %s14096_s10 = sld [smem:[#allocation97_spill]] }
 0x4df   : > { %7411 = vmatmul.msk.f32.gmra.mxu2 %vm618_vm2, %v2151_v49 }
 0x4e9   : > { %2361 = vrot.lane.b32.xlu2 %v14017_v7, %s8948_s11  ;;  %v674_v7 = vsub.f32 %v10313_v46, %v10401_v47 }
 0x4eb   : > { %2359 = vrot.lane.b32.xlu1 %v14018_v53, %s8948_s11  ;;  %v693_v53 = vmul.f32 1.442695, %v674_v7  ;;  %v676_v7 = vsub.f32 %v10358_v59, %v10464_v40 }
 0x4fb   : > { %v2104_v4 = vpop.xlane.xlu2 %2103 }
 0x4fc   : > { %8208 = vrcp.f32 %v2104_v4 }
 0x4fd   : > { %8210 = vpow2.f32 %v2059_v12 }
 0x4fe   : > { %8212 = vpow2.f32 %v695_v63  ;;  %v10596_v37 = vpop.xlane.xlu0 %638  ;;  %v1299_v63 = vsel %vm618_vm2, %v10615_v28, -inf }
 0x4ff   : > { %8214 = vpow2.f32 %v693_v53 }
 0x500   : > { %8216 = vpow2.f32 %v2063_v44 }
 0x501   : > { %8218 = vpow2.f32 %v2061_v13 }
 0x502   : > { %v8209_v11 = vpop.eup %8208  ;;  %v10604_v22 = vpop.xlane.xlu1 %2013 }
 0x503   : > { %v2152_v60 = vmul.f32 %v8209_v11, %v10513_v19  ;;  %v10587_v36 = vpop.eup %8210  ;;  %v8025_v9 = vpop.permute.xlu2 %8024 }
 0x504   : > { %v2108_v42 = vsel %vm618_vm2, %v10587_v36, 0.0  ;;  %v10598_v19 = vpop.eup %8212  ;;  %v8026_v4 = vunpack.i.l.bf16 %v8025_v9 }
 0x505   : > { %7412 = vmatmul.msk.f32.gmra.mxu2 %vm618_vm2, %v2152_v60  ;;  %v733_v46 = vsel %vm618_vm2, %v10598_v19, 0.0  ;;  %v10602_v47 = vpop.eup %8214  ;;  %v8027_v60 = vunpack.i.h.bf16 %v8025_v9 }
 0x506   : > { %v730_v49 = vsel %vm618_vm2, %v10602_v47, 0.0  ;;  %v10610_v12 = vpop.eup %8216 }
 0x507   : > { %2109 = vadd.xlane.f32.xlu0 %v2108_v42  ;;  %v2114_v11 = vsel %vm618_vm2, %v10610_v12, 0.0  ;;  %v697_v42 = vmul.f32 1.442695, %v676_v7  ;;  %v10624_v53 = vpop.eup %8218 }
 0x508   : > { %v2111_v39 = vsel %vm618_vm2, %v10624_v53, 0.0 }
 0x509   : > { %8220 = vpow2.f32 %v697_v42 }
 0x50f   : > { %v10628_v44 = vpop.eup %8220 }
 0x510   : > { %v736_v59 = vsel %vm618_vm2, %v10628_v44, 0.0 }
 0x511   : > { %v8020_v45 = vpop.permute.xlu0 %8019 }
 0x512   : > { %734 = vadd.xlane.f32.xlu2 %v733_v46  ;;  %v8021_v20 = vunpack.i.l.bf16 %v8020_v45  ;;  %v8022_v5 = vunpack.i.h.bf16 %v8020_v45 }
 0x514   : > { %890 = vmatpush.msrb.mxu1 %v8021_v20 }
 0x515   : > { %731 = vadd.xlane.f32.xlu1 %v730_v49 }
 0x516   : > { %891 = vmatpush.msrb.mxu1 %v8022_v5 }
 0x518   : > { %892 = vmatpush.msrb.mxu1 %v8026_v4 }
 0x51a   : > { %2115 = vadd.xlane.f32.xlu2 %v2114_v11  ;;  %v2358_v48 = vpop.permute.xlu1 %2357  ;;  %893 = vmatpush.msrb.mxu1 %v8027_v60  ;;  %v2031_v11 = vsub.f32 %v10480_v62, %v10558_v15 }
 0x51b   : > { %2363 = vrot.lane.b32.xlu0 %v14015_v58, %s8948_s11  ;;  %7429 = vmatmul.msk.f32.gmra.mxu3 %vm391_vm1, %v2358_v48  ;;  %v1123_v58 = vpop.f32.mrf.mxu3 }
 0x51c   : > { %v1264_v46 = vmul.f32 0.35355338, %v1123_v58  ;;  %v2065_v42 = vmul.f32 1.442695, %v2031_v11 }
 0x51d   : > { %1300 = vmax.xlane.f32.xlu1 %v1299_v63  ;;  %v7987_v63 = vunpack.i.h.bf16 %v10021_v18 }
 0x51e   : > { %v10637_v1 = vadd.f32 %v1264_v46, %v9949_v8 }
 0x520   : > { %v1302_v34 = vsel %vm618_vm2, %v10637_v1, -inf }
 0x523   : > { %v1126_v45 = vpop.f32.mrf.mxu3 }
 0x524   : > { %v1265_v9 = vmul.f32 0.35355338, %v1126_v45 }
 0x525   : > { %2112 = vadd.xlane.f32.xlu1 %v2111_v39 }
 0x526   : > { %v10648_v5 = vadd.f32 %v1265_v9, %v9949_v8 }
 0x52d   : > { %737 = vadd.xlane.f32.xlu1 %v736_v59 }
 0x532   : > { %2365 = vrot.lane.b32.xlu2 %v14012_v32, %s8948_s11 }
 0x53a   : > { %2501 = vrot.lane.b32.xlu2 %v13992_v6, %s8946_s5 }
 0x53c   : > { %v2107_v40 = vpop.xlane.xlu2 %2106  ;;  %v10645_v32 = vpop.xlane.xlu0 %641 }
 0x53d   : > { %8222 = vrcp.f32 %v2107_v40 }
 0x543   : > { %v8223_v20 = vpop.eup %8222 }
 0x544   : > { %v2153_v10 = vmul.f32 %v8223_v20, %v10542_v54  ;;  %v1305_v54 = vsel %vm618_vm2, %v10648_v5, -inf  ;;  %v10659_v39 = vpop.xlane.xlu2 %644 }
 0x545   : > { %1303 = vmax.xlane.f32.xlu0 %v1302_v34  ;;  %v729_v49 = vpop.xlane.xlu1 %728 }
 0x546   : > { %7413 = vmatmul.msk.f32.gmra.mxu2 %vm618_vm2, %v2153_v10  ;;  %2505 = vrot.lane.b32.xlu1 %v13996_v55, %s8946_s5  ;;  %8224 = vrcp.f32 %v729_v49 }
 0x547   : > { %8226 = vpow2.f32 %v2065_v42 }
 0x54c   : > { %v8225_v13 = vpop.eup %8224  ;;  %v2362_v18 = vpop.permute.xlu2 %2361 }
 0x54d   : > { %1306 = vmax.xlane.f32.xlu0 %v1305_v54  ;;  %v799_v7 = vmul.f32 %v8225_v13, %v10556_v31  ;;  %v10661_v58 = vpop.eup %8226  ;;  %v677_v31 = vsub.f32 %v10429_v25, %v10525_v50 }
 0x54e   : > { %2503 = vrot.lane.b32.xlu1 %v13994_v16, %s8946_s5  ;;  %v2117_v62 = vsel %vm618_vm2, %v10661_v58, 0.0 }
 0x54f   : > { %v8030_v4 = vpop.permute.xlu0 %8029  ;;  %v699_v15 = vmul.f32 1.442695, %v677_v31 }
 0x550   : > { %v8031_v60 = vunpack.i.l.bf16 %v8030_v4  ;;  %v8032_v48 = vunpack.i.h.bf16 %v8030_v4 }
 0x551   : > { %8228 = vpow2.f32 %v699_v15  ;;  %v679_v15 = vsub.f32 %v10518_v29, %v10596_v37 }
 0x552   : > { %894 = vmatpush.msrb.mxu1 %v8031_v60 }
 0x554   : > { %895 = vmatpush.msrb.mxu1 %v8032_v48 }
 0x555   : > { %7293 = vmatmul.msk.f32.vlgmr.msrb.gmra.mxu1 %vm618_vm2, %v799_v7 }
 0x556   : > { %1558 = vmatpush.msra.mxu1 %v7987_v63 }
 0x557   : > { %v10671_v40 = vpop.eup %8228 }
 0x558   : > { %v739_v46 = vsel %vm618_vm2, %v10671_v40, 0.0 }
 0x55d   : > { %v2360_v59 = vpop.permute.xlu1 %2359 }
 0x55e   : > { %7430 = vmatmul.msk.f32.gmra.mxu3 %vm391_vm1, %v2360_v59 }
 0x561   : > { %2367 = vrot.lane.b32.xlu0 %v14014_v23, %s8948_s11  ;;  %v678_v23 = vsub.f32 %v10485_v51, %v10551_v61 }
 0x563   : > { %2118 = vadd.xlane.f32.xlu2 %v2117_v62  ;;  %v701_v20 = vmul.f32 1.442695, %v678_v23  ;;  %v703_v23 = vmul.f32 1.442695, %v679_v15 }
 0x566   : > { %7431 = vmatmul.msk.f32.gmra.mxu3 %vm391_vm1, %v2362_v18 }
 0x578   : > { %740 = vadd.xlane.f32.xlu1 %v739_v46 }
 0x57a   : > { %v2110_v45 = vpop.xlane.xlu0 %2109 }
 0x57b   : > { %2497 = vrot.lane.b32.xlu2 %v9654_v27, %s8946_s5  ;;  %8230 = vrcp.f32 %v2110_v45 }
 0x57c   : > { %8232 = vpow2.f32 %v701_v20  ;;  %v680_v20 = vsub.f32 %v10545_v52, %v10645_v32 }
 0x581   : > { %v8231_v25 = vpop.eup %8230 }
 0x582   : > { %v2154_v50 = vmul.f32 %v8231_v25, %v10587_v36  ;;  %v10681_v9 = vpop.eup %8232  ;;  %v2032_v36 = vsub.f32 %v10521_v30, %v10604_v22 }
 0x583   : > { %v742_v51 = vsel %vm618_vm2, %v10681_v9, 0.0 }
 0x584   : > { %7414 = vmatmul.msk.f32.gmra.mxu2 %vm618_vm2, %v2154_v50  ;;  %v2067_v11 = vmul.f32 1.442695, %v2032_v36 }
 0x585   : > { %v735_v10 = vpop.xlane.xlu2 %734 }
 0x588   : > { %v732_v34 = vpop.xlane.xlu1 %731 }
 0x589   : > { %8234 = vrcp.f32 %v732_v34 }
 0x58a   : > { %8236 = vrcp.f32 %v735_v10 }
 0x58b   : > { %743 = vadd.xlane.f32.xlu0 %v742_v51  ;;  %8238 = vpow2.f32 %v2067_v11  ;;  %v705_v51 = vmul.f32 1.442695, %v680_v20 }
 0x58d   : > { %v2116_v61 = vpop.xlane.xlu2 %2115  ;;  %v2364_v49 = vpop.permute.xlu0 %2363 }
 0x58e   : > { %7432 = vmatmul.msk.f32.gmra.mxu3 %vm391_vm1, %v2364_v49 }
 0x58f   : > { %v8235_v54 = vpop.eup %8234 }
 0x590   : > { %v10688_v4 = vpop.xlane.xlu1 %1300  ;;  %v800_v13 = vmul.f32 %v8235_v54, %v10602_v47  ;;  %v8237_v48 = vpop.eup %8236 }
 0x591   : > { %2499 = vrot.lane.b32.xlu1 %v9694_v17, %s8946_s5  ;;  %v801_v63 = vmul.f32 %v8237_v48, %v10598_v19  ;;  %v10697_v30 = vpop.eup %8238 }
 0x592   : > { %7294 = vmatmul.msk.f32.gmra.mxu1 %vm618_vm2, %v800_v13  ;;  %v2120_v59 = vsel %vm618_vm2, %v10697_v30, 0.0 }
 0x595   : > { %v2366_v60 = vpop.permute.xlu2 %2365 }
 0x596   : > { %7433 = vmatmul.msk.f32.gmra.mxu3 %vm391_vm1, %v2366_v60 }
 0x598   : > { %v2113_v7 = vpop.xlane.xlu1 %2112 }
 0x599   : > { %8240 = vrcp.f32 %v2113_v7 }
 0x59a   : > { %7295 = vmatmul.msk.f32.gmra.mxu1 %vm618_vm2, %v801_v63  ;;  %8242 = vrcp.f32 %v2116_v61 }
 0x59d   : > { %v2502_v34 = vpop.permute.xlu2 %2501 }
 0x59f   : > { %v8241_v47 = vpop.eup %8240  ;;  %2369 = vrot.lane.b32.xlu0 %v14013_v24, %s8948_s11  ;;  %v10709_v24 = vpop.f32.mrf.mxu2 }
 0x5a0   : > { %v738_v22 = vpop.xlane.xlu1 %737  ;;  %v2155_v42 = vmul.f32 %v8241_v47, %v10624_v53  ;;  %v8243_v19 = vpop.eup %8242  ;;  %14031 = vst [vmem:[#allocation63_spill] sm:$0xff] %v10709_v24 }
 0x5a1   : > { %8244 = vrcp.f32 %v738_v22  ;;  %v2156_v31 = vmul.f32 %v8243_v19, %v10610_v12  ;;  %v1129_v53 = vpop.f32.mrf.mxu3 }
 0x5a2   : > { %7415 = vmatmul.msk.f32.gmra.mxu2 %vm618_vm2, %v2155_v42  ;;  %v1266_v46 = vmul.f32 0.35355338, %v1129_v53  ;;  %8246 = vpow2.f32 %v703_v23  ;;  %v681_v42 = vsub.f32 %v10554_v56, %v10659_v39 }
 0x5a3   : > { %8248 = vpow2.f32 %v705_v51 }
 0x5a4   : > { %2121 = vadd.xlane.f32.xlu2 %v2120_v59  ;;  %v10718_v45 = vadd.f32 %v1266_v46, %v9949_v8  ;;  %v707_v19 = vmul.f32 1.442695, %v681_v42 }
 0x5a7   : > { %v8245_v62 = vpop.eup %8244  ;;  %2495 = vrot.lane.b32.xlu0 %v9658_v26, %s8946_s5  ;;  %v10764_v22 = vpop.f32.mrf.mxu2 }
 0x5a8   : > { %v802_v18 = vmul.f32 %v8245_v62, %v10628_v44  ;;  %v1308_v44 = vsel %vm618_vm2, %v10718_v45, -inf  ;;  %v10728_v29 = vpop.eup %8246  ;;  %14032 = vst [vmem:[#allocation67_spill] sm:$0xff] %v10764_v22 }
 0x5a9   : > { %v1132_v37 = vpop.f32.mrf.mxu3  ;;  %v745_v10 = vsel %vm618_vm2, %v10728_v29, 0.0  ;;  %v10753_v49 = vpop.eup %8248 }
 0x5aa   : > { %7296 = vmatmul.msk.f32.gmra.mxu1 %vm618_vm2, %v802_v18  ;;  %7416 = vmatmul.msk.f32.gmra.mxu2 %vm618_vm2, %v2156_v31  ;;  %v1267_v50 = vmul.f32 0.35355338, %v1132_v37  ;;  %v748_v13 = vsel %vm618_vm2, %v10753_v49, 0.0 }
 0x5ac   : > { %v10745_v52 = vadd.f32 %v1267_v50, %v9949_v8  ;;  %v1353_v50 = vsub.f32 %v10615_v28, %v10688_v4 }
 0x5ae   : > { %v1311_v32 = vsel %vm618_vm2, %v10745_v52, -inf }
 0x5af   : > { %2493 = vrot.lane.b32.xlu0 %v9615_v38, %s8946_s5  ;;  %v10811_v51 = vpop.f32.mrf.mxu2 }
 0x5b0   : > { %14033 = vst [vmem:[#allocation82_spill] sm:$0xff] %v10811_v51 }
 0x5b1   : > { %v1135_v54 = vpop.f32.mrf.mxu3 }
 0x5b2   : > { %v1268_v36 = vmul.f32 0.35355338, %v1135_v54 }
 0x5b7   : > { %2371 = vrot.lane.b32.xlu0 %v14020_v3, %s8948_s11 }
 0x5b8   : > { %v2506_v12 = vpop.permute.xlu1 %2505  ;;  %v10734_v25 = vpop.xlane.xlu0 %1303 }
 0x5b9   : > { %7437 = vmatpush.xpose.msk.msrb.mxu0 %vm391_vm1, %v2506_v12  ;;  %7670 = vmatpush.xpose.msk.msrb.mxu2 %vm391_vm1, %v2506_v12  ;;  %v1138_v47 = vpop.f32.mrf.mxu3  ;;  %v1354_v54 = vsub.f32 %v10637_v1, %v10734_v25 }
 0x5ba   : > { %v1269_v59 = vmul.f32 0.35355338, %v1138_v47 }
 0x5bb   : > { %1309 = vmax.xlane.f32.xlu1 %v1308_v44 }
 0x5bc   : > { %2491 = vrot.lane.b32.xlu2 %v9598_v2, %s8946_s5  ;;  %v10770_v62 = vadd.f32 %v1269_v59, %v9949_v8 }
 0x5bf   : > { %2489 = vrot.lane.b32.xlu0 %v9575_v0, %s8946_s5  ;;  %s14090_s5 = sld [smem:[#allocation95_spill]] }
 0x5c0   : > { %v2504_v3 = vpop.permute.xlu1 %2503  ;;  %v10751_v61 = vpop.xlane.xlu0 %1306 }
 0x5c1   : > { %7438 = vmatpush.xpose.msk.msrb.mxu0 %vm391_vm1, %v2504_v3  ;;  %7671 = vmatpush.xpose.msk.msrb.mxu2 %vm391_vm1, %v2504_v3  ;;  %v1141_v18 = vpop.f32.mrf.mxu3 }
 0x5c2   : > { %v1270_v31 = vmul.f32 0.35355338, %v1141_v18 }
 0x5c3   : > { %746 = vadd.xlane.f32.xlu1 %v745_v10 }
 0x5c4   : > { %8034 = vrot.lane.b32.xlu2 %v14025_v43, %s8945_s2  ;;  %v10777_v56 = vadd.f32 %v1270_v31, %v9949_v8 }
 0x5c5   : > { %7439 = vmatpush.xpose.msk.msrb.mxu0 %vm391_vm1, %v2502_v34  ;;  %7672 = vmatpush.xpose.msk.msrb.mxu2 %vm391_vm1, %v2502_v34 }
 0x5c6   : > { %v1320_v23 = vsel %vm618_vm2, %v10777_v56, -inf }
 0x5c7   : > { %2471 = vrot.lane.b32.xlu0 %v9575_v0, %s8948_s11  ;;  %v10759_v0 = vadd.f32 %v1268_v36, %v9949_v8 }
 0x5c9   : > { %v1314_v48 = vsel %vm618_vm2, %v10759_v0, -inf  ;;  %v1144_v28 = vpop.f32.mrf.mxu3 }
 0x5ca   : > { %v1271_v1 = vmul.f32 0.35355338, %v1144_v28 }
 0x5cb   : > { %1312 = vmax.xlane.f32.xlu1 %v1311_v32  ;;  %v1371_v32 = vmul.f32 1.442695, %v1353_v50 }
 0x5cc   : > { %v10829_v18 = vadd.f32 %v1271_v1, %v9949_v8  ;;  %v10881_v1 = vpop.f32.mrf.mxu2 }
 0x5cd   : > { %14034 = vst [vmem:[#allocation71_spill] sm:$0xff] %v10881_v1 }
 0x5ce   : > { %v1323_v31 = vsel %vm618_vm2, %v10829_v18, -inf }
 0x5d1   : > { %v1782_v42 = vpop.f32.mrf.mxu3 }
 0x5d3   : > { %749 = vadd.xlane.f32.xlu1 %v748_v13  ;;  %v2368_v11 = vpop.permute.xlu0 %2367 }
 0x5d4   : > { %7434 = vmatmul.msk.f32.gmra.mxu3 %vm391_vm1, %v2368_v11 }
 0x5d6   : > { %v2119_v60 = vpop.xlane.xlu2 %2118 }
 0x5d7   : > { %8250 = vrcp.f32 %v2119_v60 }
 0x5d8   : > { %8252 = vpow2.f32 %v707_v19 }
 0x5db   : > { %1315 = vmax.xlane.f32.xlu1 %v1314_v48  ;;  %v1355_v48 = vsub.f32 %v10648_v5, %v10751_v61  ;;  %v1925_v61 = vmul.f32 0.35355338, %v1782_v42  ;;  %v10886_v42 = vpop.f32.mrf.mxu2 }
 0x5dc   : > { %14035 = vst [vmem:[#allocation84_spill] sm:$0xff] %v10886_v42  ;;  %v14060_v42 = vld [vmem:[#allocation53_spill] sm:$0xff] }
 0x5dd   : > { %v8251_v7 = vpop.eup %8250  ;;  %v1375_v47 = vmul.f32 1.442695, %v1355_v48 }
 0x5de   : > { %v2157_v63 = vmul.f32 %v8251_v7, %v10661_v58  ;;  %v1317_v58 = vsel %vm618_vm2, %v10770_v62, -inf  ;;  %v10774_v15 = vpop.eup %8252 }
 0x5df   : > { %v751_v39 = vsel %vm618_vm2, %v10774_v15, 0.0 }
 0x5e0   : > { %7417 = vmatmul.msk.f32.gmra.mxu2 %vm618_vm2, %v2157_v63 }
 0x5eb   : > { %v741_v53 = vpop.xlane.xlu1 %740 }
 0x5ec   : > { %8254 = vrcp.f32 %v741_v53 }
 0x5ed   : > { %1318 = vmax.xlane.f32.xlu2 %v1317_v58  ;;  %v10840_v58 = vadd.f32 %v1925_v61, %v9949_v8 }
 0x5f1   : > { %752 = vadd.xlane.f32.xlu0 %v751_v39 }
 0x5f2   : > { %v8255_v46 = vpop.eup %8254 }
 0x5f3   : > { %v803_v12 = vmul.f32 %v8255_v46, %v10671_v40  ;;  %v2498_v40 = vpop.permute.xlu2 %2497 }
 0x5f4   : > { %2473 = vrot.lane.b32.xlu1 %v9598_v2, %s8948_s11 }
 0x5f5   : > { %1321 = vmax.xlane.f32.xlu2 %v1320_v23  ;;  %7297 = vmatmul.msk.f32.gmra.mxu1 %vm618_vm2, %v803_v12  ;;  %v1785_v12 = vpop.f32.mrf.mxu3 }
 0x5fc   : > { %2475 = vrot.lane.b32.xlu1 %v9615_v38, %s8948_s11 }
 0x5fe   : > { %v744_v44 = vpop.xlane.xlu0 %743 }
 0x5ff   : > { %8256 = vrcp.f32 %v744_v44  ;;  %v1961_v44 = vsel %vm618_vm2, %v10840_v58, -inf }
 0x603   : > { %v2500_v37 = vpop.permute.xlu1 %2499 }
 0x604   : > { %7440 = vmatpush.xpose.msk.msrb.mxu0 %vm391_vm1, %v2500_v37  ;;  %8039 = vrot.lane.b32.xlu1 %v14028_v35, %s8945_s2 }
 0x605   : > { %v8257_v3 = vpop.eup %8256  ;;  %7673 = vmatpush.xpose.msk.msrb.mxu2 %vm391_vm1, %v2500_v37  ;;  %8044 = vrot.lane.b32.xlu0 %v14027_v57, %s8945_s2 }
 0x606   : > { %v804_v2 = vmul.f32 %v8257_v3, %v10681_v9 }
 0x608   : > { %7298 = vmatmul.msk.f32.gmra.mxu1 %vm618_vm2, %v804_v2  ;;  %7441 = vmatpush.xpose.msk.msrb.mxu0 %vm391_vm1, %v2498_v40  ;;  %v1926_v2 = vmul.f32 0.35355338, %v1785_v12 }
 0x609   : > { %7674 = vmatpush.xpose.msk.msrb.mxu2 %vm391_vm1, %v2498_v40 }
 0x60d   : > { %2477 = vrot.lane.b32.xlu2 %v9658_v26, %s8948_s11  ;;  %8049 = vrot.lane.b32.xlu0 %v10572_v14, %s8945_s2 }
 0x611   : > { %v2370_v38 = vpop.permute.xlu0 %2369 }
 0x612   : > { %7435 = vmatmul.msk.f32.gmra.mxu3 %vm391_vm1, %v2370_v38 }
 0x615   : > { %2479 = vrot.lane.b32.xlu2 %v9654_v27, %s8948_s11 }
 0x617   : > { %v2122_v9 = vpop.xlane.xlu2 %2121 }
 0x618   : > { %8258 = vrcp.f32 %v2122_v9 }
 0x619   : > { %v2496_v20 = vpop.permute.xlu0 %2495  ;;  %8260 = vpow2.f32 %v1371_v32 }
 0x61a   : > { %7442 = vmatpush.xpose.msk.msrb.mxu0 %vm391_vm1, %v2496_v20  ;;  %7675 = vmatpush.xpose.msk.msrb.mxu2 %vm391_vm1, %v2496_v20 }
 0x61e   : > { %v8259_v26 = vpop.eup %8258 }
 0x61f   : > { %v2492_v10 = vpop.permute.xlu2 %2491  ;;  %v2158_v34 = vmul.f32 %v8259_v26, %v10697_v30  ;;  %v1373_v30 = vmul.f32 1.442695, %v1354_v54  ;;  %v10820_v60 = vpop.eup %8260  ;;  %v10857_v26 = vadd.f32 %v1926_v2, %v9949_v8 }
 0x620   : > { %v1407_v25 = vsel %vm618_vm2, %v10820_v60, 0.0 }
 0x621   : > { %7418 = vmatmul.msk.f32.gmra.mxu2 %vm618_vm2, %v2158_v34  ;;  %v2494_v27 = vpop.permute.xlu0 %2493  ;;  %8262 = vpow2.f32 %v1373_v30  ;;  %v1964_v34 = vsel %vm618_vm2, %v10857_v26, -inf }
 0x622   : > { %7443 = vmatpush.xpose.msk.msrb.mxu0 %vm391_vm1, %v2494_v27  ;;  %7676 = vmatpush.xpose.msk.msrb.mxu2 %vm391_vm1, %v2494_v27  ;;  %8264 = vpow2.f32 %v1375_v47 }
 0x626   : > { %7444 = vmatpush.xpose.msk.msrb.mxu0 %vm391_vm1, %v2492_v10  ;;  %7677 = vmatpush.xpose.msk.msrb.mxu2 %vm391_vm1, %v2492_v10 }
 0x627   : > { %v8035_v36 = vpop.permute.xlu2 %8034  ;;  %v10833_v5 = vpop.eup %8262 }
 0x628   : > { %v8036_v4 = vunpack.i.l.bf16 %v8035_v36  ;;  %v8037_v13 = vunpack.i.h.bf16 %v8035_v36  ;;  %v1410_v53 = vsel %vm618_vm2, %v10833_v5, 0.0  ;;  %v10842_v46 = vpop.eup %8264 }
 0x629   : > { %v2372_v11 = vpop.permute.xlu0 %2371  ;;  %v1413_v3 = vsel %vm618_vm2, %v10842_v46, 0.0 }
 0x62a   : > { %1559 = vmatpush.msra.mxu1 %v8036_v4  ;;  %7436 = vmatmul.msk.f32.gmra.mxu3 %vm391_vm1, %v2372_v11 }
 0x62c   : > { %1560 = vmatpush.msra.mxu1 %v8037_v13 }
 0x62e   : > { %v1310_v7 = vpop.xlane.xlu1 %1309  ;;  %1408 = vadd.xlane.f32.xlu1 %v1407_v25 }
 0x62f   : > { %v1356_v63 = vsub.f32 %v10718_v45, %v1310_v7 }
 0x631   : > { %v1377_v59 = vmul.f32 1.442695, %v1356_v63  ;;  %v2490_v19 = vpop.permute.xlu0 %2489 }
 0x632   : > { %7445 = vmatpush.xpose.msk.msrb.mxu0 %vm391_vm1, %v2490_v19  ;;  %7678 = vmatpush.xpose.msk.msrb.mxu2 %vm391_vm1, %v2490_v19 }
 0x633   : > { %8266 = vpow2.f32 %v1377_v59 }
 0x636   : > { %v747_v45 = vpop.xlane.xlu1 %746  ;;  %1324 = vmax.xlane.f32.xlu1 %v1323_v31 }
 0x637   : > { %8268 = vrcp.f32 %v747_v45  ;;  %1411 = vadd.xlane.f32.xlu0 %v1410_v53  ;;  %v10892_v53 = vpop.f32.mrf.mxu2 }
 0x638   : > { %14036 = vst [vmem:[#allocation75_spill] sm:$0xff] %v10892_v53  ;;  %v14059_v53 = vld [vmem:[#allocation51_spill] sm:$0xff] }
 0x639   : > { %v2472_v39 = vpop.permute.xlu0 %2471  ;;  %v10845_v23 = vpop.eup %8266  ;;  %v14061_v1 = vpack.i.bf16 %v14059_v53, %v14060_v42 }
 0x63a   : > { %7446 = vmatmul.msk.f32.vlgmr.msrb.gmra.mxu0 %vm391_vm1, %v2472_v39  ;;  %v1416_v38 = vsel %vm618_vm2, %v10845_v23, 0.0 }
 0x63d   : > { %v8269_v37 = vpop.eup %8268 }
 0x63e   : > { %1962 = vmax.xlane.f32.xlu2 %v1961_v44  ;;  %v1313_v40 = vpop.xlane.xlu1 %1312  ;;  %1414 = vadd.xlane.f32.xlu1 %v1413_v3  ;;  %v805_v9 = vmul.f32 %v8269_v37, %v10728_v29  ;;  %v1788_v29 = vpop.f32.mrf.mxu3 }
 0x63f   : > { %v1357_v20 = vsub.f32 %v10745_v52, %v1313_v40  ;;  %1417 = vadd.xlane.f32.xlu0 %v1416_v38 }
 0x640   : > { %7299 = vmatmul.msk.f32.gmra.mxu1 %vm618_vm2, %v805_v9 }
 0x641   : > { %v1379_v50 = vmul.f32 1.442695, %v1357_v20  ;;  %v10901_v20 = vpop.f32.mrf.mxu2 }
 0x642   : > { %14037 = vst [vmem:[#allocation85_spill] sm:$0xff] %v10901_v20 }
 0x643   : > { %8270 = vpow2.f32 %v1379_v50  ;;  %v1927_v50 = vmul.f32 0.35355338, %v1788_v29 }
 0x646   : > { %v750_v10 = vpop.xlane.xlu1 %749  ;;  %v1791_v30 = vpop.f32.mrf.mxu3 }
 0x647   : > { %8272 = vrcp.f32 %v750_v10  ;;  %1965 = vmax.xlane.f32.xlu0 %v1964_v34  ;;  %v1928_v11 = vmul.f32 0.35355338, %v1791_v30 }
 0x649   : > { %v10861_v32 = vpop.eup %8270 }
 0x64a   : > { %v1419_v52 = vsel %vm618_vm2, %v10861_v32, 0.0 }
 0x64d   : > { %v8273_v27 = vpop.eup %8272 }
 0x64e   : > { %v1316_v54 = vpop.xlane.xlu1 %1315  ;;  %v806_v36 = vmul.f32 %v8273_v27, %v10753_v49  ;;  %v1794_v7 = vpop.f32.mrf.mxu3 }
 0x64f   : > { %v1358_v28 = vsub.f32 %v10759_v0, %v1316_v54  ;;  %1420 = vadd.xlane.f32.xlu0 %v1419_v52  ;;  %v10877_v0 = vadd.f32 %v1928_v11, %v9949_v8  ;;  %v8012_v54 = vunpack.i.h.bf16 %v10564_v21  ;;  %v10909_v52 = vadd.f32 %v1927_v50, %v9949_v8 }
 0x650   : > { %7300 = vmatmul.msk.f32.gmra.mxu1 %vm618_vm2, %v806_v36 }
 0x651   : > { %v1381_v4 = vmul.f32 1.442695, %v1358_v28  ;;  %v1929_v28 = vmul.f32 0.35355338, %v1794_v7  ;;  %v1967_v29 = vsel %vm618_vm2, %v10909_v52, -inf }
 0x653   : > { %8274 = vpow2.f32 %v1381_v4  ;;  %v10916_v4 = vadd.f32 %v1929_v28, %v9949_v8 }
 0x655   : > { %v1973_v11 = vsel %vm618_vm2, %v10916_v4, -inf }
 0x656   : > { %2485 = vrot.lane.b32.xlu2 %v13994_v16, %s8948_s11  ;;  %v1970_v16 = vsel %vm618_vm2, %v10877_v0, -inf  ;;  %v1797_v61 = vpop.f32.mrf.mxu3 }
 0x657   : > { %2481 = vrot.lane.b32.xlu1 %v9694_v17, %s8948_s11  ;;  %v1930_v21 = vmul.f32 0.35355338, %v1797_v61 }
 0x659   : > { %v10872_v13 = vpop.eup %8274 }
 0x65a   : > { %v1422_v49 = vsel %vm618_vm2, %v10872_v13, 0.0 }
 0x65b   : > { %1423 = vadd.xlane.f32.xlu0 %v1422_v49 }
 0x65e   : > { %v1800_v37 = vpop.f32.mrf.mxu3 }
 0x65f   : > { %2483 = vrot.lane.b32.xlu1 %v13992_v6, %s8948_s11  ;;  %v1931_v2 = vmul.f32 0.35355338, %v1800_v37 }
 0x660   : > { %v1319_v48 = vpop.xlane.xlu2 %1318 }
 0x661   : > { %v1359_v59 = vsub.f32 %v10770_v62, %v1319_v48  ;;  %v10905_v34 = vadd.f32 %v1931_v2, %v9949_v8  ;;  %v10922_v48 = vadd.f32 %v1930_v21, %v9949_v8 }
 0x663   : > { %1971 = vmax.xlane.f32.xlu0 %v1970_v16  ;;  %v1383_v31 = vmul.f32 1.442695, %v1359_v59  ;;  %v1979_v36 = vsel %vm618_vm2, %v10905_v34, -inf  ;;  %v1976_v16 = vsel %vm618_vm2, %v10922_v48, -inf }
 0x664   : > { %v753_v17 = vpop.xlane.xlu0 %752 }
 0x665   : > { %8276 = vrcp.f32 %v753_v17 }
 0x666   : > { %v2474_v25 = vpop.permute.xlu1 %2473  ;;  %8278 = vpow2.f32 %v1383_v31  ;;  %v1803_v7 = vpop.f32.mrf.mxu3 }
 0x667   : > { %7447 = vmatmul.msk.f32.vlgmr.msrb.gmra.mxu2 %vm391_vm1, %v2474_v25 }
 0x668   : > { %v1322_v63 = vpop.xlane.xlu2 %1321 }
 0x669   : > { %v1360_v30 = vsub.f32 %v10777_v56, %v1322_v63 }
 0x66b   : > { %v8277_v47 = vpop.eup %8276  ;;  %v1385_v49 = vmul.f32 1.442695, %v1360_v30 }
 0x66c   : > { %v807_v6 = vmul.f32 %v8277_v47, %v10774_v15  ;;  %v10897_v15 = vpop.eup %8278 }
 0x66d   : > { %v1425_v38 = vsel %vm618_vm2, %v10897_v15, 0.0  ;;  %8280 = vpow2.f32 %v1385_v49  ;;  %v10960_v49 = vpop.f32.mrf.mxu2 }
 0x66e   : > { %v2476_v19 = vpop.permute.xlu1 %2475  ;;  %7301 = vmatmul.msk.f32.gmra.mxu1 %vm618_vm2, %v807_v6  ;;  %v1806_v61 = vpop.f32.mrf.mxu3  ;;  %14038 = vst [vmem:[#allocation62_spill] sm:$0xff] %v10960_v49 }
 0x66f   : > { %7448 = vmatmul.msk.f32.gmra.mxu2 %vm391_vm1, %v2476_v19 }
 0x670   : > { %v2478_v45 = vpop.permute.xlu2 %2477 }
 0x673   : > { %v10926_v17 = vpop.eup %8280 }
 0x674   : > { %v1428_v56 = vsel %vm618_vm2, %v10926_v17, 0.0 }
 0x676   : > { %v8040_v39 = vpop.permute.xlu1 %8039 }
 0x677   : > { %v8041_v12 = vunpack.i.l.bf16 %v8040_v39  ;;  %2487 = vrot.lane.b32.xlu0 %v13996_v55, %s8948_s11  ;;  %v8045_v44 = vpop.permute.xlu0 %8044  ;;  %7449 = vmatmul.msk.f32.gmra.mxu2 %vm391_vm1, %v2478_v45  ;;  %v8042_v62 = vunpack.i.h.bf16 %v8040_v39 }
 0x678   : > { %v8046_v3 = vunpack.i.l.bf16 %v8045_v44  ;;  %v8047_v40 = vunpack.i.h.bf16 %v8045_v44  ;;  %v2480_v9 = vpop.permute.xlu2 %2479 }
 0x679   : > { %1561 = vmatpush.msra.mxu1 %v8041_v12 }
 0x67b   : > { %1562 = vmatpush.msra.mxu1 %v8042_v62 }
 0x67d   : > { %1563 = vmatpush.msra.mxu1 %v8046_v3 }
 0x67f   : > { %1426 = vadd.xlane.f32.xlu2 %v1425_v38  ;;  %v8050_v55 = vpop.permute.xlu0 %8049  ;;  %1564 = vmatpush.msra.mxu1 %v8047_v40 }
 0x680   : > { %7450 = vmatmul.msk.f32.gmra.mxu2 %vm391_vm1, %v2480_v9  ;;  %v8051_v10 = vunpack.i.l.bf16 %v8050_v55  ;;  %v8052_v27 = vunpack.i.h.bf16 %v8050_v55  ;;  %v1932_v55 = vmul.f32 0.35355338, %v1803_v7 }
 0x682   : > { %1565 = vmatpush.msra.mxu1 %v8051_v10 }
 0x684   : > { %1566 = vmatpush.msra.mxu1 %v8052_v27 }
 0x686   : > { %2220 = vmatpush.msrb.mxu1 %v8012_v54  ;;  %v10950_v54 = vadd.f32 %v1932_v55, %v9949_v8 }
 0x687   : > { %1980 = vmax.xlane.f32.xlu2 %v1979_v36 }
 0x689   : > { %1968 = vmax.xlane.f32.xlu1 %v1967_v29  ;;  %v1933_v29 = vmul.f32 0.35355338, %v1806_v61 }
 0x691   : > { %1974 = vmax.xlane.f32.xlu1 %v1973_v11 }
 0x699   : > { %1977 = vmax.xlane.f32.xlu1 %v1976_v16 }
 0x69f   : > { %8059 = vrot.lane.b32.xlu2 %v14028_v35, %s8947_s9 }
 0x6a1   : > { %v1409_v25 = vpop.xlane.xlu1 %1408  ;;  %1429 = vadd.xlane.f32.xlu0 %v1428_v56 }
 0x6a2   : > { %8282 = vrcp.f32 %v1409_v25 }
 0x6a8   : > { %v8283_v63 = vpop.eup %8282 }
 0x6a9   : > { %v1479_v47 = vmul.f32 %v8283_v63, %v10820_v60  ;;  %v1325_v59 = vpop.xlane.xlu1 %1324  ;;  %v2444_v60 = vpop.f32.mrf.mxu3 }
 0x6aa   : > { %v1361_v6 = vsub.f32 %v10829_v18, %v1325_v59  ;;  %v1412_v19 = vpop.xlane.xlu0 %1411  ;;  %v2587_v63 = vmul.f32 0.35355338, %v2444_v60 }
 0x6ab   : > { %8284 = vrcp.f32 %v1412_v19  ;;  %7347 = vmatmul.msk.f32.vlgmr.msra.gmra.mxu1 %vm618_vm2, %v1479_v47 }
 0x6ac   : > { %v1387_v31 = vmul.f32 1.442695, %v1361_v6  ;;  %v10980_v19 = vadd.f32 %v2587_v63, %v9949_v8 }
 0x6ae   : > { %8286 = vpow2.f32 %v1387_v31  ;;  %v2623_v31 = vsel %vm618_vm2, %v10980_v19, -inf }
 0x6b1   : > { %v1963_v35 = vpop.xlane.xlu2 %1962  ;;  %v8285_v45 = vpop.eup %8284 }
 0x6b2   : > { %v2015_v39 = vsub.f32 %v10840_v58, %v1963_v35  ;;  %v1415_v12 = vpop.xlane.xlu1 %1414  ;;  %v1418_v44 = vpop.xlane.xlu0 %1417  ;;  %v1480_v62 = vmul.f32 %v8285_v45, %v10833_v5 }
 0x6b3   : > { %8288 = vrcp.f32 %v1415_v12  ;;  %v2447_v9 = vpop.f32.mrf.mxu3 }
 0x6b4   : > { %v2033_v37 = vmul.f32 1.442695, %v2015_v39  ;;  %v10937_v3 = vpop.eup %8286  ;;  %7348 = vmatmul.msk.f32.gmra.mxu1 %vm618_vm2, %v1480_v62 }
 0x6b5   : > { %v1431_v18 = vsel %vm618_vm2, %v10937_v3, 0.0 }
 0x6b6   : > { %8290 = vpow2.f32 %v2033_v37  ;;  %1432 = vadd.xlane.f32.xlu1 %v1431_v18 }
 0x6b7   : > { %8292 = vrcp.f32 %v1418_v44 }
 0x6b9   : > { %v8289_v2 = vpop.eup %8288 }
 0x6ba   : > { %v1481_v58 = vmul.f32 %v8289_v2, %v10842_v46  ;;  %v1966_v40 = vpop.xlane.xlu0 %1965 }
 0x6bb   : > { %v2016_v5 = vsub.f32 %v10857_v26, %v1966_v40  ;;  %v2450_v28 = vpop.f32.mrf.mxu3  ;;  %v1982_v26 = vsel %vm618_vm2, %v10950_v54, -inf }
 0x6bc   : > { %v10943_v38 = vpop.eup %8290  ;;  %7349 = vmatmul.msk.f32.gmra.mxu1 %vm618_vm2, %v1481_v58  ;;  %v2589_v21 = vmul.f32 0.35355338, %v2450_v28 }
 0x6bd   : > { %v2069_v50 = vsel %vm618_vm2, %v10943_v38, 0.0  ;;  %v2035_v10 = vmul.f32 1.442695, %v2016_v5  ;;  %v8293_v27 = vpop.eup %8292 }
 0x6be   : > { %2070 = vadd.xlane.f32.xlu0 %v2069_v50  ;;  %v1482_v36 = vmul.f32 %v8293_v27, %v10845_v23  ;;  %v10963_v23 = vadd.f32 %v1933_v29, %v9949_v8  ;;  %v10968_v7 = vadd.f32 %v2589_v21, %v9949_v8 }
 0x6bf   : > { %8294 = vpow2.f32 %v2035_v10 }
 0x6c0   : > { %v1985_v47 = vsel %vm618_vm2, %v10963_v23, -inf  ;;  %v2629_v6 = vsel %vm618_vm2, %v10968_v7, -inf }
 0x6c2   : > { %v1421_v46 = vpop.xlane.xlu0 %1420 }
 0x6c3   : > { %8296 = vrcp.f32 %v1421_v46  ;;  %v2453_v58 = vpop.f32.mrf.mxu3 }
 0x6c4   : > { %7350 = vmatmul.msk.f32.gmra.mxu1 %vm618_vm2, %v1482_v36 }
 0x6c5   : > { %v10956_v30 = vpop.eup %8294 }
 0x6c6   : > { %1983 = vmax.xlane.f32.xlu0 %v1982_v26  ;;  %v2072_v11 = vsel %vm618_vm2, %v10956_v30, 0.0 }
 0x6c8   : > { %2073 = vadd.xlane.f32.xlu2 %v2072_v11 }
 0x6c9   : > { %v8297_v16 = vpop.eup %8296  ;;  %v2482_v56 = vpop.permute.xlu1 %2481 }
 0x6ca   : > { %7451 = vmatmul.msk.f32.gmra.mxu2 %vm391_vm1, %v2482_v56  ;;  %v1483_v25 = vmul.f32 %v8297_v16, %v10861_v32  ;;  %v10977_v32 = vpop.f32.mrf.mxu2 }
 0x6cb   : > { %14039 = vst [vmem:[#allocation61_spill] sm:$0xff] %v10977_v32  ;;  %v2456_v55 = vpop.f32.mrf.mxu3 }
 0x6cc   : > { %7351 = vmatmul.msk.f32.gmra.mxu1 %vm618_vm2, %v1483_v25 }
 0x6ce   : > { %1986 = vmax.xlane.f32.xlu0 %v1985_v47  ;;  %v1424_v59 = vpop.xlane.xlu0 %1423 }
 0x6cf   : > { %8298 = vrcp.f32 %v1424_v59  ;;  %8054 = vrot.lane.b32.xlu1 %v14025_v43, %s8947_s9  ;;  %v2486_v43 = vpop.permute.xlu2 %2485 }
 0x6d0   : > { %2630 = vmax.xlane.f32.xlu2 %v2629_v6 }
 0x6d1   : > { %v2484_v61 = vpop.permute.xlu1 %2483 }
 0x6d2   : > { %7452 = vmatmul.msk.f32.gmra.mxu2 %vm391_vm1, %v2484_v61  ;;  %v10990_v62 = vpop.f32.mrf.mxu2 }
 0x6d3   : > { %v2459_v21 = vpop.f32.mrf.mxu3 }
 0x6d4   : > { %v2592_v56 = vmul.f32 0.35355338, %v2459_v21 }
 0x6d5   : > { %v8299_v35 = vpop.eup %8298 }
 0x6d6   : > { %2624 = vmax.xlane.f32.xlu0 %v2623_v31  ;;  %v1972_v45 = vpop.xlane.xlu0 %1971  ;;  %v1484_v39 = vmul.f32 %v8299_v35, %v10872_v13  ;;  %v2588_v13 = vmul.f32 0.35355338, %v2447_v9  ;;  %v11027_v59 = vadd.f32 %v2592_v56, %v9949_v8 }
 0x6d7   : > { %v2018_v12 = vsub.f32 %v10877_v0, %v1972_v45  ;;  %8064 = vrot.lane.b32.xlu1 %v14027_v57, %s8947_s9 }
 0x6d8   : > { %7352 = vmatmul.msk.f32.gmra.mxu1 %vm618_vm2, %v1484_v39  ;;  %v11002_v37 = vadd.f32 %v2588_v13, %v9949_v8  ;;  %v2638_v39 = vsel %vm618_vm2, %v11027_v59, -inf }
 0x6d9   : > { %v2039_v44 = vmul.f32 1.442695, %v2018_v12 }
 0x6da   : > { %7453 = vmatmul.msk.f32.gmra.mxu2 %vm391_vm1, %v2486_v43  ;;  %v10999_v57 = vpop.f32.mrf.mxu2  ;;  %v2626_v2 = vsel %vm618_vm2, %v11002_v37, -inf }
 0x6db   : > { %8300 = vpow2.f32 %v2039_v44  ;;  %v2462_v6 = vpop.f32.mrf.mxu3 }
 0x6dc   : > { %v2593_v35 = vmul.f32 0.35355338, %v2462_v6 }
 0x6df   : > { %8069 = vrot.lane.b32.xlu1 %v10572_v14, %s8947_s9  ;;  %s3886_s9 = scalar_lea.vmem %s14090_s5, %s9323_s1  ;;  %s7491_s1 = sshll.u32 %s8909_s0, 1 }
 0x6e1   : > { %v10995_v60 = vpop.eup %8300 }
 0x6e2   : > { %v2078_v0 = vsel %vm618_vm2, %v10995_v60, 0.0  ;;  %v11007_v14 = vpop.f32.mrf.mxu2 }
 0x6e3   : > { %2079 = vadd.xlane.f32.xlu0 %v2078_v0  ;;  %v11044_v0 = vadd.f32 %v2593_v35, %v9949_v8 }
 0x6e9   : > { %v2488_v18 = vpop.permute.xlu0 %2487 }
 0x6ea   : > { %7454 = vmatmul.msk.f32.gmra.mxu2 %vm391_vm1, %v2488_v18  ;;  %v11009_v5 = vpop.f32.mrf.mxu2  ;;  %v2641_v18 = vsel %vm618_vm2, %v11044_v0, -inf }
 0x6eb   : > { %2627 = vmax.xlane.f32.xlu0 %v2626_v2 }
 0x6f2   : > { %v1427_v40 = vpop.xlane.xlu2 %1426  ;;  %v11015_v26 = vpop.f32.mrf.mxu2 }
 0x6f3   : > { %8302 = vrcp.f32 %v1427_v40  ;;  %v2591_v40 = vmul.f32 0.35355338, %v2456_v55 }
 0x6f9   : > { %v8303_v9 = vpop.eup %8302 }
 0x6fa   : > { %v1981_v50 = vpop.xlane.xlu2 %1980  ;;  %v1485_v10 = vmul.f32 %v8303_v9, %v10897_v15  ;;  %v11029_v61 = vpop.f32.mrf.mxu2 }
 0x6fb   : > { %v2021_v27 = vsub.f32 %v10905_v34, %v1981_v50 }
 0x6fc   : > { %7353 = vmatmul.msk.f32.gmra.mxu1 %vm618_vm2, %v1485_v10  ;;  %v1969_v36 = vpop.xlane.xlu1 %1968  ;;  %v11055_v10 = vadd.f32 %v2591_v40, %v9949_v8 }
 0x6fd   : > { %v2045_v46 = vmul.f32 1.442695, %v2021_v27  ;;  %v2017_v28 = vsub.f32 %v10909_v52, %v1969_v36  ;;  %v2590_v52 = vmul.f32 0.35355338, %v2453_v58 }
 0x6fe   : > { %v2635_v36 = vsel %vm618_vm2, %v11055_v10, -inf }
 0x6ff   : > { %8304 = vpow2.f32 %v2045_v46  ;;  %v2037_v29 = vmul.f32 1.442695, %v2017_v28 }
 0x701   : > { %8306 = vpow2.f32 %v2037_v29 }
 0x702   : > { %v11048_v2 = vpop.f32.mrf.mxu2 }
 0x704   : > { %v1975_v16 = vpop.xlane.xlu1 %1974 }
 0x705   : > { %v11017_v11 = vpop.eup %8304  ;;  %v2019_v15 = vsub.f32 %v10916_v4, %v1975_v16  ;;  %v11032_v4 = vadd.f32 %v2590_v52, %v9949_v8 }
 0x706   : > { %v2087_v34 = vsel %vm618_vm2, %v11017_v11, 0.0 }
 0x707   : > { %2088 = vadd.xlane.f32.xlu2 %v2087_v34  ;;  %v11022_v25 = vpop.eup %8306  ;;  %v2041_v63 = vmul.f32 1.442695, %v2019_v15  ;;  %v2632_v44 = vsel %vm618_vm2, %v11032_v4, -inf }
 0x708   : > { %v2075_v47 = vsel %vm618_vm2, %v11022_v25, 0.0 }
 0x709   : > { %8308 = vpow2.f32 %v2041_v63  ;;  %2076 = vadd.xlane.f32.xlu1 %v2075_v47 }
 0x70a   : > { %v11059_v46 = vpop.f32.mrf.mxu2 }
 0x70c   : > { %v1978_v31 = vpop.xlane.xlu1 %1977 }
 0x70d   : > { %v2020_v45 = vsub.f32 %v10922_v48, %v1978_v31 }
 0x70f   : > { %2639 = vmax.xlane.f32.xlu2 %v2638_v39  ;;  %v11037_v12 = vpop.eup %8308  ;;  %v2043_v43 = vmul.f32 1.442695, %v2020_v45  ;;  %v8060_v39 = vpop.permute.xlu2 %8059 }
 0x710   : > { %v2081_v13 = vsel %vm618_vm2, %v11037_v12, 0.0 }
 0x711   : > { %8310 = vpow2.f32 %v2043_v43  ;;  %2633 = vmax.xlane.f32.xlu1 %v2632_v44  ;;  %2082 = vadd.xlane.f32.xlu0 %v2081_v13  ;;  %v8061_v44 = vunpack.i.l.bf16 %v8060_v39  ;;  %v8062_v13 = vunpack.i.h.bf16 %v8060_v39 }
 0x712   : > { %v11063_v28 = vpop.f32.mrf.mxu2 }
 0x714   : > { %v1430_v48 = vpop.xlane.xlu0 %1429 }
 0x715   : > { %8312 = vrcp.f32 %v1430_v48 }
 0x717   : > { %2642 = vmax.xlane.f32.xlu2 %v2641_v18  ;;  %v11050_v58 = vpop.eup %8310 }
 0x718   : > { %v2084_v9 = vsel %vm618_vm2, %v11050_v58, 0.0 }
 0x719   : > { %2085 = vadd.xlane.f32.xlu0 %v2084_v9 }
 0x71a   : > { %v11065_v21 = vpop.f32.mrf.mxu2 }
 0x71b   : > { %v8313_v50 = vpop.eup %8312 }
 0x71c   : > { %v1486_v27 = vmul.f32 %v8313_v50, %v10926_v17 }
 0x71e   : > { %7354 = vmatmul.msk.f32.gmra.mxu1 %vm618_vm2, %v1486_v27 }
 0x721   : > { %2636 = vmax.xlane.f32.xlu0 %v2635_v36 }
 0x722   : > { %v11070_v34 = vpop.f32.mrf.mxu2 }
 0x729   : > { %v1433_v55 = vpop.xlane.xlu1 %1432 }
 0x72a   : > { %8314 = vrcp.f32 %v1433_v55  ;;  %v11073_v31 = vpop.f32.mrf.mxu2 }
 0x730   : > { %v8315_v29 = vpop.eup %8314 }
 0x731   : > { %v2071_v16 = vpop.xlane.xlu0 %2070  ;;  %v1487_v56 = vmul.f32 %v8315_v29, %v10937_v3 }
 0x732   : > { %v11080_v40 = vpop.f32.mrf.mxu2 }
 0x733   : > { %7355 = vmatmul.msk.f32.gmra.mxu1 %vm618_vm2, %v1487_v56 }
 0x739   : > { %v1984_v17 = vpop.xlane.xlu0 %1983 }
 0x73a   : > { %v2022_v15 = vsub.f32 %v10950_v54, %v1984_v17  ;;  %v11086_v17 = vpop.f32.mrf.mxu2 }
 0x73b   : > { %v2074_v29 = vpop.xlane.xlu2 %2073 }
 0x73c   : > { %v2047_v63 = vmul.f32 1.442695, %v2022_v15 }
 0x73e   : > { %8316 = vpow2.f32 %v2047_v63 }
 0x741   : > { %v1987_v52 = vpop.xlane.xlu0 %1986  ;;  %v8055_v6 = vpop.permute.xlu1 %8054 }
 0x742   : > { %v2023_v47 = vsub.f32 %v10963_v23, %v1987_v52  ;;  %v8056_v35 = vunpack.i.l.bf16 %v8055_v6  ;;  %v8057_v43 = vunpack.i.h.bf16 %v8055_v6 }
 0x744   : > { %v11075_v45 = vpop.eup %8316  ;;  %v2049_v3 = vmul.f32 1.442695, %v2023_v47  ;;  %2221 = vmatpush.msrb.mxu1 %v8056_v35  ;;  %v11094_v35 = vpop.f32.mrf.mxu2 }
 0x745   : > { %v2090_v54 = vsel %vm618_vm2, %v11075_v45, 0.0 }
 0x746   : > { %8318 = vpow2.f32 %v2049_v3  ;;  %2091 = vadd.xlane.f32.xlu1 %v2090_v54  ;;  %2222 = vmatpush.msrb.mxu1 %v8057_v43  ;;  %v14040_v3 = vld [vmem:[#allocation45_spill] sm:$0xff] }
 0x747   : > { %8320 = vrcp.f32 %v2071_v16  ;;  %v14041_v43 = vld [vmem:[#allocation49_spill] sm:$0xff] }
 0x748   : > { %2223 = vmatpush.msrb.mxu1 %v8061_v44  ;;  %v14042_v54 = vpack.i.bf16 %v14040_v3, %v14041_v43  ;;  %v14043_v44 = vld [vmem:[#allocation41_spill] sm:$0xff] }
 0x749   : > { %v2625_v48 = vpop.xlane.xlu0 %2624  ;;  %v8065_v18 = vpop.permute.xlu1 %8064 }
 0x74a   : > { %v2677_v23 = vsub.f32 %v10980_v19, %v2625_v48  ;;  %v8066_v9 = vunpack.i.l.bf16 %v8065_v18  ;;  %2224 = vmatpush.msrb.mxu1 %v8062_v13  ;;  %v8067_v36 = vunpack.i.h.bf16 %v8065_v18 }
 0x74c   : > { %v11082_v50 = vpop.eup %8318  ;;  %v2695_v27 = vmul.f32 1.442695, %v2677_v23  ;;  %2225 = vmatpush.msrb.mxu1 %v8066_v9  ;;  %v11106_v48 = vpop.f32.mrf.mxu2  ;;  %v14046_v23 = vld [vmem:[#allocation34_spill] sm:$0xff]  ;;  %v14048_v9 = vld [vmem:[#allocation36_spill] sm:$0xff] }
 0x74d   : > { %v2093_v55 = vsel %vm618_vm2, %v11082_v50, 0.0  ;;  %v8321_v19 = vpop.eup %8320  ;;  %v14047_v18 = vpack.i.bf16 %v14029_v41, %v14046_v23  ;;  %v2631_v41 = vpop.xlane.xlu2 %2630 }
 0x74e   : > { %8322 = vpow2.f32 %v2695_v27  ;;  %2094 = vadd.xlane.f32.xlu0 %v2093_v55  ;;  %2226 = vmatpush.msrb.mxu1 %v8067_v36  ;;  %v2141_v47 = vmul.f32 %v8321_v19, %v10943_v38  ;;  %v14044_v38 = vld [vmem:[#allocation44_spill] sm:$0xff]  ;;  %v14049_v27 = vld [vmem:[#allocation39_spill] sm:$0xff]  ;;  %v2560_v23 = vpop.f32.mrf.mxu0 }
 0x74f   : > { %8324 = vrcp.f32 %v2074_v29  ;;  %v14045_v13 = vpack.i.bf16 %v14043_v44, %v14044_v38  ;;  %v14050_v36 = vpack.i.bf16 %v14048_v9, %v14049_v27  ;;  %v14051_v29 = vld [vmem:[#allocation72_spill] sm:$0xff]  ;;  %v2596_v9 = vmul.f32 0.35355338, %v2560_v23 }
 0x751   : > { %v8070_v56 = vpop.permute.xlu1 %8069 }
 0x752   : > { %v8071_v15 = vunpack.i.l.bf16 %v8070_v56  ;;  %v8072_v52 = vunpack.i.h.bf16 %v8070_v56  ;;  %v8093_v56 = vpack.i.bf16 %v14051_v29, %v14030_v33 }
 0x754   : > { %v11088_v63 = vpop.eup %8322  ;;  %2227 = vmatpush.msrb.mxu1 %v8071_v15 }
 0x755   : > { %v2731_v16 = vsel %vm618_vm2, %v11088_v63, 0.0  ;;  %v8325_v6 = vpop.eup %8324 }
 0x756   : > { %2732 = vadd.xlane.f32.xlu2 %v2731_v16  ;;  %2228 = vmatpush.msrb.mxu1 %v8072_v52  ;;  %v2142_v39 = vmul.f32 %v8325_v6, %v10956_v30  ;;  %v11112_v30 = vpop.f32.mrf.mxu2  ;;  %v2080_v55 = vpop.xlane.xlu0 %2079 }
 0x757   : > { %7401 = vmatmul.msk.f32.vlgmr.msrb.gmra.mxu1 %vm618_vm2, %v2141_v47  ;;  %v2465_v6 = vpop.f32.mrf.mxu3 }
 0x75e   : > { %v11120_v19 = vpop.f32.mrf.mxu2  ;;  %v2628_v15 = vpop.xlane.xlu0 %2627 }
 0x75f   : > { %8074 = vrot.lane.b32.xlu1 %v14042_v54, %s8949_s26  ;;  %7402 = vmatmul.msk.f32.gmra.mxu1 %vm618_vm2, %v2142_v39  ;;  %v2678_v47 = vsub.f32 %v11002_v37, %v2628_v15  ;;  %v2594_v39 = vmul.f32 0.35355338, %v2465_v6  ;;  %v2679_v37 = vsub.f32 %v10968_v7, %v2631_v41 }
 0x761   : > { %v2697_v3 = vmul.f32 1.442695, %v2678_v47  ;;  %v11126_v38 = vadd.f32 %v2594_v39, %v9949_v8  ;;  %v2699_v29 = vmul.f32 1.442695, %v2679_v37 }
 0x762   : > { %8079 = vrot.lane.b32.xlu0 %v14045_v13, %s8949_s26 }
 0x763   : > { %v2644_v27 = vsel %vm618_vm2, %v11126_v38, -inf }
 0x766   : > { %v2563_v52 = vpop.f32.mrf.mxu2 }
 0x767   : > { %8089 = vrot.lane.b32.xlu1 %v14047_v18, %s8949_s26 }
 0x76e   : > { %8084 = vrot.lane.b32.xlu2 %v14050_v36, %s8949_s26  ;;  %v2566_v13 = vpop.f32.mrf.mxu2 }
 0x776   : > { %8094 = vrot.lane.b32.xlu2 %v8093_v56, %s8949_s26  ;;  %v11136_v56 = vadd.f32 %v2596_v9, %v9949_v8  ;;  %v2569_v47 = vpop.f32.mrf.mxu2  ;;  %v2598_v9 = vmul.f32 0.35355338, %v2566_v13 }
 0x77a   : > { %v2089_v33 = vpop.xlane.xlu2 %2088 }
 0x77c   : > { %v2077_v16 = vpop.xlane.xlu1 %2076 }
 0x77d   : > { %8326 = vrcp.f32 %v2077_v16  ;;  %v2597_v16 = vmul.f32 0.35355338, %v2563_v52 }
 0x77e   : > { %8328 = vrcp.f32 %v2080_v55 }
 0x77f   : > { %8330 = vpow2.f32 %v2697_v3  ;;  %v2468_v3 = vpop.f32.mrf.mxu3 }
 0x782   : > { %v2640_v7 = vpop.xlane.xlu2 %2639 }
 0x783   : > { %v8327_v43 = vpop.eup %8326  ;;  %v2682_v23 = vsub.f32 %v11027_v59, %v2640_v7  ;;  %v11163_v7 = vadd.f32 %v2598_v9, %v9949_v8 }
 0x784   : > { %v2083_v54 = vpop.xlane.xlu0 %2082  ;;  %v2143_v44 = vmul.f32 %v8327_v43, %v11022_v25  ;;  %v8329_v18 = vpop.eup %8328  ;;  %v11145_v43 = vadd.f32 %v2597_v16, %v9949_v8 }
 0x785   : > { %8332 = vrcp.f32 %v2083_v54  ;;  %v11132_v36 = vpop.eup %8330  ;;  %v2144_v55 = vmul.f32 %v8329_v18, %v10995_v60  ;;  %v2634_v15 = vpop.xlane.xlu1 %2633  ;;  %v2650_v60 = vsel %vm618_vm2, %v11136_v56, -inf  ;;  %v2595_v54 = vmul.f32 0.35355338, %v2468_v3 }
 0x786   : > { %7403 = vmatmul.msk.f32.gmra.mxu1 %vm618_vm2, %v2143_v44  ;;  %v2734_v41 = vsel %vm618_vm2, %v11132_v36, 0.0  ;;  %8334 = vpow2.f32 %v2699_v29  ;;  %v2680_v39 = vsub.f32 %v11032_v4, %v2634_v15  ;;  %v11152_v4 = vpop.f32.mrf.mxu1  ;;  %v2572_v29 = vpop.f32.mrf.mxu2  ;;  %v2705_v15 = vmul.f32 1.442695, %v2682_v23 }
 0x788   : > { %v2701_v44 = vmul.f32 1.442695, %v2680_v39 }
 0x78b   : > { %v8333_v6 = vpop.eup %8332 }
 0x78c   : > { %2645 = vmax.xlane.f32.xlu0 %v2644_v27  ;;  %v2086_v25 = vpop.xlane.xlu0 %2085  ;;  %v2145_v52 = vmul.f32 %v8333_v6, %v11037_v12  ;;  %v11150_v37 = vpop.eup %8334  ;;  %v2653_v27 = vsel %vm618_vm2, %v11145_v43, -inf  ;;  %v2599_v6 = vmul.f32 0.35355338, %v2569_v47 }
 0x78d   : > { %8336 = vrcp.f32 %v2086_v25  ;;  %v2643_v12 = vpop.xlane.xlu2 %2642  ;;  %v2737_v16 = vsel %vm618_vm2, %v11150_v37, 0.0 }
 0x78e   : > { %7404 = vmatmul.msk.f32.gmra.mxu1 %vm618_vm2, %v2144_v55  ;;  %v11157_v55 = vadd.f32 %v2595_v54, %v9949_v8  ;;  %8338 = vpow2.f32 %v2701_v44  ;;  %v2683_v13 = vsub.f32 %v11044_v0, %v2643_v12  ;;  %v2575_v47 = vpop.f32.mrf.mxu2 }
 0x78f   : > { %8340 = vrcp.f32 %v2089_v33  ;;  %v2656_v33 = vsel %vm618_vm2, %v11163_v7, -inf }
 0x790   : > { %v2647_v3 = vsel %vm618_vm2, %v11157_v55, -inf  ;;  %8342 = vpow2.f32 %v2705_v15  ;;  %v2600_v15 = vmul.f32 0.35355338, %v2572_v29 }
 0x791   : > { %2735 = vadd.xlane.f32.xlu1 %v2734_v41 }
 0x793   : > { %v8337_v25 = vpop.eup %8336 }
 0x794   : > { %2651 = vmax.xlane.f32.xlu0 %v2650_v60  ;;  %v2637_v18 = vpop.xlane.xlu0 %2636  ;;  %v2146_v41 = vmul.f32 %v8337_v25, %v11050_v58  ;;  %v11172_v60 = vpop.f32.mrf.mxu1  ;;  %v11177_v58 = vadd.f32 %v2599_v6, %v9949_v8  ;;  %v11203_v6 = vadd.f32 %v2600_v15, %v9949_v8  ;;  %v14052_v15 = vld [vmem:[#allocation65_spill] sm:$0xff] }
 0x795   : > { %v2681_v59 = vsub.f32 %v11055_v10, %v2637_v18  ;;  %v11170_v10 = vpop.eup %8338 }
 0x796   : > { %7405 = vmatmul.msk.f32.gmra.mxu1 %vm618_vm2, %v2145_v52  ;;  %v2707_v52 = vmul.f32 1.442695, %v2683_v13  ;;  %v8341_v0 = vpop.eup %8340  ;;  %v2740_v54 = vsel %vm618_vm2, %v11170_v10, 0.0  ;;  %v2659_v18 = vsel %vm618_vm2, %v11177_v58, -inf  ;;  %v2578_v13 = vpop.f32.mrf.mxu2 }
 0x797   : > { %v2703_v39 = vmul.f32 1.442695, %v2681_v59  ;;  %v11181_v44 = vpop.eup %8342  ;;  %v2147_v23 = vmul.f32 %v8341_v0, %v11017_v11 }
 0x798   : > { %v2746_v25 = vsel %vm618_vm2, %v11181_v44, 0.0 }
 0x799   : > { %2654 = vmax.xlane.f32.xlu1 %v2653_v27  ;;  %8344 = vpow2.f32 %v2703_v39  ;;  %v2601_v27 = vmul.f32 0.35355338, %v2575_v47  ;;  %v2602_v39 = vmul.f32 0.35355338, %v2578_v13 }
 0x79a   : > { %8346 = vpow2.f32 %v2707_v52 }
 0x79b   : > { %v11212_v52 = vadd.f32 %v2602_v39, %v9949_v8 }
 0x79c   : > { %2738 = vadd.xlane.f32.xlu0 %v2737_v16  ;;  %v11191_v12 = vpop.f32.mrf.mxu1  ;;  %v11198_v16 = vadd.f32 %v2601_v27, %v9949_v8 }
 0x79d   : > { %v2668_v0 = vsel %vm618_vm2, %v11212_v52, -inf }
 0x79e   : > { %7406 = vmatmul.msk.f32.gmra.mxu1 %vm618_vm2, %v2146_v41 }
 0x79f   : > { %2648 = vmax.xlane.f32.xlu2 %v2647_v3  ;;  %v11187_v9 = vpop.eup %8344  ;;  %v2665_v3 = vsel %vm618_vm2, %v11198_v16, -inf }
 0x7a0   : > { %v11193_v59 = vpop.eup %8346  ;;  %v2743_v11 = vsel %vm618_vm2, %v11187_v9, 0.0 }
 0x7a1   : > { %2657 = vmax.xlane.f32.xlu1 %v2656_v33  ;;  %v2749_v41 = vsel %vm618_vm2, %v11193_v59, 0.0  ;;  %v2662_v33 = vsel %vm618_vm2, %v11203_v6, -inf }
 0x7a4   : > { %2741 = vadd.xlane.f32.xlu0 %v2740_v54  ;;  %v11207_v29 = vpop.f32.mrf.mxu1 }
 0x7a6   : > { %7407 = vmatmul.msk.f32.gmra.mxu1 %vm618_vm2, %v2147_v23 }
 0x7a7   : > { %2660 = vmax.xlane.f32.xlu2 %v2659_v18 }
 0x7a9   : > { %2747 = vadd.xlane.f32.xlu1 %v2746_v25 }
 0x7ac   : > { %2744 = vadd.xlane.f32.xlu0 %v2743_v11  ;;  %v11216_v54 = vpop.f32.mrf.mxu1  ;;  %v14053_v11 = vld [vmem:[#allocation68_spill] sm:$0xff] }
 0x7ad   : > { %v14054_v13 = vpack.i.bf16 %v14052_v15, %v14053_v11 }
 0x7af   : > { %2750 = vadd.xlane.f32.xlu2 %v2749_v41 }
 0x7b1   : > { %2666 = vmax.xlane.f32.xlu1 %v2665_v3 }
 0x7b4   : > { %2663 = vmax.xlane.f32.xlu0 %v2662_v33  ;;  %v11219_v25 = vpop.f32.mrf.mxu1 }
 0x7b9   : > { %v2092_v47 = vpop.xlane.xlu1 %2091  ;;  %2669 = vmax.xlane.f32.xlu1 %v2668_v0 }
 0x7ba   : > { %8348 = vrcp.f32 %v2092_v47 }
 0x7bc   : > { %v11227_v33 = vpop.f32.mrf.mxu1 }
 0x7c0   : > { %v8349_v23 = vpop.eup %8348 }
 0x7c1   : > { %v2095_v18 = vpop.xlane.xlu0 %2094  ;;  %v2148_v27 = vmul.f32 %v8349_v23, %v11075_v45 }
 0x7c2   : > { %8350 = vrcp.f32 %v2095_v18  ;;  %v14055_v18 = vld [vmem:[#allocation58_spill] sm:$0xff] }
 0x7c3   : > { %7408 = vmatmul.msk.f32.gmra.mxu1 %vm618_vm2, %v2148_v27  ;;  %v14056_v27 = vld [vmem:[#allocation64_spill] sm:$0xff] }
 0x7c4   : > { %v11230_v47 = vpop.f32.mrf.mxu1  ;;  %v14057_v32 = vpack.i.bf16 %v14055_v18, %v14056_v27 }
 0x7c7   : > { %8099 = vrot.lane.b32.xlu2 %v14054_v13, %s8949_s26 }
 0x7c8   : > { %v8351_v41 = vpop.eup %8350 }
 0x7c9   : > { %v2733_v39 = vpop.xlane.xlu2 %2732  ;;  %v2149_v3 = vmul.f32 %v8351_v41, %v11082_v50 }
 0x7ca   : > { %8352 = vrcp.f32 %v2733_v39 }
 0x7cb   : > { %7409 = vmatmul.msk.f32.gmra.mxu1 %vm618_vm2, %v2149_v3 }
 0x7cc   : > { %v11236_v49 = vpop.f32.mrf.mxu1 }
 0x7cd   : > { %14058 = vst [vmem:[#allocation76_spill] sm:$0xff] %v11236_v49 }
 0x7d0   : > { %v8353_v18 = vpop.eup %8352 }
 0x7d1   : > { %v8075_v0 = vpop.permute.xlu1 %8074  ;;  %v8085_v45 = vpop.permute.xlu2 %8084 }
 0x7d2   : > { %v8076_v23 = vunpack.i.l.bf16 %v8075_v0  ;;  %8104 = vrot.lane.b32.xlu1 %v14057_v32, %s8949_s26  ;;  %v8077_v15 = vunpack.i.h.bf16 %v8075_v0  ;;  %v8086_v3 = vunpack.i.l.bf16 %v8085_v45  ;;  %v8087_v0 = vunpack.i.h.bf16 %v8085_v45 }
 0x7d4   : > { %v8080_v11 = vpop.permute.xlu0 %8079  ;;  %2882 = vmatpush.msra.mxu1 %v8076_v23 }
 0x7d5   : > { %v8081_v13 = vunpack.i.l.bf16 %v8080_v11  ;;  %v8082_v50 = vunpack.i.h.bf16 %v8080_v11  ;;  %v2803_v11 = vmul.f32 %v8353_v18, %v11088_v63 }
 0x7d6   : > { %2883 = vmatpush.msra.mxu1 %v8077_v15  ;;  %v11242_v15 = vpop.f32.mrf.mxu1 }
 0x7d8   : > { %2884 = vmatpush.msra.mxu1 %v8081_v13  ;;  %v2581_v13 = vpop.f32.mrf.mxu2 }
 0x7d9   : > { %v8095_v41 = vpop.permute.xlu2 %8094  ;;  %v8090_v32 = vpop.permute.xlu1 %8089 }
 0x7da   : > { %v8097_v20 = vunpack.i.h.bf16 %v8095_v41  ;;  %2885 = vmatpush.msra.mxu1 %v8082_v50  ;;  %8114 = vrot.lane.b32.xlu1 %v14061_v1, %s8949_s26  ;;  %v8091_v23 = vunpack.i.l.bf16 %v8090_v32  ;;  %v8092_v27 = vunpack.i.h.bf16 %v8090_v32  ;;  %v8096_v39 = vunpack.i.l.bf16 %v8095_v41 }
 0x7db   : > { %v2603_v1 = vmul.f32 0.35355338, %v2581_v13 }
 0x7dc   : > { %2886 = vmatpush.msra.mxu1 %v8086_v3  ;;  %2980 = vmatpush.msra.mxu2 %v8097_v20 }
 0x7dd   : > { %v11247_v42 = vadd.f32 %v2603_v1, %v9949_v8 }
 0x7de   : > { %2887 = vmatpush.msra.mxu1 %v8087_v0  ;;  %v11249_v53 = vpop.f32.mrf.mxu1 }
 0x7df   : > { %v2671_v20 = vsel %vm618_vm2, %v11247_v42, -inf }
 0x7e0   : > { %2888 = vmatpush.msra.mxu1 %v8091_v23  ;;  %v2584_v50 = vpop.f32.mrf.mxu2 }
 0x7e1   : > { %v2604_v41 = vmul.f32 0.35355338, %v2584_v50 }
 0x7e2   : > { %2889 = vmatpush.msra.mxu1 %v8092_v27 }
 0x7e3   : > { %v11256_v63 = vadd.f32 %v2604_v41, %v9949_v8 }
 0x7e4   : > { %2890 = vmatpush.msra.mxu1 %v8096_v39 }
 0x7e5   : > { %7455 = vmatmul.msk.f32.vlgmr.msra.gmra.mxu1 %vm618_vm2, %v2803_v11  ;;  %v2674_v18 = vsel %vm618_vm2, %v11256_v63, -inf }
 0x7e6   : > { %v11253_v45 = vpop.f32.mrf.mxu1 }
 0x7ee   : > { %v11258_v32 = vpop.f32.mrf.mxu1 }
 0x7f0   : > { %2672 = vmax.xlane.f32.xlu2 %v2671_v20 }
 0x7f6   : > { %v11265_v13 = vpop.f32.mrf.mxu1 }
 0x7fe   : > { %v11273_v41 = vpop.f32.mrf.mxu1 }
 0x7ff   : > { %v2646_v3 = vpop.xlane.xlu0 %2645 }
 0x800   : > { %v2684_v0 = vsub.f32 %v11126_v38, %v2646_v3 }
 0x802   : > { %v2709_v23 = vmul.f32 1.442695, %v2684_v0 }
 0x804   : > { %8354 = vpow2.f32 %v2709_v23  ;;  %v2736_v27 = vpop.xlane.xlu1 %2735  ;;  %2675 = vmax.xlane.f32.xlu1 %v2674_v18 }
 0x805   : > { %8356 = vrcp.f32 %v2736_v27 }
 0x807   : > { %v2652_v39 = vpop.xlane.xlu0 %2651 }
 0x808   : > { %v2686_v18 = vsub.f32 %v11136_v56, %v2652_v39 }
 0x80a   : > { %v11263_v11 = vpop.eup %8354 }
 0x80b   : > { %v8357_v8 = vpop.eup %8356  ;;  %v2752_v1 = vsel %vm618_vm2, %v11263_v11, 0.0 }
 0x80c   : > { %v11269_v20 = vpop.xlane.xlu1 %2654  ;;  %2753 = vadd.xlane.f32.xlu0 %v2752_v1  ;;  %v2804_v38 = vmul.f32 %v8357_v8, %v11132_v36  ;;  %v2713_v8 = vmul.f32 1.442695, %v2686_v18 }
 0x80e   : > { %7456 = vmatmul.msk.f32.gmra.mxu1 %vm618_vm2, %v2804_v38  ;;  %v11280_v38 = vpop.f32.mrf.mxu1 }
 0x80f   : > { %v2739_v50 = vpop.xlane.xlu0 %2738 }
 0x810   : > { %8358 = vrcp.f32 %v2739_v50 }
 0x812   : > { %v2649_v3 = vpop.xlane.xlu2 %2648 }
 0x813   : > { %v2685_v0 = vsub.f32 %v11157_v55, %v2649_v3 }
 0x814   : > { %v2658_v23 = vpop.xlane.xlu1 %2657 }
 0x815   : > { %v2711_v27 = vmul.f32 1.442695, %v2685_v0  ;;  %v2688_v51 = vsub.f32 %v11163_v7, %v2658_v23 }
 0x816   : > { %v8359_v22 = vpop.eup %8358  ;;  %v11293_v0 = vpop.f32.mrf.mxu1 }
 0x817   : > { %8360 = vpow2.f32 %v2711_v27  ;;  %v2717_v1 = vmul.f32 1.442695, %v2688_v51  ;;  %v2742_v24 = vpop.xlane.xlu0 %2741  ;;  %v2805_v36 = vmul.f32 %v8359_v22, %v11150_v37 }
 0x818   : > { %8362 = vrcp.f32 %v2742_v24 }
 0x819   : > { %8364 = vpow2.f32 %v2717_v1  ;;  %7457 = vmatmul.msk.f32.gmra.mxu1 %vm618_vm2, %v2805_v36 }
 0x81a   : > { %v2661_v55 = vpop.xlane.xlu2 %2660  ;;  %8366 = vpow2.f32 %v2713_v8 }
 0x81b   : > { %v2689_v50 = vsub.f32 %v11177_v58, %v2661_v55 }
 0x81c   : > { %v2748_v56 = vpop.xlane.xlu1 %2747 }
 0x81d   : > { %v11283_v39 = vpop.eup %8360  ;;  %v2719_v7 = vmul.f32 1.442695, %v2689_v50 }
 0x81e   : > { %v8363_v3 = vpop.eup %8362  ;;  %v2755_v51 = vsel %vm618_vm2, %v11283_v39, 0.0 }
 0x81f   : > { %v11287_v22 = vpop.eup %8364  ;;  %8368 = vpow2.f32 %v2719_v7  ;;  %v2745_v24 = vpop.xlane.xlu0 %2744  ;;  %2756 = vadd.xlane.f32.xlu0 %v2755_v51  ;;  %v2806_v37 = vmul.f32 %v8363_v3, %v11170_v10 }
 0x820   : > { %8370 = vrcp.f32 %v2745_v24  ;;  %v2764_v58 = vsel %vm618_vm2, %v11287_v22, 0.0  ;;  %v11295_v18 = vpop.eup %8366  ;;  %v11306_v3 = vpop.f32.mrf.mxu1 }
 0x821   : > { %7458 = vmatmul.msk.f32.gmra.mxu1 %vm618_vm2, %v2806_v37  ;;  %2765 = vadd.xlane.f32.xlu2 %v2764_v58  ;;  %8372 = vrcp.f32 %v2748_v56  ;;  %v2758_v10 = vsel %vm618_vm2, %v11295_v18, 0.0 }
 0x822   : > { %v2751_v23 = vpop.xlane.xlu2 %2750 }
 0x824   : > { %v2667_v27 = vpop.xlane.xlu1 %2666 }
 0x825   : > { %v11297_v1 = vpop.eup %8368 }
 0x826   : > { %v8371_v36 = vpop.eup %8370  ;;  %v2767_v7 = vsel %vm618_vm2, %v11297_v1, 0.0 }
 0x827   : > { %2759 = vadd.xlane.f32.xlu0 %v2758_v10  ;;  %v2664_v8 = vpop.xlane.xlu0 %2663  ;;  %v2807_v55 = vmul.f32 %v8371_v36, %v11187_v9  ;;  %v8373_v37 = vpop.eup %8372 }
 0x828   : > { %v2690_v50 = vsub.f32 %v11203_v6, %v2664_v8  ;;  %v2808_v6 = vmul.f32 %v8373_v37, %v11181_v44  ;;  %v11313_v8 = vpop.f32.mrf.mxu1  ;;  %v14062_v44 = vld [vmem:[#allocation54_spill] sm:$0xff] }
 0x829   : > { %7459 = vmatmul.msk.f32.gmra.mxu1 %vm618_vm2, %v2807_v55  ;;  %2768 = vadd.xlane.f32.xlu2 %v2767_v7 }
 0x82a   : > { %v2721_v51 = vmul.f32 1.442695, %v2690_v50  ;;  %v8100_v24 = vpop.permute.xlu2 %8099 }
 0x82b   : > { %v8101_v56 = vunpack.i.l.bf16 %v8100_v24  ;;  %v8102_v10 = vunpack.i.h.bf16 %v8100_v24 }
 0x82c   : > { %8374 = vpow2.f32 %v2721_v51  ;;  %v2670_v58 = vpop.xlane.xlu1 %2669 }
 0x82d   : > { %v2692_v49 = vsub.f32 %v11212_v52, %v2670_v58  ;;  %2981 = vmatpush.msra.mxu2 %v8101_v56  ;;  %8376 = vrcp.f32 %v2751_v23  ;;  %v14063_v23 = vld [vmem:[#allocation56_spill] sm:$0xff] }
 0x82e   : > { %v14064_v51 = vpack.i.bf16 %v14062_v44, %v14063_v23 }
 0x82f   : > { %v2725_v9 = vmul.f32 1.442695, %v2692_v49  ;;  %2982 = vmatpush.msra.mxu2 %v8102_v10 }
 0x830   : > { %v11327_v24 = vpop.f32.mrf.mxu1 }
 0x831   : > { %8378 = vpow2.f32 %v2725_v9  ;;  %7460 = vmatmul.msk.f32.gmra.mxu1 %vm618_vm2, %v2808_v6  ;;  %v2687_v9 = vsub.f32 %v11145_v43, %v11269_v20 }
 0x832   : > { %v11311_v36 = vpop.eup %8374 }
 0x833   : > { %v2770_v55 = vsel %vm618_vm2, %v11311_v36, 0.0  ;;  %v8377_v50 = vpop.eup %8376  ;;  %v2715_v6 = vmul.f32 1.442695, %v2687_v9 }
 0x834   : > { %2771 = vadd.xlane.f32.xlu2 %v2770_v55  ;;  %v2809_v52 = vmul.f32 %v8377_v50, %v11193_v59  ;;  %v2691_v50 = vsub.f32 %v11198_v16, %v2667_v27 }
 0x835   : > { %8380 = vpow2.f32 %v2715_v6 }
 0x837   : > { %v11317_v7 = vpop.eup %8378 }
 0x838   : > { %v2776_v49 = vsel %vm618_vm2, %v11317_v7, 0.0  ;;  %v11329_v56 = vpop.f32.mrf.mxu1 }
 0x839   : > { %7461 = vmatmul.msk.f32.gmra.mxu1 %vm618_vm2, %v2809_v52  ;;  %2777 = vadd.xlane.f32.xlu1 %v2776_v49  ;;  %v2723_v52 = vmul.f32 1.442695, %v2691_v50 }
 0x83b   : > { %8109 = vrot.lane.b32.xlu0 %v14064_v51, %s8949_s26  ;;  %v11342_v49 = vpop.eup %8380  ;;  %8382 = vpow2.f32 %v2723_v52 }
 0x83c   : > { %v2761_v20 = vsel %vm618_vm2, %v11342_v49, 0.0 }
 0x840   : > { %v11331_v59 = vpop.f32.mrf.mxu1 }
 0x841   : > { %v11351_v23 = vpop.eup %8382 }
 0x844   : > { %v8105_v37 = vpop.permute.xlu1 %8104 }
 0x845   : > { %v8106_v58 = vunpack.i.l.bf16 %v8105_v37  ;;  %v8107_v10 = vunpack.i.h.bf16 %v8105_v37 }
 0x847   : > { %2983 = vmatpush.msra.mxu2 %v8106_v58 }
 0x848   : > { %v11337_v55 = vpop.f32.mrf.mxu1 }
 0x849   : > { %2984 = vmatpush.msra.mxu2 %v8107_v10 }
 0x850   : > { %v11344_v44 = vpop.f32.mrf.mxu1 }
 0x852   : > { %3035 = vrot.lane.b32.xlu1 %v11242_v15, %s8950_s25 }
 0x858   : > { %v11355_v16 = vpop.f32.mrf.mxu1 }
 0x85a   : > { %3037 = vrot.lane.b32.xlu1 %v11249_v53, %s8950_s25 }
 0x860   : > { %v11365_v37 = vpop.f32.mrf.mxu1 }
 0x862   : > { %3039 = vrot.lane.b32.xlu1 %v11253_v45, %s8950_s25  ;;  %v2773_v45 = vsel %vm618_vm2, %v11351_v23, 0.0 }
 0x863   : > { %v2673_v15 = vpop.xlane.xlu2 %2672 }
 0x864   : > { %v2693_v43 = vsub.f32 %v11247_v42, %v2673_v15  ;;  %v8115_v42 = vpop.permute.xlu1 %8114 }
 0x865   : > { %2762 = vadd.xlane.f32.xlu0 %v2761_v20 }
 0x866   : > { %v2727_v53 = vmul.f32 1.442695, %v2693_v43 }
 0x868   : > { %8384 = vpow2.f32 %v2727_v53  ;;  %v11370_v9 = vpop.f32.mrf.mxu1 }
 0x86a   : > { %3041 = vrot.lane.b32.xlu1 %v11258_v32, %s8950_s25 }
 0x86d   : > { %2774 = vadd.xlane.f32.xlu0 %v2773_v45 }
 0x86e   : > { %v11359_v27 = vpop.eup %8384 }
 0x86f   : > { %v2779_v51 = vsel %vm618_vm2, %v11359_v27, 0.0 }
 0x870   : > { %2780 = vadd.xlane.f32.xlu2 %v2779_v51 }
 0x872   : > { %3043 = vrot.lane.b32.xlu1 %v11265_v13, %s8950_s25 }
 0x877   : > { %v2676_v58 = vpop.xlane.xlu1 %2675 }
 0x878   : > { %v2694_v32 = vsub.f32 %v11256_v63, %v2676_v58  ;;  %v2892_v63 = vpop.f32.mrf.mxu1 }
 0x87a   : > { %v2729_v10 = vmul.f32 1.442695, %v2694_v32  ;;  %3045 = vrot.lane.b32.xlu1 %v11273_v41, %s8950_s25 }
 0x87c   : > { %8386 = vpow2.f32 %v2729_v10 }
 0x87f   : > { %v2754_v6 = vpop.xlane.xlu0 %2753 }
 0x880   : > { %8388 = vrcp.f32 %v2754_v6 }
 0x882   : > { %v11372_v50 = vpop.eup %8386  ;;  %3047 = vrot.lane.b32.xlu1 %v11280_v38, %s8950_s25 }
 0x883   : > { %v2782_v13 = vsel %vm618_vm2, %v11372_v50, 0.0 }
 0x884   : > { %2783 = vadd.xlane.f32.xlu0 %v2782_v13 }
 0x886   : > { %v8389_v52 = vpop.eup %8388 }
 0x887   : > { %v2810_v15 = vmul.f32 %v8389_v52, %v11263_v11 }
 0x888   : > { %3107 = vrot.lane.b32.xlu2 %v11313_v8, %s8951_s27 }
 0x889   : > { %7462 = vmatmul.msk.f32.gmra.mxu1 %vm618_vm2, %v2810_v15 }
 0x88a   : > { %3049 = vrot.lane.b32.xlu1 %v11293_v0, %s8950_s25 }
 0x88b   : > { %v2895_v41 = vpop.f32.mrf.mxu1 }
 0x890   : > { %3181 = vrot.lane.b32.xlu2 %v2895_v41, %s8952_s29 }
 0x892   : > { %v2757_v38 = vpop.xlane.xlu0 %2756  ;;  %3051 = vrot.lane.b32.xlu1 %v11306_v3, %s8950_s25 }
 0x893   : > { %8390 = vrcp.f32 %v2757_v38 }
 0x896   : > { %v2898_v43 = vpop.f32.mrf.mxu1 }
 0x898   : > { %3183 = vrot.lane.b32.xlu2 %v2898_v43, %s8952_s29  ;;  %3179 = vrot.lane.b32.xlu0 %v2892_v63, %s8952_s29 }
 0x899   : > { %v8391_v11 = vpop.eup %8390 }
 0x89a   : > { %3053 = vrot.lane.b32.xlu1 %v10990_v62, %s8950_s25  ;;  %v2811_v0 = vmul.f32 %v8391_v11, %v11283_v39  ;;  %v2760_v3 = vpop.xlane.xlu0 %2759 }
 0x89b   : > { %8392 = vrcp.f32 %v2760_v3 }
 0x89c   : > { %7463 = vmatmul.msk.f32.gmra.mxu1 %vm618_vm2, %v2811_v0 }
 0x89e   : > { %v2901_v8 = vpop.f32.mrf.mxu1 }
 0x8a0   : > { %3185 = vrot.lane.b32.xlu2 %v2901_v8, %s8952_s29  ;;  %3109 = vrot.lane.b32.xlu0 %v11327_v24, %s8951_s27  ;;  %v8116_v24 = vunpack.i.l.bf16 %v8115_v42 }
 0x8a2   : > { %3055 = vrot.lane.b32.xlu1 %v10999_v57, %s8950_s25  ;;  %v8393_v57 = vpop.eup %8392 }
 0x8a6   : > { %v2904_v20 = vpop.f32.mrf.mxu1 }
 0x8a8   : > { %3187 = vrot.lane.b32.xlu2 %v2904_v20, %s8952_s29  ;;  %3111 = vrot.lane.b32.xlu0 %v11329_v56, %s8951_s27  ;;  %v8117_v56 = vunpack.i.h.bf16 %v8115_v42 }
 0x8aa   : > { %3057 = vrot.lane.b32.xlu1 %v11007_v14, %s8950_s25  ;;  %v2812_v14 = vmul.f32 %v8393_v57, %v11295_v18 }
 0x8ad   : > { %v8110_v62 = vpop.permute.xlu0 %8109 }
 0x8ae   : > { %v8111_v39 = vunpack.i.l.bf16 %v8110_v62  ;;  %v2907_v53 = vpop.f32.mrf.mxu1  ;;  %v8112_v45 = vunpack.i.h.bf16 %v8110_v62 }
 0x8b0   : > { %2985 = vmatpush.msra.mxu2 %v8111_v39  ;;  %3189 = vrot.lane.b32.xlu2 %v2907_v53, %s8952_s29 }
 0x8b1   : > { %3113 = vrot.lane.b32.xlu0 %v11331_v59, %s8951_s27  ;;  %v3293_v59 = vld [vmem:[%s3289_s13 + $0x18] sm:$0xff] }
 0x8b2   : > { %2986 = vmatpush.msra.mxu2 %v8112_v45  ;;  %3059 = vrot.lane.b32.xlu1 %v11009_v5, %s8950_s25 }
 0x8b3   : > { %3365 = vmatpush.msra.mxu3 %v3293_v59 }
 0x8b4   : > { %2987 = vmatpush.msra.mxu2 %v8116_v24 }
 0x8b6   : > { %v2910_v51 = vpop.f32.mrf.mxu1  ;;  %2988 = vmatpush.msra.mxu2 %v8117_v56 }
 0x8b7   : > { %7464 = vmatmul.msk.f32.vlgmr.msra.gmra.mxu2 %vm618_vm2, %v2812_v14 }
 0x8b8   : > { %3191 = vrot.lane.b32.xlu2 %v2910_v51, %s8952_s29 }
 0x8b9   : > { %3115 = vrot.lane.b32.xlu0 %v11337_v55, %s8951_s27  ;;  %v3292_v55 = vld [vmem:[%s3289_s13 + $0x10] sm:$0xff] }
 0x8ba   : > { %3061 = vrot.lane.b32.xlu1 %v11015_v26, %s8950_s25  ;;  %v2766_v26 = vpop.xlane.xlu2 %2765  ;;  %3366 = vmatpush.msra.mxu3 %v3292_v55 }
 0x8c1   : > { %3117 = vrot.lane.b32.xlu0 %v11344_v44, %s8951_s27 }
 0x8c2   : > { %3063 = vrot.lane.b32.xlu1 %v11029_v61, %s8950_s25 }
 0x8c9   : > { %3119 = vrot.lane.b32.xlu0 %v11355_v16, %s8951_s27 }
 0x8ca   : > { %3065 = vrot.lane.b32.xlu1 %v11048_v2, %s8950_s25  ;;  %v2769_v2 = vpop.xlane.xlu2 %2768 }
 0x8d1   : > { %3121 = vrot.lane.b32.xlu0 %v11365_v37, %s8951_s27 }
 0x8d2   : > { %3067 = vrot.lane.b32.xlu1 %v11059_v46, %s8950_s25  ;;  %v2772_v44 = vpop.xlane.xlu2 %2771 }
 0x8d8   : > { %v2763_v5 = vpop.xlane.xlu0 %2762 }
 0x8d9   : > { %8394 = vrcp.f32 %v2763_v5  ;;  %3123 = vrot.lane.b32.xlu0 %v11370_v9, %s8951_s27 }
 0x8da   : > { %3069 = vrot.lane.b32.xlu1 %v11063_v28, %s8950_s25  ;;  %8396 = vrcp.f32 %v2766_v26  ;;  %s14091_s25 = sld [smem:[#allocation94_spill]] }
 0x8db   : > { %8398 = vrcp.f32 %v2769_v2 }
 0x8dc   : > { %8400 = vrcp.f32 %v2772_v44 }
 0x8df   : > { %v8395_v61 = vpop.eup %8394 }
 0x8e0   : > { %v2813_v18 = vmul.f32 %v8395_v61, %v11342_v49  ;;  %v8397_v46 = vpop.eup %8396  ;;  %v3291_v49 = vld [vmem:[%s3289_s13 + $0x8] sm:$0xff]  ;;  %v2775_v37 = vpop.xlane.xlu0 %2774 }
 0x8e1   : > { %3125 = vrot.lane.b32.xlu0 %v11065_v21, %s8951_s27  ;;  %v2814_v28 = vmul.f32 %v8397_v46, %v11287_v22  ;;  %3367 = vmatpush.msra.mxu3 %v3291_v49  ;;  %v3290_v21 = vld [vmem:[%s3289_s13] sm:$0xff]  ;;  %v8399_v16 = vpop.eup %8398  ;;  %v2778_v22 = vpop.xlane.xlu1 %2777  ;;  %8402 = vrcp.f32 %v2775_v37 }
 0x8e2   : > { %7465 = vmatmul.msk.f32.gmra.mxu2 %vm618_vm2, %v2813_v18  ;;  %v2815_v42 = vmul.f32 %v8399_v16, %v11297_v1  ;;  %v8401_v58 = vpop.eup %8400  ;;  %8404 = vrcp.f32 %v2778_v22 }
 0x8e3   : > { %3368 = vmatpush.msra.mxu3 %v3290_v21  ;;  %v2816_v32 = vmul.f32 %v8401_v58, %v11311_v36 }
 0x8e7   : > { %v8403_v9 = vpop.eup %8402 }
 0x8e8   : > { %v8405_v13 = vpop.eup %8404 }
 0x8e9   : > { %3127 = vrot.lane.b32.xlu0 %v11070_v34, %s8951_s27  ;;  %v2781_v34 = vpop.xlane.xlu2 %2780  ;;  %v3036_v10 = vpop.permute.xlu1 %3035 }
 0x8ea   : > { %7466 = vmatmul.msk.f32.gmra.mxu2 %vm618_vm2, %v2814_v28  ;;  %8406 = vrcp.f32 %v2781_v34  ;;  %v3233_v63 = vsel %vm391_vm1, %v11152_v4, %v3036_v10 }
 0x8f0   : > { %v8407_v38 = vpop.eup %8406 }
 0x8f1   : > { %3129 = vrot.lane.b32.xlu0 %v11073_v31, %s8951_s27  ;;  %v3108_v1 = vpop.permute.xlu2 %3107  ;;  %v2817_v31 = vmul.f32 %v8403_v9, %v11351_v23  ;;  %v3038_v52 = vpop.permute.xlu1 %3037  ;;  %v14066_v9 = vld [vmem:[#allocation76_spill] sm:$0xff] }
 0x8f2   : > { %7467 = vmatmul.msk.f32.gmra.mxu2 %vm618_vm2, %v2815_v42 }
 0x8f7   : > { %v2784_v6 = vpop.xlane.xlu0 %2783 }
 0x8f8   : > { %8408 = vrcp.f32 %v2784_v6 }
 0x8f9   : > { %3131 = vrot.lane.b32.xlu0 %v11080_v40, %s8951_s27  ;;  %v2818_v40 = vmul.f32 %v8405_v13, %v11317_v7  ;;  %v3182_v23 = vpop.permute.xlu2 %3181  ;;  %v3040_v43 = vpop.permute.xlu1 %3039  ;;  %v2819_v7 = vmul.f32 %v8407_v38, %v11359_v27  ;;  %v14067_v38 = vld [vmem:[#allocation29_spill] sm:$0xff] }
 0x8fa   : > { %7468 = vmatmul.msk.f32.gmra.mxu2 %vm618_vm2, %v2816_v32 }
 0x8fe   : > { %v8409_v3 = vpop.eup %8408 }
 0x8ff   : > { %v2820_v20 = vmul.f32 %v8409_v3, %v11372_v50 }
 0x901   : > { %3133 = vrot.lane.b32.xlu0 %v11086_v17, %s8951_s27  ;;  %v3252_v17 = vsel %vm3251_vm3, %v3233_v63, %v3108_v1  ;;  %v3184_v0 = vpop.permute.xlu2 %3183  ;;  %v3042_v27 = vpop.permute.xlu1 %3041 }
 0x902   : > { %7469 = vmatmul.msk.f32.gmra.mxu2 %vm618_vm2, %v2817_v31 }
 0x906   : > { %v2913_v36 = vpop.f32.mrf.mxu1 }
 0x907   : > { %3193 = vrot.lane.b32.xlu2 %v2913_v36, %s8952_s29 }
 0x909   : > { %3135 = vrot.lane.b32.xlu0 %v11094_v35, %s8951_s27  ;;  %v3234_v35 = vsel %vm391_vm1, %v11172_v60, %v3038_v52  ;;  %v3235_v60 = vsel %vm391_vm1, %v11191_v12, %v3040_v43  ;;  %v3186_v50 = vpop.permute.xlu2 %3185  ;;  %v3044_v45 = vpop.permute.xlu1 %3043 }
 0x90a   : > { %v3180_v15 = vpop.permute.xlu0 %3179  ;;  %7470 = vmatmul.msk.f32.gmra.mxu2 %vm618_vm2, %v2818_v40  ;;  %v3237_v14 = vsel %vm391_vm1, %v11216_v54, %v3044_v45  ;;  %v11527_v40 = vld [vmem:[%s3294_s30] ss:$0 sm:$0xff]  ;;  %s4324_s30 = scalar_lea.vmem %s13785_s15, %s7491_s1 }
 0x90b   : > { %v3271_v41 = vsel %vm3270_vm4, %v3252_v17, %v3180_v15 }
 0x90c   : > { %7473 = vmatmul.msk.f32.vlgmr.msra.gmra.mxu3 %vm149_vm0, %v3271_v41 }
 0x911   : > { %3137 = vrot.lane.b32.xlu0 %v11106_v48, %s8951_s27  ;;  %v3188_v56 = vpop.permute.xlu2 %3187  ;;  %v3046_v26 = vpop.permute.xlu1 %3045 }
 0x912   : > { %v3110_v4 = vpop.permute.xlu0 %3109  ;;  %7471 = vmatmul.msk.f32.gmra.mxu2 %vm618_vm2, %v2819_v7  ;;  %v3238_v61 = vsel %vm391_vm1, %v11219_v25, %v3046_v26  ;;  %v14068_v7 = vld [vmem:[#allocation63_spill] sm:$0xff] }
 0x913   : > { %v3253_v11 = vsel %vm3251_vm3, %v3234_v35, %v3110_v4 }
 0x914   : > { %v3272_v8 = vsel %vm3270_vm4, %v3253_v11, %v3182_v23 }
 0x915   : > { %7474 = vmatmul.msk.f32.gmra.mxu3 %vm149_vm0, %v3272_v8 }
 0x919   : > { %3139 = vrot.lane.b32.xlu0 %v11112_v30, %s8951_s27  ;;  %v2916_v48 = vpop.f32.mrf.mxu1  ;;  %v3236_v30 = vsel %vm391_vm1, %v11207_v29, %v3042_v27  ;;  %v3190_v29 = vpop.permute.xlu2 %3189 }
 0x91a   : > { %3195 = vrot.lane.b32.xlu2 %v2916_v48, %s8952_s29  ;;  %v3112_v62 = vpop.permute.xlu0 %3111  ;;  %7472 = vmatmul.msk.f32.gmra.mxu2 %vm618_vm2, %v2820_v20  ;;  %v3048_v54 = vpop.permute.xlu1 %3047 }
 0x91b   : > { %v3254_v39 = vsel %vm3251_vm3, %v3235_v60, %v3112_v62  ;;  %v3239_v55 = vsel %vm391_vm1, %v11227_v33, %v3048_v54  ;;  %v14069_v60 = vld [vmem:[#allocation28_spill] sm:$0xff] }
 0x91c   : > { %v3273_v53 = vsel %vm3270_vm4, %v3254_v39, %v3184_v0 }
 0x91d   : > { %7475 = vmatmul.msk.f32.gmra.mxu3 %vm149_vm0, %v3273_v53 }
 0x921   : > { %3141 = vrot.lane.b32.xlu0 %v11120_v19, %s8951_s27  ;;  %v3192_v49 = vpop.permute.xlu2 %3191  ;;  %s3425_s27 = scalar_lea.vmem %s14091_s25, %s7491_s1 }
 0x922   : > { %v3050_v44 = vpop.permute.xlu1 %3049 }
 0x923   : > { %v3114_v12 = vpop.permute.xlu0 %3113  ;;  %v3240_v42 = vsel %vm391_vm1, %v11230_v47, %v3050_v44 }
 0x924   : > { %v3255_v57 = vsel %vm3251_vm3, %v3236_v30, %v3114_v12  ;;  %v14070_v12 = vld [vmem:[#allocation26_spill] sm:$0xff] }
 0x925   : > { %v3274_v24 = vsel %vm3270_vm4, %v3255_v57, %v3186_v50 }
 0x926   : > { %7476 = vmatmul.msk.f32.gmra.mxu3 %vm149_vm0, %v3274_v24 }
 0x92a   : > { %v3052_v32 = vpop.permute.xlu1 %3051 }
 0x92b   : > { %v3116_v51 = vpop.permute.xlu0 %3115  ;;  %v3241_v1 = vsel %vm391_vm1, %v14066_v9, %v3052_v32  ;;  %v14075_v32 = vld [vmem:[#allocation82_spill] sm:$0xff] }
 0x92c   : > { %v3256_v5 = vsel %vm3251_vm3, %v3237_v14, %v3116_v51 }
 0x92d   : > { %v3275_v19 = vsel %vm3270_vm4, %v3256_v5, %v3188_v56  ;;  %v14071_v5 = vld [vmem:[#allocation25_spill] sm:$0xff] }
 0x92e   : > { %7477 = vmatmul.msk.f32.gmra.mxu3 %vm149_vm0, %v3275_v19 }
 0x932   : > { %v3054_v15 = vpop.permute.xlu1 %3053 }
 0x933   : > { %v3118_v18 = vpop.permute.xlu0 %3117  ;;  %v3242_v35 = vsel %vm391_vm1, %v14068_v7, %v3054_v15  ;;  %v14078_v7 = vld [vmem:[#allocation84_spill] sm:$0xff] }
 0x934   : > { %v3257_v2 = vsel %vm3251_vm3, %v3238_v61, %v3118_v18 }
 0x935   : > { %v3276_v46 = vsel %vm3270_vm4, %v3257_v2, %v3190_v29 }
 0x936   : > { %7478 = vmatmul.msk.f32.gmra.mxu3 %vm149_vm0, %v3276_v46  ;;  %v14072_v46 = vld [vmem:[#allocation67_spill] sm:$0xff] }
 0x93a   : > { %v2990_v59 = vpop.f32.mrf.mxu2  ;;  %v3056_v57 = vpop.permute.xlu1 %3055 }
 0x93b   : > { %v3120_v28 = vpop.permute.xlu0 %3119  ;;  %3197 = vrot.lane.b32.xlu2 %v2990_v59, %s8952_s29  ;;  %v3243_v54 = vsel %vm391_vm1, %v14072_v46, %v3056_v57 }
 0x93c   : > { %v3258_v21 = vsel %vm3251_vm3, %v3239_v55, %v3120_v28 }
 0x93d   : > { %v3277_v25 = vsel %vm3270_vm4, %v3258_v21, %v3192_v49 }
 0x93e   : > { %7479 = vmatmul.msk.f32.gmra.mxu3 %vm149_vm0, %v3277_v25  ;;  %v14073_v25 = vld [vmem:[#allocation27_spill] sm:$0xff] }
 0x942   : > { %v3058_v29 = vpop.permute.xlu1 %3057 }
 0x943   : > { %v3122_v16 = vpop.permute.xlu0 %3121 }
 0x944   : > { %v3259_v22 = vsel %vm3251_vm3, %v3240_v42, %v3122_v16 }
 0x94a   : > { %v3060_v21 = vpop.permute.xlu1 %3059 }
 0x94b   : > { %v3124_v10 = vpop.permute.xlu0 %3123 }
 0x94c   : > { %v3260_v47 = vsel %vm3251_vm3, %v3241_v1, %v3124_v10  ;;  %v3244_v10 = vsel %vm391_vm1, %v14075_v32, %v3058_v29 }
 0x953   : > { %v3126_v41 = vpop.permute.xlu0 %3125 }
 0x954   : > { %v3261_v11 = vsel %vm3251_vm3, %v3242_v35, %v3126_v41 }
 0x95b   : > { %v3128_v56 = vpop.permute.xlu0 %3127 }
 0x95c   : > { %v3262_v59 = vsel %vm3251_vm3, %v3243_v54, %v3128_v56 }
 0x961   : > { %v3194_v37 = vpop.permute.xlu2 %3193 }
 0x962   : > { %v3278_v33 = vsel %vm3270_vm4, %v3259_v22, %v3194_v37  ;;  %v14074_v22 = vld [vmem:[#allocation23_spill] sm:$0xff] }
 0x963   : > { %7480 = vmatmul.msk.f32.gmra.mxu3 %vm149_vm0, %v3278_v33  ;;  %v3130_v61 = vpop.permute.xlu0 %3129 }
 0x964   : > { %v3263_v9 = vsel %vm3251_vm3, %v3244_v10, %v3130_v61 }
 0x965   : > { %v2993_v58 = vpop.f32.mrf.mxu2 }
 0x966   : > { %3199 = vrot.lane.b32.xlu2 %v2993_v58, %s8952_s29 }
 0x96b   : > { %v3132_v42 = vpop.permute.xlu0 %3131 }
 0x96d   : > { %v2996_v34 = vpop.f32.mrf.mxu2 }
 0x96e   : > { %3201 = vrot.lane.b32.xlu2 %v2996_v34, %s8952_s29 }
 0x974   : > { %v3196_v31 = vpop.permute.xlu2 %3195 }
 0x975   : > { %v3279_v6 = vsel %vm3270_vm4, %v3260_v47, %v3196_v31  ;;  %v2999_v13 = vpop.f32.mrf.mxu2  ;;  %v14076_v31 = vld [vmem:[#allocation24_spill] sm:$0xff] }
 0x976   : > { %3203 = vrot.lane.b32.xlu2 %v2999_v13, %s8952_s29  ;;  %7481 = vmatmul.msk.f32.gmra.mxu3 %vm149_vm0, %v3279_v6  ;;  %v3062_v13 = vpop.permute.xlu1 %3061 }
 0x977   : > { %v3246_v35 = vsel %vm391_vm1, %v14078_v7, %v3062_v13 }
 0x97d   : > { %v3002_v52 = vpop.f32.mrf.mxu2 }
 0x97e   : > { %3205 = vrot.lane.b32.xlu2 %v3002_v52, %s8952_s29  ;;  %v3134_v52 = vpop.permute.xlu0 %3133 }
 0x985   : > { %v3005_v36 = vpop.f32.mrf.mxu2 }
 0x986   : > { %3207 = vrot.lane.b32.xlu2 %v3005_v36, %s8952_s29 }
 0x98d   : > { %v3008_v63 = vpop.f32.mrf.mxu2 }
 0x98e   : > { %3209 = vrot.lane.b32.xlu2 %v3008_v63, %s8952_s29  ;;  %v14077_v63 = vld [vmem:[#allocation71_spill] sm:$0xff] }
 0x98f   : > { %v3370_v17 = vpop.f32.mrf.mxu3 }
 0x990   : > { %v3371_v23 = vadd.f32 %v11527_v40, %v3370_v17  ;;  %v3245_v17 = vsel %vm391_vm1, %v14077_v63, %v3060_v21 }
 0x992   : > { %v11532_v43 = vadd.f32 %v14067_v38, %v3371_v23  ;;  %v3264_v23 = vsel %vm3251_vm3, %v3245_v17, %v3132_v42  ;;  %v3064_v38 = vpop.permute.xlu1 %3063 }
 0x994   : > { %v3445_v4 = vsel %vm149_vm0, %v11532_v43, 0.0 }
 0x995   : > { %v3198_v0 = vpop.permute.xlu2 %3197  ;;  %v3011_v8 = vpop.f32.mrf.mxu2  ;;  %3446 = vadd.xlane.f32.xlu1 %v3445_v4 }
 0x996   : > { %v3280_v3 = vsel %vm3270_vm4, %v3261_v11, %v3198_v0  ;;  %3211 = vrot.lane.b32.xlu2 %v3011_v8, %s8952_s29  ;;  %v3136_v4 = vpop.permute.xlu0 %3135  ;;  %v3265_v11 = vsel %vm3251_vm3, %v3246_v35, %v3134_v52  ;;  %v14083_v52 = vld [vmem:[#allocation22_spill] sm:$0xff] }
 0x997   : > { %7482 = vmatmul.msk.f32.gmra.mxu3 %vm149_vm0, %v3280_v3  ;;  %v14079_v3 = vld [vmem:[#allocation75_spill] sm:$0xff] }
 0x998   : > { %v3373_v20 = vpop.f32.mrf.mxu3 }
 0x999   : > { %v3374_v48 = vadd.f32 %v11527_v40, %v3373_v20  ;;  %v3247_v20 = vsel %vm391_vm1, %v14079_v3, %v3064_v38  ;;  %v14084_v38 = vld [vmem:[#allocation21_spill] sm:$0xff] }
 0x99b   : > { %v11544_v27 = vadd.f32 %v14069_v60, %v3374_v48  ;;  %v3066_v48 = vpop.permute.xlu1 %3065  ;;  %v3266_v60 = vsel %vm3251_vm3, %v3247_v20, %v3136_v4 }
 0x99d   : > { %v3014_v62 = vpop.f32.mrf.mxu2  ;;  %v3448_v39 = vsel %vm149_vm0, %v11544_v27, 0.0 }
 0x99e   : > { %3213 = vrot.lane.b32.xlu2 %v3014_v62, %s8952_s29  ;;  %3449 = vadd.xlane.f32.xlu0 %v3448_v39  ;;  %v3138_v39 = vpop.permute.xlu0 %3137  ;;  %s7510_s29 = sshll.u32 %s8909_s0, 6  ;;  %s119_s0 = sadd.s32 1, %s8909_s0  }
 0x99f   : > { %s4184_s13 = scalar_lea.vmem %s14096_s10, %s7510_s29  ;;  %p12434_p0 = scmp.ge.s32.totalorder %s119_s0, 2  }
 0x9a0   : > { %v3376_v53 = vpop.f32.mrf.mxu3  ;;  %s14111_s11 = sld [smem:[#allocation88_spill]] (%p12434_p0)  ;;  %s12542_s26 = smov (%p12434_p0), 0  }
 0x9a1   : > { %v3377_v2 = vadd.f32 %v11527_v40, %v3376_v53  ;;  %s14112_s0 = sld [smem:[#allocation89_spill]] (%p12434_p0) }
 0x9a2   :  { %s14113_s4 = sld [smem:[#allocation87_spill]] (%p12434_p0) }
 0x9a3   : > { %v11567_v44 = vadd.f32 %v14073_v25, %v3377_v2  ;;  %v3068_v56 = vpop.permute.xlu1 %3067 }
 0x9a5   : > { %v3451_v34 = vsel %vm149_vm0, %v11567_v44, 0.0 }
 0x9a9   : > { %v3379_v50 = vpop.f32.mrf.mxu3 }
 0x9aa   : > { %v3380_v30 = vadd.f32 %v11527_v40, %v3379_v50  ;;  %v14080_v50 = vld [vmem:[#allocation85_spill] sm:$0xff] }
 0x9ab   : > { %v3070_v46 = vpop.permute.xlu1 %3069 }
 0x9ac   : > { %v11551_v45 = vadd.f32 %v14070_v12, %v3380_v30  ;;  %v3248_v30 = vsel %vm391_vm1, %v14080_v50, %v3066_v48 }
 0x9ad   : > { %v3267_v12 = vsel %vm3251_vm3, %v3248_v30, %v3138_v39 }
 0x9ae   : > { %v3454_v24 = vsel %vm149_vm0, %v11551_v45, 0.0 }
 0x9af   : > { %3455 = vadd.xlane.f32.xlu1 %v3454_v24 }
 0x9b1   : > { %v3382_v14 = vpop.f32.mrf.mxu3 }
 0x9b2   : > { %v3383_v51 = vadd.f32 %v11527_v40, %v3382_v14  ;;  %v3140_v14 = vpop.permute.xlu0 %3139 }
 0x9b4   : > { %v11557_v19 = vadd.f32 %v14071_v5, %v3383_v51  ;;  %v8953_v51 = vmov 32.0   ;;  %v14081_v5 = vld [vmem:[#allocation62_spill] sm:$0xff] }
 0x9b5   : > { %8410 = vrcp.f32 %v8953_v51 }
 0x9b6   : > { %v3457_v26 = vsel %vm149_vm0, %v11557_v19, 0.0 }
 0x9b7   : > { %3458 = vadd.xlane.f32.xlu0 %v3457_v26  ;;  %v3249_v26 = vsel %vm391_vm1, %v14081_v5, %v3068_v56  ;;  %v14085_v56 = vld [vmem:[#allocation20_spill] sm:$0xff] }
 0x9b8   : > { %v3268_v29 = vsel %vm3251_vm3, %v3249_v26, %v3140_v14 }
 0x9b9   : > { %v3385_v18 = vpop.f32.mrf.mxu3 }
 0x9ba   : > { %v3386_v33 = vadd.f32 %v11527_v40, %v3385_v18  ;;  %v3142_v54 = vpop.permute.xlu0 %3141 }
 0x9bb   : > { %v8411_v2 = vpop.eup %8410 }
 0x9bc   : > { %v11584_v6 = vadd.f32 %v14076_v31, %v3386_v33  ;;  %vm3504_vm5 = vweird.f32 %v8411_v2 }
 0x9be   : > { %v3460_v36 = vsel %vm149_vm0, %v11584_v6, 0.0 }
 0x9c0   : > { %v3200_v55 = vpop.permute.xlu2 %3199 }
 0x9c1   : > { %v3281_v28 = vsel %vm3270_vm4, %v3262_v59, %v3200_v55  ;;  %v3388_v49 = vpop.f32.mrf.mxu3  ;;  %v3500_v59 = vmul.f32 32.0, %v8411_v2  ;;  %v14082_v55 = vld [vmem:[#allocation61_spill] sm:$0xff] }
 0x9c2   : > { %v3389_v16 = vadd.f32 %v11527_v40, %v3388_v49  ;;  %7483 = vmatmul.msk.f32.gmra.mxu3 %vm149_vm0, %v3281_v28  ;;  %v3250_v28 = vsel %vm391_vm1, %v14082_v55, %v3070_v46 }
 0x9c3   : > { %v3269_v49 = vsel %vm3251_vm3, %v3250_v28, %v3142_v54 }
 0x9c4   : > { %v11572_v37 = vadd.f32 %v14074_v22, %v3389_v16  ;;  %v3501_v16 = vsub.f32 1.0, %v3500_v59 }
 0x9c6   : > { %v3463_v58 = vsel %vm149_vm0, %v11572_v37, 0.0  ;;  %v3502_v42 = vmul.f32 %v8411_v2, %v3501_v16 }
 0x9c7   : > { %3464 = vadd.xlane.f32.xlu0 %v3463_v58  ;;  %3452 = vadd.xlane.f32.xlu2 %v3451_v34 }
 0x9c8   : > { %v3202_v1 = vpop.permute.xlu2 %3201  ;;  %v3503_v22 = vadd.f32 %v8411_v2, %v3502_v42 }
 0x9c9   : > { %v3282_v47 = vsel %vm3270_vm4, %v3263_v9, %v3202_v1 }
 0x9ca   : > { %7484 = vmatmul.msk.f32.gmra.mxu3 %vm149_vm0, %v3282_v47  ;;  %v11619_v33 = vsel %vm3504_vm5, %v8411_v2, %v3503_v22 }
 0x9cf   : > { %3461 = vadd.xlane.f32.xlu2 %v3460_v36 }
 0x9d0   : > { %v3204_v15 = vpop.permute.xlu2 %3203 }
 0x9d1   : > { %v3283_v41 = vsel %vm3270_vm4, %v3264_v23, %v3204_v15 }
 0x9d2   : > { %7485 = vmatmul.msk.f32.gmra.mxu3 %vm149_vm0, %v3283_v41 }
 0x9d8   : > { %v3206_v0 = vpop.permute.xlu2 %3205 }
 0x9d9   : > { %v3284_v8 = vsel %vm3270_vm4, %v3265_v11, %v3206_v0 }
 0x9da   : > { %7486 = vmatmul.msk.f32.gmra.mxu3 %vm149_vm0, %v3284_v8 }
 0x9e0   : > { %v3208_v62 = vpop.permute.xlu2 %3207 }
 0x9e1   : > { %v3285_v53 = vsel %vm3270_vm4, %v3266_v60, %v3208_v62 }
 0x9e2   : > { %7487 = vmatmul.msk.f32.gmra.mxu3 %vm149_vm0, %v3285_v53 }
 0x9e6   : > { %v3391_v10 = vpop.f32.mrf.mxu3 }
 0x9e7   : > { %v3392_v1 = vadd.f32 %v11527_v40, %v3391_v10 }
 0x9e8   : > { %v3210_v57 = vpop.permute.xlu2 %3209 }
 0x9e9   : > { %v3286_v24 = vsel %vm3270_vm4, %v3267_v12, %v3210_v57  ;;  %v11631_v36 = vadd.f32 %v14083_v52, %v3392_v1  ;;  %v3890_v52 = vld [vmem:[%s3886_s9 + $0x18] sm:$0xff] }
 0x9ea   : > { %7488 = vmatmul.msk.f32.gmra.mxu3 %vm149_vm0, %v3286_v24  ;;  %3962 = vmatpush.msra.mxu0 %v3890_v52 }
 0x9eb   : > { %v3466_v23 = vsel %vm149_vm0, %v11631_v36, 0.0 }
 0x9f0   : > { %v3212_v61 = vpop.permute.xlu2 %3211 }
 0x9f1   : > { %v3287_v18 = vsel %vm3270_vm4, %v3268_v29, %v3212_v61  ;;  %v14086_v29 = vld [vmem:[#allocation19_spill] sm:$0xff] }
 0x9f2   : > { %7489 = vmatmul.msk.f32.gmra.mxu3 %vm149_vm0, %v3287_v18 }
 0x9f8   : > { %v3214_v21 = vpop.permute.xlu2 %3213 }
 0x9f9   : > { %v3288_v25 = vsel %vm3270_vm4, %v3269_v49, %v3214_v21  ;;  %v14087_v49 = vld [vmem:[#allocation18_spill] sm:$0xff] }
 0x9fa   : > { %7490 = vmatmul.msk.f32.gmra.mxu3 %vm149_vm0, %v3288_v25 }
 0xa08   : > { %v3447_v58 = vpop.xlane.xlu1 %3446 }
 0xa09   : > { %v3506_v34 = vmul.f32 %v11619_v33, %v3447_v58  ;;  %v14088_v58 = vld [vmem:[#allocation17_spill] sm:$0xff] }
 0xa0b   : > { %v11623_v32 = vsub.f32 %v11532_v43, %v3506_v34  ;;  %v3394_v43 = vpop.f32.mrf.mxu3 }
 0xa0c   : > { %v3395_v15 = vadd.f32 %v11527_v40, %v3394_v43  ;;  %v3889_v43 = vld [vmem:[%s3886_s9 + $0x10] sm:$0xff] }
 0xa0d   : > { %v3542_v9 = vmul.f32 %v11623_v32, %v11623_v32  ;;  %3963 = vmatpush.msra.mxu0 %v3889_v43 }
 0xa0e   : > { %v11643_v7 = vadd.f32 %v14084_v38, %v3395_v15 }
 0xa0f   : > { %v3560_v47 = vsel %vm149_vm0, %v3542_v9, 0.0 }
 0xa10   : > { %3561 = vadd.xlane.f32.xlu1 %v3560_v47  ;;  %v14089_v47 = vld [vmem:[#allocation16_spill] sm:$0xff] }
 0xa11   : > { %v3450_v31 = vpop.xlane.xlu0 %3449 }
 0xa12   : > { %v3507_v13 = vmul.f32 %v11619_v33, %v3450_v31 }
 0xa14   : > { %v11634_v63 = vsub.f32 %v11544_v27, %v3507_v13  ;;  %v3469_v27 = vsel %vm149_vm0, %v11643_v7, 0.0 }
 0xa16   : > { %v3543_v17 = vmul.f32 %v11634_v63, %v11634_v63 }
 0xa18   : > { %3467 = vadd.xlane.f32.xlu1 %v3466_v23  ;;  %v3563_v41 = vsel %vm149_vm0, %v3543_v17, 0.0  ;;  %v3888_v17 = vld [vmem:[%s3886_s9 + $0x8] sm:$0xff]  ;;  %v3887_v23 = vld [vmem:[%s3886_s9] sm:$0xff] }
 0xa19   : > { %3564 = vadd.xlane.f32.xlu2 %v3563_v41  ;;  %3964 = vmatpush.msra.mxu0 %v3888_v17 }
 0xa1a   : > { %v3397_v53 = vpop.f32.mrf.mxu3 }
 0xa1b   : > { %v3398_v12 = vadd.f32 %v11527_v40, %v3397_v53  ;;  %3965 = vmatpush.msra.mxu0 %v3887_v23 }
 0xa1d   : > { %v11670_v14 = vadd.f32 %v14085_v56, %v3398_v12  ;;  %v14092_v56 = vld [vmem:[#allocation15_spill] sm:$0xff] }
 0xa1f   : > { %v3472_v2 = vsel %vm149_vm0, %v11670_v14, 0.0 }
 0xa21   : > { %3470 = vadd.xlane.f32.xlu2 %v3469_v27 }
 0xa22   : > { %v3456_v35 = vpop.xlane.xlu1 %3455 }
 0xa23   : > { %v3509_v4 = vmul.f32 %v11619_v33, %v3456_v35 }
 0xa25   : > { %v11649_v11 = vsub.f32 %v11551_v45, %v3509_v4 }
 0xa27   : > { %v3545_v0 = vmul.f32 %v11649_v11, %v11649_v11 }
 0xa29   : > { %v3569_v8 = vsel %vm149_vm0, %v3545_v0, 0.0 }
 0xa2a   : > { %v3459_v3 = vpop.xlane.xlu0 %3458  ;;  %3570 = vadd.xlane.f32.xlu1 %v3569_v8 }
 0xa2b   : > { %v3510_v20 = vmul.f32 %v11619_v33, %v3459_v3 }
 0xa2d   : > { %v11656_v48 = vsub.f32 %v11557_v19, %v3510_v20 }
 0xa2f   : > { %v3546_v60 = vmul.f32 %v11656_v48, %v11656_v48 }
 0xa31   : > { %v3572_v62 = vsel %vm149_vm0, %v3546_v60, 0.0 }
 0xa32   : > { %3573 = vadd.xlane.f32.xlu2 %v3572_v62 }
 0xa3a   : > { %v3453_v45 = vpop.xlane.xlu2 %3452  ;;  %v3465_v24 = vpop.xlane.xlu0 %3464 }
 0xa3b   : > { %v3508_v39 = vmul.f32 %v11619_v33, %v3453_v45  ;;  %v3512_v26 = vmul.f32 %v11619_v33, %v3465_v24 }
 0xa3d   : > { %v11663_v50 = vsub.f32 %v11567_v44, %v3508_v39  ;;  %v11684_v46 = vsub.f32 %v11572_v37, %v3512_v26 }
 0xa3f   : > { %v3544_v30 = vmul.f32 %v11663_v50, %v11663_v50 }
 0xa41   : > { %v3566_v19 = vsel %vm149_vm0, %v3544_v30, 0.0 }
 0xa42   : > { %v3462_v57 = vpop.xlane.xlu2 %3461  ;;  %3567 = vadd.xlane.f32.xlu0 %v3566_v19  ;;  %v3426_v19 = vld [vmem:[%s3425_s27] sm:$0x3] }
 0xa43   : > { %v3511_v51 = vmul.f32 %v11619_v33, %v3462_v57 }
 0xa45   : > { %v3400_v5 = vpop.f32.mrf.mxu3  ;;  %v11679_v18 = vsub.f32 %v11584_v6, %v3511_v51  ;;  %v3548_v6 = vmul.f32 %v11684_v46, %v11684_v46 }
 0xa46   : > { %v3401_v44 = vadd.f32 %v11527_v40, %v3400_v5 }
 0xa47   : > { %v3547_v55 = vmul.f32 %v11679_v18, %v11679_v18  ;;  %v3578_v16 = vsel %vm149_vm0, %v3548_v6, 0.0 }
 0xa48   : > { %v11676_v61 = vadd.f32 %v14086_v29, %v3401_v44  ;;  %v11739_v29 = vperm.slane %v3426_v19, 0 }
 0xa49   : > { %v3575_v37 = vsel %vm149_vm0, %v3547_v55, 0.0 }
 0xa4a   : > { %3473 = vadd.xlane.f32.xlu0 %v3472_v2  ;;  %v3475_v54 = vsel %vm149_vm0, %v11676_v61, 0.0 }
 0xa4b   : > { %3476 = vadd.xlane.f32.xlu1 %v3475_v54 }
 0xa4d   : > { %v3403_v59 = vpop.f32.mrf.mxu3 }
 0xa4e   : > { %v3404_v28 = vadd.f32 %v11527_v40, %v3403_v59 }
 0xa50   : > { %v11694_v21 = vadd.f32 %v14087_v49, %v3404_v28  ;;  %v11743_v28 = vperm.slane %v3426_v19, 1 }
 0xa52   : > { %3576 = vadd.xlane.f32.xlu0 %v3575_v37  ;;  %v3478_v25 = vsel %vm149_vm0, %v11694_v21, 0.0 }
 0xa53   : > { %3479 = vadd.xlane.f32.xlu2 %v3478_v25  ;;  %3579 = vadd.xlane.f32.xlu1 %v3578_v16 }
 0xa55   : > { %v3406_v42 = vpop.f32.mrf.mxu3 }
 0xa56   : > { %v3407_v22 = vadd.f32 %v11527_v40, %v3406_v42 }
 0xa58   : > { %v11702_v34 = vadd.f32 %v14088_v58, %v3407_v22 }
 0xa5a   : > { %v3481_v10 = vsel %vm149_vm0, %v11702_v34, 0.0 }
 0xa5b   : > { %3482 = vadd.xlane.f32.xlu0 %v3481_v10  ;;  %v14093_v10 = vld [vmem:[#allocation14_spill] sm:$0xff] }
 0xa5d   : > { %v3409_v9 = vpop.f32.mrf.mxu3 }
 0xa5e   : > { %v3410_v1 = vadd.f32 %v11527_v40, %v3409_v9 }
 0xa60   : > { %v11708_v31 = vadd.f32 %v14089_v47, %v3410_v1 }
 0xa62   : > { %v3484_v13 = vsel %vm149_vm0, %v11708_v31, 0.0 }
 0xa63   : > { %3485 = vadd.xlane.f32.xlu1 %v3484_v13 }
 0xa65   : > { %v3412_v3 = vpop.f32.mrf.mxu3 }
 0xa66   : > { %v3413_v53 = vadd.f32 %v11527_v40, %v3412_v3 }
 0xa68   : > { %v11734_v51 = vadd.f32 %v14092_v56, %v3413_v53 }
 0xa6a   : > { %v3487_v37 = vsel %vm149_vm0, %v11734_v51, 0.0 }
 0xa6d   : > { %v3415_v2 = vpop.f32.mrf.mxu3 }
 0xa83   : > { %v3562_v15 = vpop.xlane.xlu1 %3561 }
 0xa84   : > { %v3614_v41 = vmul.f32 %v3562_v15, %v11619_v33 }
 0xa86   : > { %v3632_v38 = vadd.f32 1e-05, %v3614_v41 }
 0xa88   : > { %8412 = vrsqrt.f32 %v3632_v38  ;;  %vm3656_vm7 = vweird.f32 %v3632_v38 }
 0xa8b   : > { %v3468_v27 = vpop.xlane.xlu1 %3467 }
 0xa8c   : > { %v3513_v35 = vmul.f32 %v11619_v33, %v3468_v27  ;;  %v3565_v4 = vpop.xlane.xlu2 %3564 }
 0xa8d   : > { %v3615_v0 = vmul.f32 %v3565_v4, %v11619_v33 }
 0xa8e   : > { %v8413_v8 = vpop.eup %8412  ;;  %v11720_v20 = vsub.f32 %v11631_v36, %v3513_v35  ;;  %v3418_v35 = vpop.f32.mrf.mxu3 }
 0xa8f   : > { %v3651_v60 = vmul.f32 %v8413_v8, %v3632_v38  ;;  %v3633_v62 = vadd.f32 1e-05, %v3615_v0  ;;  %vm3657_vm6 = vweird.f32 %v8413_v8 }
 0xa90   : > { %v3549_v45 = vmul.f32 %v11720_v20, %v11720_v20  ;;  %vm3658_vm8 = vmor %vm3656_vm7, %vm3657_vm6 }
 0xa91   : > { %v3652_v39 = vmul.f32 %v8413_v8, %v3651_v60  ;;  %8414 = vrsqrt.f32 %v3633_v62  ;;  %vm3666_vm10 = vweird.f32 %v3633_v62 }
 0xa92   : > { %v3581_v30 = vsel %vm149_vm0, %v3549_v45, 0.0 }
 0xa93   : > { %v3653_v12 = vmul.f32 0.5, %v3652_v39  ;;  %3582 = vadd.xlane.f32.xlu2 %v3581_v30 }
 0xa94   : > { %v3471_v36 = vpop.xlane.xlu2 %3470 }
 0xa95   : > { %v3654_v57 = vsub.f32 1.5, %v3653_v12  ;;  %v3514_v24 = vmul.f32 %v11619_v33, %v3471_v36 }
 0xa96   : > { %v3421_v30 = vpop.f32.mrf.mxu3 }
 0xa97   : > { %v8415_v5 = vpop.eup %8414  ;;  %v3655_v26 = vmul.f32 %v8413_v8, %v3654_v57  ;;  %v11737_v44 = vsub.f32 %v11643_v7, %v3514_v24  ;;  %v3416_v7 = vadd.f32 %v11527_v40, %v3415_v2  ;;  %v3422_v2 = vadd.f32 %v11527_v40, %v3421_v30 }
 0xa98   : > { %v3661_v54 = vmul.f32 %v8415_v5, %v3633_v62  ;;  %vm3667_vm9 = vweird.f32 %v8415_v5 }
 0xa99   : > { %v3659_v59 = vsel %vm3658_vm8, %v8413_v8, %v3655_v26  ;;  %v3550_v55 = vmul.f32 %v11737_v44, %v11737_v44  ;;  %vm3668_vm11 = vmor %vm3666_vm10, %vm3667_vm9  ;;  %v3419_v26 = vadd.f32 %v11527_v40, %v3418_v35  ;;  %v14095_v40 = vld [vmem:[#allocation12_spill] sm:$0xff] }
 0xa9a   : > { %v3830_v6 = vmul.f32 %v3659_v59, %v11623_v32  ;;  %v3662_v49 = vmul.f32 %v8415_v5, %v3661_v54  ;;  %v11755_v32 = vadd.f32 %v14093_v10, %v3416_v7 }
 0xa9b   : > { %3488 = vadd.xlane.f32.xlu2 %v3487_v37  ;;  %v3584_v25 = vsel %vm149_vm0, %v3550_v55, 0.0 }
 0xa9c   : > { %v3849_v16 = vmul.f32 %v11739_v29, %v3830_v6  ;;  %v3663_v42 = vmul.f32 0.5, %v3662_v49  ;;  %3585 = vadd.xlane.f32.xlu0 %v3584_v25  ;;  %v3490_v13 = vsel %vm149_vm0, %v11755_v32, 0.0  ;;  %v14094_v25 = vld [vmem:[#allocation13_spill] sm:$0xff] }
 0xa9d   : > { %v3571_v52 = vpop.xlane.xlu1 %3570 }
 0xa9e   : > { %v11752_v22 = vadd.f32 %v11743_v28, %v3849_v16  ;;  %v3664_v58 = vsub.f32 1.5, %v3663_v42  ;;  %v3617_v17 = vmul.f32 %v3571_v52, %v11619_v33  ;;  %v11800_v16 = vadd.f32 %v14094_v25, %v3419_v26 }
 0xa9f   : > { %v11803_v42 = vadd.f32 %v14095_v40, %v3422_v2 }
 0xaa0   : > { %v3665_v9 = vmul.f32 %v8415_v5, %v3664_v58  ;;  %7492 = vmatmul.msk.f32.vlgmr.msra.gmra.mxu0 %vm149_vm0, %v11752_v22  ;;  %v3635_v15 = vadd.f32 1e-05, %v3617_v17 }
 0xaa2   : > { %v3669_v1 = vsel %vm3668_vm11, %v8415_v5, %v3665_v9  ;;  %8416 = vrsqrt.f32 %v3635_v15  ;;  %vm3686_vm2 = vweird.f32 %v3635_v15 }
 0xaa3   : > { %v3831_v47 = vmul.f32 %v3669_v1, %v11634_v63 }
 0xaa4   : > { %3491 = vadd.xlane.f32.xlu0 %v3490_v13 }
 0xaa5   : > { %v3850_v43 = vmul.f32 %v11739_v29, %v3831_v47  ;;  %v3574_v41 = vpop.xlane.xlu2 %3573 }
 0xaa6   : > { %v3618_v63 = vmul.f32 %v3574_v41, %v11619_v33 }
 0xaa7   : > { %v11765_v23 = vadd.f32 %v11743_v28, %v3850_v43 }
 0xaa8   : > { %v11770_v38 = vadd.f32 1e-05, %v3618_v63  ;;  %v11772_v27 = vpop.eup %8416 }
 0xaa9   : > { %7493 = vmatmul.msk.f32.gmra.mxu0 %vm149_vm0, %v11765_v23  ;;  %v3681_v8 = vmul.f32 %v11772_v27, %v3635_v15  ;;  %vm3687_vm13 = vweird.f32 %v11772_v27  ;;  %v3496_v15 = vsel %vm149_vm0, %v11803_v42, 0.0 }
 0xaaa   : > { %8418 = vrsqrt.f32 %v11770_v38  ;;  %vm3688_vm5 = vmor %vm3686_vm2, %vm3687_vm13  ;;  %vm3696_vm7 = vweird.f32 %v11770_v38 }
 0xaab   : > { %v3682_v60 = vmul.f32 %v11772_v27, %v3681_v8 }
 0xaad   : > { %v3683_v19 = vmul.f32 0.5, %v3682_v60 }
 0xaaf   : > { %v3684_v6 = vsub.f32 1.5, %v3683_v19 }
 0xab0   : > { %v11778_v62 = vpop.eup %8418 }
 0xab1   : > { %v3691_v57 = vmul.f32 %v11778_v62, %v11770_v38  ;;  %v3685_v52 = vmul.f32 %v11772_v27, %v3684_v6  ;;  %vm3697_vm6 = vweird.f32 %v11778_v62 }
 0xab2   : > { %vm3698_vm8 = vmor %vm3696_vm7, %vm3697_vm6 }
 0xab3   : > { %v3692_v49 = vmul.f32 %v11778_v62, %v3691_v57 }
 0xab5   : > { %v3568_v4 = vpop.xlane.xlu0 %3567  ;;  %v3693_v43 = vmul.f32 0.5, %v3692_v49 }
 0xab6   : > { %v3616_v0 = vmul.f32 %v3568_v4, %v11619_v33 }
 0xab7   : > { %v3694_v60 = vsub.f32 1.5, %v3693_v43 }
 0xab8   : > { %v3634_v3 = vadd.f32 1e-05, %v3616_v0 }
 0xab9   : > { %v3695_v19 = vmul.f32 %v11778_v62, %v3694_v60 }
 0xaba   : > { %8420 = vrsqrt.f32 %v3634_v3  ;;  %vm3676_vm14 = vweird.f32 %v3634_v3 }
 0xabd   : > { %v3474_v45 = vpop.xlane.xlu0 %3473 }
 0xabe   : > { %v3515_v39 = vmul.f32 %v11619_v33, %v3474_v45  ;;  %v3477_v53 = vpop.xlane.xlu1 %3476 }
 0xabf   : > { %v3516_v12 = vmul.f32 %v11619_v33, %v3477_v53 }
 0xac0   : > { %v8421_v36 = vpop.eup %8420  ;;  %v11785_v24 = vsub.f32 %v11670_v14, %v3515_v39 }
 0xac1   : > { %v3671_v56 = vmul.f32 %v8421_v36, %v3634_v3  ;;  %v11788_v5 = vsub.f32 %v11676_v61, %v3516_v12  ;;  %vm3677_vm12 = vweird.f32 %v8421_v36  ;;  %v3493_v3 = vsel %vm149_vm0, %v11800_v16, 0.0 }
 0xac2   : > { %v3551_v54 = vmul.f32 %v11785_v24, %v11785_v24  ;;  %vm3678_vm15 = vmor %vm3676_vm14, %vm3677_vm12 }
 0xac3   : > { %v3672_v59 = vmul.f32 %v8421_v36, %v3671_v56  ;;  %v3552_v55 = vmul.f32 %v11788_v5, %v11788_v5 }
 0xac4   : > { %v3587_v14 = vsel %vm149_vm0, %v3551_v54, 0.0 }
 0xac5   : > { %v3673_v37 = vmul.f32 0.5, %v3672_v59  ;;  %v3577_v7 = vpop.xlane.xlu0 %3576  ;;  %3588 = vadd.xlane.f32.xlu1 %v3587_v14  ;;  %v3590_v61 = vsel %vm149_vm0, %v3552_v55, 0.0  ;;  %v3699_v59 = vsel %vm3698_vm8, %v11778_v62, %v3695_v19 }
 0xac6   : > { %v3619_v58 = vmul.f32 %v3577_v7, %v11619_v33  ;;  %v3480_v10 = vpop.xlane.xlu2 %3479  ;;  %3591 = vadd.xlane.f32.xlu2 %v3590_v61  ;;  %v3580_v9 = vpop.xlane.xlu1 %3579  ;;  %v3834_v38 = vmul.f32 %v3699_v59, %v11656_v48 }
 0xac7   : > { %v3674_v1 = vsub.f32 1.5, %v3673_v37  ;;  %v3517_v47 = vmul.f32 %v11619_v33, %v3480_v10  ;;  %v3620_v13 = vmul.f32 %v3580_v9, %v11619_v33 }
 0xac8   : > { %v3637_v17 = vadd.f32 1e-05, %v3619_v58  ;;  %v3853_v58 = vmul.f32 %v11739_v29, %v3834_v38 }
 0xac9   : > { %v3675_v41 = vmul.f32 %v8421_v36, %v3674_v1  ;;  %v11811_v63 = vsub.f32 %v11694_v21, %v3517_v47  ;;  %v11813_v35 = vadd.f32 1e-05, %v3620_v13  ;;  %v3689_v21 = vsel %vm3688_vm5, %v11772_v27, %v3685_v52 }
 0xaca   : > { %8422 = vrsqrt.f32 %v3637_v17  ;;  %v3833_v12 = vmul.f32 %v3689_v21, %v11649_v11  ;;  %vm3706_vm10 = vweird.f32 %v3637_v17 }
 0xacb   : > { %v3679_v4 = vsel %vm3678_vm15, %v8421_v36, %v3675_v41  ;;  %8424 = vrsqrt.f32 %v11813_v35  ;;  %v3553_v0 = vmul.f32 %v11811_v63, %v11811_v63  ;;  %vm3716_vm13 = vweird.f32 %v11813_v35 }
 0xacc   : > { %v3832_v8 = vmul.f32 %v3679_v4, %v11663_v50  ;;  %v3852_v54 = vmul.f32 %v11739_v29, %v3833_v12 }
 0xacd   : > { %3494 = vadd.xlane.f32.xlu1 %v3493_v3  ;;  %v3593_v45 = vsel %vm149_vm0, %v3553_v0, 0.0  ;;  %v4192_v0 = vld [vmem:[%s4184_s13 + $0x38] sm:$0xff]  ;;  %v4190_v3 = vld [vmem:[%s4184_s13 + $0x28] sm:$0xff] }
 0xace   : > { %v3483_v39 = vpop.xlane.xlu0 %3482  ;;  %3594 = vadd.xlane.f32.xlu0 %v3593_v45  ;;  %3497 = vadd.xlane.f32.xlu2 %v3496_v15  ;;  %v3851_v53 = vmul.f32 %v11739_v29, %v3832_v8  ;;  %v11848_v7 = vadd.f32 %v11743_v28, %v3852_v54  ;;  %v4191_v8 = vld [vmem:[%s4184_s13 + $0x30] sm:$0xff]  ;;  %v4189_v15 = vld [vmem:[%s4184_s13 + $0x20] sm:$0xff] }
 0xacf   : > { %v3518_v30 = vmul.f32 %v11619_v33, %v3483_v39  ;;  %4261 = vmatpush.msrb.mxu1 %v4192_v0  ;;  %v4185_v54 = vld [vmem:[%s4184_s13] sm:$0xff] }
 0xad0   : > { %v8423_v50 = vpop.eup %8422  ;;  %v11829_v36 = vadd.f32 %v11743_v28, %v3851_v53 }
 0xad1   : > { %v8425_v27 = vpop.eup %8424  ;;  %v3701_v57 = vmul.f32 %v8423_v50, %v3637_v17  ;;  %v11834_v56 = vsub.f32 %v11702_v34, %v3518_v30  ;;  %vm3707_vm9 = vweird.f32 %v8423_v50  ;;  %4262 = vmatpush.msrb.mxu1 %v4191_v8 }
 0xad2   : > { %v3711_v26 = vmul.f32 %v8425_v27, %v11813_v35  ;;  %7494 = vmatmul.msk.f32.gmra.mxu0 %vm149_vm0, %v11829_v36  ;;  %vm3708_vm11 = vmor %vm3706_vm10, %vm3707_vm9  ;;  %vm3717_vm12 = vweird.f32 %v8425_v27  ;;  %vm4198_vm9 = vcmask 523264  }
 0xad3   : > { %v3702_v11 = vmul.f32 %v8423_v50, %v3701_v57  ;;  %v3554_v2 = vmul.f32 %v11834_v56, %v11834_v56  ;;  %vm3718_vm14 = vmor %vm3716_vm13, %vm3717_vm12  ;;  %4263 = vmatpush.msrb.mxu1 %v4190_v3  ;;  %v4187_v57 = vld [vmem:[%s4184_s13 + $0x10] sm:$0xff] }
 0xad4   : > { %v3712_v6 = vmul.f32 %v8425_v27, %v3711_v26 }
 0xad5   : > { %v3703_v55 = vmul.f32 0.5, %v3702_v11  ;;  %v3596_v34 = vsel %vm149_vm0, %v3554_v2, 0.0  ;;  %4264 = vmatpush.msrb.mxu1 %v4189_v15  ;;  %v4186_v2 = vld [vmem:[%s4184_s13 + $0x8] sm:$0xff] }
 0xad6   : > { %3597 = vadd.xlane.f32.xlu1 %v3596_v34  ;;  %v3486_v49 = vpop.xlane.xlu1 %3485  ;;  %v3713_v25 = vmul.f32 0.5, %v3712_v6 }
 0xad7   : > { %v3704_v14 = vsub.f32 1.5, %v3703_v55  ;;  %v3519_v37 = vmul.f32 %v11619_v33, %v3486_v49  ;;  %v11898_v49 = vld [vmem:[%s3891_s28] ss:$0 sm:$0xff] }
 0xad8   : > { %v3714_v10 = vsub.f32 1.5, %v3713_v25 }
 0xad9   : > { %v3705_v61 = vmul.f32 %v8423_v50, %v3704_v14  ;;  %v11851_v40 = vsub.f32 %v11708_v31, %v3519_v37  ;;  %v11861_v31 = vadd.f32 %v11743_v28, %v3853_v58 }
 0xada   : > { %7495 = vmatmul.msk.f32.gmra.mxu0 %vm149_vm0, %v11848_v7  ;;  %v3715_v47 = vmul.f32 %v8425_v27, %v3714_v10 }
 0xadb   : > { %v3555_v62 = vmul.f32 %v11851_v40, %v11851_v40  ;;  %v3709_v48 = vsel %vm3708_vm11, %v8423_v50, %v3705_v61  ;;  %v4188_v50 = vld [vmem:[%s4184_s13 + $0x18] sm:$0xff] }
 0xadc   : > { %v3835_v1 = vmul.f32 %v3709_v48, %v11679_v18  ;;  %v3719_v52 = vsel %vm3718_vm14, %v8425_v27, %v3715_v47  ;;  %4265 = vmatpush.msrb.mxu1 %v4188_v50 }
 0xadd   : > { %v3599_v9 = vsel %vm149_vm0, %v3555_v62, 0.0  ;;  %v3836_v43 = vmul.f32 %v3719_v52, %v11684_v46 }
 0xade   : > { %3600 = vadd.xlane.f32.xlu0 %v3599_v9  ;;  %v3854_v13 = vmul.f32 %v11739_v29, %v3835_v1  ;;  %4266 = vmatpush.msrb.mxu1 %v4187_v57 }
 0xadf   : > { %v3855_v18 = vmul.f32 %v11739_v29, %v3836_v43 }
 0xae0   : > { %v11869_v17 = vadd.f32 %v11743_v28, %v3854_v13  ;;  %4267 = vmatpush.msrb.mxu1 %v4186_v2 }
 0xae1   : > { %v11875_v41 = vadd.f32 %v11743_v28, %v3855_v18 }
 0xae2   : > { %7496 = vmatmul.msk.f32.gmra.mxu0 %vm149_vm0, %v11861_v31  ;;  %4268 = vmatpush.msrb.mxu1 %v4185_v54 }
 0xaea   : > { %7497 = vmatmul.msk.f32.gmra.mxu0 %vm149_vm0, %v11869_v17 }
 0xaf2   : > { %7498 = vmatmul.msk.f32.gmra.mxu0 %vm149_vm0, %v11875_v41 }
 0xb06   : > { %v3583_v35 = vpop.xlane.xlu2 %3582 }
 0xb07   : > { %v3621_v46 = vmul.f32 %v3583_v35, %v11619_v33 }
 0xb09   : > { %v3639_v4 = vadd.f32 1e-05, %v3621_v46 }
 0xb0b   : > { %8426 = vrsqrt.f32 %v3639_v4  ;;  %vm3726_vm2 = vweird.f32 %v3639_v4 }
 0xb0e   : > { %v3489_v21 = vpop.xlane.xlu2 %3488 }
 0xb0f   : > { %v3520_v60 = vmul.f32 %v11619_v33, %v3489_v21  ;;  %v3586_v45 = vpop.xlane.xlu0 %3585 }
 0xb10   : > { %v3622_v39 = vmul.f32 %v3586_v45, %v11619_v33 }
 0xb11   : > { %v8427_v53 = vpop.eup %8426  ;;  %v11887_v30 = vsub.f32 %v11734_v51, %v3520_v60 }
 0xb12   : > { %v3721_v12 = vmul.f32 %v8427_v53, %v3639_v4  ;;  %v3640_v27 = vadd.f32 1e-05, %v3622_v39  ;;  %vm3727_vm15 = vweird.f32 %v8427_v53 }
 0xb13   : > { %v3556_v19 = vmul.f32 %v11887_v30, %v11887_v30  ;;  %vm3728_vm5 = vmor %vm3726_vm2, %vm3727_vm15 }
 0xb14   : > { %v3722_v26 = vmul.f32 %v8427_v53, %v3721_v12  ;;  %8428 = vrsqrt.f32 %v3640_v27  ;;  %vm3736_vm7 = vweird.f32 %v3640_v27 }
 0xb15   : > { %v3602_v11 = vsel %vm149_vm0, %v3556_v19, 0.0 }
 0xb16   : > { %v3723_v59 = vmul.f32 0.5, %v3722_v26  ;;  %3603 = vadd.xlane.f32.xlu2 %v3602_v11 }
 0xb17   : > { %v3492_v51 = vpop.xlane.xlu0 %3491 }
 0xb18   : > { %v3724_v55 = vsub.f32 1.5, %v3723_v59  ;;  %v3521_v6 = vmul.f32 %v11619_v33, %v3492_v51 }
 0xb1a   : > { %v8429_v34 = vpop.eup %8428  ;;  %v3725_v14 = vmul.f32 %v8427_v53, %v3724_v55  ;;  %v11901_v37 = vsub.f32 %v11755_v32, %v3521_v6 }
 0xb1b   : > { %v3731_v38 = vmul.f32 %v8429_v34, %v3640_v27  ;;  %vm3737_vm6 = vweird.f32 %v8429_v34 }
 0xb1c   : > { %v3729_v61 = vsel %vm3728_vm5, %v8427_v53, %v3725_v14  ;;  %v3557_v25 = vmul.f32 %v11901_v37, %v11901_v37  ;;  %vm3738_vm8 = vmor %vm3736_vm7, %vm3737_vm6 }
 0xb1d   : > { %v3837_v62 = vmul.f32 %v3729_v61, %v11720_v20  ;;  %v3732_v58 = vmul.f32 %v8429_v34, %v3731_v38  ;;  %v3967_v48 = vpop.f32.mrf.mxu0 }
 0xb1e   : > { %v3968_v10 = vadd.f32 %v11898_v49, %v3967_v48  ;;  %v3605_v9 = vsel %vm149_vm0, %v3557_v25, 0.0 }
 0xb1f   : > { %v3733_v1 = vmul.f32 0.5, %v3732_v58  ;;  %3606 = vadd.xlane.f32.xlu1 %v3605_v9  ;;  %v3856_v47 = vmul.f32 %v11739_v29, %v3837_v62 }
 0xb20   : > { %v4021_v32 = vmul.f32 %v3968_v10, %v3968_v10 }
 0xb21   : > { %v3734_v13 = vsub.f32 1.5, %v3733_v1  ;;  %v11910_v52 = vadd.f32 %v11743_v28, %v3856_v47 }
 0xb22   : > { %v4039_v43 = vmul.f32 %v4021_v32, %v3968_v10 }
 0xb23   : > { %v3735_v18 = vmul.f32 %v8429_v34, %v3734_v13  ;;  %7499 = vmatmul.msk.f32.gmra.mxu0 %vm149_vm0, %v11910_v52 }
 0xb24   : > { %v4057_v20 = vmul.f32 0.044715, %v4039_v43 }
 0xb25   : > { %v3739_v35 = vsel %vm3738_vm8, %v8429_v34, %v3735_v18 }
 0xb26   : > { %v3838_v46 = vmul.f32 %v3739_v35, %v11737_v44  ;;  %v4075_v4 = vadd.f32 %v4057_v20, %v3968_v10  ;;  %v3970_v0 = vpop.f32.mrf.mxu0 }
 0xb27   : > { %v3971_v8 = vadd.f32 %v11898_v49, %v3970_v0 }
 0xb28   : > { %v4093_v3 = vmul.f32 0.7978846, %v4075_v4  ;;  %v3857_v21 = vmul.f32 %v11739_v29, %v3838_v46 }
 0xb29   : > { %v4022_v60 = vmul.f32 %v3971_v8, %v3971_v8 }
 0xb2a   : > { %8430 = vtanh.f32 %v4093_v3  ;;  %v11918_v45 = vadd.f32 %v11743_v28, %v3857_v21 }
 0xb2b   : > { %v4040_v15 = vmul.f32 %v4022_v60, %v3971_v8 }
 0xb2c   : > { %7500 = vmatmul.msk.f32.gmra.mxu0 %vm149_vm0, %v11918_v45 }
 0xb2d   : > { %v4058_v39 = vmul.f32 0.044715, %v4040_v15 }
 0xb2f   : > { %v4076_v53 = vadd.f32 %v4058_v39, %v3971_v8 }
 0xb30   : > { %v8431_v50 = vpop.eup %8430 }
 0xb31   : > { %v4129_v44 = vadd.f32 1.0, %v8431_v50  ;;  %v4094_v12 = vmul.f32 0.7978846, %v4076_v53 }
 0xb33   : > { %v4147_v27 = vmul.f32 0.5, %v4129_v44  ;;  %8432 = vtanh.f32 %v4094_v12 }
 0xb35   : > { %v4165_v19 = vmul.f32 %v4147_v27, %v3968_v10 }
 0xb37   : > { %7511 = vmatmul.msk.f32.vlgmr.msrb.gmra.mxu1 %vm4198_vm9, %v4165_v19 }
 0xb38   : > { %v3589_v57 = vpop.xlane.xlu1 %3588 }
 0xb39   : > { %v8433_v26 = vpop.eup %8432  ;;  %v3623_v11 = vmul.f32 %v3589_v57, %v11619_v33  ;;  %v3592_v2 = vpop.xlane.xlu2 %3591 }
 0xb3a   : > { %v3624_v54 = vmul.f32 %v3592_v2, %v11619_v33  ;;  %v4130_v59 = vadd.f32 1.0, %v8433_v26 }
 0xb3b   : > { %v3641_v51 = vadd.f32 1e-05, %v3623_v11 }
 0xb3c   : > { %v3642_v55 = vadd.f32 1e-05, %v3624_v54  ;;  %v4148_v6 = vmul.f32 0.5, %v4130_v59 }
 0xb3d   : > { %8434 = vrsqrt.f32 %v3641_v51  ;;  %vm3746_vm11 = vweird.f32 %v3641_v51 }
 0xb3e   : > { %8436 = vrsqrt.f32 %v3642_v55  ;;  %v4166_v34 = vmul.f32 %v4148_v6, %v3971_v8  ;;  %vm3756_vm14 = vweird.f32 %v3642_v55 }
 0xb40   : > { %7512 = vmatmul.msk.f32.gmra.mxu1 %vm4198_vm9, %v4166_v34  ;;  %v3495_v14 = vpop.xlane.xlu1 %3494 }
 0xb41   : > { %v3522_v38 = vmul.f32 %v11619_v33, %v3495_v14  ;;  %v3595_v61 = vpop.xlane.xlu0 %3594  ;;  %v3498_v25 = vpop.xlane.xlu2 %3497 }
 0xb42   : > { %v3625_v62 = vmul.f32 %v3595_v61, %v11619_v33  ;;  %v3523_v58 = vmul.f32 %v11619_v33, %v3498_v25 }
 0xb43   : > { %v8435_v48 = vpop.eup %8434  ;;  %v11930_v10 = vsub.f32 %v11800_v16, %v3522_v38 }
 0xb44   : > { %v8437_v9 = vpop.eup %8436  ;;  %v3741_v1 = vmul.f32 %v8435_v48, %v3641_v51  ;;  %v3643_v47 = vadd.f32 1e-05, %v3625_v62  ;;  %v11933_v32 = vsub.f32 %v11803_v42, %v3523_v58  ;;  %vm3747_vm10 = vweird.f32 %v8435_v48 }
 0xb45   : > { %v3751_v13 = vmul.f32 %v8437_v9, %v3642_v55  ;;  %v3558_v43 = vmul.f32 %v11930_v10, %v11930_v10  ;;  %vm3757_vm12 = vweird.f32 %v8437_v9  ;;  %vm3748_vm13 = vmor %vm3746_vm11, %vm3747_vm10 }
 0xb46   : > { %v3742_v18 = vmul.f32 %v8435_v48, %v3741_v1  ;;  %8438 = vrsqrt.f32 %v3643_v47  ;;  %v3559_v20 = vmul.f32 %v11933_v32, %v11933_v32  ;;  %vm3758_vm15 = vmor %vm3756_vm14, %vm3757_vm12  ;;  %vm3766_vm5 = vweird.f32 %v3643_v47 }
 0xb47   : > { %v3752_v35 = vmul.f32 %v8437_v9, %v3751_v13  ;;  %v3608_v46 = vsel %vm149_vm0, %v3558_v43, 0.0 }
 0xb48   : > { %v3743_v16 = vmul.f32 0.5, %v3742_v18  ;;  %3609 = vadd.xlane.f32.xlu0 %v3608_v46  ;;  %v3611_v4 = vsel %vm149_vm0, %v3559_v20, 0.0 }
 0xb49   : > { %v3753_v0 = vmul.f32 0.5, %v3752_v35  ;;  %3612 = vadd.xlane.f32.xlu2 %v3611_v4  ;;  %v3598_v42 = vpop.xlane.xlu1 %3597 }
 0xb4a   : > { %v3744_v8 = vsub.f32 1.5, %v3743_v16  ;;  %v3626_v3 = vmul.f32 %v3598_v42, %v11619_v33 }
 0xb4b   : > { %v3754_v21 = vsub.f32 1.5, %v3753_v0 }
 0xb4c   : > { %v8439_v60 = vpop.eup %8438  ;;  %v3745_v15 = vmul.f32 %v8435_v48, %v3744_v8  ;;  %v3644_v39 = vadd.f32 1e-05, %v3626_v3 }
 0xb4d   : > { %v3755_v53 = vmul.f32 %v8437_v9, %v3754_v21  ;;  %v3761_v50 = vmul.f32 %v8439_v60, %v3643_v47  ;;  %vm3767_vm2 = vweird.f32 %v8439_v60 }
 0xb4e   : > { %v3749_v44 = vsel %vm3748_vm13, %v8435_v48, %v3745_v15  ;;  %8440 = vrsqrt.f32 %v3644_v39  ;;  %vm3768_vm6 = vmor %vm3766_vm5, %vm3767_vm2  ;;  %vm3776_vm8 = vweird.f32 %v3644_v39 }
 0xb4f   : > { %v3839_v12 = vmul.f32 %v3749_v44, %v11785_v24  ;;  %v3762_v27 = vmul.f32 %v8439_v60, %v3761_v50  ;;  %v3973_v19 = vpop.f32.mrf.mxu0  ;;  %v3759_v57 = vsel %vm3758_vm15, %v8437_v9, %v3755_v53 }
 0xb50   : > { %v11944_v26 = vadd.f32 %v11898_v49, %v3973_v19  ;;  %v3840_v55 = vmul.f32 %v3759_v57, %v11788_v5 }
 0xb51   : > { %v3763_v11 = vmul.f32 0.5, %v3762_v27  ;;  %v3601_v2 = vpop.xlane.xlu0 %3600  ;;  %v3858_v54 = vmul.f32 %v11739_v29, %v3839_v12 }
 0xb52   : > { %v4023_v59 = vmul.f32 %v11944_v26, %v11944_v26  ;;  %v3627_v51 = vmul.f32 %v3601_v2, %v11619_v33  ;;  %v3859_v48 = vmul.f32 %v11739_v29, %v3840_v55 }
 0xb53   : > { %v3764_v6 = vsub.f32 1.5, %v3763_v11  ;;  %v11952_v24 = vadd.f32 %v11743_v28, %v3858_v54 }
 0xb54   : > { %v8441_v34 = vpop.eup %8440  ;;  %v4041_v14 = vmul.f32 %v4023_v59, %v11944_v26  ;;  %v3645_v38 = vadd.f32 1e-05, %v3627_v51  ;;  %v11962_v47 = vadd.f32 %v11743_v28, %v3859_v48 }
 0xb55   : > { %v3765_v61 = vmul.f32 %v8439_v60, %v3764_v6  ;;  %v3771_v25 = vmul.f32 %v8441_v34, %v3644_v39  ;;  %7501 = vmatmul.msk.f32.gmra.mxu0 %vm149_vm0, %v11952_v24  ;;  %vm3777_vm7 = vweird.f32 %v8441_v34 }
 0xb56   : > { %v4059_v62 = vmul.f32 0.044715, %v4041_v14  ;;  %8442 = vrsqrt.f32 %v3645_v38  ;;  %vm3778_vm10 = vmor %vm3776_vm8, %vm3777_vm7  ;;  %vm3786_vm12 = vweird.f32 %v3645_v38 }
 0xb57   : > { %v3772_v58 = vmul.f32 %v8441_v34, %v3771_v25  ;;  %v3976_v5 = vpop.f32.mrf.mxu0  ;;  %v3769_v9 = vsel %vm3768_vm6, %v8439_v60, %v3765_v61 }
 0xb58   : > { %v4077_v1 = vadd.f32 %v4059_v62, %v11944_v26  ;;  %v3977_v13 = vadd.f32 %v11898_v49, %v3976_v5  ;;  %v3841_v35 = vmul.f32 %v3769_v9, %v11811_v63 }
 0xb59   : > { %v3773_v43 = vmul.f32 0.5, %v3772_v58 }
 0xb5a   : > { %v4095_v18 = vmul.f32 0.7978846, %v4077_v1  ;;  %v4024_v20 = vmul.f32 %v3977_v13, %v3977_v13  ;;  %v3860_v63 = vmul.f32 %v11739_v29, %v3841_v35 }
 0xb5b   : > { %v3774_v46 = vsub.f32 1.5, %v3773_v43 }
 0xb5c   : > { %v8443_v16 = vpop.eup %8442  ;;  %8444 = vtanh.f32 %v4095_v18  ;;  %v4042_v4 = vmul.f32 %v4024_v20, %v3977_v13  ;;  %v11970_v11 = vadd.f32 %v11743_v28, %v3860_v63 }
 0xb5d   : > { %v3775_v0 = vmul.f32 %v8441_v34, %v3774_v46  ;;  %v3781_v42 = vmul.f32 %v8443_v16, %v3645_v38  ;;  %7502 = vmatmul.msk.f32.gmra.mxu0 %vm149_vm0, %v11962_v47  ;;  %vm3787_vm11 = vweird.f32 %v8443_v16 }
 0xb5e   : > { %v4060_v8 = vmul.f32 0.044715, %v4042_v4  ;;  %vm3788_vm13 = vmor %vm3786_vm12, %vm3787_vm11 }
 0xb5f   : > { %v3782_v3 = vmul.f32 %v8443_v16, %v3781_v42  ;;  %v3979_v21 = vpop.f32.mrf.mxu0  ;;  %v3779_v60 = vsel %vm3778_vm10, %v8441_v34, %v3775_v0 }
 0xb60   : > { %v4078_v15 = vadd.f32 %v4060_v8, %v3977_v13  ;;  %v3980_v53 = vadd.f32 %v11898_v49, %v3979_v21  ;;  %v3842_v19 = vmul.f32 %v3779_v60, %v11834_v56 }
 0xb61   : > { %v3783_v50 = vmul.f32 0.5, %v3782_v3 }
 0xb62   : > { %v8445_v44 = vpop.eup %8444  ;;  %v4096_v12 = vmul.f32 0.7978846, %v4078_v15  ;;  %v4025_v27 = vmul.f32 %v3980_v53, %v3980_v53  ;;  %v3861_v56 = vmul.f32 %v11739_v29, %v3842_v19 }
 0xb63   : > { %v3784_v57 = vsub.f32 1.5, %v3783_v50  ;;  %v4131_v39 = vadd.f32 1.0, %v8445_v44 }
 0xb64   : > { %8446 = vtanh.f32 %v4096_v12  ;;  %v4043_v2 = vmul.f32 %v4025_v27, %v3980_v53  ;;  %v11980_v38 = vadd.f32 %v11743_v28, %v3861_v56 }
 0xb65   : > { %v3785_v54 = vmul.f32 %v8443_v16, %v3784_v57  ;;  %7503 = vmatmul.msk.f32.gmra.mxu0 %vm149_vm0, %v11970_v11  ;;  %v4149_v59 = vmul.f32 0.5, %v4131_v39 }
 0xb66   : > { %v4061_v51 = vmul.f32 0.044715, %v4043_v2 }
 0xb67   : > { %v3982_v55 = vpop.f32.mrf.mxu0  ;;  %v4167_v6 = vmul.f32 %v4149_v59, %v11944_v26  ;;  %v3789_v34 = vsel %vm3788_vm13, %v8443_v16, %v3785_v54 }
 0xb68   : > { %v4079_v14 = vadd.f32 %v4061_v51, %v3980_v53  ;;  %v3983_v61 = vadd.f32 %v11898_v49, %v3982_v55  ;;  %v3843_v5 = vmul.f32 %v3789_v34, %v11851_v40 }
 0xb69   : > { %7513 = vmatmul.msk.f32.gmra.mxu1 %vm4198_vm9, %v4167_v6 }
 0xb6a   : > { %v8447_v25 = vpop.eup %8446  ;;  %v4097_v62 = vmul.f32 0.7978846, %v4079_v14  ;;  %v4026_v58 = vmul.f32 %v3983_v61, %v3983_v61  ;;  %v3862_v20 = vmul.f32 %v11739_v29, %v3843_v5 }
 0xb6b   : > { %v4132_v48 = vadd.f32 1.0, %v8447_v25 }
 0xb6c   : > { %8448 = vtanh.f32 %v4097_v62  ;;  %v4044_v9 = vmul.f32 %v4026_v58, %v3983_v61  ;;  %v11988_v0 = vadd.f32 %v11743_v28, %v3862_v20 }
 0xb6d   : > { %7504 = vmatmul.msk.f32.gmra.mxu0 %vm149_vm0, %v11980_v38  ;;  %v4150_v26 = vmul.f32 0.5, %v4132_v48 }
 0xb6e   : > { %v4062_v1 = vmul.f32 0.044715, %v4044_v9 }
 0xb6f   : > { %v3985_v43 = vpop.f32.mrf.mxu0  ;;  %v4168_v18 = vmul.f32 %v4150_v26, %v3977_v13 }
 0xb70   : > { %v4080_v35 = vadd.f32 %v4062_v1, %v3983_v61  ;;  %v3986_v46 = vadd.f32 %v11898_v49, %v3985_v43 }
 0xb71   : > { %7514 = vmatmul.msk.f32.gmra.mxu1 %vm4198_vm9, %v4168_v18 }
 0xb72   : > { %v8449_v40 = vpop.eup %8448  ;;  %v4098_v16 = vmul.f32 0.7978846, %v4080_v35  ;;  %v4027_v4 = vmul.f32 %v3986_v46, %v3986_v46 }
 0xb73   : > { %v4133_v42 = vadd.f32 1.0, %v8449_v40 }
 0xb74   : > { %8450 = vtanh.f32 %v4098_v16  ;;  %v4045_v8 = vmul.f32 %v4027_v4, %v3986_v46 }
 0xb75   : > { %7505 = vmatmul.msk.f32.gmra.mxu0 %vm149_vm0, %v11988_v0  ;;  %v4151_v13 = vmul.f32 0.5, %v4133_v42 }
 0xb76   : > { %v4063_v3 = vmul.f32 0.044715, %v4045_v8 }
 0xb77   : > { %v4169_v21 = vmul.f32 %v4151_v13, %v3980_v53 }
 0xb78   : > { %v4081_v63 = vadd.f32 %v4063_v3, %v3986_v46 }
 0xb79   : > { %7515 = vmatmul.msk.f32.gmra.mxu1 %vm4198_vm9, %v4169_v21 }
 0xb7a   : > { %v8451_v60 = vpop.eup %8450  ;;  %v4099_v15 = vmul.f32 0.7978846, %v4081_v63 }
 0xb7b   : > { %v4134_v50 = vadd.f32 1.0, %v8451_v60 }
 0xb7c   : > { %8452 = vtanh.f32 %v4099_v15 }
 0xb7d   : > { %v4152_v44 = vmul.f32 0.5, %v4134_v50 }
 0xb7f   : > { %v4170_v12 = vmul.f32 %v4152_v44, %v3983_v61 }
 0xb81   : > { %7516 = vmatmul.msk.f32.gmra.mxu1 %vm4198_vm9, %v4170_v12 }
 0xb82   : > { %v8453_v27 = vpop.eup %8452 }
 0xb83   : > { %v4135_v19 = vadd.f32 1.0, %v8453_v27 }
 0xb85   : > { %v4153_v57 = vmul.f32 0.5, %v4135_v19 }
 0xb87   : > { %v4171_v39 = vmul.f32 %v4153_v57, %v3986_v46 }
 0xb89   : > { %v3604_v2 = vpop.xlane.xlu2 %3603  ;;  %7517 = vmatmul.msk.f32.gmra.mxu1 %vm4198_vm9, %v4171_v39 }
 0xb8a   : > { %v3628_v53 = vmul.f32 %v3604_v2, %v11619_v33 }
 0xb8c   : > { %v3646_v54 = vadd.f32 1e-05, %v3628_v53 }
 0xb8e   : > { %8454 = vrsqrt.f32 %v3646_v54  ;;  %vm3796_vm15 = vweird.f32 %v3646_v54 }
 0xb92   : > { %v3607_v59 = vpop.xlane.xlu1 %3606 }
 0xb93   : > { %v3629_v51 = vmul.f32 %v3607_v59, %v11619_v33 }
 0xb94   : > { %v8455_v55 = vpop.eup %8454 }
 0xb95   : > { %v3791_v6 = vmul.f32 %v8455_v55, %v3646_v54  ;;  %v3647_v56 = vadd.f32 1e-05, %v3629_v51  ;;  %vm3797_vm14 = vweird.f32 %v8455_v55 }
 0xb96   : > { %vm3798_vm2 = vmor %vm3796_vm15, %vm3797_vm14 }
 0xb97   : > { %v3792_v34 = vmul.f32 %v8455_v55, %v3791_v6  ;;  %8456 = vrsqrt.f32 %v3647_v56  ;;  %vm3806_vm6 = vweird.f32 %v3647_v56 }
 0xb99   : > { %v3793_v14 = vmul.f32 0.5, %v3792_v34 }
 0xb9b   : > { %v3794_v61 = vsub.f32 1.5, %v3793_v14 }
 0xb9d   : > { %v8457_v25 = vpop.eup %8456  ;;  %v3795_v62 = vmul.f32 %v8455_v55, %v3794_v61 }
 0xb9e   : > { %v3801_v58 = vmul.f32 %v8457_v25, %v3647_v56  ;;  %vm3807_vm5 = vweird.f32 %v8457_v25 }
 0xb9f   : > { %v3799_v5 = vsel %vm3798_vm2, %v8455_v55, %v3795_v62  ;;  %vm3808_vm7 = vmor %vm3806_vm6, %vm3807_vm5 }
 0xba0   : > { %v3844_v48 = vmul.f32 %v3799_v5, %v11887_v30  ;;  %v3802_v9 = vmul.f32 %v8457_v25, %v3801_v58  ;;  %v3988_v26 = vpop.f32.mrf.mxu0 }
 0xba1   : > { %v3989_v1 = vadd.f32 %v11898_v49, %v3988_v26 }
 0xba2   : > { %v3803_v43 = vmul.f32 0.5, %v3802_v9  ;;  %v3863_v18 = vmul.f32 %v11739_v29, %v3844_v48 }
 0xba3   : > { %v4028_v20 = vmul.f32 %v3989_v1, %v3989_v1 }
 0xba4   : > { %v3804_v35 = vsub.f32 1.5, %v3803_v43  ;;  %v12001_v46 = vadd.f32 %v11743_v28, %v3863_v18 }
 0xba5   : > { %v4046_v40 = vmul.f32 %v4028_v20, %v3989_v1 }
 0xba6   : > { %v3805_v16 = vmul.f32 %v8457_v25, %v3804_v35  ;;  %7506 = vmatmul.msk.f32.gmra.mxu0 %vm149_vm0, %v12001_v46 }
 0xba7   : > { %v4064_v30 = vmul.f32 0.044715, %v4046_v40 }
 0xba8   : > { %v3809_v4 = vsel %vm3808_vm7, %v8457_v25, %v3805_v16 }
 0xba9   : > { %v3845_v42 = vmul.f32 %v3809_v4, %v11901_v37  ;;  %v4082_v8 = vadd.f32 %v4064_v30, %v3989_v1  ;;  %v3991_v13 = vpop.f32.mrf.mxu0  ;;  %v12018_v37 = vld [vmem:[%s4193_s12] ss:$0 sm:$0xff] }
 0xbaa   : > { %v3992_v3 = vadd.f32 %v11898_v49, %v3991_v13 }
 0xbab   : > { %v4100_v21 = vmul.f32 0.7978846, %v4082_v8  ;;  %v3864_v63 = vmul.f32 %v11739_v29, %v3845_v42 }
 0xbac   : > { %v4029_v60 = vmul.f32 %v3992_v3, %v3992_v3 }
 0xbad   : > { %8458 = vtanh.f32 %v4100_v21  ;;  %v12009_v15 = vadd.f32 %v11743_v28, %v3864_v63 }
 0xbae   : > { %v4047_v50 = vmul.f32 %v4029_v60, %v3992_v3 }
 0xbaf   : > { %7507 = vmatmul.msk.f32.gmra.mxu0 %vm149_vm0, %v12009_v15 }
 0xbb0   : > { %v4065_v44 = vmul.f32 0.044715, %v4047_v50 }
 0xbb2   : > { %v4083_v12 = vadd.f32 %v4065_v44, %v3992_v3 }
 0xbb3   : > { %v8459_v27 = vpop.eup %8458 }
 0xbb4   : > { %v4101_v19 = vmul.f32 0.7978846, %v4083_v12  ;;  %v4270_v57 = vpop.f32.mrf.mxu1  ;;  %v4136_v39 = vadd.f32 1.0, %v8459_v27 }
 0xbb5   : > { %v4271_v2 = vadd.f32 %v12018_v37, %v4270_v57 }
 0xbb6   : > { %8460 = vtanh.f32 %v4101_v19  ;;  %v4154_v53 = vmul.f32 0.5, %v4136_v39 }
 0xbb7   : > { %v12022_v54 = vadd.f32 %v4271_v2, %v11752_v22 }
 0xbb8   : > { %v4172_v59 = vmul.f32 %v4154_v53, %v3989_v1 }
 0xbb9   : > { %v4344_v51 = vsel %vm149_vm0, %v12022_v54, 0.0 }
 0xbba   : > { %4345 = vadd.xlane.f32.xlu1 %v4344_v51  ;;  %7518 = vmatmul.msk.f32.gmra.mxu1 %vm4198_vm9, %v4172_v59 }
 0xbbb   : > { %v3610_v55 = vpop.xlane.xlu0 %3609 }
 0xbbc   : > { %v8461_v6 = vpop.eup %8460  ;;  %v3630_v56 = vmul.f32 %v3610_v55, %v11619_v33  ;;  %v3613_v34 = vpop.xlane.xlu2 %3612 }
 0xbbd   : > { %v3631_v14 = vmul.f32 %v3613_v34, %v11619_v33  ;;  %v4273_v61 = vpop.f32.mrf.mxu1  ;;  %v4137_v25 = vadd.f32 1.0, %v8461_v6 }
 0xbbe   : > { %v3648_v62 = vadd.f32 1e-05, %v3630_v56  ;;  %v4274_v22 = vadd.f32 %v12018_v37, %v4273_v61 }
 0xbbf   : > { %v3649_v58 = vadd.f32 1e-05, %v3631_v14  ;;  %v4155_v5 = vmul.f32 0.5, %v4137_v25 }
 0xbc0   : > { %8462 = vrsqrt.f32 %v3648_v62  ;;  %v12031_v48 = vadd.f32 %v4274_v22, %v11765_v23  ;;  %vm3816_vm10 = vweird.f32 %v3648_v62 }
 0xbc1   : > { %8464 = vrsqrt.f32 %v3649_v58  ;;  %v4173_v9 = vmul.f32 %v4155_v5, %v3992_v3  ;;  %vm3826_vm13 = vweird.f32 %v3649_v58 }
 0xbc2   : > { %v4347_v26 = vsel %vm149_vm0, %v12031_v48, 0.0 }
 0xbc3   : > { %7519 = vmatmul.msk.f32.gmra.mxu1 %vm4198_vm9, %v4173_v9  ;;  %4348 = vadd.xlane.f32.xlu0 %v4347_v26 }
 0xbc6   : > { %v8463_v1 = vpop.eup %8462 }
 0xbc7   : > { %v8465_v43 = vpop.eup %8464  ;;  %v3811_v18 = vmul.f32 %v8463_v1, %v3648_v62  ;;  %vm3817_vm8 = vweird.f32 %v8463_v1 }
 0xbc8   : > { %v3821_v20 = vmul.f32 %v8465_v43, %v3649_v58  ;;  %vm3827_vm11 = vweird.f32 %v8465_v43  ;;  %vm3818_vm12 = vmor %vm3816_vm10, %vm3817_vm8 }
 0xbc9   : > { %v3812_v35 = vmul.f32 %v8463_v1, %v3811_v18  ;;  %vm3828_vm14 = vmor %vm3826_vm13, %vm3827_vm11 }
 0xbca   : > { %v3822_v40 = vmul.f32 %v8465_v43, %v3821_v20 }
 0xbcb   : > { %v3813_v16 = vmul.f32 0.5, %v3812_v35 }
 0xbcc   : > { %v3823_v30 = vmul.f32 0.5, %v3822_v40 }
 0xbcd   : > { %v3814_v4 = vsub.f32 1.5, %v3813_v16 }
 0xbce   : > { %v3824_v23 = vsub.f32 1.5, %v3823_v30 }
 0xbcf   : > { %v3815_v42 = vmul.f32 %v8463_v1, %v3814_v4 }
 0xbd0   : > { %v3825_v8 = vmul.f32 %v8465_v43, %v3824_v23 }
 0xbd1   : > { %v3819_v13 = vsel %vm3818_vm12, %v8463_v1, %v3815_v42 }
 0xbd2   : > { %v3846_v3 = vmul.f32 %v3819_v13, %v11930_v10  ;;  %v3994_v21 = vpop.f32.mrf.mxu0  ;;  %v3829_v63 = vsel %vm3828_vm14, %v8465_v43, %v3825_v8 }
 0xbd3   : > { %v3995_v60 = vadd.f32 %v11898_v49, %v3994_v21  ;;  %v3847_v12 = vmul.f32 %v3829_v63, %v11933_v32 }
 0xbd4   : > { %v3865_v50 = vmul.f32 %v11739_v29, %v3846_v3 }
 0xbd5   : > { %v4030_v44 = vmul.f32 %v3995_v60, %v3995_v60  ;;  %v3866_v10 = vmul.f32 %v11739_v29, %v3847_v12 }
 0xbd6   : > { %v12041_v27 = vadd.f32 %v11743_v28, %v3865_v50 }
 0xbd7   : > { %v4048_v19 = vmul.f32 %v4030_v44, %v3995_v60  ;;  %v12048_v55 = vadd.f32 %v11743_v28, %v3866_v10 }
 0xbd8   : > { %7508 = vmatmul.msk.f32.gmra.mxu0 %vm149_vm0, %v12041_v27 }
 0xbd9   : > { %v4066_v57 = vmul.f32 0.044715, %v4048_v19 }
 0xbda   : > { %v3997_v39 = vpop.f32.mrf.mxu0 }
 0xbdb   : > { %v4084_v2 = vadd.f32 %v4066_v57, %v3995_v60  ;;  %v3998_v53 = vadd.f32 %v11898_v49, %v3997_v39 }
 0xbdd   : > { %v4102_v59 = vmul.f32 0.7978846, %v4084_v2  ;;  %v4031_v51 = vmul.f32 %v3998_v53, %v3998_v53 }
 0xbdf   : > { %8466 = vtanh.f32 %v4102_v59  ;;  %v4049_v32 = vmul.f32 %v4031_v51, %v3998_v53 }
 0xbe0   : > { %7509 = vmatmul.msk.f32.gmra.mxu0 %vm149_vm0, %v12048_v55 }
 0xbe1   : > { %v4067_v6 = vmul.f32 0.044715, %v4049_v32 }
 0xbe2   : > { %v4000_v56 = vpop.f32.mrf.mxu0 }
 0xbe3   : > { %v4085_v34 = vadd.f32 %v4067_v6, %v3998_v53  ;;  %v4001_v14 = vadd.f32 %v11898_v49, %v4000_v56 }
 0xbe5   : > { %v8467_v61 = vpop.eup %8466  ;;  %v4103_v29 = vmul.f32 0.7978846, %v4085_v34  ;;  %v4032_v25 = vmul.f32 %v4001_v14, %v4001_v14 }
 0xbe6   : > { %v4276_v62 = vpop.f32.mrf.mxu1  ;;  %v4138_v22 = vadd.f32 1.0, %v8467_v61 }
 0xbe7   : > { %8468 = vtanh.f32 %v4103_v29  ;;  %v4050_v58 = vmul.f32 %v4032_v25, %v4001_v14  ;;  %v4277_v28 = vadd.f32 %v12018_v37, %v4276_v62 }
 0xbe8   : > { %v4156_v5 = vmul.f32 0.5, %v4138_v22 }
 0xbe9   : > { %v4068_v9 = vmul.f32 0.044715, %v4050_v58  ;;  %v12055_v26 = vadd.f32 %v4277_v28, %v11829_v36 }
 0xbea   : > { %v4003_v1 = vpop.f32.mrf.mxu0  ;;  %v4174_v43 = vmul.f32 %v4156_v5, %v3995_v60 }
 0xbeb   : > { %v4086_v18 = vadd.f32 %v4068_v9, %v4001_v14  ;;  %v4004_v20 = vadd.f32 %v11898_v49, %v4003_v1  ;;  %v4350_v35 = vsel %vm149_vm0, %v12055_v26, 0.0 }
 0xbec   : > { %4351 = vadd.xlane.f32.xlu2 %v4350_v35  ;;  %7520 = vmatmul.msk.f32.gmra.mxu1 %vm4198_vm9, %v4174_v43 }
 0xbed   : > { %v8469_v40 = vpop.eup %8468  ;;  %v4104_v16 = vmul.f32 0.7978846, %v4086_v18  ;;  %v4033_v30 = vmul.f32 %v4004_v20, %v4004_v20 }
 0xbee   : > { %v4279_v4 = vpop.f32.mrf.mxu1  ;;  %v4139_v23 = vadd.f32 1.0, %v8469_v40 }
 0xbef   : > { %8470 = vtanh.f32 %v4104_v16  ;;  %v4051_v42 = vmul.f32 %v4033_v30, %v4004_v20  ;;  %v4280_v36 = vadd.f32 %v12018_v37, %v4279_v4 }
 0xbf0   : > { %v4157_v8 = vmul.f32 0.5, %v4139_v23 }
 0xbf1   : > { %v4069_v13 = vmul.f32 0.044715, %v4051_v42  ;;  %v12063_v3 = vadd.f32 %v4280_v36, %v11848_v7 }
 0xbf2   : > { %v4006_v21 = vpop.f32.mrf.mxu0  ;;  %v4175_v63 = vmul.f32 %v4157_v8, %v3998_v53 }
 0xbf3   : > { %v4087_v60 = vadd.f32 %v4069_v13, %v4004_v20  ;;  %v4007_v50 = vadd.f32 %v11898_v49, %v4006_v21  ;;  %v4353_v44 = vsel %vm149_vm0, %v12063_v3, 0.0 }
 0xbf4   : > { %4354 = vadd.xlane.f32.xlu1 %v4353_v44  ;;  %7521 = vmatmul.msk.f32.gmra.mxu1 %vm4198_vm9, %v4175_v63 }
 0xbf5   : > { %v8471_v12 = vpop.eup %8470  ;;  %v4105_v19 = vmul.f32 0.7978846, %v4087_v60  ;;  %v4034_v57 = vmul.f32 %v4007_v50, %v4007_v50 }
 0xbf6   : > { %v4282_v39 = vpop.f32.mrf.mxu1  ;;  %v4140_v10 = vadd.f32 1.0, %v8471_v12 }
 0xbf7   : > { %8472 = vtanh.f32 %v4105_v19  ;;  %v4052_v2 = vmul.f32 %v4034_v57, %v4007_v50  ;;  %v4283_v7 = vadd.f32 %v12018_v37, %v4282_v39 }
 0xbf8   : > { %v4158_v59 = vmul.f32 0.5, %v4140_v10 }
 0xbf9   : > { %v4070_v53 = vmul.f32 0.044715, %v4052_v2  ;;  %v12071_v51 = vadd.f32 %v4283_v7, %v11861_v31 }
 0xbfa   : > { %v4176_v32 = vmul.f32 %v4158_v59, %v4001_v14 }
 0xbfb   : > { %v4088_v6 = vadd.f32 %v4070_v53, %v4007_v50  ;;  %v4356_v56 = vsel %vm149_vm0, %v12071_v51, 0.0 }
 0xbfc   : > { %7522 = vmatmul.msk.f32.gmra.mxu1 %vm4198_vm9, %v4176_v32  ;;  %4357 = vadd.xlane.f32.xlu0 %v4356_v56 }
 0xbfd   : > { %v8473_v34 = vpop.eup %8472  ;;  %v4106_v61 = vmul.f32 0.7978846, %v4088_v6 }
 0xbfe   : > { %v4285_v29 = vpop.f32.mrf.mxu1  ;;  %v4141_v25 = vadd.f32 1.0, %v8473_v34 }
 0xbff   : > { %8474 = vtanh.f32 %v4106_v61  ;;  %v4286_v62 = vadd.f32 %v12018_v37, %v4285_v29 }
 0xc00   : > { %v4159_v22 = vmul.f32 0.5, %v4141_v25 }
 0xc01   : > { %v12078_v58 = vadd.f32 %v4286_v62, %v11869_v17 }
 0xc02   : > { %v4177_v31 = vmul.f32 %v4159_v22, %v4004_v20 }
 0xc03   : > { %v4359_v14 = vsel %vm149_vm0, %v12078_v58, 0.0 }
 0xc04   : > { %4360 = vadd.xlane.f32.xlu2 %v4359_v14  ;;  %7523 = vmatmul.msk.f32.gmra.mxu1 %vm4198_vm9, %v4177_v31 }
 0xc05   : > { %v8475_v28 = vpop.eup %8474 }
 0xc06   : > { %v4288_v5 = vpop.f32.mrf.mxu1  ;;  %v4142_v9 = vadd.f32 1.0, %v8475_v28 }
 0xc07   : > { %v4289_v1 = vadd.f32 %v12018_v37, %v4288_v5 }
 0xc08   : > { %v4160_v43 = vmul.f32 0.5, %v4142_v9 }
 0xc09   : > { %v12085_v18 = vadd.f32 %v4289_v1, %v11875_v41 }
 0xc0a   : > { %v4178_v35 = vmul.f32 %v4160_v43, %v4007_v50 }
 0xc0b   : > { %v4362_v17 = vsel %vm149_vm0, %v12085_v18, 0.0 }
 0xc0c   : > { %4363 = vadd.xlane.f32.xlu1 %v4362_v17  ;;  %7524 = vmatmul.msk.f32.gmra.mxu1 %vm4198_vm9, %v4178_v35 }
 0xc23   : > { %v4009_v20 = vpop.f32.mrf.mxu0 }
 0xc24   : > { %v4010_v40 = vadd.f32 %v11898_v49, %v4009_v20 }
 0xc26   : > { %v4035_v16 = vmul.f32 %v4010_v40, %v4010_v40 }
 0xc28   : > { %v4053_v30 = vmul.f32 %v4035_v16, %v4010_v40 }
 0xc2a   : > { %v4071_v4 = vmul.f32 0.044715, %v4053_v30 }
 0xc2c   : > { %v4089_v23 = vadd.f32 %v4071_v4, %v4010_v40  ;;  %v4012_v42 = vpop.f32.mrf.mxu0 }
 0xc2d   : > { %v4013_v36 = vadd.f32 %v11898_v49, %v4012_v42 }
 0xc2e   : > { %v4107_v8 = vmul.f32 0.7978846, %v4089_v23 }
 0xc2f   : > { %v4036_v41 = vmul.f32 %v4013_v36, %v4013_v36 }
 0xc30   : > { %8476 = vtanh.f32 %v4107_v8 }
 0xc31   : > { %v4054_v13 = vmul.f32 %v4036_v41, %v4013_v36 }
 0xc33   : > { %v4072_v21 = vmul.f32 0.044715, %v4054_v13 }
 0xc35   : > { %v4090_v63 = vadd.f32 %v4072_v21, %v4013_v36 }
 0xc36   : > { %v8477_v60 = vpop.eup %8476 }
 0xc37   : > { %v4108_v50 = vmul.f32 0.7978846, %v4090_v63  ;;  %v4291_v44 = vpop.f32.mrf.mxu1  ;;  %v4143_v12 = vadd.f32 1.0, %v8477_v60 }
 0xc38   : > { %v4292_v19 = vadd.f32 %v12018_v37, %v4291_v44 }
 0xc39   : > { %8478 = vtanh.f32 %v4108_v50  ;;  %v4161_v57 = vmul.f32 0.5, %v4143_v12 }
 0xc3a   : > { %v12094_v39 = vadd.f32 %v4292_v19, %v11910_v52 }
 0xc3b   : > { %v4179_v10 = vmul.f32 %v4161_v57, %v4010_v40 }
 0xc3c   : > { %v4365_v2 = vsel %vm149_vm0, %v12094_v39, 0.0 }
 0xc3d   : > { %4366 = vadd.xlane.f32.xlu0 %v4365_v2  ;;  %7525 = vmatmul.msk.f32.gmra.mxu1 %vm4198_vm9, %v4179_v10 }
 0xc3f   : > { %v8479_v7 = vpop.eup %8478 }
 0xc40   : > { %v4294_v59 = vpop.f32.mrf.mxu1  ;;  %v4144_v53 = vadd.f32 1.0, %v8479_v7 }
 0xc41   : > { %v4295_v32 = vadd.f32 %v12018_v37, %v4294_v59 }
 0xc42   : > { %v4162_v6 = vmul.f32 0.5, %v4144_v53 }
 0xc43   : > { %v12101_v56 = vadd.f32 %v4295_v32, %v11918_v45 }
 0xc44   : > { %v4180_v34 = vmul.f32 %v4162_v6, %v4013_v36 }
 0xc45   : > { %v4368_v52 = vsel %vm149_vm0, %v12101_v56, 0.0 }
 0xc46   : > { %4369 = vadd.xlane.f32.xlu2 %v4368_v52  ;;  %7526 = vmatmul.msk.f32.gmra.mxu1 %vm4198_vm9, %v4180_v34  ;;  %v4346_v34 = vpop.xlane.xlu1 %4345 }
 0xc55   : > { %v4015_v61 = vpop.f32.mrf.mxu0 }
 0xc56   : > { %v4016_v29 = vadd.f32 %v11898_v49, %v4015_v61  ;;  %v4398_v61 = vmul.f32 %v4346_v34, %v11619_v33 }
 0xc58   : > { %v4037_v25 = vmul.f32 %v4016_v29, %v4016_v29 }
 0xc5a   : > { %v4055_v62 = vmul.f32 %v4037_v25, %v4016_v29  ;;  %v12149_v25 = vsub.f32 %v12022_v54, %v4398_v61 }
 0xc5c   : > { %v4073_v22 = vmul.f32 0.044715, %v4055_v62 }
 0xc5d   : > { %v4018_v31 = vpop.f32.mrf.mxu0 }
 0xc5e   : > { %v4091_v14 = vadd.f32 %v4073_v22, %v4016_v29  ;;  %v4019_v28 = vadd.f32 %v11898_v49, %v4018_v31  ;;  %v4434_v31 = vmul.f32 %v12149_v25, %v12149_v25 }
 0xc60   : > { %v4109_v5 = vmul.f32 0.7978846, %v4091_v14  ;;  %v4038_v45 = vmul.f32 %v4019_v28, %v4019_v28 }
 0xc62   : > { %8480 = vtanh.f32 %v4109_v5  ;;  %v4056_v9 = vmul.f32 %v4038_v45, %v4019_v28 }
 0xc64   : > { %v4074_v1 = vmul.f32 0.044715, %v4056_v9 }
 0xc66   : > { %v4092_v43 = vadd.f32 %v4074_v1, %v4019_v28 }
 0xc67   : > { %v4355_v62 = vpop.xlane.xlu1 %4354 }
 0xc68   : > { %v8481_v35 = vpop.eup %8480  ;;  %v4110_v17 = vmul.f32 0.7978846, %v4092_v43  ;;  %v4401_v22 = vmul.f32 %v4355_v62, %v11619_v33 }
 0xc69   : > { %v4297_v20 = vpop.f32.mrf.mxu1  ;;  %v4145_v40 = vadd.f32 1.0, %v8481_v35 }
 0xc6a   : > { %8482 = vtanh.f32 %v4110_v17  ;;  %v4298_v16 = vadd.f32 %v12018_v37, %v4297_v20  ;;  %v12157_v14 = vsub.f32 %v12063_v3, %v4401_v22 }
 0xc6b   : > { %v4163_v30 = vmul.f32 0.5, %v4145_v40  ;;  %v4349_v40 = vpop.xlane.xlu0 %4348 }
 0xc6c   : > { %v4335_v4 = vadd.f32 %v4298_v16, %v11952_v24  ;;  %v4437_v5 = vmul.f32 %v12157_v14, %v12157_v14 }
 0xc6d   : > { %v4181_v23 = vmul.f32 %v4163_v30, %v4016_v29  ;;  %v4399_v30 = vmul.f32 %v4349_v40, %v11619_v33 }
 0xc6e   : > { %v4371_v42 = vsel %vm149_vm0, %v4335_v4, 0.0  ;;  %v4461_v9 = vsel %vm149_vm0, %v4437_v5, 0.0 }
 0xc6f   : > { %4372 = vadd.xlane.f32.xlu1 %v4371_v42  ;;  %7527 = vmatmul.msk.f32.gmra.mxu1 %vm4198_vm9, %v4181_v23 }
 0xc70   : > { %v8483_v49 = vpop.eup %8482 }
 0xc71   : > { %v4300_v36 = vpop.f32.mrf.mxu1  ;;  %v4146_v8 = vadd.f32 1.0, %v8483_v49  ;;  %v12182_v49 = vsub.f32 %v12031_v48, %v4399_v30 }
 0xc72   : > { %v4301_v41 = vadd.f32 %v12018_v37, %v4300_v36 }
 0xc73   : > { %v4164_v13 = vmul.f32 0.5, %v4146_v8  ;;  %v4358_v8 = vpop.xlane.xlu0 %4357 }
 0xc74   : > { %v12114_v21 = vadd.f32 %v4301_v41, %v11962_v47 }
 0xc75   : > { %v4182_v63 = vmul.f32 %v4164_v13, %v4019_v28  ;;  %v4452_v28 = vsel %vm149_vm0, %v4434_v31, 0.0 }
 0xc76   : > { %v4374_v60 = vsel %vm149_vm0, %v12114_v21, 0.0 }
 0xc77   : > { %4375 = vadd.xlane.f32.xlu0 %v4374_v60  ;;  %7528 = vmatmul.msk.f32.gmra.mxu1 %vm4198_vm9, %v4182_v63  ;;  %v4402_v63 = vmul.f32 %v4358_v8, %v11619_v33 }
 0xc79   : > { %v4303_v24 = vpop.f32.mrf.mxu1 }
 0xc7a   : > { %v4304_v50 = vadd.f32 %v12018_v37, %v4303_v24 }
 0xc7c   : > { %v12121_v44 = vadd.f32 %v4304_v50, %v11970_v11  ;;  %v12198_v50 = vsub.f32 %v12071_v51, %v4402_v63 }
 0xc7e   : > { %v4377_v12 = vsel %vm149_vm0, %v12121_v44, 0.0 }
 0xc7f   : > { %4378 = vadd.xlane.f32.xlu2 %v4377_v12 }
 0xc81   : > { %v4306_v19 = vpop.f32.mrf.mxu1 }
 0xc82   : > { %v4307_v47 = vadd.f32 %v12018_v37, %v4306_v19 }
 0xc84   : > { %v12127_v57 = vadd.f32 %v4307_v47, %v11980_v38 }
 0xc86   : > { %v4380_v10 = vsel %vm149_vm0, %v12127_v57, 0.0 }
 0xc87   : > { %4381 = vadd.xlane.f32.xlu1 %v4380_v10 }
 0xc89   : > { %v4309_v2 = vpop.f32.mrf.mxu1 }
 0xc8a   : > { %v4310_v7 = vadd.f32 %v12018_v37, %v4309_v2 }
 0xc8c   : > { %v12133_v11 = vadd.f32 %v4310_v7, %v11988_v0 }
 0xc8e   : > { %v4383_v59 = vsel %vm149_vm0, %v12133_v11, 0.0 }
 0xc8f   : > { %4384 = vadd.xlane.f32.xlu0 %v4383_v59  ;;  %v4438_v59 = vmul.f32 %v12198_v50, %v12198_v50 }
 0xcb0   : > { %v4367_v10 = vpop.xlane.xlu0 %4366 }
 0xcb1   : > { %v4405_v51 = vmul.f32 %v4367_v10, %v11619_v33 }
 0xcb3   : > { %v12220_v34 = vsub.f32 %v12094_v39, %v4405_v51 }
 0xcb5   : > { %v4441_v39 = vmul.f32 %v12220_v34, %v12220_v34 }
 0xcba   : > { %v4312_v53 = vpop.f32.mrf.mxu1 }
 0xcbb   : > { %v4313_v32 = vadd.f32 %v12018_v37, %v4312_v53 }
 0xcbd   : > { %v12139_v38 = vadd.f32 %v4313_v32, %v12001_v46 }
 0xcbf   : > { %v4386_v6 = vsel %vm149_vm0, %v12139_v38, 0.0 }
 0xcc0   : > { %4387 = vadd.xlane.f32.xlu2 %v4386_v6 }
 0xcc3   : > { %v4315_v52 = vpop.f32.mrf.mxu1 }
 0xcc4   : > { %v4316_v0 = vadd.f32 %v12018_v37, %v4315_v52  ;;  %v4464_v52 = vsel %vm149_vm0, %v4438_v59, 0.0  ;;  %v4325_v59 = vld [vmem:[%s4324_s30] sm:$0x3] }
 0xcc6   : > { %v12146_v29 = vadd.f32 %v4316_v0, %v12009_v15  ;;  %v4364_v15 = vpop.xlane.xlu1 %4363 }
 0xcc7   : > { %v4404_v54 = vmul.f32 %v4364_v15, %v11619_v33  ;;  %v4473_v15 = vsel %vm149_vm0, %v4441_v39, 0.0 }
 0xcc8   : > { %v4389_v46 = vsel %vm149_vm0, %v12146_v29, 0.0 }
 0xcc9   : > { %4390 = vadd.xlane.f32.xlu1 %v4389_v46  ;;  %v12164_v45 = vsub.f32 %v12085_v18, %v4404_v54 }
 0xccb   : > { %v4440_v1 = vmul.f32 %v12164_v45, %v12164_v45 }
 0xccd   : > { %v4470_v3 = vsel %vm149_vm0, %v4440_v1, 0.0 }
 0xcd1   : > { %4453 = vadd.xlane.f32.xlu1 %v4452_v28 }
 0xcd9   : > { %4462 = vadd.xlane.f32.xlu1 %v4461_v9 }
 0xce1   : > { %4471 = vadd.xlane.f32.xlu1 %v4470_v3 }
 0xce2   : > { %v4373_v43 = vpop.xlane.xlu1 %4372 }
 0xce3   : > { %v4407_v35 = vmul.f32 %v4373_v43, %v11619_v33 }
 0xce5   : > { %v12171_v17 = vsub.f32 %v4335_v4, %v4407_v35  ;;  %v4352_v4 = vpop.xlane.xlu2 %4351 }
 0xce6   : > { %v4400_v41 = vmul.f32 %v4352_v4, %v11619_v33 }
 0xce7   : > { %v4443_v20 = vmul.f32 %v12171_v17, %v12171_v17 }
 0xce8   : > { %v12195_v48 = vsub.f32 %v12055_v26, %v4400_v41 }
 0xce9   : > { %v4479_v18 = vsel %vm149_vm0, %v4443_v20, 0.0 }
 0xcea   : > { %4480 = vadd.xlane.f32.xlu1 %v4479_v18  ;;  %v4376_v0 = vpop.xlane.xlu0 %4375 }
 0xceb   : > { %v4408_v62 = vmul.f32 %v4376_v0, %v11619_v33  ;;  %v12280_v0 = vperm.slane %v4325_v59, 0 }
 0xcec   : > { %v4318_v16 = vpop.f32.mrf.mxu1 }
 0xced   : > { %v4319_v23 = vadd.f32 %v12018_v37, %v4318_v16  ;;  %v4361_v12 = vpop.xlane.xlu2 %4360  ;;  %v12234_v31 = vsub.f32 %v12114_v21, %v4408_v62 }
 0xcee   : > { %v4403_v26 = vmul.f32 %v4361_v12, %v11619_v33 }
 0xcef   : > { %v12179_v42 = vadd.f32 %v4319_v23, %v12041_v27  ;;  %v4435_v27 = vmul.f32 %v12182_v49, %v12182_v49 }
 0xcf0   : > { %v12217_v6 = vsub.f32 %v12078_v58, %v4403_v26 }
 0xcf1   : > { %v4392_v36 = vsel %vm149_vm0, %v12179_v42, 0.0  ;;  %v4455_v47 = vsel %vm149_vm0, %v4435_v27, 0.0 }
 0xcf2   : > { %4393 = vadd.xlane.f32.xlu0 %v4392_v36  ;;  %v4439_v58 = vmul.f32 %v12217_v6, %v12217_v6 }
 0xcf4   : > { %v4321_v13 = vpop.f32.mrf.mxu1  ;;  %v4467_v28 = vsel %vm149_vm0, %v4439_v58, 0.0  ;;  %v12282_v58 = vperm.slane %v4325_v59, 1 }
 0xcf5   : > { %v4322_v60 = vadd.f32 %v12018_v37, %v4321_v13 }
 0xcf7   : > { %v12192_v24 = vadd.f32 %v4322_v60, %v12048_v55  ;;  %v4436_v55 = vmul.f32 %v12195_v48, %v12195_v48 }
 0xcf9   : > { %v4395_v19 = vsel %vm149_vm0, %v12192_v24, 0.0  ;;  %v4458_v32 = vsel %vm149_vm0, %v4436_v55, 0.0 }
 0xcfa   : > { %4396 = vadd.xlane.f32.xlu2 %v4395_v19  ;;  %4456 = vadd.xlane.f32.xlu0 %v4455_v47  ;;  %v4382_v37 = vpop.xlane.xlu1 %4381 }
 0xcfb   : > { %v4410_v2 = vmul.f32 %v4382_v37, %v11619_v33 }
 0xcfd   : > { %v12209_v7 = vsub.f32 %v12127_v57, %v4410_v2  ;;  %v4370_v57 = vpop.xlane.xlu2 %4369 }
 0xcfe   : > { %v4406_v46 = vmul.f32 %v4370_v57, %v11619_v33 }
 0xcff   : > { %v4446_v53 = vmul.f32 %v12209_v7, %v12209_v7 }
 0xd00   : > { %v12231_v22 = vsub.f32 %v12101_v56, %v4406_v46  ;;  %v4444_v56 = vmul.f32 %v12234_v31, %v12234_v31 }
 0xd01   : > { %v4488_v61 = vsel %vm149_vm0, %v4446_v53, 0.0 }
 0xd02   : > { %4459 = vadd.xlane.f32.xlu2 %v4458_v32  ;;  %4465 = vadd.xlane.f32.xlu0 %v4464_v52  ;;  %v4385_v5 = vpop.xlane.xlu0 %4384  ;;  %v4442_v3 = vmul.f32 %v12231_v22, %v12231_v22  ;;  %v4482_v20 = vsel %vm149_vm0, %v4444_v56, 0.0 }
 0xd03   : > { %4489 = vadd.xlane.f32.xlu1 %v4488_v61  ;;  %v4411_v1 = vmul.f32 %v4385_v5, %v11619_v33 }
 0xd04   : > { %v4476_v35 = vsel %vm149_vm0, %v4442_v3, 0.0 }
 0xd05   : > { %v4379_v54 = vpop.xlane.xlu2 %4378  ;;  %v12248_v43 = vsub.f32 %v12133_v11, %v4411_v1 }
 0xd06   : > { %v4409_v9 = vmul.f32 %v4379_v54, %v11619_v33 }
 0xd07   : > { %v4447_v40 = vmul.f32 %v12248_v43, %v12248_v43 }
 0xd08   : > { %v12245_v21 = vsub.f32 %v12121_v44, %v4409_v9 }
 0xd09   : > { %v4491_v44 = vsel %vm149_vm0, %v4447_v40, 0.0 }
 0xd0a   : > { %4468 = vadd.xlane.f32.xlu2 %v4467_v28  ;;  %4474 = vadd.xlane.f32.xlu0 %v4473_v15  ;;  %v4445_v18 = vmul.f32 %v12245_v21, %v12245_v21 }
 0xd0c   : > { %v4485_v16 = vsel %vm149_vm0, %v4445_v18, 0.0 }
 0xd12   : > { %4477 = vadd.xlane.f32.xlu2 %v4476_v35  ;;  %4483 = vadd.xlane.f32.xlu0 %v4482_v20 }
 0xd1a   : > { %4486 = vadd.xlane.f32.xlu2 %v4485_v16  ;;  %4492 = vadd.xlane.f32.xlu0 %v4491_v44 }
 0xd33   : > { %v4388_v11 = vpop.xlane.xlu2 %4387 }
 0xd34   : > { %v4412_v30 = vmul.f32 %v4388_v11, %v11619_v33 }
 0xd36   : > { %v12260_v23 = vsub.f32 %v12139_v38, %v4412_v30 }
 0xd38   : > { %v4448_v4 = vmul.f32 %v12260_v23, %v12260_v23 }
 0xd3a   : > { %v4494_v36 = vsel %vm149_vm0, %v4448_v4, 0.0 }
 0xd3b   : > { %4495 = vadd.xlane.f32.xlu2 %v4494_v36 }
 0xd3c   : > { %v4391_v8 = vpop.xlane.xlu1 %4390 }
 0xd3d   : > { %v4413_v41 = vmul.f32 %v4391_v8, %v11619_v33 }
 0xd3f   : > { %v12267_v13 = vsub.f32 %v12146_v29, %v4413_v41 }
 0xd41   : > { %v4449_v63 = vmul.f32 %v12267_v13, %v12267_v13 }
 0xd43   : > { %v4497_v60 = vsel %vm149_vm0, %v4449_v63, 0.0 }
 0xd44   : > { %4498 = vadd.xlane.f32.xlu1 %v4497_v60  ;;  %v4454_v38 = vpop.xlane.xlu1 %4453 }
 0xd45   : > { %v4506_v27 = vmul.f32 %v4454_v38, %v11619_v33 }
 0xd47   : > { %v4524_v12 = vadd.f32 1e-05, %v4506_v27 }
 0xd49   : > { %8484 = vrsqrt.f32 %v4524_v12  ;;  %vm4548_vm2 = vweird.f32 %v4524_v12 }
 0xd4c   : > { %v4463_v19 = vpop.xlane.xlu1 %4462 }
 0xd4d   : > { %v4509_v47 = vmul.f32 %v4463_v19, %v11619_v33 }
 0xd4f   : > { %v8485_v10 = vpop.eup %8484  ;;  %v4527_v37 = vadd.f32 1e-05, %v4509_v47 }
 0xd50   : > { %v4543_v2 = vmul.f32 %v8485_v10, %v4524_v12  ;;  %vm4549_vm15 = vweird.f32 %v8485_v10 }
 0xd51   : > { %8486 = vrsqrt.f32 %v4527_v37  ;;  %vm4550_vm5 = vmor %vm4548_vm2, %vm4549_vm15  ;;  %vm4578_vm7 = vweird.f32 %v4527_v37 }
 0xd52   : > { %v4544_v29 = vmul.f32 %v8485_v10, %v4543_v2 }
 0xd54   : > { %v4545_v55 = vmul.f32 0.5, %v4544_v29  ;;  %v4472_v26 = vpop.xlane.xlu1 %4471 }
 0xd55   : > { %v4512_v51 = vmul.f32 %v4472_v26, %v11619_v33 }
 0xd56   : > { %v4546_v53 = vsub.f32 1.5, %v4545_v55 }
 0xd57   : > { %v8487_v32 = vpop.eup %8486  ;;  %v4530_v52 = vadd.f32 1e-05, %v4512_v51 }
 0xd58   : > { %v4547_v61 = vmul.f32 %v8485_v10, %v4546_v53  ;;  %v4573_v57 = vmul.f32 %v8487_v32, %v4527_v37  ;;  %vm4579_vm6 = vweird.f32 %v8487_v32 }
 0xd59   : > { %8488 = vrsqrt.f32 %v4530_v52  ;;  %vm4580_vm8 = vmor %vm4578_vm7, %vm4579_vm6  ;;  %vm4608_vm11 = vweird.f32 %v4530_v52 }
 0xd5a   : > { %v4551_v46 = vsel %vm4550_vm5, %v8485_v10, %v4547_v61  ;;  %v4574_v62 = vmul.f32 %v8487_v32, %v4573_v57 }
 0xd5b   : > { %v4722_v39 = vmul.f32 %v4551_v46, %v12149_v25 }
 0xd5c   : > { %v4575_v28 = vmul.f32 0.5, %v4574_v62 }
 0xd5d   : > { %v4741_v15 = vmul.f32 %v12280_v0, %v4722_v39  ;;  %v4481_v54 = vpop.xlane.xlu1 %4480 }
 0xd5e   : > { %v4576_v5 = vsub.f32 1.5, %v4575_v28  ;;  %v4515_v9 = vmul.f32 %v4481_v54, %v11619_v33 }
 0xd5f   : > { %v8489_v1 = vpop.eup %8488  ;;  %v12288_v10 = vadd.f32 %v12282_v58, %v4741_v15  }
 0xd60   : > { %v4577_v56 = vmul.f32 %v8487_v32, %v4576_v5  ;;  %v4603_v35 = vmul.f32 %v8489_v1, %v4530_v52  ;;  %v4533_v20 = vadd.f32 1e-05, %v4515_v9  ;;  %vm4609_vm10 = vweird.f32 %v8489_v1 }
 0xd61   : > { %v14097_v3 = vmov %v12288_v10  ;;  %vm4610_vm12 = vmor %vm4608_vm11, %vm4609_vm10 }
 0xd62   : > { %v4581_v18 = vsel %vm4580_vm8, %v8487_v32, %v4577_v56  ;;  %v4604_v40 = vmul.f32 %v8489_v1, %v4603_v35  ;;  %8490 = vrsqrt.f32 %v4533_v20  ;;  %vm4638_vm14 = vweird.f32 %v4533_v20 }
 0xd63   : > { %v4725_v25 = vmul.f32 %v4581_v18, %v12157_v14 }
 0xd64   : > { %v4605_v16 = vmul.f32 0.5, %v4604_v40 }
 0xd65   : > { %v4744_v44 = vmul.f32 %v12280_v0, %v4725_v25  ;;  %v4394_v11 = vpop.xlane.xlu0 %4393 }
 0xd66   : > { %v4606_v30 = vsub.f32 1.5, %v4605_v16  ;;  %v4414_v4 = vmul.f32 %v4394_v11, %v11619_v33 }
 0xd67   : > { %v12294_v36 = vadd.f32 %v12282_v58, %v4744_v44  }
 0xd68   : > { %v8491_v8 = vpop.eup %8490  ;;  %v4607_v41 = vmul.f32 %v8489_v1, %v4606_v30  ;;  %v12297_v63 = vsub.f32 %v12179_v42, %v4414_v4 }
 0xd69   : > { %v4633_v60 = vmul.f32 %v8491_v8, %v4533_v20  ;;  %vm4639_vm13 = vweird.f32 %v8491_v8 }
 0xd6a   : > { %v4611_v14 = vsel %vm4610_vm12, %v8489_v1, %v4607_v41  ;;  %v4450_v38 = vmul.f32 %v12297_v63, %v12297_v63  ;;  %vm4640_vm15 = vmor %vm4638_vm14, %vm4639_vm13 }
 0xd6b   : > { %v4728_v27 = vmul.f32 %v4611_v14, %v12164_v45  ;;  %v4634_v12 = vmul.f32 %v8491_v8, %v4633_v60 }
 0xd6c   : > { %v4500_v19 = vsel %vm149_vm0, %v4450_v38, 0.0 }
 0xd6d   : > { %v4747_v47 = vmul.f32 %v12280_v0, %v4728_v27  ;;  %v4635_v10 = vmul.f32 0.5, %v4634_v12  ;;  %v4397_v37 = vpop.xlane.xlu2 %4396  ;;  %4501 = vadd.xlane.f32.xlu0 %v4500_v19  ;;  %v4457_v2 = vpop.xlane.xlu0 %4456 }
 0xd6e   : > { %v4415_v42 = vmul.f32 %v4397_v37, %v11619_v33  ;;  %v4507_v29 = vmul.f32 %v4457_v2, %v11619_v33 }
 0xd6f   : > { %v12307_v16 = vadd.f32 %v12282_v58, %v4747_v47   ;;  %v4636_v55 = vsub.f32 1.5, %v4635_v10 }
 0xd70   : > { %v12310_v45 = vsub.f32 %v12192_v24, %v4415_v42  ;;  %v4525_v26 = vadd.f32 1e-05, %v4507_v29  ;;  %v4783_v16 = vld [vmem:[%s14113_s4 + $0x8] sm:$0xff] (%p12434_p0)  }
 0xd71   : > { %v4637_v51 = vmul.f32 %v8491_v8, %v4636_v55 }
 0xd72   : > { %8492 = vrsqrt.f32 %v4525_v26  ;;  %v4451_v59 = vmul.f32 %v12310_v45, %v12310_v45  ;;  %vm4558_vm5 = vweird.f32 %v4525_v26 }
 0xd73   : > { %v4641_v53 = vsel %vm4640_vm15, %v8491_v8, %v4637_v51 }
 0xd74   : > { %v4731_v32 = vmul.f32 %v4641_v53, %v12171_v17  ;;  %v4503_v52 = vsel %vm149_vm0, %v4451_v59, 0.0 }
 0xd75   : > { %4504 = vadd.xlane.f32.xlu2 %v4503_v52  ;;  %v4460_v61 = vpop.xlane.xlu2 %4459  ;;  %v4466_v57 = vpop.xlane.xlu0 %4465 }
 0xd76   : > { %v4750_v46 = vmul.f32 %v12280_v0, %v4731_v32  ;;  %v4508_v24 = vmul.f32 %v4460_v61, %v11619_v33  ;;  %v4510_v62 = vmul.f32 %v4466_v57, %v11619_v33  ;;  %v4490_v39 = vpop.xlane.xlu1 %4489 }
 0xd77   : > { %v4518_v28 = vmul.f32 %v4490_v39, %v11619_v33 }
 0xd78   : > { %v8493_v15 = vpop.eup %8492  ;;  %v12321_v19 = vadd.f32 %v12282_v58, %v4750_v46   ;;  %v4526_v5 = vadd.f32 1e-05, %v4508_v24  ;;  %v4528_v17 = vadd.f32 1e-05, %v4510_v62 }
 0xd79   : > { %v4553_v9 = vmul.f32 %v8493_v15, %v4525_v26  ;;  %v12323_v1 = vadd.f32 1e-05, %v4518_v28  ;;  %vm4559_vm2 = vweird.f32 %v8493_v15 }
 0xd7a   : > { %v14098_v54 = vmov %v12321_v19  ;;  %8494 = vrsqrt.f32 %v4526_v5  ;;  %vm4560_vm6 = vmor %vm4558_vm5, %vm4559_vm2  ;;  %vm4568_vm7 = vweird.f32 %v4526_v5  ;;  %vm4588_vm8 = vweird.f32 %v4528_v17 }
 0xd7b   : > { %v4554_v56 = vmul.f32 %v8493_v15, %v4553_v9  ;;  %8496 = vrsqrt.f32 %v4528_v17  ;;  %vm4668_vm14 = vweird.f32 %v12323_v1 }
 0xd7c   : > { %8498 = vrsqrt.f32 %v12323_v1 }
 0xd7d   : > { %v4555_v35 = vmul.f32 0.5, %v4554_v56  ;;  %v4469_v20 = vpop.xlane.xlu2 %4468  ;;  %v4475_v18 = vpop.xlane.xlu0 %4474 }
 0xd7e   : > { %v4511_v40 = vmul.f32 %v4469_v20, %v11619_v33  ;;  %v4513_v25 = vmul.f32 %v4475_v18, %v11619_v33 }
 0xd7f   : > { %v4556_v44 = vsub.f32 1.5, %v4555_v35 }
 0xd80   : > { %v8495_v11 = vpop.eup %8494  ;;  %v12328_v30 = vadd.f32 1e-05, %v4511_v40  ;;  %v12330_v4 = vadd.f32 1e-05, %v4513_v25 }
 0xd81   : > { %v8497_v8 = vpop.eup %8496  ;;  %v4557_v41 = vmul.f32 %v8493_v15, %v4556_v44  ;;  %v4563_v60 = vmul.f32 %v8495_v11, %v4526_v5  ;;  %vm4569_vm10 = vweird.f32 %v8495_v11 }
 0xd82   : > { %v8499_v14 = vpop.eup %8498  ;;  %v4583_v38 = vmul.f32 %v8497_v8, %v4528_v17  ;;  %8500 = vrsqrt.f32 %v12328_v30  ;;  %vm4589_vm11 = vweird.f32 %v8497_v8  ;;  %vm4570_vm13 = vmor %vm4568_vm7, %vm4569_vm10  ;;  %vm4598_vm15 = vweird.f32 %v12328_v30 }
 0xd83   : > { %v4561_v27 = vsel %vm4560_vm6, %v8493_v15, %v4557_v41  ;;  %v4564_v12 = vmul.f32 %v8495_v11, %v4563_v60  ;;  %v4663_v19 = vmul.f32 %v8499_v14, %v12323_v1  ;;  %8502 = vrsqrt.f32 %v12330_v4  ;;  %vm4590_vm2 = vmor %vm4588_vm8, %vm4589_vm11 }
 0xd84   : > { %v4723_v47 = vmul.f32 %v4561_v27, %v12182_v49  ;;  %v4584_v10 = vmul.f32 %v8497_v8, %v4583_v38  ;;  %vm4669_vm12 = vweird.f32 %v8499_v14  ;;  %vm4618_vm10 = vweird.f32 %v12330_v4 }
 0xd85   : > { %v4565_v37 = vmul.f32 0.5, %v4564_v12  ;;  %v4664_v2 = vmul.f32 %v8499_v14, %v4663_v19  ;;  %v4478_v42 = vpop.xlane.xlu2 %4477  ;;  %v4484_v29 = vpop.xlane.xlu0 %4483  ;;  %vm4670_vm5 = vmor %vm4668_vm14, %vm4669_vm12 }
 0xd86   : > { %v4742_v55 = vmul.f32 %v12280_v0, %v4723_v47  ;;  %v4585_v26 = vmul.f32 0.5, %v4584_v10  ;;  %v4514_v51 = vmul.f32 %v4478_v42, %v11619_v33  ;;  %v4516_v59 = vmul.f32 %v4484_v29, %v11619_v33 }
 0xd87   : > { %v4566_v53 = vsub.f32 1.5, %v4565_v37  ;;  %v4665_v49 = vmul.f32 0.5, %v4664_v2 }
 0xd88   : > { %v8501_v32 = vpop.eup %8500  ;;  %v12340_v52 = vadd.f32 %v12282_v58, %v4742_v55   ;;  %v4586_v61 = vsub.f32 1.5, %v4585_v26  ;;  %v12342_v57 = vadd.f32 1e-05, %v4514_v51  ;;  %v12344_v46 = vadd.f32 1e-05, %v4516_v59 }
 0xd89   : > { %v4567_v24 = vmul.f32 %v8495_v11, %v4566_v53  ;;  %v4666_v62 = vsub.f32 1.5, %v4665_v49  ;;  %v4593_v39 = vmul.f32 %v8501_v32, %v12328_v30  ;;  %v8503_v28 = vpop.eup %8502  ;;  %vm4599_vm6 = vweird.f32 %v8501_v32 }
 0xd8a   : > { %v4587_v15 = vmul.f32 %v8497_v8, %v4586_v61  ;;  %8504 = vrsqrt.f32 %v12342_v57  ;;  %v4613_v20 = vmul.f32 %v8503_v28, %v12330_v4  ;;  %vm4619_vm7 = vweird.f32 %v8503_v28  ;;  %vm4600_vm8 = vmor %vm4598_vm15, %vm4599_vm6 }
 0xd8b   : > { %v4571_v9 = vsel %vm4570_vm13, %v8495_v11, %v4567_v24  ;;  %v4667_v56 = vmul.f32 %v8499_v14, %v4666_v62  ;;  %v4594_v35 = vmul.f32 %v8501_v32, %v4593_v39  ;;  %8506 = vrsqrt.f32 %v12344_v46  ;;  %vm4620_vm11 = vmor %vm4618_vm10, %vm4619_vm7 }
 0xd8c   : > { %v4724_v18 = vmul.f32 %v4571_v9, %v12195_v48  ;;  %v4591_v40 = vsel %vm4590_vm2, %v8497_v8, %v4587_v15  ;;  %v4614_v44 = vmul.f32 %v8503_v28, %v4613_v20  ;;  %vm4628_vm13 = vweird.f32 %v12342_v57 }
 0xd8d   : > { %v4726_v5 = vmul.f32 %v4591_v40, %v12198_v50  ;;  %v4671_v1 = vsel %vm4670_vm5, %v8499_v14, %v4667_v56  ;;  %v4595_v25 = vmul.f32 0.5, %v4594_v35  ;;  %v4487_v11 = vpop.xlane.xlu2 %4486  ;;  %v4493_v17 = vpop.xlane.xlu0 %4492  ;;  %vm4648_vm2 = vweird.f32 %v12344_v46 }
 0xd8e   : > { %v4743_v41 = vmul.f32 %v12280_v0, %v4724_v18  ;;  %v4734_v60 = vmul.f32 %v4671_v1, %v12209_v7  ;;  %v4517_v38 = vmul.f32 %v4487_v11, %v11619_v33  ;;  %v4519_v48 = vmul.f32 %v4493_v17, %v11619_v33 }
 0xd8f   : > { %v4745_v8 = vmul.f32 %v12280_v0, %v4726_v5  ;;  %v4596_v27 = vsub.f32 1.5, %v4595_v25  ;;  %v4615_v12 = vmul.f32 0.5, %v4614_v44 }
 0xd90   : > { %v8505_v19 = vpop.eup %8504  ;;  %v12364_v50 = vadd.f32 %v12282_v58, %v4743_v41   ;;  %v4753_v14 = vmul.f32 %v12280_v0, %v4734_v60  ;;  %v4535_v47 = vadd.f32 1e-05, %v4517_v38  ;;  %v12367_v10 = vadd.f32 1e-05, %v4519_v48 }
 0xd91   : > { %v12370_v7 = vadd.f32 %v12282_v58, %v4745_v8   ;;  %v4597_v37 = vmul.f32 %v8501_v32, %v4596_v27  ;;  %v4616_v2 = vsub.f32 1.5, %v4615_v12  ;;  %v4623_v42 = vmul.f32 %v8505_v19, %v12342_v57  ;;  %v8507_v29 = vpop.eup %8506 }
 0xd92   : > { %v12374_v55 = vadd.f32 %v12282_v58, %v4753_v14   ;;  %8508 = vrsqrt.f32 %v4535_v47  ;;  %v4643_v53 = vmul.f32 %v8507_v29, %v12344_v46  ;;  %vm4629_vm12 = vweird.f32 %v8505_v19 }
 0xd93   : > { %v4601_v26 = vsel %vm4600_vm8, %v8501_v32, %v4597_v37  ;;  %v4617_v51 = vmul.f32 %v8503_v28, %v4616_v2  ;;  %v4624_v59 = vmul.f32 %v8505_v19, %v4623_v42  ;;  %8510 = vrsqrt.f32 %v12367_v10  ;;  %vm4630_vm15 = vmor %vm4628_vm13, %vm4629_vm12 }
 0xd94   : > { %v4727_v49 = vmul.f32 %v4601_v26, %v12217_v6  ;;  %v4644_v62 = vmul.f32 %v8507_v29, %v4643_v53  ;;  %vm4649_vm14 = vweird.f32 %v8507_v29  ;;  %vm4658_vm7 = vweird.f32 %v4535_v47 }
 0xd95   : > { %v4621_v61 = vsel %vm4620_vm11, %v8503_v28, %v4617_v51  ;;  %v4625_v24 = vmul.f32 0.5, %v4624_v59  ;;  %vm4650_vm5 = vmor %vm4648_vm2, %vm4649_vm14  ;;  %vm4678_vm11 = vweird.f32 %v12367_v10 }
 0xd96   : > { %v4746_v30 = vmul.f32 %v12280_v0, %v4727_v49  ;;  %v4729_v39 = vmul.f32 %v4621_v61, %v12220_v34  ;;  %v4645_v32 = vmul.f32 0.5, %v4644_v62 }
 0xd97   : > { %v4626_v4 = vsub.f32 1.5, %v4625_v24 }
 0xd98   : > { %v8509_v15 = vpop.eup %8508  ;;  %v12387_v9 = vadd.f32 %v12282_v58, %v4746_v30   ;;  %v4748_v6 = vmul.f32 %v12280_v0, %v4729_v39  ;;  %v4646_v35 = vsub.f32 1.5, %v4645_v32 }
 0xd99   : > { %v4627_v56 = vmul.f32 %v8505_v19, %v4626_v4  ;;  %v4653_v28 = vmul.f32 %v8509_v15, %v4535_v47  ;;  %v8511_v20 = vpop.eup %8510  ;;  %vm4659_vm6 = vweird.f32 %v8509_v15 }
 0xd9a   : > { %v12392_v17 = vadd.f32 %v12282_v58, %v4748_v6   ;;  %v4647_v18 = vmul.f32 %v8507_v29, %v4646_v35  ;;  %v4673_v5 = vmul.f32 %v8511_v20, %v12367_v10  ;;  %vm4679_vm8 = vweird.f32 %v8511_v20  ;;  %vm4660_vm10 = vmor %vm4658_vm7, %vm4659_vm6 }
 0xd9b   : > { %v4631_v34 = vsel %vm4630_vm15, %v8505_v19, %v4627_v56  ;;  %v4654_v40 = vmul.f32 %v8509_v15, %v4653_v28  ;;  %vm4680_vm12 = vmor %vm4678_vm11, %vm4679_vm8  ;;  %v4786_v17 = vld [vmem:[%s14113_s4 + $0x20] sm:$0xff] (%p12434_p0)  }
 0xd9c   : > { %v4730_v1 = vmul.f32 %v4631_v34, %v12231_v22  ;;  %v4651_v57 = vsel %vm4650_vm5, %v8507_v29, %v4647_v18  ;;  %v4674_v44 = vmul.f32 %v8511_v20, %v4673_v5 }
 0xd9d   : > { %v4655_v25 = vmul.f32 0.5, %v4654_v40  ;;  %v4732_v41 = vmul.f32 %v4651_v57, %v12234_v31 }
 0xd9e   : > { %v4749_v11 = vmul.f32 %v12280_v0, %v4730_v1  ;;  %v4675_v38 = vmul.f32 0.5, %v4674_v44 }
 0xd9f   : > { %v4656_v60 = vsub.f32 1.5, %v4655_v25  ;;  %v4751_v46 = vmul.f32 %v12280_v0, %v4732_v41 }
 0xda0   : > { %v12400_v18 = vadd.f32 %v12282_v58, %v4749_v11   ;;  %v4676_v8 = vsub.f32 1.5, %v4675_v38 }
 0xda1   : > { %v4657_v48 = vmul.f32 %v8509_v15, %v4656_v60  ;;  %v12404_v22 = vadd.f32 %v12282_v58, %v4751_v46  }
 0xda2   : > { %v4677_v19 = vmul.f32 %v8511_v20, %v4676_v8 }
 0xda3   : > { %v14099_v12 = vmov %v12404_v22  ;;  %v4661_v27 = vsel %vm4660_vm10, %v8509_v15, %v4657_v48 }
 0xda4   : > { %v4733_v31 = vmul.f32 %v4661_v27, %v12245_v21  ;;  %v4681_v14 = vsel %vm4680_vm12, %v8511_v20, %v4677_v19 }
 0xda5   : > { %v4735_v2 = vmul.f32 %v4681_v14, %v12248_v43 }
 0xda6   : > { %v4752_v37 = vmul.f32 %v12280_v0, %v4733_v31 }
 0xda7   : > { %v4754_v47 = vmul.f32 %v12280_v0, %v4735_v2 }
 0xda8   : > { %v12411_v21 = vadd.f32 %v12282_v58, %v4752_v37  }
 0xda9   : > { %v12415_v42 = vadd.f32 %v12282_v58, %v4754_v47   ;;  %v4782_v21 = vld [vmem:[%s14113_s4] sm:$0xff] (%p12434_p0)  }
 0xdae   : > { %v4496_v29 = vpop.xlane.xlu2 %4495 }
 0xdaf   : > { %v4520_v26 = vmul.f32 %v4496_v29, %v11619_v33 }
 0xdb1   : > { %v4538_v10 = vadd.f32 1e-05, %v4520_v26 }
 0xdb3   : > { %8512 = vrsqrt.f32 %v4538_v10  ;;  %vm4688_vm14 = vweird.f32 %v4538_v10 }
 0xdb7   : > { %v4499_v51 = vpop.xlane.xlu1 %4498 }
 0xdb8   : > { %v4521_v59 = vmul.f32 %v4499_v51, %v11619_v33 }
 0xdb9   : > { %v8513_v53 = vpop.eup %8512 }
 0xdba   : > { %v4683_v49 = vmul.f32 %v8513_v53, %v4538_v10  ;;  %v4539_v61 = vadd.f32 1e-05, %v4521_v59  ;;  %vm4689_vm13 = vweird.f32 %v8513_v53 }
 0xdbb   : > { %vm4690_vm15 = vmor %vm4688_vm14, %vm4689_vm13 }
 0xdbc   : > { %v4684_v43 = vmul.f32 %v8513_v53, %v4683_v49  ;;  %8514 = vrsqrt.f32 %v4539_v61  ;;  %vm4698_vm5 = vweird.f32 %v4539_v61 }
 0xdbe   : > { %v4685_v24 = vmul.f32 0.5, %v4684_v43 }
 0xdc0   : > { %v4686_v62 = vsub.f32 1.5, %v4685_v24 }
 0xdc2   : > { %v8515_v30 = vpop.eup %8514  ;;  %v4687_v39 = vmul.f32 %v8513_v53, %v4686_v62 }
 0xdc3   : > { %v4693_v4 = vmul.f32 %v8515_v30, %v4539_v61  ;;  %vm4699_vm2 = vweird.f32 %v8515_v30 }
 0xdc4   : > { %v4691_v32 = vsel %vm4690_vm15, %v8513_v53, %v4687_v39  ;;  %vm4700_vm6 = vmor %vm4698_vm5, %vm4699_vm2 }
 0xdc5   : > { %v4736_v15 = vmul.f32 %v4691_v32, %v12260_v23  ;;  %v4694_v6 = vmul.f32 %v8515_v30, %v4693_v4 }
 0xdc7   : > { %v4755_v56 = vmul.f32 %v12280_v0, %v4736_v15  ;;  %v4695_v35 = vmul.f32 0.5, %v4694_v6  ;;  %v14105_v15 = vmov %v12387_v9 }
 0xdc9   : > { %v4774_v24 = vadd.f32 %v12282_v58, %v4755_v56   ;;  %v4696_v28 = vsub.f32 1.5, %v4695_v35 }
 0xdcb   : > { %v4697_v20 = vmul.f32 %v8515_v30, %v4696_v28 }
 0xdcd   : > { %v4701_v34 = vsel %vm4700_vm6, %v8515_v30, %v4697_v20  ;;  %v14103_v20 = vmov %v14099_v12  ;;  %v14108_v12 = vmov %v12364_v50  ;;  %v4787_v50 = vld [vmem:[%s14113_s4 + $0x28] sm:$0xff] (%p12434_p0)  }
 0xdce   : > { %v4737_v40 = vmul.f32 %v4701_v34, %v12267_v13 }
 0xdd0   : > { %v4756_v5 = vmul.f32 %v12280_v0, %v4737_v40 }
 0xdd2   : > { %v4775_v25 = vadd.f32 %v12282_v58, %v4756_v5  }
 0xde0   : > { %v4502_v1 = vpop.xlane.xlu0 %4501 }
 0xde1   : > { %v4522_v23 = vmul.f32 %v4502_v1, %v11619_v33 }
 0xde3   : > { %v4540_v57 = vadd.f32 1e-05, %v4522_v23  ;;  %v14101_v23 = vmov %v12415_v42 }
 0xde5   : > { %8516 = vrsqrt.f32 %v4540_v57  ;;  %vm4708_vm8 = vweird.f32 %v4540_v57 }
 0xde8   : > { %v4505_v44 = vpop.xlane.xlu2 %4504 }
 0xde9   : > { %v4523_v11 = vmul.f32 %v4505_v44, %v11619_v33 }
 0xdeb   : > { %v8517_v41 = vpop.eup %8516  ;;  %v4541_v60 = vadd.f32 1e-05, %v4523_v11  ;;  %v14109_v11 = vmov %v12340_v52  ;;  %v4785_v52 = vld [vmem:[%s14113_s4 + $0x18] sm:$0xff] (%p12434_p0)  }
 0xdec   : > { %v4703_v38 = vmul.f32 %v8517_v41, %v4540_v57  ;;  %vm4709_vm7 = vweird.f32 %v8517_v41 }
 0xded   : > { %8518 = vrsqrt.f32 %v4541_v60  ;;  %vm4710_vm10 = vmor %vm4708_vm8, %vm4709_vm7  ;;  %vm4718_vm12 = vweird.f32 %v4541_v60 }
 0xdee   : > { %v4704_v46 = vmul.f32 %v8517_v41, %v4703_v38 }
 0xdf0   : > { %v4705_v48 = vmul.f32 0.5, %v4704_v46 }
 0xdf2   : > { %v4706_v8 = vsub.f32 1.5, %v4705_v48 }
 0xdf3   : > { %v8519_v13 = vpop.eup %8518 }
 0xdf4   : > { %v4707_v22 = vmul.f32 %v8517_v41, %v4706_v8  ;;  %v4713_v27 = vmul.f32 %v8519_v13, %v4541_v60  ;;  %vm4719_vm11 = vweird.f32 %v8519_v13 }
 0xdf5   : > { %vm4720_vm13 = vmor %vm4718_vm12, %vm4719_vm11 }
 0xdf6   : > { %v4711_v19 = vsel %vm4710_vm10, %v8517_v41, %v4707_v22  ;;  %v4714_v31 = vmul.f32 %v8519_v13, %v4713_v27  ;;  %v14102_v22 = vmov %v12374_v55 }
 0xdf7   : > { %v4738_v14 = vmul.f32 %v4711_v19, %v12297_v63  ;;  %v14104_v19 = vmov %v14098_v54  ;;  %v12510_v63 = vld [vmem:[%s14112_s0] sm:$0x1] (%p12434_p0) }
 0xdf8   : > { %v4715_v37 = vmul.f32 0.5, %v4714_v31 }
 0xdf9   : > { %v4757_v2 = vmul.f32 %v12280_v0, %v4738_v14  ;;  %v14106_v14 = vmov %v12370_v7 }
 0xdfa   : > { %v4716_v47 = vsub.f32 1.5, %v4715_v37 }
 0xdfb   : > { %v4776_v26 = vadd.f32 %v12282_v58, %v4757_v2  }
 0xdfc   : > { %v4717_v29 = vmul.f32 %v8519_v13, %v4716_v47 }
 0xdfe   : > { %v4721_v10 = vsel %vm4720_vm13, %v8519_v13, %v4717_v29  ;;  %v14107_v13 = vmov %v12294_v36  ;;  %v12505_v36 = vld [vmem:[%s14111_s11 + $0x10] sm:$0xff] (%p12434_p0) }
 0xdff   : > { %v4739_v51 = vmul.f32 %v4721_v10, %v12310_v45  ;;  %v14110_v10 = vmov %v14097_v3  ;;  %118 = sbr.rel (!%p12434_p0) target bundleno = 31 (0x1f), region = 162  ;;  %v4784_v45 = vld [vmem:[%s14113_s4 + $0x10] sm:$0xff] (%p12434_p0)  }
 0xe01   : > { %v4758_v59 = vmul.f32 %v12280_v0, %v4739_v51  ;;  %v12495_v0 = vld [vmem:[%s14111_s11] sm:$0xff] (%p12434_p0) }
 0xe03   : > { %v4777_v27 = vadd.f32 %v12282_v58, %v4758_v59   ;;  %v12500_v58 = vld [vmem:[%s14111_s11 + $0x8] sm:$0xff] (%p12434_p0) }
 0xe04 LB: > { %s12566_s25 = sshll.u32 %s8937_s26, 5  ;;  %s14114_s3 = sld [smem:[#allocation91_spill]]  ;;  %v12657_v38 = vperm.slane %v12510_v63, 0  ;;  %s8937_s26 = sphi %s12542_s26, %s4793_s26   ;;  %v8933_v21 = vphi %v4782_v21, %v14124_v21   ;;  %v8929_v16 = vphi %v4783_v16, %v13376_v16   ;;  %v8925_v45 = vphi %v4784_v45, %v6628_v45   ;;  %v8921_v52 = vphi %v4785_v52, %v14123_v52   ;;  %v8917_v17 = vphi %v4786_v17, %v6630_v17   ;;  %v8913_v50 = vphi %v4787_v50, %v6631_v50  }
 0xe05   : > { %s14115_s13 = sld [smem:[#allocation90_spill]]  ;;  %s8954_s2 = smov 96  }
 0xe06   : > { %s8955_s7 = smov 64   ;;  %s8956_s28 = smov 88  }
 0xe07   : > { %s8957_s12 = smov 120   ;;  %s8958_s6 = smov 80  }
 0xe08   : > { %s8959_s30 = smov 56   ;;  %s8960_s5 = smov 112  }
 0xe09   : > { %s8961_s9 = smov 72   ;;  %s8962_s1 = smov 104  }
 0xe0a   : > { %s7124_s8 = scalar_lea.vmem %s14114_s3, %s8937_s26  ;;  %s8963_s11 = smov 48  }
 0xe0b   : > { %s7122_s4 = scalar_lea.vmem %s14115_s13, %s12566_s25  ;;  %v8575_v25 = vld [vmem:[%s7124_s8 + $0x2] ss:$0 sm:$0xff]  ;;  %s8964_s27 = smov 40  }
 0xe0c   : > { %v7533_v7 = vld [vmem:[%s7122_s4 + $0x58] sm:$0xff]  ;;  %v7532_v55 = vld [vmem:[%s7122_s4 + $0x50] sm:$0xff]  ;;  %v7531_v9 = vld [vmem:[%s7122_s4 + $0x48] sm:$0xff]  ;;  %s8965_s29 = smov 8   ;;  %s8966_s3 = smov 16  }
 0xe0d   : > { %4843 = vmatpush.msra.mxu0 %v7533_v7  ;;  %7679 = vmatpush.msra.mxu1 %v7533_v7  ;;  %v7530_v18 = vld [vmem:[%s7122_s4 + $0x40] sm:$0xff]  ;;  %s8967_s8 = smov 24   ;;  %s14116_s13 = sld [smem:[#allocation92_spill]] }
 0xe0f   : > { %4844 = vmatpush.msra.mxu0 %v7532_v55  ;;  %7680 = vmatpush.msra.mxu1 %v7532_v55 }
 0xe11   : > { %4845 = vmatpush.msra.mxu0 %v7531_v9  ;;  %7681 = vmatpush.msra.mxu1 %v7531_v9 }
 0xe13   : > { %4846 = vmatpush.msra.mxu0 %v7530_v18  ;;  %7682 = vmatpush.msra.mxu1 %v7530_v18  ;;  %s7127_s4 = scalar_lea.vmem %s14116_s13, %s12566_s25  ;;  %s14120_s13 = sld [smem:[#allocation96_spill]] }
 0xe14   : > { %7535 = vmatmul.msk.f32.vlgmr.msra.gmra.mxu0 %vm149_vm0, %v8933_v21  ;;  %7543 = vmatmul.msk.f32.vlgmr.msra.gmra.mxu1 %vm149_vm0, %v12505_v36 }
 0xe15   : > { %4887 = vmatpush.msrb.mxu0 %v7533_v7 }
 0xe17   : > { %4888 = vmatpush.msrb.mxu0 %v7532_v55 }
 0xe19   : > { %4889 = vmatpush.msrb.mxu0 %v7531_v9 }
 0xe1b   : > { %4890 = vmatpush.msrb.mxu0 %v7530_v18 }
 0xe1c   : > { %7536 = vmatmul.msk.f32.gmra.mxu0 %vm149_vm0, %v8929_v16 }
 0xe24   : > { %7537 = vmatmul.msk.f32.gmra.mxu0 %vm149_vm0, %v8925_v45 }
 0xe2c   : > { %7538 = vmatmul.msk.f32.gmra.mxu0 %vm149_vm0, %v8921_v52 }
 0xe34   : > { %7539 = vmatmul.msk.f32.gmra.mxu0 %vm149_vm0, %v8917_v17 }
 0xe3c   : > { %7540 = vmatmul.msk.f32.gmra.mxu0 %vm149_vm0, %v8913_v50 }
 0xe44   : > { %7541 = vmatmul.msk.f32.vlgmr.msrb.gmra.mxu0 %vm149_vm0, %v12495_v0 }
 0xe4c   : > { %7542 = vmatmul.msk.f32.gmra.mxu0 %vm149_vm0, %v12500_v58 }
 0xe91   : > { %v4848_v12 = vpop.f32.mrf.mxu0  ;;  %v4898_v32 = vpop.f32.mrf.mxu1 }
 0xe92   : > { %v12594_v42 = vadd.f32 %v8575_v25, %v4848_v12 }
 0xe99   : > { %v4851_v26 = vpop.f32.mrf.mxu0 }
 0xe9a   : > { %v12596_v49 = vadd.f32 %v8575_v25, %v4851_v26 }
 0xea1   : > { %v4854_v53 = vpop.f32.mrf.mxu0 }
 0xea2   : > { %v12598_v61 = vadd.f32 %v8575_v25, %v4854_v53 }
 0xea4   : > { %v12602_v43 = vpack.i.bf16 %v12596_v49, %v12598_v61  ;;  %v12631_v5 = vadd.f32 %v4898_v32, %v12598_v61 }
 0xea9   : > { %v4857_v24 = vpop.f32.mrf.mxu0 }
 0xeaa   : > { %v12616_v56 = vadd.f32 %v8575_v25, %v4857_v24 }
 0xeac   : > { %v8530_v29 = vpack.i.bf16 %v12598_v61, %v12616_v56 }
 0xeb1   : > { %v4860_v62 = vpop.f32.mrf.mxu0 }
 0xeb2   : > { %v12604_v39 = vadd.f32 %v8575_v25, %v4860_v62 }
 0xeb9   : > { %v4863_v30 = vpop.f32.mrf.mxu0 }
 0xeba   : > { %v12606_v4 = vadd.f32 %v8575_v25, %v4863_v30 }
 0xebc   : > { %v12609_v15 = vadd.f32 %v4898_v32, %v12606_v4  ;;  %v12613_v6 = vpack.i.bf16 %v12604_v39, %v12606_v4 }
 0xebe   : > { %4962 = vrot.lane.b32.xlu0 %v12609_v15, %s8954_s2 }
 0xec1   : > { %v4892_v35 = vpop.f32.mrf.mxu0 }
 0xec2   : > { %v12619_v28 = vadd.f32 %v4892_v35, %v12616_v56  ;;  %v12635_v1 = vadd.f32 %v4892_v35, %v12594_v42 }
 0xec4   : > { %4958 = vrot.lane.b32.xlu1 %v12619_v28, %s8954_s2 }
 0xec9   : > { %v4895_v20 = vpop.f32.mrf.mxu0 }
 0xeca   : > { %v12623_v34 = vadd.f32 %v4895_v20, %v12596_v49  ;;  %v12626_v40 = vadd.f32 %v4895_v20, %v12604_v39 }
 0xecc   : > { %4912 = vrot.lane.b32.xlu2 %v12623_v34, %s8954_s2  ;;  %4960 = vrot.lane.b32.xlu0 %v12626_v40, %s8954_s2 }
 0xed4   : > { %4914 = vrot.lane.b32.xlu0 %v12631_v5, %s8954_s2 }
 0xedc   : > { %4910 = vrot.lane.b32.xlu0 %v12635_v1, %s8954_s2  ;;  %s7642_s2 = sshll.u32 %s8937_s26, 6 }
 0xf26   : > { %v4913_v41 = vpop.permute.xlu2 %4912 }
 0xf30   : > { %v4963_v23 = vpop.permute.xlu0 %4962 }
 0xf31   : > { %7550 = vmatpush.xpose.msk.msra.mxu3 %vm391_vm1, %v4963_v23 }
 0xf36   : > { %v4959_v44 = vpop.permute.xlu1 %4958 }
 0xf3e   : > { %v4961_v57 = vpop.permute.xlu0 %4960 }
 0xf3f   : > { %7551 = vmatpush.xpose.msk.msra.mxu3 %vm391_vm1, %v4961_v57 }
 0xf43   : > { %7552 = vmatpush.xpose.msk.msra.mxu3 %vm391_vm1, %v4959_v44 }
 0xf46   : > { %7553 = vmatmul.msk.f32.vlgmr.msra.gmra.mxu3 %vm391_vm1, %v12619_v28  ;;  %v4915_v11 = vpop.permute.xlu0 %4914 }
 0xf47   : > { %7544 = vmatpush.xpose.msk.msra.mxu2 %vm391_vm1, %v4915_v11 }
 0xf4b   : > { %7545 = vmatpush.xpose.msk.msra.mxu2 %vm391_vm1, %v4913_v41 }
 0xf4e   : > { %7554 = vmatmul.msk.f32.gmra.mxu3 %vm391_vm1, %v12626_v40  ;;  %v4911_v60 = vpop.permute.xlu0 %4910 }
 0xf4f   : > { %7546 = vmatpush.xpose.msk.msra.mxu2 %vm391_vm1, %v4911_v60 }
 0xf52   : > { %7547 = vmatmul.msk.f32.vlgmr.msra.gmra.mxu2 %vm391_vm1, %v12635_v1 }
 0xf56   : > { %7555 = vmatmul.msk.f32.gmra.mxu3 %vm391_vm1, %v12609_v15 }
 0xf5a   : > { %7548 = vmatmul.msk.f32.gmra.mxu2 %vm391_vm1, %v12623_v34 }
 0xf62   : > { %7549 = vmatmul.msk.f32.gmra.mxu2 %vm391_vm1, %v12631_v5 }
 0xfc9   : > { %v4993_v46 = vpop.f32.mrf.mxu3 }
 0xfca   : > { %v5005_v48 = vmul.f32 0.35355338, %v4993_v46 }
 0xfcc   : > { %v5014_v8 = vadd.f32 %v12657_v38, %v5005_v48 }
 0xfce   : > { %v5027_v13 = vsel %vm3270_vm4, %v5014_v8, -inf }
 0xfcf   : > { %5028 = vmax.xlane.f32.xlu1 %v5027_v13 }
 0xfd1   : > { %v4996_v22 = vpop.f32.mrf.mxu3 }
 0xfd2   : > { %v5006_v27 = vmul.f32 0.35355338, %v4996_v22 }
 0xfd4   : > { %v5015_v19 = vadd.f32 %v12657_v38, %v5006_v27 }
 0xfd6   : > { %v5030_v31 = vsel %vm3270_vm4, %v5015_v19, -inf }
 0xfd7   : > { %5031 = vmax.xlane.f32.xlu2 %v5030_v31 }
 0xfd9   : > { %v4999_v14 = vpop.f32.mrf.mxu3 }
 0xfda   : > { %v5007_v37 = vmul.f32 0.35355338, %v4999_v14 }
 0xfdc   : > { %v5016_v2 = vadd.f32 %v12657_v38, %v5007_v37 }
 0xfde   : > { %v5033_v47 = vsel %vm3270_vm4, %v5016_v2, -inf }
 0xfdf   : > { %5034 = vmax.xlane.f32.xlu2 %v5033_v47 }
 0xfe8   : > { %5134 = vrot.lane.b32.xlu1 %v12616_v56, %s8955_s7 }
 0xff0   : > { %5238 = vrot.lane.b32.xlu1 %v12609_v15, %s8956_s28 }
 0xff7   : > { %8521 = vrot.lane.b32.xlu2 %v12613_v6, %s8955_s7 }
 0xff8   : > { %5234 = vrot.lane.b32.xlu1 %v12619_v28, %s8956_s28 }
0x1000   : > { %5230 = vrot.lane.b32.xlu1 %v12626_v40, %s8957_s12 }
0x1008   : > { %5232 = vrot.lane.b32.xlu1 %v12609_v15, %s8957_s12 }
0x1010   : > { %5186 = vrot.lane.b32.xlu1 %v12623_v34, %s8956_s28 }
0x1018   : > { %5454 = vrot.lane.b32.xlu1 %v12631_v5, %s8958_s6 }
0x1020   : > { %5450 = vrot.lane.b32.xlu1 %v12635_v1, %s8958_s6 }
0x1028   : > { %8526 = vrot.lane.b32.xlu1 %v12613_v6, %s8959_s30 }
0x1030   : > { %5446 = vrot.lane.b32.xlu1 %v12623_v34, %s8960_s5 }
0x1038   : > { %8531 = vrot.lane.b32.xlu1 %v8530_v29, %s8959_s30 }
0x1040   : > { %5504 = vrot.lane.b32.xlu1 %v12609_v15, %s8958_s6 }
0x1042   : > { %v5029_v10 = vpop.xlane.xlu1 %5028 }
0x1043   : > { %v5039_v51 = vsub.f32 %v5014_v8, %v5029_v10 }
0x1045   : > { %v5048_v59 = vmul.f32 1.442695, %v5039_v51 }
0x1047   : > { %8579 = vpow2.f32 %v5048_v59 }
0x1048   : > { %5720 = vrot.lane.b32.xlu1 %v12631_v5, %s8961_s9 }
0x104a   : > { %v5032_v7 = vpop.xlane.xlu2 %5031 }
0x104b   : > { %v5040_v55 = vsub.f32 %v5015_v19, %v5032_v7 }
0x104d   : > { %v8580_v9 = vpop.eup %8579  ;;  %v5050_v18 = vmul.f32 1.442695, %v5040_v55 }
0x104e   : > { %v5063_v25 = vsel %vm3270_vm4, %v8580_v9, 0.0 }
0x104f   : > { %8581 = vpow2.f32 %v5050_v18  ;;  %5064 = vadd.xlane.f32.xlu0 %v5063_v25 }
0x1050   : > { %5448 = vrot.lane.b32.xlu1 %v12631_v5, %s8960_s5 }
0x1052   : > { %v5035_v12 = vpop.xlane.xlu2 %5034 }
0x1053   : > { %v5041_v26 = vsub.f32 %v5016_v2, %v5035_v12 }
0x1055   : > { %v8582_v53 = vpop.eup %8581  ;;  %v5052_v61 = vmul.f32 1.442695, %v5041_v26 }
0x1056   : > { %v5066_v24 = vsel %vm3270_vm4, %v8582_v53, 0.0 }
0x1057   : > { %8583 = vpow2.f32 %v5052_v61  ;;  %5067 = vadd.xlane.f32.xlu2 %v5066_v24 }
0x105a   : > { %v5135_v62 = vpop.permute.xlu1 %5134  ;;  %v8522_v30 = vpop.permute.xlu2 %8521 }
0x105b   : > { %v8523_v32 = vunpack.i.l.bf16 %v8522_v30  ;;  %v8524_v35 = vunpack.i.h.bf16 %v8522_v30 }
0x105d   : > { %v8584_v6 = vpop.eup %8583  ;;  %5165 = vmatpush.msrb.mxu2 %v8523_v32 }
0x105e   : > { %v5069_v20 = vsel %vm3270_vm4, %v8584_v6, 0.0 }
0x105f   : > { %5070 = vadd.xlane.f32.xlu0 %v5069_v20  ;;  %5166 = vmatpush.msrb.mxu2 %v8524_v35  ;;  %v4946_v35 = vpop.f32.mrf.mxu2 }
0x1061   : > { %5167 = vmatpush.msrb.mxu2 %v5135_v62 }
0x1062   : > { %v5239_v23 = vpop.permute.xlu1 %5238 }
0x1063   : > { %7568 = vmatpush.xpose.msk.msra.mxu2 %vm391_vm1, %v5239_v23 }
0x1067   : > { %v12755_v20 = vpop.f32.mrf.mxu2 }
0x106a   : > { %v5235_v57 = vpop.permute.xlu1 %5234 }
0x106f   : > { %5228 = vrot.lane.b32.xlu2 %v12619_v28, %s8957_s12  ;;  %v12757_v23 = vpop.f32.mrf.mxu2 }
0x1072   : > { %v5231_v44 = vpop.permute.xlu1 %5230 }
0x1073   : > { %5236 = vrot.lane.b32.xlu0 %v12626_v40, %s8956_s28 }
0x1077   : > { %5184 = vrot.lane.b32.xlu2 %v12635_v1, %s8956_s28 }
0x107a   : > { %v5233_v11 = vpop.permute.xlu1 %5232 }
0x107b   : > { %5188 = vrot.lane.b32.xlu0 %v12631_v5, %s8956_s28  ;;  %s14117_s28 = sld [smem:[#allocation93_spill]] }
0x107f   : > { %5182 = vrot.lane.b32.xlu2 %v12631_v5, %s8957_s12 }
0x1082   : > { %v5187_v41 = vpop.permute.xlu1 %5186 }
0x1083   : > { %5178 = vrot.lane.b32.xlu0 %v12635_v1, %s8957_s12 }
0x1087   : > { %5502 = vrot.lane.b32.xlu2 %v12626_v40, %s8958_s6 }
0x108a   : > { %v5455_v60 = vpop.permute.xlu1 %5454 }
0x108b   : > { %5180 = vrot.lane.b32.xlu0 %v12623_v34, %s8957_s12  ;;  %s7129_s12 = scalar_lea.vmem %s14117_s28, %s8937_s26 }
0x108f   : > { %5496 = vrot.lane.b32.xlu2 %v12626_v40, %s8960_s5 }
0x1092   : > { %v5451_v46 = vpop.permute.xlu1 %5450 }
0x1093   : > { %5452 = vrot.lane.b32.xlu0 %v12623_v34, %s8958_s6 }
0x1097   : > { %5770 = vrot.lane.b32.xlu2 %v12609_v15, %s8961_s9 }
0x109a   : > { %v8527_v48 = vpop.permute.xlu1 %8526 }
0x109b   : > { %5444 = vrot.lane.b32.xlu0 %v12635_v1, %s8960_s5  ;;  %v8529_v25 = vunpack.i.h.bf16 %v8527_v48 }
0x10a2   : > { %v5447_v8 = vpop.permute.xlu1 %5446 }
0x10a3   : > { %5718 = vrot.lane.b32.xlu0 %v12623_v34, %s8961_s9 }
0x10aa   : > { %v12726_v13 = vpop.permute.xlu1 %8531 }
0x10ab   : > { %v8533_v26 = vunpack.i.l.bf16 %v12726_v13 }
0x10b2   : > { %v5505_v22 = vpop.permute.xlu1 %5504 }
0x10b3   : > { %7586 = vmatpush.xpose.msk.msra.mxu0 %vm391_vm1, %v5505_v22 }
0x10ba   : > { %v5721_v62 = vpop.permute.xlu1 %5720 }
0x10c2   : > { %v5065_v27 = vpop.xlane.xlu0 %5064 }
0x10c3   : > { %8585 = vrcp.f32 %v5065_v27 }
0x10c9   : > { %v8586_v19 = vpop.eup %8585 }
0x10ca   : > { %v5068_v31 = vpop.xlane.xlu2 %5067  ;;  %v5081_v14 = vmul.f32 %v8586_v19, %v8580_v9  ;;  %v8528_v9 = vunpack.i.l.bf16 %v8527_v48 }
0x10cb   : > { %8587 = vrcp.f32 %v5068_v31 }
0x10cc   : > { %7559 = vmatmul.msk.f32.vlgmr.msrb.gmra.mxu2 %vm3270_vm4, %v5081_v14 }
0x10d1   : > { %v8588_v37 = vpop.eup %8587 }
0x10d2   : > { %v5229_v2 = vpop.permute.xlu2 %5228  ;;  %v5071_v47 = vpop.xlane.xlu0 %5070  ;;  %v5082_v29 = vmul.f32 %v8588_v37, %v8582_v53 }
0x10d3   : > { %8589 = vrcp.f32 %v5071_v47 }
0x10d4   : > { %7560 = vmatmul.msk.f32.gmra.mxu2 %vm3270_vm4, %v5082_v29 }
0x10d9   : > { %v8590_v10 = vpop.eup %8589 }
0x10da   : > { %v5185_v51 = vpop.permute.xlu2 %5184  ;;  %v5083_v59 = vmul.f32 %v8590_v10, %v8584_v6  ;;  %v5449_v6 = vpop.permute.xlu1 %5448  ;;  %v5002_v10 = vmul.f32 0.35355338, %v4946_v35 }
0x10dc   : > { %7561 = vmatmul.msk.f32.gmra.mxu2 %vm3270_vm4, %v5083_v59  ;;  %v12793_v59 = vadd.f32 %v12657_v38, %v5002_v10 }
0x10e2   : > { %v5183_v7 = vpop.permute.xlu2 %5182 }
0x10e5   : > { %v5237_v55 = vpop.permute.xlu0 %5236 }
0x10e6   : > { %7569 = vmatpush.xpose.msk.msra.mxu2 %vm391_vm1, %v5237_v55 }
0x10ea   : > { %v5503_v18 = vpop.permute.xlu2 %5502  ;;  %7570 = vmatpush.xpose.msk.msra.mxu2 %vm391_vm1, %v5235_v57 }
0x10eb   : > { %7587 = vmatpush.xpose.msk.msra.mxu0 %vm391_vm1, %v5503_v18 }
0x10ed   : > { %7571 = vmatmul.msk.f32.vlgmr.msra.gmra.mxu2 %vm391_vm1, %v5229_v2  ;;  %v5189_v12 = vpop.permute.xlu0 %5188 }
0x10ee   : > { %5431 = vmatpush.msrb.mxu2 %v8528_v9  ;;  %7562 = vmatpush.xpose.msk.msrb.mxu3 %vm391_vm1, %v5189_v12 }
0x10f0   : > { %5432 = vmatpush.msrb.mxu2 %v8529_v25 }
0x10f2   : > { %5433 = vmatpush.msrb.mxu2 %v8533_v26  ;;  %7563 = vmatpush.xpose.msk.msrb.mxu3 %vm391_vm1, %v5187_v41 }
0x10f4   : > { %7683 = vmatpush.xpose.msk.msra.mxu2 %vm391_vm1, %v5505_v22 }
0x10f5   : > { %v5179_v53 = vpop.permute.xlu0 %5178  ;;  %7572 = vmatmul.msk.f32.gmra.mxu2 %vm391_vm1, %v5231_v44 }
0x10f6   : > { %7564 = vmatpush.xpose.msk.msrb.mxu3 %vm391_vm1, %v5185_v51 }
0x10f8   : > { %7684 = vmatpush.xpose.msk.msra.mxu2 %vm391_vm1, %v5503_v18 }
0x10f9   : > { %7565 = vmatmul.msk.f32.vlgmr.msrb.gmra.mxu3 %vm391_vm1, %v5179_v53 }
0x10fa   : > { %7580 = vmatpush.xpose.msk.msra.mxu3 %vm391_vm1, %v5455_v60 }
0x10fd   : > { %v5181_v61 = vpop.permute.xlu0 %5180  ;;  %7573 = vmatmul.msk.f32.gmra.mxu2 %vm391_vm1, %v5233_v11 }
0x1101   : > { %7566 = vmatmul.msk.f32.gmra.mxu3 %vm391_vm1, %v5181_v61 }
0x1105   : > { %v5453_v24 = vpop.permute.xlu0 %5452 }
0x1106   : > { %7581 = vmatpush.xpose.msk.msra.mxu3 %vm391_vm1, %v5453_v24 }
0x1109   : > { %7567 = vmatmul.msk.f32.gmra.mxu3 %vm391_vm1, %v5183_v7  ;;  %v5018_v7 = vsel %vm3270_vm4, %v12793_v59, -inf }
0x110a   : > { %7582 = vmatpush.xpose.msk.msra.mxu3 %vm391_vm1, %v5451_v46 }
0x110d   : > { %v5445_v30 = vpop.permute.xlu0 %5444 }
0x110e   : > { %7598 = vmatpush.xpose.msk.msrb.mxu3 %vm391_vm1, %v5721_v62 }
0x1111   : > { %7583 = vmatmul.msk.f32.vlgmr.msra.gmra.mxu3 %vm391_vm1, %v5445_v30 }
0x1115   : > { %v5719_v32 = vpop.permute.xlu0 %5718 }
0x1116   : > { %7599 = vmatpush.xpose.msk.msrb.mxu3 %vm391_vm1, %v5719_v32 }
0x1119   : > { %7584 = vmatmul.msk.f32.gmra.mxu3 %vm391_vm1, %v5447_v8 }
0x1121   : > { %7585 = vmatmul.msk.f32.gmra.mxu3 %vm391_vm1, %v5449_v6 }
0x114f   : > { %v12759_v57 = vpop.f32.mrf.mxu2 }
0x1157   : > { %v12761_v44 = vpop.f32.mrf.mxu2 }
0x115f   : > { %v12763_v11 = vpop.f32.mrf.mxu2 }
0x1170   : > { %v5269_v41 = vpop.f32.mrf.mxu2 }
0x1171   : > { %v5281_v60 = vmul.f32 0.35355338, %v5269_v41  ;;  %v5497_v41 = vpop.permute.xlu2 %5496 }
0x1173   : > { %v5287_v46 = vadd.f32 %v5281_v60, %v12657_v38 }
0x1175   : > { %v5299_v48 = vsel %vm3270_vm4, %v5287_v46, -inf }
0x1176   : > { %5300 = vmax.xlane.f32.xlu0 %v5299_v48 }
0x1178   : > { %v5272_v8 = vpop.f32.mrf.mxu2 }
0x1179   : > { %v5282_v22 = vmul.f32 0.35355338, %v5272_v8 }
0x117b   : > { %v5288_v27 = vadd.f32 %v5282_v22, %v12657_v38 }
0x117c   : > { %v5219_v47 = vpop.f32.mrf.mxu3 }
0x117d   : > { %v5302_v19 = vsel %vm3270_vm4, %v5288_v27, -inf }
0x117e   : > { %5303 = vmax.xlane.f32.xlu1 %v5302_v19 }
0x1180   : > { %v5275_v31 = vpop.f32.mrf.mxu2 }
0x1181   : > { %v5283_v14 = vmul.f32 0.35355338, %v5275_v31 }
0x1183   : > { %v12770_v37 = vadd.f32 %v5283_v14, %v12657_v38 }
0x1184   : > { %v5222_v29 = vpop.f32.mrf.mxu3 }
0x1185   : > { %v5305_v2 = vsel %vm3270_vm4, %v12770_v37, -inf }
0x1186   : > { %5306 = vmax.xlane.f32.xlu2 %v5305_v2 }
0x118a   : > { %5710 = vrot.lane.b32.xlu0 %v12635_v1, %s8962_s1 }
0x118c   : > { %v12790_v51 = vpop.f32.mrf.mxu3 }
0x1192   : > { %5498 = vrot.lane.b32.xlu0 %v12609_v15, %s8960_s5 }
0x1194   : > { %v5485_v18 = vpop.f32.mrf.mxu3 }
0x1195   : > { %v5544_v25 = vmul.f32 0.35355338, %v5485_v18 }
0x1197   : > { %5500 = vrot.lane.b32.xlu1 %v12619_v28, %s8958_s6  ;;  %v12804_v30 = vadd.f32 %v5544_v25, %v12657_v38 }
0x1199   : > { %v5556_v32 = vsel %vm3270_vm4, %v12804_v30, -inf }
0x119f   : > { %5716 = vrot.lane.b32.xlu1 %v12635_v1, %s8961_s9  ;;  %v5278_v1 = vmul.f32 0.35355338, %v5219_v47  ;;  %v5003_v47 = vmul.f32 0.35355338, %v12755_v20 }
0x11a1   : > { %v12836_v10 = vadd.f32 %v12657_v38, %v5003_v47 }
0x11a7   : > { %5494 = vrot.lane.b32.xlu1 %v12619_v28, %s8960_s5 }
0x11af   : > { %5712 = vrot.lane.b32.xlu1 %v12623_v34, %s8962_s1 }
0x11b7   : > { %5714 = vrot.lane.b32.xlu1 %v12631_v5, %s8962_s1  ;;  %v12798_v5 = vadd.f32 %v5278_v1, %v12657_v38  ;;  %v5279_v1 = vmul.f32 0.35355338, %v5222_v29 }
0x11b9   : > { %v5290_v12 = vsel %vm3270_vm4, %v12798_v5, -inf }
0x11bf   : > { %5760 = vrot.lane.b32.xlu1 %v12619_v28, %s8962_s1 }
0x11e9   : > { %v5301_v55 = vpop.xlane.xlu0 %5300  ;;  %5019 = vmax.xlane.f32.xlu1 %v5018_v7  ;;  %v12841_v7 = vadd.f32 %v5279_v1, %v12657_v38 }
0x11ea   : > { %v5311_v34 = vsub.f32 %v5287_v46, %v5301_v55  ;;  %v5771_v46 = vpop.permute.xlu2 %5770 }
0x11eb   : > { %v5293_v55 = vsel %vm3270_vm4, %v12841_v7, -inf }
0x11ec   : > { %v5320_v9 = vmul.f32 1.442695, %v5311_v34 }
0x11ee   : > { %8591 = vpow2.f32 %v5320_v9 }
0x11f1   : > { %v5304_v26 = vpop.xlane.xlu1 %5303  ;;  %5291 = vmax.xlane.f32.xlu1 %v5290_v12 }
0x11f2   : > { %v5312_v53 = vsub.f32 %v5288_v27, %v5304_v26 }
0x11f4   : > { %v8592_v61 = vpop.eup %8591  ;;  %v5322_v24 = vmul.f32 1.442695, %v5312_v53  ;;  %v5004_v53 = vmul.f32 0.35355338, %v12757_v23 }
0x11f5   : > { %v5335_v62 = vsel %vm3270_vm4, %v8592_v61, 0.0 }
0x11f6   : > { %5336 = vadd.xlane.f32.xlu2 %v5335_v62  ;;  %8593 = vpow2.f32 %v5322_v24 }
0x11f9   : > { %5557 = vmax.xlane.f32.xlu1 %v5556_v32  ;;  %v5307_v27 = vpop.xlane.xlu2 %5306 }
0x11fa   : > { %v5313_v19 = vsub.f32 %v12770_v37, %v5307_v27  ;;  %v5021_v37 = vsel %vm3270_vm4, %v12836_v10, -inf }
0x11fc   : > { %v12808_v6 = vpop.eup %8593  ;;  %v5711_v8 = vpop.permute.xlu0 %5710  ;;  %v5324_v31 = vmul.f32 1.442695, %v5313_v19 }
0x11fd   : > { %v5338_v35 = vsel %vm3270_vm4, %v12808_v6, 0.0 }
0x11fe   : > { %5339 = vadd.xlane.f32.xlu0 %v5338_v35  ;;  %8595 = vpow2.f32 %v5324_v31  ;;  %v5280_v35 = vmul.f32 0.35355338, %v12790_v51 }
0x1204   : > { %v12830_v2 = vpop.eup %8595  ;;  %v5499_v26 = vpop.permute.xlu0 %5498 }
0x1209   : > { %v5501_v60 = vpop.permute.xlu1 %5500 }
0x120a   : > { %7588 = vmatpush.xpose.msk.msra.mxu0 %vm391_vm1, %v5501_v60  ;;  %7685 = vmatpush.xpose.msk.msra.mxu2 %vm391_vm1, %v5501_v60 }
0x120e   : > { %7604 = vmatpush.xpose.msk.msrb.mxu0 %vm391_vm1, %v5771_v46  ;;  %5766 = vrot.lane.b32.xlu2 %v12619_v28, %s8961_s9  ;;  %v12864_v46 = vadd.f32 %v5280_v35, %v12657_v38 }
0x1211   : > { %v5717_v48 = vpop.permute.xlu1 %5716 }
0x1212   : > { %5768 = vrot.lane.b32.xlu0 %v12626_v40, %s8961_s9  ;;  %8536 = vrot.lane.b32.xlu1 %v12602_v43, %s8955_s7 }
0x1213   : > { %7600 = vmatpush.xpose.msk.msrb.mxu3 %vm391_vm1, %v5717_v48 }
0x1216   : > { %7601 = vmatmul.msk.f32.vlgmr.msrb.gmra.mxu3 %vm391_vm1, %v5711_v8 }
0x1219   : > { %v5495_v22 = vpop.permute.xlu1 %5494 }
0x121a   : > { %5762 = vrot.lane.b32.xlu0 %v12626_v40, %s8962_s1  ;;  %7589 = vmatmul.msk.f32.vlgmr.msra.gmra.mxu0 %vm391_vm1, %v5495_v22  ;;  %v5341_v40 = vsel %vm3270_vm4, %v12830_v2, 0.0  ;;  %v5296_v22 = vsel %vm3270_vm4, %v12864_v46, -inf }
0x1221   : > { %v5713_v28 = vpop.permute.xlu1 %5712 }
0x1222   : > { %7590 = vmatmul.msk.f32.gmra.mxu0 %vm391_vm1, %v5497_v41  ;;  %7602 = vmatmul.msk.f32.gmra.mxu3 %vm391_vm1, %v5713_v28 }
0x1229   : > { %v5715_v14 = vpop.permute.xlu1 %5714 }
0x122a   : > { %7603 = vmatmul.msk.f32.gmra.mxu3 %vm391_vm1, %v5715_v14 }
0x1231   : > { %v5761_v34 = vpop.permute.xlu1 %5760 }
0x1237   : > { %5342 = vadd.xlane.f32.xlu2 %v5341_v40 }
0x1244   : > { %5022 = vmax.xlane.f32.xlu0 %v5021_v37 }
0x124c   : > { %5294 = vmax.xlane.f32.xlu0 %v5293_v55 }
0x124f   : > { %5764 = vrot.lane.b32.xlu2 %v12609_v15, %s8962_s1  ;;  %s14118_s1 = sld [smem:[#allocation95_spill]] }
0x125c   : > { %v5020_v20 = vpop.xlane.xlu1 %5019 }
0x125d   : > { %v5036_v9 = vsub.f32 %v12793_v59, %v5020_v20  ;;  %v12856_v59 = vadd.f32 %v12657_v38, %v5004_v53 }
0x125f   : > { %v5042_v18 = vmul.f32 1.442695, %v5036_v9  ;;  %v5024_v41 = vsel %vm3270_vm4, %v12856_v59, -inf }
0x1261   : > { %8597 = vpow2.f32 %v5042_v18 }
0x1264   : > { %v12853_v32 = vpop.xlane.xlu1 %5291 }
0x1267   : > { %v12848_v29 = vpop.eup %8597 }
0x1268   : > { %v5054_v25 = vsel %vm3270_vm4, %v12848_v29, 0.0 }
0x1269   : > { %v5337_v12 = vpop.xlane.xlu2 %5336  ;;  %5055 = vadd.xlane.f32.xlu0 %v5054_v25 }
0x126a   : > { %8599 = vrcp.f32 %v5337_v12 }
0x126c   : > { %v12867_v48 = vpop.xlane.xlu1 %5557 }
0x1270   : > { %v8600_v24 = vpop.eup %8599 }
0x1271   : > { %v5340_v62 = vpop.xlane.xlu0 %5339  ;;  %v5353_v15 = vmul.f32 %v8600_v24, %v8592_v61  ;;  %v5488_v61 = vpop.f32.mrf.mxu3 }
0x1272   : > { %8601 = vrcp.f32 %v5340_v62  ;;  %v5545_v8 = vmul.f32 0.35355338, %v5488_v61  ;;  %v5767_v14 = vpop.permute.xlu2 %5766 }
0x1273   : > { %7577 = vmatmul.msk.f32.vlgmr.msrb.gmra.mxu2 %vm3270_vm4, %v5353_v15 }
0x1274   : > { %v12872_v51 = vadd.f32 %v5545_v8, %v12657_v38 }
0x1276   : > { %v5559_v19 = vsel %vm3270_vm4, %v12872_v51, -inf }
0x1278   : > { %5025 = vmax.xlane.f32.xlu2 %v5024_v41  ;;  %v8602_v60 = vpop.eup %8601 }
0x1279   : > { %v5354_v23 = vmul.f32 %v8602_v60, %v12808_v6  ;;  %v5491_v1 = vpop.f32.mrf.mxu3 }
0x127a   : > { %v5546_v35 = vmul.f32 0.35355338, %v5491_v1 }
0x127b   : > { %7578 = vmatmul.msk.f32.gmra.mxu2 %vm3270_vm4, %v5354_v23 }
0x1280   : > { %5297 = vmax.xlane.f32.xlu2 %v5296_v22 }
0x1284   : > { %v8537_v27 = vpop.permute.xlu1 %8536  ;;  %v5769_v28 = vpop.permute.xlu0 %5768 }
0x1285   : > { %7605 = vmatpush.xpose.msk.msrb.mxu0 %vm391_vm1, %v5769_v28  ;;  %v8538_v6 = vunpack.i.l.bf16 %v8537_v27  ;;  %v8539_v31 = vunpack.i.h.bf16 %v8537_v27 }
0x1287   : > { %5118 = vmatpush.msrb.mxu1 %v8538_v6  ;;  %v5308_v6 = vsub.f32 %v12798_v5, %v12853_v32 }
0x1288   : > { %5560 = vmax.xlane.f32.xlu2 %v5559_v19 }
0x1289   : > { %5119 = vmatpush.msrb.mxu1 %v8539_v31  ;;  %7606 = vmatpush.xpose.msk.msrb.mxu0 %vm391_vm1, %v5767_v14  ;;  %v5314_v14 = vmul.f32 1.442695, %v5308_v6  ;;  %v8534_v6 = vunpack.i.h.bf16 %v12726_v13 }
0x128c   : > { %7607 = vmatmul.msk.f32.vlgmr.msrb.gmra.mxu0 %vm391_vm1, %v5761_v34  ;;  %v5763_v40 = vpop.permute.xlu0 %5762 }
0x1294   : > { %7608 = vmatmul.msk.f32.gmra.mxu0 %vm391_vm1, %v5763_v40 }
0x1297   : > { %v5535_v9 = vpop.f32.mrf.mxu0 }
0x1298   : > { %v5547_v61 = vmul.f32 0.35355338, %v5535_v9 }
0x1299   : > { %v5751_v18 = vpop.f32.mrf.mxu3 }
0x129a   : > { %v12907_v28 = vadd.f32 %v5547_v61, %v12657_v38  ;;  %v5810_v19 = vmul.f32 0.35355338, %v5751_v18 }
0x129c   : > { %v5565_v31 = vsel %vm3270_vm4, %v12907_v28, -inf  ;;  %v12914_v40 = vadd.f32 %v5810_v19, %v12657_v38  ;;  %v5574_v19 = vsub.f32 %v12804_v30, %v12867_v48 }
0x129f   : > { %v5538_v24 = vpop.f32.mrf.mxu0 }
0x12a0   : > { %5087 = vrot.lane.b32.xlu2 %v12594_v42, %s8955_s7  ;;  %v5548_v62 = vmul.f32 0.35355338, %v5538_v24 }
0x12a2   : > { %v12892_v41 = vadd.f32 %v5548_v62, %v12657_v38 }
0x12a5   : > { %v5754_v12 = vpop.f32.mrf.mxu3 }
0x12aa   : > { %v5343_v47 = vpop.xlane.xlu2 %5342 }
0x12ab   : > { %8603 = vrcp.f32 %v5343_v47  ;;  %v5822_v47 = vsel %vm3270_vm4, %v12914_v40, -inf }
0x12ad   : > { %v5757_v60 = vpop.f32.mrf.mxu3 }
0x12ae   : > { %v5812_v23 = vmul.f32 0.35355338, %v5757_v60 }
0x12b0   : > { %v12902_v22 = vadd.f32 %v5812_v23, %v12657_v38 }
0x12b1   : > { %v8604_v37 = vpop.eup %8603 }
0x12b2   : > { %v5765_v55 = vpop.permute.xlu2 %5764  ;;  %v5355_v20 = vmul.f32 %v8604_v37, %v12830_v2  ;;  %v5828_v27 = vsel %vm3270_vm4, %v12902_v22, -inf  ;;  %v5811_v37 = vmul.f32 0.35355338, %v5754_v12 }
0x12b3   : > { %7609 = vmatmul.msk.f32.gmra.mxu0 %vm391_vm1, %v5765_v55 }
0x12b4   : > { %7579 = vmatmul.msk.f32.gmra.mxu2 %vm3270_vm4, %v5355_v20  ;;  %v12923_v32 = vadd.f32 %v5811_v37, %v12657_v38 }
0x12b6   : > { %v5825_v18 = vsel %vm3270_vm4, %v12923_v32, -inf }
0x12b7   : > { %v5023_v34 = vpop.xlane.xlu0 %5022 }
0x12b8   : > { %v5037_v25 = vsub.f32 %v12836_v10, %v5023_v34  ;;  %v5568_v10 = vsel %vm3270_vm4, %v12892_v41, -inf }
0x12ba   : > { %v5044_v53 = vmul.f32 1.442695, %v5037_v25 }
0x12bc   : > { %7591 = vmatmul.msk.f32.vlgmr.msra.gmra.mxu2 %vm391_vm1, %v5499_v26  ;;  %8605 = vpow2.f32 %v5044_v53  ;;  %v12897_v26 = vadd.f32 %v5546_v35, %v12657_v38 }
0x12bd   : > { %8607 = vpow2.f32 %v5314_v14 }
0x12be   : > { %v5562_v8 = vsel %vm3270_vm4, %v12897_v26, -inf }
0x12bf   : > { %v5295_v55 = vpop.xlane.xlu0 %5294 }
0x12c0   : > { %v5309_v34 = vsub.f32 %v12841_v7, %v5295_v55 }
0x12c2   : > { %v12887_v15 = vpop.eup %8605  ;;  %v5316_v12 = vmul.f32 1.442695, %v5309_v34 }
0x12c3   : > { %v5057_v2 = vsel %vm3270_vm4, %v12887_v15, 0.0  ;;  %v12918_v1 = vpop.eup %8607 }
0x12c4   : > { %5058 = vadd.xlane.f32.xlu0 %v5057_v2  ;;  %v5326_v5 = vsel %vm3270_vm4, %v12918_v1, 0.0 }
0x12c9   : > { %5569 = vmax.xlane.f32.xlu2 %v5568_v10 }
0x12cc   : > { %5563 = vmax.xlane.f32.xlu0 %v5562_v8 }
0x12d1   : > { %5829 = vmax.xlane.f32.xlu2 %v5828_v27 }
0x12d4   : > { %5566 = vmax.xlane.f32.xlu0 %v5565_v31  ;;  %v5580_v31 = vmul.f32 1.442695, %v5574_v19 }
0x12dc   : > { %5823 = vmax.xlane.f32.xlu0 %v5822_v47  ;;  %v5056_v2 = vpop.xlane.xlu0 %5055 }
0x12e4   : > { %5327 = vadd.xlane.f32.xlu0 %v5326_v5 }
0x12eb   : > { %v5026_v20 = vpop.xlane.xlu2 %5025 }
0x12ec   : > { %v5038_v9 = vsub.f32 %v12856_v59, %v5026_v20  ;;  %5826 = vmax.xlane.f32.xlu0 %v5825_v18 }
0x12ee   : > { %v5046_v25 = vmul.f32 1.442695, %v5038_v9 }
0x12f0   : > { %8609 = vpow2.f32 %v5046_v25 }
0x12f1   : > { %8611 = vpow2.f32 %v5316_v12 }
0x12f3   : > { %v5298_v53 = vpop.xlane.xlu2 %5297 }
0x12f4   : > { %v5310_v24 = vsub.f32 %v12864_v46, %v5298_v53 }
0x12f6   : > { %v12930_v62 = vpop.eup %8609  ;;  %v5318_v35 = vmul.f32 1.442695, %v5310_v24  ;;  %v12958_v30 = vpop.f32.mrf.mxu2 }
0x12f7   : > { %v5060_v59 = vsel %vm3270_vm4, %v12930_v62, 0.0  ;;  %v12934_v23 = vpop.eup %8611 }
0x12f8   : > { %8613 = vpow2.f32 %v5318_v35  ;;  %5061 = vadd.xlane.f32.xlu1 %v5060_v59  ;;  %v5329_v46 = vsel %vm3270_vm4, %v12934_v23, 0.0 }
0x12f9   : > { %8615 = vrcp.f32 %v5056_v2 }
0x12fa   : > { %8617 = vpow2.f32 %v5580_v31 }
0x12fb   : > { %v5561_v60 = vpop.xlane.xlu2 %5560 }
0x12fc   : > { %v5575_v55 = vsub.f32 %v12872_v51, %v5561_v60 }
0x12fe   : > { %v12936_v7 = vpop.eup %8613  ;;  %v12961_v20 = vpop.f32.mrf.mxu2  ;;  %v5582_v9 = vmul.f32 1.442695, %v5575_v55 }
0x12ff   : > { %v5332_v10 = vsel %vm3270_vm4, %v12936_v7, 0.0  ;;  %v8616_v61 = vpop.eup %8615 }
0x1300   : > { %5333 = vadd.xlane.f32.xlu2 %v5332_v10  ;;  %5330 = vadd.xlane.f32.xlu1 %v5329_v46  ;;  %v5078_v27 = vmul.f32 %v8616_v61, %v12848_v29  ;;  %v12952_v29 = vpop.eup %8617  ;;  %8619 = vpow2.f32 %v5582_v9 }
0x1301   : > { %v5592_v13 = vsel %vm3270_vm4, %v12952_v29, 0.0 }
0x1303   : > { %v5088_v8 = vpop.permute.xlu2 %5087 }
0x1304   : > { %5120 = vmatpush.msrb.mxu1 %v5088_v8 }
0x1305   : > { %7556 = vmatmul.msk.f32.vlgmr.msrb.gmra.mxu1 %vm3270_vm4, %v5078_v27 }
0x1306   : > { %5387 = vmatpush.msra.mxu1 %v8534_v6  ;;  %v12970_v35 = vpop.eup %8619 }
0x1307   : > { %v5595_v51 = vsel %vm3270_vm4, %v12970_v35, 0.0 }
0x1309   : > { %v5801_v14 = vpop.f32.mrf.mxu0 }
0x130a   : > { %v5813_v47 = vmul.f32 0.35355338, %v5801_v14  ;;  %v12994_v14 = vpack.i.bf16 %v12616_v56, %v12604_v39 }
0x130c   : > { %v12948_v37 = vadd.f32 %v5813_v47, %v12657_v38 }
0x130e   : > { %v5831_v5 = vsel %vm3270_vm4, %v12948_v37, -inf }
0x130f   : > { %5832 = vmax.xlane.f32.xlu1 %v5831_v5 }
0x1311   : > { %v5804_v48 = vpop.f32.mrf.mxu0 }
0x1312   : > { %v5814_v39 = vmul.f32 0.35355338, %v5804_v48 }
0x1314   : > { %v13005_v9 = vadd.f32 %v5814_v39, %v12657_v38 }
0x1317   : > { %5593 = vadd.xlane.f32.xlu1 %v5592_v13 }
0x1318   : > { %8546 = vrot.lane.b32.xlu2 %v12602_v43, %s8963_s11 }
0x1330   : > { %v5807_v18 = vpop.f32.mrf.mxu0 }
0x1331   : > { %v5815_v34 = vmul.f32 0.35355338, %v5807_v18  ;;  %v5834_v18 = vsel %vm3270_vm4, %v13005_v9, -inf }
0x1333   : > { %v12964_v25 = vadd.f32 %v5815_v34, %v12657_v38 }
0x1335   : > { %v5837_v12 = vsel %vm3270_vm4, %v12964_v25, -inf }
0x1336   : > { %5838 = vmax.xlane.f32.xlu1 %v5837_v12 }
0x1337   : > { %v12968_v53 = vpop.f32.mrf.mxu2  ;;  %v5059_v24 = vpop.xlane.xlu0 %5058 }
0x1338   : > { %8621 = vrcp.f32 %v5059_v24 }
0x133c   : > { %v5570_v24 = vpop.xlane.xlu2 %5569 }
0x133d   : > { %v5578_v48 = vsub.f32 %v12892_v41, %v5570_v24 }
0x133e   : > { %5596 = vadd.xlane.f32.xlu1 %v5595_v51  ;;  %v8622_v2 = vpop.eup %8621 }
0x133f   : > { %v5541_v59 = vpop.f32.mrf.mxu2  ;;  %v5564_v10 = vpop.xlane.xlu0 %5563  ;;  %v5079_v46 = vmul.f32 %v8622_v2, %v12887_v15  ;;  %v8550_v15 = vpack.i.bf16 %v12606_v4, %v12594_v42 }
0x1340   : > { %v5549_v60 = vmul.f32 0.35355338, %v5541_v59  ;;  %v5576_v61 = vsub.f32 %v12897_v26, %v5564_v10  ;;  %v8540_v26 = vpack.i.bf16 %v12594_v42, %v12596_v49 }
0x1341   : > { %7557 = vmatmul.msk.f32.gmra.mxu1 %vm3270_vm4, %v5079_v46 }
0x1342   : > { %v12978_v8 = vadd.f32 %v5549_v60, %v12657_v38  ;;  %v5584_v27 = vmul.f32 1.442695, %v5576_v61 }
0x1344   : > { %v5571_v6 = vsel %vm3270_vm4, %v12978_v8, -inf  ;;  %8623 = vpow2.f32 %v5584_v27  ;;  %v5830_v61 = vpop.xlane.xlu2 %5829 }
0x1345   : > { %5572 = vmax.xlane.f32.xlu0 %v5571_v6 }
0x1347   : > { %v5567_v4 = vpop.xlane.xlu0 %5566 }
0x1348   : > { %v5577_v49 = vsub.f32 %v12907_v28, %v5567_v4 }
0x134a   : > { %v12982_v19 = vpop.eup %8623  ;;  %v5586_v55 = vmul.f32 1.442695, %v5577_v49 }
0x134b   : > { %v5598_v31 = vsel %vm3270_vm4, %v12982_v19, 0.0 }
0x134c   : > { %5599 = vadd.xlane.f32.xlu2 %v5598_v31  ;;  %v5842_v31 = vsub.f32 %v12902_v22, %v5830_v61 }
0x134f   : > { %v5824_v56 = vpop.xlane.xlu0 %5823 }
0x1357   : > { %8551 = vrot.lane.b32.xlu1 %v8550_v15, %s8963_s11  ;;  %v5328_v34 = vpop.xlane.xlu0 %5327 }
0x1359   : > { %8541 = vrot.lane.b32.xlu0 %v8540_v26, %s8959_s30 }
0x135f   : > { %8556 = vrot.lane.b32.xlu1 %v12994_v14, %s8963_s11  ;;  %v5827_v59 = vpop.xlane.xlu0 %5826  ;;  %s7135_s11 = scalar_lea.vmem %s14118_s1, %s12566_s25  ;;  %s7628_s25 = sshll.u32 %s8937_s26, 1 }
0x1360   : > { %v5841_v10 = vsub.f32 %v12923_v32, %v5827_v59  ;;  %s7145_s0 = scalar_lea.vmem %s13785_s15, %s7628_s25 }
0x1362   : > { %v5848_v41 = vmul.f32 1.442695, %v5841_v10 }
0x1367   : > { %8561 = vrot.lane.b32.xlu1 %v12602_v43, %s8964_s27  ;;  %v5840_v43 = vsub.f32 %v12914_v40, %v5824_v56  ;;  %v5588_v40 = vmul.f32 1.442695, %v5578_v48 }
0x1369   : > { %v5846_v12 = vmul.f32 1.442695, %v5840_v43 }
0x136b   : > { %v5062_v47 = vpop.xlane.xlu1 %5061 }
0x136c   : > { %8625 = vrcp.f32 %v5062_v47 }
0x136d   : > { %8627 = vpow2.f32 %v5586_v55 }
0x136e   : > { %8629 = vpow2.f32 %v5846_v12 }
0x136f   : > { %8566 = vrot.lane.b32.xlu1 %v8550_v15, %s8964_s27  ;;  %v5850_v15 = vmul.f32 1.442695, %v5842_v31 }
0x1372   : > { %v8626_v5 = vpop.eup %8625 }
0x1373   : > { %v5080_v42 = vmul.f32 %v8626_v5, %v12930_v62  ;;  %v5331_v13 = vpop.xlane.xlu1 %5330  ;;  %v13010_v51 = vpop.eup %8627 }
0x1374   : > { %v5601_v38 = vsel %vm3270_vm4, %v13010_v51, 0.0  ;;  %v13016_v60 = vpop.eup %8629 }
0x1375   : > { %7558 = vmatmul.msk.f32.gmra.mxu1 %vm3270_vm4, %v5080_v42  ;;  %v5858_v46 = vsel %vm3270_vm4, %v13016_v60, 0.0 }
0x1382   : > { %v5833_v62 = vpop.xlane.xlu1 %5832 }
0x1383   : > { %5835 = vmax.xlane.f32.xlu0 %v5834_v18  ;;  %v5843_v28 = vsub.f32 %v12948_v37, %v5833_v62  ;;  %v5334_v18 = vpop.xlane.xlu2 %5333 }
0x1385   : > { %v5852_v2 = vmul.f32 1.442695, %v5843_v28 }
0x1387   : > { %8631 = vpow2.f32 %v5852_v2 }
0x1388   : > { %8633 = vpow2.f32 %v5588_v40 }
0x1389   : > { %8635 = vpow2.f32 %v5848_v41 }
0x138a   : > { %8637 = vpow2.f32 %v5850_v15  ;;  %v5594_v22 = vpop.xlane.xlu1 %5593 }
0x138b   : > { %5602 = vadd.xlane.f32.xlu0 %v5601_v38  ;;  %v8547_v2 = vpop.permute.xlu2 %8546 }
0x138c   : > { %v8548_v59 = vunpack.i.l.bf16 %v8547_v2 }
0x138d   : > { %v13021_v37 = vpop.eup %8631 }
0x138e   : > { %v13023_v27 = vpop.eup %8633  ;;  %v5867_v6 = vsel %vm3270_vm4, %v13021_v37, 0.0 }
0x138f   : > { %v5604_v32 = vsel %vm3270_vm4, %v13023_v27, 0.0  ;;  %v13030_v26 = vpop.eup %8635 }
0x1390   : > { %v5861_v47 = vsel %vm3270_vm4, %v13030_v26, 0.0  ;;  %v13034_v4 = vpop.eup %8637 }
0x1391   : > { %v5864_v5 = vsel %vm3270_vm4, %v13034_v4, 0.0 }
0x1393   : > { %5859 = vadd.xlane.f32.xlu0 %v5858_v46  ;;  %v8549_v46 = vunpack.i.h.bf16 %v8547_v2 }
0x1399   : > { %5868 = vadd.xlane.f32.xlu1 %v5867_v6 }
0x139b   : > { %5605 = vadd.xlane.f32.xlu0 %v5604_v32 }
0x13a3   : > { %5862 = vadd.xlane.f32.xlu0 %v5861_v47 }
0x13a9   : > { %v13038_v42 = vpop.xlane.xlu1 %5838 }
0x13ab   : > { %5865 = vadd.xlane.f32.xlu0 %v5864_v5 }
0x13b1   : > { %v5597_v55 = vpop.xlane.xlu1 %5596 }
0x13b8   : > { %v5573_v49 = vpop.xlane.xlu0 %5572 }
0x13b9   : > { %v5579_v39 = vsub.f32 %v12978_v8, %v5573_v49 }
0x13bb   : > { %v5590_v56 = vmul.f32 1.442695, %v5579_v39 }
0x13bd   : > { %8639 = vpow2.f32 %v5590_v56 }
0x13be   : > { %8641 = vrcp.f32 %v5328_v34 }
0x13bf   : > { %8643 = vrcp.f32 %v5331_v13 }
0x13c0   : > { %8645 = vrcp.f32 %v5334_v18  ;;  %v5600_v18 = vpop.xlane.xlu2 %5599 }
0x13c1   : > { %8647 = vrcp.f32 %v5594_v22 }
0x13c2   : > { %8649 = vrcp.f32 %v5597_v55  ;;  %v5845_v55 = vsub.f32 %v12964_v25, %v13038_v42 }
0x13c3   : > { %v13041_v43 = vpop.eup %8639  ;;  %8651 = vrcp.f32 %v5600_v18 }
0x13c4   : > { %v5607_v62 = vsel %vm3270_vm4, %v13041_v43, 0.0  ;;  %v8642_v48 = vpop.eup %8641 }
0x13c5   : > { %5608 = vadd.xlane.f32.xlu2 %v5607_v62  ;;  %v5350_v40 = vmul.f32 %v8642_v48, %v12918_v1  ;;  %v8644_v34 = vpop.eup %8643 }
0x13c6   : > { %v5351_v13 = vmul.f32 %v8644_v34, %v12934_v23  ;;  %v8646_v32 = vpop.eup %8645 }
0x13c7   : > { %v5352_v47 = vmul.f32 %v8646_v32, %v12936_v7  ;;  %v8648_v23 = vpop.eup %8647 }
0x13c8   : > { %v5616_v56 = vmul.f32 %v8648_v23, %v12952_v29  ;;  %v8650_v62 = vpop.eup %8649  ;;  %v5856_v29 = vmul.f32 1.442695, %v5845_v55 }
0x13c9   : > { %v8552_v12 = vpop.permute.xlu1 %8551  ;;  %v8652_v7 = vpop.eup %8651 }
0x13ca   : > { %v8554_v24 = vunpack.i.h.bf16 %v8552_v12  ;;  %v8553_v61 = vunpack.i.l.bf16 %v8552_v12 }
0x13cb   : > { %v8542_v28 = vpop.permute.xlu0 %8541 }
0x13cc   : > { %v8543_v38 = vunpack.i.l.bf16 %v8542_v28  ;;  %5697 = vmatpush.msrb.mxu2 %v8554_v24  ;;  %v8544_v8 = vunpack.i.h.bf16 %v8542_v28  ;;  %v5618_v24 = vmul.f32 %v8652_v7, %v12982_v19 }
0x13ce   : > { %5388 = vmatpush.msra.mxu1 %v8543_v38 }
0x13d0   : > { %5389 = vmatpush.msra.mxu1 %v8544_v8 }
0x13d1   : > { %v8557_v10 = vpop.permute.xlu1 %8556  ;;  %7574 = vmatmul.msk.f32.vlgmr.msra.gmra.mxu1 %vm3270_vm4, %v5350_v40 }
0x13d2   : > { %v8558_v41 = vunpack.i.l.bf16 %v8557_v10  ;;  %5653 = vmatpush.msrb.mxu1 %v8548_v59  ;;  %v8559_v6 = vunpack.i.h.bf16 %v8557_v10 }
0x13d4   : > { %5654 = vmatpush.msrb.mxu1 %v8549_v46  ;;  %5698 = vmatpush.msrb.mxu2 %v8558_v41 }
0x13d6   : > { %5655 = vmatpush.msrb.mxu1 %v8553_v61  ;;  %5699 = vmatpush.msrb.mxu2 %v8559_v6 }
0x13d9   : > { %v8562_v31 = vpop.permute.xlu1 %8561  ;;  %7575 = vmatmul.msk.f32.gmra.mxu1 %vm3270_vm4, %v5351_v13  ;;  %v13080_v13 = vpop.f32.mrf.mxu1 }
0x13da   : > { %v8563_v1 = vunpack.i.l.bf16 %v8562_v31  ;;  %v8564_v15 = vunpack.i.h.bf16 %v8562_v31 }
0x13dc   : > { %5919 = vmatpush.msra.mxu1 %v8563_v1 }
0x13dd   : > { %8571 = vrot.lane.b32.xlu2 %v12994_v14, %s8964_s27  ;;  %v5617_v14 = vmul.f32 %v8650_v62, %v12970_v35 }
0x13de   : > { %5920 = vmatpush.msra.mxu1 %v8564_v15 }
0x13e1   : > { %v8567_v5 = vpop.permute.xlu1 %8566  ;;  %7576 = vmatmul.msk.f32.gmra.mxu1 %vm3270_vm4, %v5352_v47  ;;  %v13082_v1 = vpop.f32.mrf.mxu1 }
0x13e2   : > { %v8569_v49 = vunpack.i.h.bf16 %v8567_v5  ;;  %v8568_v39 = vunpack.i.l.bf16 %v8567_v5 }
0x13e4   : > { %5921 = vmatpush.msra.mxu1 %v8568_v39  ;;  %5963 = vmatpush.msra.mxu2 %v8569_v49 }
0x13e9   : > { %7592 = vmatmul.msk.f32.vlgmr.msrb.gmra.mxu1 %vm3270_vm4, %v5616_v56 }
0x13f1   : > { %7593 = vmatmul.msk.f32.gmra.mxu1 %vm3270_vm4, %v5617_v14 }
0x13f2   : > { %v13086_v49 = vpop.f32.mrf.mxu1 }
0x13f6   : > { %v5836_v22 = vpop.xlane.xlu0 %5835 }
0x13f7   : > { %v5844_v12 = vsub.f32 %v13005_v9, %v5836_v22 }
0x13f9   : > { %v5854_v28 = vmul.f32 1.442695, %v5844_v12  ;;  %7594 = vmatmul.msk.f32.gmra.mxu1 %vm3270_vm4, %v5618_v24 }
0x13fb   : > { %8653 = vpow2.f32 %v5854_v28 }
0x13fe   : > { %v5603_v48 = vpop.xlane.xlu0 %5602 }
0x13ff   : > { %8655 = vrcp.f32 %v5603_v48 }
0x1400   : > { %8657 = vpow2.f32 %v5856_v29 }
0x1401   : > { %v13062_v38 = vpop.eup %8653 }
0x1402   : > { %v5870_v35 = vsel %vm3270_vm4, %v13062_v38, 0.0 }
0x1403   : > { %5871 = vadd.xlane.f32.xlu0 %v5870_v35  ;;  %v7619_v35 = vld [vmem:[%s7127_s4 + $0x50] sm:$0xff] }
0x1405   : > { %v8656_v9 = vpop.eup %8655 }
0x1406   : > { %v5860_v2 = vpop.xlane.xlu0 %5859  ;;  %v5619_v19 = vmul.f32 %v8656_v9, %v13010_v51  ;;  %v13067_v8 = vpop.eup %8657  ;;  %v7618_v9 = vld [vmem:[%s7127_s4 + $0x48] sm:$0xff] }
0x1407   : > { %8659 = vrcp.f32 %v5860_v2  ;;  %v5873_v25 = vsel %vm3270_vm4, %v13067_v8, 0.0 }
0x1408   : > { %7595 = vmatmul.msk.f32.vlgmr.msrb.gmra.mxu2 %vm3270_vm4, %v5619_v19 }
0x140b   : > { %5874 = vadd.xlane.f32.xlu0 %v5873_v25 }
0x140d   : > { %v8660_v42 = vpop.eup %8659 }
0x140e   : > { %v5606_v40 = vpop.xlane.xlu0 %5605  ;;  %v5882_v59 = vmul.f32 %v8660_v42, %v13016_v60 }
0x140f   : > { %8661 = vrcp.f32 %v5606_v40 }
0x1410   : > { %7610 = vmatmul.msk.f32.vlgmr.msra.gmra.mxu1 %vm3270_vm4, %v5882_v59 }
0x1415   : > { %v8662_v10 = vpop.eup %8661 }
0x1416   : > { %v5863_v46 = vpop.xlane.xlu0 %5862  ;;  %v5620_v51 = vmul.f32 %v8662_v10, %v13023_v27  ;;  %v5869_v27 = vpop.xlane.xlu1 %5868 }
0x1417   : > { %8663 = vrcp.f32 %v5863_v46 }
0x1418   : > { %7596 = vmatmul.msk.f32.gmra.mxu2 %vm3270_vm4, %v5620_v51 }
0x141d   : > { %v8664_v41 = vpop.eup %8663 }
0x141e   : > { %v5866_v34 = vpop.xlane.xlu0 %5865  ;;  %v5883_v61 = vmul.f32 %v8664_v41, %v13030_v26 }
0x141f   : > { %8665 = vrcp.f32 %v5866_v34 }
0x1420   : > { %7611 = vmatmul.msk.f32.gmra.mxu1 %vm3270_vm4, %v5883_v61 }
0x1425   : > { %v8666_v6 = vpop.eup %8665 }
0x1426   : > { %v5884_v60 = vmul.f32 %v8666_v6, %v13034_v4 }
0x1428   : > { %7612 = vmatmul.msk.f32.gmra.mxu1 %vm3270_vm4, %v5884_v60 }
0x1438   : > { %v5609_v31 = vpop.xlane.xlu2 %5608 }
0x1439   : > { %8667 = vrcp.f32 %v5609_v31 }
0x143a   : > { %8669 = vrcp.f32 %v5869_v27 }
0x143f   : > { %v8668_v32 = vpop.eup %8667 }
0x1440   : > { %v8572_v15 = vpop.permute.xlu2 %8571  ;;  %v5621_v26 = vmul.f32 %v8668_v32, %v13041_v43  ;;  %v8670_v4 = vpop.eup %8669 }
0x1441   : > { %v8573_v47 = vunpack.i.l.bf16 %v8572_v15  ;;  %v8574_v5 = vunpack.i.h.bf16 %v8572_v15  ;;  %v5885_v39 = vmul.f32 %v8670_v4, %v13021_v37 }
0x1442   : > { %7597 = vmatmul.msk.f32.gmra.mxu2 %vm3270_vm4, %v5621_v26 }
0x1443   : > { %5964 = vmatpush.msra.mxu2 %v8573_v47 }
0x1445   : > { %5965 = vmatpush.msra.mxu2 %v8574_v5 }
0x144a   : > { %7613 = vmatmul.msk.f32.vlgmr.msra.gmra.mxu2 %vm3270_vm4, %v5885_v39 }
0x144e   : > { %v5391_v23 = vpop.f32.mrf.mxu1 }
0x144f   : > { %5982 = vrot.lane.b32.xlu0 %v5391_v23, %s8965_s29 }
0x1456   : > { %v5394_v56 = vpop.f32.mrf.mxu1 }
0x1457   : > { %5984 = vrot.lane.b32.xlu0 %v5394_v56, %s8965_s29 }
0x145e   : > { %v5397_v43 = vpop.f32.mrf.mxu1 }
0x145f   : > { %5986 = vrot.lane.b32.xlu0 %v5397_v43, %s8965_s29 }
0x1466   : > { %v5657_v18 = vpop.f32.mrf.mxu1 }
0x1467   : > { %6006 = vrot.lane.b32.xlu2 %v5657_v18, %s8966_s3 }
0x146e   : > { %v5660_v62 = vpop.f32.mrf.mxu1 }
0x146f   : > { %6008 = vrot.lane.b32.xlu1 %v5660_v62, %s8966_s3 }
0x1476   : > { %v5872_v37 = vpop.xlane.xlu0 %5871  ;;  %v5663_v24 = vpop.f32.mrf.mxu1 }
0x1477   : > { %8671 = vrcp.f32 %v5872_v37  ;;  %5990 = vrot.lane.b32.xlu1 %v12961_v20, %s8965_s29 }
0x147d   : > { %v8672_v14 = vpop.eup %8671 }
0x147e   : > { %v5875_v7 = vpop.xlane.xlu0 %5874  ;;  %v5886_v22 = vmul.f32 %v8672_v14, %v13062_v38  ;;  %v7620_v38 = vld [vmem:[%s7127_s4 + $0x58] sm:$0xff] }
0x147f   : > { %8673 = vrcp.f32 %v5875_v7  ;;  %5992 = vrot.lane.b32.xlu1 %v12968_v53, %s8965_s29  ;;  %6107 = vmatpush.msra.mxu3 %v7620_v38 }
0x1480   : > { %7614 = vmatmul.msk.f32.gmra.mxu2 %vm3270_vm4, %v5886_v22 }
0x1481   : > { %6108 = vmatpush.msra.mxu3 %v7619_v35 }
0x1483   : > { %6109 = vmatpush.msra.mxu3 %v7618_v9 }
0x1485   : > { %v8674_v12 = vpop.eup %8673 }
0x1486   : > { %v5887_v55 = vmul.f32 %v8674_v12, %v13067_v8 }
0x1488   : > { %7615 = vmatmul.msk.f32.gmra.mxu2 %vm3270_vm4, %v5887_v55 }
0x148b   : > { %v5701_v53 = vpop.f32.mrf.mxu2 }
0x148d   : > { %v5923_v28 = vpop.f32.mrf.mxu1 }
0x148e   : > { %6030 = vrot.lane.b32.xlu2 %v5923_v28, %s8967_s8 }
0x149b   : > { %v5704_v48 = vpop.f32.mrf.mxu2 }
0x149d   : > { %v5926_v20 = vpop.f32.mrf.mxu1 }
0x149e   : > { %6032 = vrot.lane.b32.xlu2 %v5926_v20, %s8967_s8 }
0x14a5   : > { %v5929_v29 = vpop.f32.mrf.mxu1 }
0x14a6   : > { %6010 = vrot.lane.b32.xlu2 %v5663_v24, %s8966_s3  ;;  %6034 = vrot.lane.b32.xlu0 %v5929_v29, %s8967_s8 }
0x14ae   : > { %5988 = vrot.lane.b32.xlu2 %v12958_v30, %s8965_s29  ;;  %6012 = vrot.lane.b32.xlu0 %v5701_v53, %s8966_s3  ;;  %v7617_v30 = vld [vmem:[%s7127_s4 + $0x40] sm:$0xff]  ;;  %s7137_s4 = scalar_lea.vmem %s14120_s13, %s8937_s26 }
0x14af   : > { %6110 = vmatpush.msra.mxu3 %v7617_v30 }
0x14b6   : > { %6014 = vrot.lane.b32.xlu0 %v5704_v48, %s8966_s3 }
0x14c1   : > { %v6007_v8 = vpop.permute.xlu2 %6006  ;;  %v5983_v25 = vpop.permute.xlu0 %5982 }
0x14c2   : > { %v6048_v42 = vsel %vm391_vm1, %v13080_v13, %v5983_v25 }
0x14c3   : > { %v6055_v40 = vsel %vm3251_vm3, %v6048_v42, %v6007_v8 }
0x14c5   : > { %v5707_v2 = vpop.f32.mrf.mxu2 }
0x14c6   : > { %6016 = vrot.lane.b32.xlu0 %v5707_v2, %s8966_s3  ;;  %s14119_s3 = sld [smem:[#allocation94_spill]] }
0x14c9   : > { %v5985_v46 = vpop.permute.xlu0 %5984 }
0x14ca   : > { %v6049_v41 = vsel %vm391_vm1, %v13082_v1, %v5985_v46 }
0x14cd   : > { %v5967_v19 = vpop.f32.mrf.mxu2 }
0x14ce   : > { %6036 = vrot.lane.b32.xlu2 %v5967_v19, %s8967_s8 }
0x14d1   : > { %v5987_v31 = vpop.permute.xlu0 %5986 }
0x14d2   : > { %v6050_v32 = vsel %vm391_vm1, %v13086_v49, %v5987_v31 }
0x14e1   : > { %v6009_v51 = vpop.permute.xlu1 %6008 }
0x14e2   : > { %v6056_v34 = vsel %vm3251_vm3, %v6049_v41, %v6009_v51 }
0x14e8   : > { %v6031_v59 = vpop.permute.xlu2 %6030 }
0x14e9   : > { %v6061_v10 = vsel %vm3270_vm4, %v6055_v40, %v6031_v59  ;;  %v5991_v49 = vpop.permute.xlu1 %5990 }
0x14ea   : > { %7622 = vmatmul.msk.f32.vlgmr.msra.gmra.mxu3 %vm149_vm0, %v6061_v10  ;;  %v6052_v18 = vsel %vm391_vm1, %v12761_v44, %v5991_v49  ;;  %v8576_v44 = vld [vmem:[%s7129_s12 + $0x2] ss:$0 sm:$0xff]  ;;  %v7634_v49 = vld [vmem:[%s7135_s11 + $0x58] sm:$0xff]  ;;  %s14121_s12 = sld [smem:[#allocation97_spill]] }
0x14eb   : > { %6332 = vmatpush.msra.mxu0 %v7634_v49 }
0x14f0   : > { %s13262_s6 = scalar_lea.vmem %s14121_s12, %s7642_s2 }
0x14f8   : > { %v6033_v61 = vpop.permute.xlu2 %6032 }
0x14f9   : > { %v6062_v6 = vsel %vm3270_vm4, %v6056_v34, %v6033_v61 }
0x14fa   : > { %7623 = vmatmul.msk.f32.gmra.mxu3 %vm149_vm0, %v6062_v6 }
0x1500   : > { %v6011_v27 = vpop.permute.xlu2 %6010 }
0x1501   : > { %v6057_v1 = vsel %vm3251_vm3, %v6050_v32, %v6011_v27 }
0x1503   : > { %v5970_v60 = vpop.f32.mrf.mxu2 }
0x1504   : > { %6038 = vrot.lane.b32.xlu2 %v5970_v60, %s8967_s8 }
0x1508   : > { %v5989_v47 = vpop.permute.xlu2 %5988 }
0x1509   : > { %v6051_v4 = vsel %vm391_vm1, %v12759_v57, %v5989_v47  ;;  %v5993_v57 = vpop.permute.xlu1 %5992 }
0x150a   : > { %v6053_v22 = vsel %vm391_vm1, %v12763_v11, %v5993_v57 }
0x150b   : > { %v5973_v13 = vpop.f32.mrf.mxu2 }
0x150c   : > { %6040 = vrot.lane.b32.xlu2 %v5973_v13, %s8967_s8  ;;  %s7132_s8 = scalar_lea.vmem %s14119_s3, %s7628_s25 }
0x1518   : > { %v6035_v15 = vpop.permute.xlu0 %6034 }
0x1519   : > { %v6063_v26 = vsel %vm3270_vm4, %v6057_v1, %v6035_v15 }
0x151a   : > { %7624 = vmatmul.msk.f32.gmra.mxu3 %vm149_vm0, %v6063_v26 }
0x1520   : > { %v6013_v5 = vpop.permute.xlu0 %6012 }
0x1521   : > { %v6058_v39 = vsel %vm3251_vm3, %v6051_v4, %v6013_v5 }
0x1528   : > { %v6037_v23 = vpop.permute.xlu2 %6036  ;;  %v6015_v43 = vpop.permute.xlu0 %6014 }
0x1529   : > { %v6064_v56 = vsel %vm3270_vm4, %v6058_v39, %v6037_v23  ;;  %v6059_v62 = vsel %vm3251_vm3, %v6052_v18, %v6015_v43  ;;  %v7633_v43 = vld [vmem:[%s7135_s11 + $0x50] sm:$0xff] }
0x152a   : > { %7625 = vmatmul.msk.f32.gmra.mxu3 %vm149_vm0, %v6064_v56  ;;  %6333 = vmatpush.msra.mxu0 %v7633_v43 }
0x1538   : > { %v6017_v7 = vpop.permute.xlu0 %6016 }
0x1539   : > { %v6060_v12 = vsel %vm3251_vm3, %v6053_v22, %v6017_v7 }
0x155e   : > { %v6039_v37 = vpop.permute.xlu2 %6038 }
0x155f   : > { %v6065_v14 = vsel %vm3270_vm4, %v6059_v62, %v6039_v37  ;;  %v7632_v62 = vld [vmem:[%s7135_s11 + $0x48] sm:$0xff] }
0x1560   : > { %7626 = vmatmul.msk.f32.gmra.mxu3 %vm149_vm0, %v6065_v14  ;;  %6334 = vmatpush.msra.mxu0 %v7632_v62  ;;  %v7631_v14 = vld [vmem:[%s7135_s11 + $0x40] sm:$0xff]  ;;  %s7142_s11 = scalar_lea.vmem %s13784_s14, %s8937_s26  ;;  %s4793_s26 = sadd.s32 1, %s8937_s26  }
0x1561   : > { %p4790_p1 = scmp.ge.s32.totalorder %s4793_s26, 2  }
0x1562   : > { %6335 = vmatpush.msra.mxu0 %v7631_v14  ;;  %s8968_s26 = smov (%p4790_p1), 32   ;;  %v6650_v0 = vld [vmem:[%s13786_s16 + $0x18] sm:$0xff] (%p4790_p1)  ;;  %v6649_v58 = vld [vmem:[%s13786_s16 + $0x10] sm:$0xff] (%p4790_p1)  ;;  %v6648_v36 = vld [vmem:[%s13786_s16 + $0x8] sm:$0xff] (%p4790_p1)  ;;  %vm6683_vm1 = vcmask (%p4790_p1), 25600   ;;  %s8974_s3 = smov (%p4790_p1), 122  }
0x1563   :  { %v6647_v63 = vld [vmem:[%s13786_s16] sm:$0xff] (%p4790_p1)  ;;  %s14125_s25 = sld [smem:[#allocation98_spill]] (%p4790_p1)  ;;  %s8976_s10 = smov (%p4790_p1), 125  }
0x1564   :  { %s8978_s13 = smov (%p4790_p1), 120   ;;  %s8980_s2 = smov (%p4790_p1), 71  }
0x1565   :  { %s8981_s7 = smov (%p4790_p1), 67   ;;  %s14126_s28 = sld [smem:[#allocation99_spill]] (%p4790_p1) }
0x1566   : > { %v6041_v24 = vpop.permute.xlu2 %6040 }
0x1567   : > { %v6066_v55 = vsel %vm3270_vm4, %v6060_v12, %v6041_v24 }
0x1568   : > { %7627 = vmatmul.msk.f32.gmra.mxu3 %vm149_vm0, %v6066_v55 }
0x156d   : > { %v6112_v28 = vpop.f32.mrf.mxu3 }
0x156e   : > { %v6113_v20 = vadd.f32 %v8576_v44, %v6112_v28 }
0x1570   : > { %v6133_v29 = vadd.f32 %v8933_v21, %v6113_v20 }
0x1572   : > { %v6139_v53 = vsel %vm149_vm0, %v6133_v29, 0.0 }
0x1573   : > { %6140 = vadd.xlane.f32.xlu1 %v6139_v53 }
0x157d   : > { %v6115_v11 = vpop.f32.mrf.mxu3 }
0x157e   : > { %v6116_v48 = vadd.f32 %v8576_v44, %v6115_v11 }
0x1580   : > { %v6134_v38 = vadd.f32 %v8929_v16, %v6116_v48 }
0x1582   : > { %v6142_v35 = vsel %vm149_vm0, %v6134_v38, 0.0 }
0x1583   : > { %6143 = vadd.xlane.f32.xlu0 %v6142_v35 }
0x159d   : > { %v6118_v9 = vpop.f32.mrf.mxu3 }
0x159e   : > { %v6119_v2 = vadd.f32 %v8576_v44, %v6118_v9 }
0x15a0   : > { %v6135_v30 = vadd.f32 %v8925_v45, %v6119_v2 }
0x15a2   : > { %v6145_v19 = vsel %vm149_vm0, %v6135_v30, 0.0 }
0x15a3   : > { %6146 = vadd.xlane.f32.xlu2 %v6145_v19  ;;  %v7629_v19 = vld [vmem:[%s7132_s8 + $0x4] sm:$0x3] }
0x15ad   : > { %v6121_v8 = vpop.f32.mrf.mxu3 }
0x15ae   : > { %v6122_v25 = vadd.f32 %v8576_v44, %v6121_v8 }
0x15b0   : > { %v6136_v21 = vadd.f32 %v8921_v52, %v6122_v25 }
0x15b2   : > { %v6148_v42 = vsel %vm149_vm0, %v6136_v21, 0.0 }
0x15b3   : > { %6149 = vadd.xlane.f32.xlu1 %v6148_v42 }
0x15e3   : > { %v6124_v40 = vpop.f32.mrf.mxu3 }
0x15e4   : > { %v6125_v59 = vadd.f32 %v8576_v44, %v6124_v40 }
0x15e6   : > { %v6141_v16 = vpop.xlane.xlu1 %6140  ;;  %v6137_v10 = vadd.f32 %v8917_v17, %v6125_v59  ;;  %v13225_v59 = vperm.slane %v7629_v19, 1 }
0x15e7   : > { %v6164_v46 = vmul.f32 %v6141_v16, %v11619_v33 }
0x15e8   : > { %v6151_v51 = vsel %vm149_vm0, %v6137_v10, 0.0 }
0x15e9   : > { %v13169_v45 = vsub.f32 %v6133_v29, %v6164_v46  ;;  %6152 = vadd.xlane.f32.xlu2 %v6151_v51 }
0x15eb   : > { %v6127_v41 = vpop.f32.mrf.mxu3  ;;  %v6176_v34 = vmul.f32 %v13169_v45, %v13169_v45 }
0x15ec   : > { %v6128_v52 = vadd.f32 %v8576_v44, %v6127_v41 }
0x15ed   : > { %v6182_v61 = vsel %vm149_vm0, %v6176_v34, 0.0 }
0x15ee   : > { %6183 = vadd.xlane.f32.xlu1 %v6182_v61  ;;  %v6138_v6 = vadd.f32 %v8913_v50, %v6128_v52 }
0x15f0   : > { %v6154_v60 = vsel %vm149_vm0, %v6138_v6, 0.0 }
0x15f1   : > { %6155 = vadd.xlane.f32.xlu0 %v6154_v60 }
0x15f6   : > { %v6144_v17 = vpop.xlane.xlu0 %6143 }
0x15f7   : > { %v6165_v13 = vmul.f32 %v6144_v17, %v11619_v33 }
0x15f9   : > { %v13177_v31 = vsub.f32 %v6134_v38, %v6165_v13 }
0x15fb   : > { %v6177_v27 = vmul.f32 %v13177_v31, %v13177_v31 }
0x15fd   : > { %v6185_v32 = vsel %vm149_vm0, %v6177_v27, 0.0 }
0x15fe   : > { %6186 = vadd.xlane.f32.xlu2 %v6185_v32 }
0x1616   : > { %v6147_v1 = vpop.xlane.xlu2 %6146 }
0x1617   : > { %v6166_v15 = vmul.f32 %v6147_v1, %v11619_v33 }
0x1619   : > { %v13183_v26 = vsub.f32 %v6135_v30, %v6166_v15 }
0x161b   : > { %v6178_v50 = vmul.f32 %v13183_v26, %v13183_v26 }
0x161d   : > { %v6188_v47 = vsel %vm149_vm0, %v6178_v50, 0.0 }
0x161e   : > { %6189 = vadd.xlane.f32.xlu0 %v6188_v47 }
0x1626   : > { %v6150_v5 = vpop.xlane.xlu1 %6149 }
0x1627   : > { %v6167_v4 = vmul.f32 %v6150_v5, %v11619_v33 }
0x1629   : > { %v13189_v39 = vsub.f32 %v6136_v21, %v6167_v4  ;;  %v13222_v21 = vperm.slane %v7629_v19, 0  ;;  %v7650_v19 = vld [vmem:[%s13262_s6 + $0xb8] sm:$0xff] }
0x162a   : > { %6451 = vmatpush.msrb.mxu1 %v7650_v19 }
0x162b   : > { %v6179_v23 = vmul.f32 %v13189_v39, %v13189_v39 }
0x162d   : > { %v6191_v56 = vsel %vm149_vm0, %v6179_v23, 0.0 }
0x162e   : > { %6192 = vadd.xlane.f32.xlu1 %v6191_v56 }
0x165c   : > { %v6153_v18 = vpop.xlane.xlu2 %6152 }
0x165d   : > { %v6168_v37 = vmul.f32 %v6153_v18, %v11619_v33 }
0x165f   : > { %v13199_v57 = vsub.f32 %v6137_v10, %v6168_v37 }
0x1661   : > { %v6184_v7 = vpop.xlane.xlu1 %6183  ;;  %v6180_v22 = vmul.f32 %v13199_v57, %v13199_v57 }
0x1662   : > { %v6200_v12 = vmul.f32 %v6184_v7, %v11619_v33 }
0x1663   : > { %v6194_v24 = vsel %vm149_vm0, %v6180_v22, 0.0 }
0x1664   : > { %v6206_v55 = vadd.f32 1e-05, %v6200_v12  ;;  %6195 = vadd.xlane.f32.xlu2 %v6194_v24  ;;  %v6156_v44 = vpop.xlane.xlu0 %6155 }
0x1665   : > { %v6169_v28 = vmul.f32 %v6156_v44, %v11619_v33 }
0x1666   : > { %8675 = vrsqrt.f32 %v6206_v55  ;;  %vm6218_vm15 = vweird.f32 %v6206_v55 }
0x1667   : > { %v13206_v20 = vsub.f32 %v6138_v6, %v6169_v28 }
0x1669   : > { %v6181_v29 = vmul.f32 %v13206_v20, %v13206_v20 }
0x166b   : > { %v6197_v53 = vsel %vm149_vm0, %v6181_v29, 0.0 }
0x166c   : > { %v8676_v11 = vpop.eup %8675  ;;  %6198 = vadd.xlane.f32.xlu0 %v6197_v53 }
0x166d   : > { %v6213_v48 = vmul.f32 %v8676_v11, %v6206_v55  ;;  %vm6219_vm14 = vweird.f32 %v8676_v11 }
0x166e   : > { %vm6220_vm2 = vmor %vm6218_vm15, %vm6219_vm14 }
0x166f   : > { %v6214_v38 = vmul.f32 %v8676_v11, %v6213_v48 }
0x1671   : > { %v6215_v35 = vmul.f32 0.5, %v6214_v38  ;;  %v6187_v9 = vpop.xlane.xlu2 %6186 }
0x1672   : > { %v6201_v2 = vmul.f32 %v6187_v9, %v11619_v33 }
0x1673   : > { %v6216_v30 = vsub.f32 1.5, %v6215_v35 }
0x1674   : > { %v6207_v8 = vadd.f32 1e-05, %v6201_v2 }
0x1675   : > { %v6217_v25 = vmul.f32 %v8676_v11, %v6216_v30 }
0x1676   : > { %8677 = vrsqrt.f32 %v6207_v8  ;;  %vm6228_vm6 = vweird.f32 %v6207_v8 }
0x1677   : > { %v6221_v42 = vsel %vm6220_vm2, %v8676_v11, %v6217_v25 }
0x1678   : > { %v6272_v40 = vmul.f32 %v6221_v42, %v13169_v45  ;;  %v7648_v42 = vld [vmem:[%s13262_s6 + $0xa8] sm:$0xff] }
0x167a   : > { %v6279_v16 = vmul.f32 %v13222_v21, %v6272_v40 }
0x167c   : > { %v8678_v10 = vpop.eup %8677  ;;  %v13229_v46 = vadd.f32 %v13225_v59, %v6279_v16 }
0x167d   : > { %v6223_v51 = vmul.f32 %v8678_v10, %v6207_v8  ;;  %vm6229_vm5 = vweird.f32 %v8678_v10  ;;  %v7649_v8 = vld [vmem:[%s13262_s6 + $0xb0] sm:$0xff] }
0x167e   : > { %7636 = vmatmul.msk.f32.vlgmr.msra.gmra.mxu0 %vm149_vm0, %v13229_v46  ;;  %vm6230_vm7 = vmor %vm6228_vm6, %vm6229_vm5  ;;  %6452 = vmatpush.msrb.mxu1 %v7649_v8 }
0x167f   : > { %v6224_v41 = vmul.f32 %v8678_v10, %v6223_v51 }
0x1680   : > { %6453 = vmatpush.msrb.mxu1 %v7648_v42 }
0x1681   : > { %v6225_v34 = vmul.f32 0.5, %v6224_v41 }
0x1683   : > { %v6226_v52 = vsub.f32 1.5, %v6225_v34  ;;  %v7647_v34 = vld [vmem:[%s13262_s6 + $0xa0] sm:$0xff] }
0x1684   : > { %6454 = vmatpush.msrb.mxu1 %v7647_v34 }
0x1685   : > { %v6227_v61 = vmul.f32 %v8678_v10, %v6226_v52 }
0x1687   : > { %v6231_v45 = vsel %vm6230_vm7, %v8678_v10, %v6227_v61 }
0x1688   : > { %v6273_v6 = vmul.f32 %v6231_v45, %v13177_v31  ;;  %v7646_v45 = vld [vmem:[%s13262_s6 + $0x98] sm:$0xff] }
0x1689   : > { %6455 = vmatpush.msrb.mxu1 %v7646_v45 }
0x168a   : > { %v6280_v60 = vmul.f32 %v13222_v21, %v6273_v6 }
0x168c   : > { %v13236_v17 = vadd.f32 %v13225_v59, %v6280_v60  ;;  %v7645_v60 = vld [vmem:[%s13262_s6 + $0x90] sm:$0xff] }
0x168d   : > { %6456 = vmatpush.msrb.mxu1 %v7645_v60 }
0x168e   : > { %7637 = vmatmul.msk.f32.gmra.mxu0 %vm149_vm0, %v13236_v17 }
0x1691   : > { %v6190_v13 = vpop.xlane.xlu0 %6189 }
0x1692   : > { %v6202_v27 = vmul.f32 %v6190_v13, %v11619_v33 }
0x1694   : > { %v6208_v32 = vadd.f32 1e-05, %v6202_v27  ;;  %v7644_v27 = vld [vmem:[%s13262_s6 + $0x88] sm:$0xff] }
0x1695   : > { %6457 = vmatpush.msrb.mxu1 %v7644_v27 }
0x1696   : > { %8679 = vrsqrt.f32 %v6208_v32  ;;  %vm6238_vm10 = vweird.f32 %v6208_v32 }
0x169c   : > { %v8680_v1 = vpop.eup %8679 }
0x169d   : > { %v6233_v15 = vmul.f32 %v8680_v1, %v6208_v32  ;;  %vm6239_vm8 = vweird.f32 %v8680_v1 }
0x169e   : > { %vm6240_vm11 = vmor %vm6238_vm10, %vm6239_vm8 }
0x169f   : > { %v6234_v50 = vmul.f32 %v8680_v1, %v6233_v15  ;;  %v7643_v15 = vld [vmem:[%s13262_s6 + $0x80] sm:$0xff] }
0x16a0   : > { %6458 = vmatpush.msrb.mxu1 %v7643_v15 }
0x16a1   : > { %v6235_v47 = vmul.f32 0.5, %v6234_v50  ;;  %v6193_v5 = vpop.xlane.xlu1 %6192 }
0x16a2   : > { %v6203_v31 = vmul.f32 %v6193_v5, %v11619_v33 }
0x16a3   : > { %v6236_v4 = vsub.f32 1.5, %v6235_v47  ;;  %v13285_v47 = vld [vmem:[%s7137_s4 + $0x2] ss:$0 sm:$0xff]  ;;  %s8979_s4 = smov (%p4790_p1), 116  }
0x16a4   : > { %v6209_v23 = vadd.f32 1e-05, %v6203_v31 }
0x16a5   : > { %v6237_v56 = vmul.f32 %v8680_v1, %v6236_v4 }
0x16a6   : > { %8681 = vrsqrt.f32 %v6209_v23  ;;  %vm6248_vm13 = vweird.f32 %v6209_v23 }
0x16a7   : > { %v6241_v49 = vsel %vm6240_vm11, %v8680_v1, %v6237_v56 }
0x16a8   : > { %v6274_v43 = vmul.f32 %v6241_v49, %v13183_v26 }
0x16aa   : > { %v6281_v18 = vmul.f32 %v13222_v21, %v6274_v43 }
0x16ac   : > { %v8682_v62 = vpop.eup %8681  ;;  %v13245_v37 = vadd.f32 %v13225_v59, %v6281_v18 }
0x16ad   : > { %v6243_v14 = vmul.f32 %v8682_v62, %v6209_v23  ;;  %vm6249_vm12 = vweird.f32 %v8682_v62 }
0x16ae   : > { %7638 = vmatmul.msk.f32.gmra.mxu0 %vm149_vm0, %v13245_v37  ;;  %vm6250_vm14 = vmor %vm6248_vm13, %vm6249_vm12 }
0x16af   : > { %v6244_v7 = vmul.f32 %v8682_v62, %v6243_v14 }
0x16b1   : > { %v6245_v22 = vmul.f32 0.5, %v6244_v7 }
0x16b3   : > { %v6246_v12 = vsub.f32 1.5, %v6245_v22 }
0x16b5   : > { %v6247_v24 = vmul.f32 %v8682_v62, %v6246_v12 }
0x16b7   : > { %v6251_v55 = vsel %vm6250_vm14, %v8682_v62, %v6247_v24 }
0x16b8   : > { %v6275_v26 = vmul.f32 %v6251_v55, %v13189_v39 }
0x16ba   : > { %v6282_v44 = vmul.f32 %v13222_v21, %v6275_v26 }
0x16bc   : > { %v13252_v28 = vadd.f32 %v13225_v59, %v6282_v44 }
0x16be   : > { %7639 = vmatmul.msk.f32.gmra.mxu0 %vm149_vm0, %v13252_v28 }
0x16d7   : > { %v6196_v29 = vpop.xlane.xlu2 %6195 }
0x16d8   : > { %v6204_v53 = vmul.f32 %v6196_v29, %v11619_v33 }
0x16da   : > { %v6210_v11 = vadd.f32 1e-05, %v6204_v53 }
0x16dc   : > { %8683 = vrsqrt.f32 %v6210_v11  ;;  %vm6258_vm2 = vweird.f32 %v6210_v11 }
0x16df   : > { %v6199_v48 = vpop.xlane.xlu0 %6198 }
0x16e0   : > { %v6205_v38 = vmul.f32 %v6199_v48, %v11619_v33 }
0x16e2   : > { %v8684_v35 = vpop.eup %8683  ;;  %v6211_v9 = vadd.f32 1e-05, %v6205_v38 }
0x16e3   : > { %v6253_v39 = vmul.f32 %v8684_v35, %v6210_v11  ;;  %vm6259_vm15 = vweird.f32 %v8684_v35 }
0x16e4   : > { %8685 = vrsqrt.f32 %v6211_v9  ;;  %vm6260_vm5 = vmor %vm6258_vm2, %vm6259_vm15  ;;  %vm6268_vm7 = vweird.f32 %v6211_v9 }
0x16e5   : > { %v6254_v2 = vmul.f32 %v8684_v35, %v6253_v39 }
0x16e7   : > { %v6255_v30 = vmul.f32 0.5, %v6254_v2 }
0x16e9   : > { %v6256_v25 = vsub.f32 1.5, %v6255_v30 }
0x16ea   : > { %v8686_v40 = vpop.eup %8685 }
0x16eb   : > { %v6257_v16 = vmul.f32 %v8684_v35, %v6256_v25  ;;  %v6263_v10 = vmul.f32 %v8686_v40, %v6211_v9  ;;  %vm6269_vm6 = vweird.f32 %v8686_v40 }
0x16ec   : > { %vm6270_vm8 = vmor %vm6268_vm7, %vm6269_vm6 }
0x16ed   : > { %v6264_v51 = vmul.f32 %v8686_v40, %v6263_v10  ;;  %v6261_v41 = vsel %vm6260_vm5, %v8684_v35, %v6257_v16 }
0x16ee   : > { %v6276_v52 = vmul.f32 %v6261_v41, %v13199_v57 }
0x16ef   : > { %v6265_v61 = vmul.f32 0.5, %v6264_v51 }
0x16f0   : > { %v6283_v6 = vmul.f32 %v13222_v21, %v6276_v52 }
0x16f1   : > { %v6266_v13 = vsub.f32 1.5, %v6265_v61 }
0x16f2   : > { %v13274_v32 = vadd.f32 %v13225_v59, %v6283_v6 }
0x16f3   : > { %v6267_v1 = vmul.f32 %v8686_v40, %v6266_v13 }
0x16f4   : > { %7640 = vmatmul.msk.f32.gmra.mxu0 %vm149_vm0, %v13274_v32 }
0x16f5   : > { %v6271_v57 = vsel %vm6270_vm8, %v8686_v40, %v6267_v1 }
0x16f6   : > { %v6277_v50 = vmul.f32 %v6271_v57, %v13206_v20 }
0x16f8   : > { %v6284_v5 = vmul.f32 %v13222_v21, %v6277_v50 }
0x16fa   : > { %v13289_v31 = vadd.f32 %v13225_v59, %v6284_v5 }
0x16fb   : > { %v6337_v4 = vpop.f32.mrf.mxu0 }
0x16fc   : > { %v6338_v23 = vadd.f32 %v13285_v47, %v6337_v4  ;;  %7641 = vmatmul.msk.f32.gmra.mxu0 %vm149_vm0, %v13289_v31 }
0x16fe   : > { %v6355_v56 = vmul.f32 %v6338_v23, %v6338_v23 }
0x1700   : > { %v6361_v20 = vmul.f32 %v6355_v56, %v6338_v23 }
0x1702   : > { %v6367_v49 = vmul.f32 0.044715, %v6361_v20 }
0x1704   : > { %v6373_v43 = vadd.f32 %v6367_v49, %v6338_v23 }
0x1706   : > { %v6379_v18 = vmul.f32 0.7978846, %v6373_v43 }
0x1708   : > { %8687 = vtanh.f32 %v6379_v18 }
0x170b   : > { %v6340_v62 = vpop.f32.mrf.mxu0 }
0x170c   : > { %v6341_v21 = vadd.f32 %v13285_v47, %v6340_v62 }
0x170e   : > { %v8688_v59 = vpop.eup %8687  ;;  %v6356_v14 = vmul.f32 %v6341_v21, %v6341_v21 }
0x170f   : > { %v6391_v7 = vadd.f32 1.0, %v8688_v59 }
0x1710   : > { %v6362_v22 = vmul.f32 %v6356_v14, %v6341_v21 }
0x1711   : > { %v6397_v12 = vmul.f32 0.5, %v6391_v7 }
0x1712   : > { %v6368_v24 = vmul.f32 0.044715, %v6362_v22 }
0x1713   : > { %v6403_v55 = vmul.f32 %v6397_v12, %v6338_v23 }
0x1714   : > { %v6374_v26 = vadd.f32 %v6368_v24, %v6341_v21 }
0x1715   : > { %7652 = vmatmul.msk.f32.vlgmr.msrb.gmra.mxu1 %vm4198_vm9, %v6403_v55 }
0x1716   : > { %v6380_v44 = vmul.f32 0.7978846, %v6374_v26 }
0x1718   : > { %8689 = vtanh.f32 %v6380_v44 }
0x171e   : > { %v8690_v29 = vpop.eup %8689 }
0x171f   : > { %v6392_v53 = vadd.f32 1.0, %v8690_v29 }
0x1721   : > { %v6398_v11 = vmul.f32 0.5, %v6392_v53 }
0x1723   : > { %v6404_v48 = vmul.f32 %v6398_v11, %v6341_v21 }
0x1725   : > { %7653 = vmatmul.msk.f32.gmra.mxu1 %vm4198_vm9, %v6404_v48 }
0x172b   : > { %v6343_v38 = vpop.f32.mrf.mxu0 }
0x172c   : > { %v6344_v35 = vadd.f32 %v13285_v47, %v6343_v38 }
0x172e   : > { %v6357_v9 = vmul.f32 %v6344_v35, %v6344_v35 }
0x1730   : > { %v6363_v39 = vmul.f32 %v6357_v9, %v6344_v35 }
0x1732   : > { %v6369_v2 = vmul.f32 0.044715, %v6363_v39 }
0x1734   : > { %v6375_v30 = vadd.f32 %v6369_v2, %v6344_v35 }
0x1736   : > { %v6381_v19 = vmul.f32 0.7978846, %v6375_v30 }
0x1738   : > { %8691 = vtanh.f32 %v6381_v19 }
0x173b   : > { %v6346_v8 = vpop.f32.mrf.mxu0 }
0x173c   : > { %v6347_v25 = vadd.f32 %v13285_v47, %v6346_v8 }
0x173e   : > { %v8692_v42 = vpop.eup %8691  ;;  %v6358_v40 = vmul.f32 %v6347_v25, %v6347_v25 }
0x173f   : > { %v6393_v16 = vadd.f32 1.0, %v8692_v42 }
0x1740   : > { %v6364_v10 = vmul.f32 %v6358_v40, %v6347_v25 }
0x1741   : > { %v6399_v51 = vmul.f32 0.5, %v6393_v16 }
0x1742   : > { %v6370_v41 = vmul.f32 0.044715, %v6364_v10 }
0x1743   : > { %v6405_v34 = vmul.f32 %v6399_v51, %v6344_v35 }
0x1744   : > { %v6376_v52 = vadd.f32 %v6370_v41, %v6347_v25 }
0x1745   : > { %7654 = vmatmul.msk.f32.gmra.mxu1 %vm4198_vm9, %v6405_v34 }
0x1746   : > { %v6382_v61 = vmul.f32 0.7978846, %v6376_v52 }
0x1748   : > { %8693 = vtanh.f32 %v6382_v61 }
0x174e   : > { %v8694_v45 = vpop.eup %8693 }
0x174f   : > { %v6394_v6 = vadd.f32 1.0, %v8694_v45 }
0x1751   : > { %v6400_v60 = vmul.f32 0.5, %v6394_v6 }
0x1753   : > { %v6406_v13 = vmul.f32 %v6400_v60, %v6347_v25 }
0x1755   : > { %7655 = vmatmul.msk.f32.gmra.mxu1 %vm4198_vm9, %v6406_v13 }
0x1771   : > { %v6349_v27 = vpop.f32.mrf.mxu0 }
0x1772   : > { %v6350_v1 = vadd.f32 %v13285_v47, %v6349_v27 }
0x1774   : > { %v6359_v15 = vmul.f32 %v6350_v1, %v6350_v1 }
0x1776   : > { %v6365_v57 = vmul.f32 %v6359_v15, %v6350_v1 }
0x1778   : > { %v6371_v50 = vmul.f32 0.044715, %v6365_v57 }
0x1779   : > { %v6352_v5 = vpop.f32.mrf.mxu0 }
0x177a   : > { %v6353_v4 = vadd.f32 %v13285_v47, %v6352_v5  ;;  %v6377_v23 = vadd.f32 %v6371_v50, %v6350_v1  ;;  %v8578_v47 = vld [vmem:[%s7142_s11 + $0x2] ss:$0 sm:$0xff] }
0x177c   : > { %v6360_v56 = vmul.f32 %v6353_v4, %v6353_v4  ;;  %v6383_v20 = vmul.f32 0.7978846, %v6377_v23 }
0x177e   : > { %v6366_v49 = vmul.f32 %v6360_v56, %v6353_v4  ;;  %8695 = vtanh.f32 %v6383_v20 }
0x1780   : > { %v6372_v43 = vmul.f32 0.044715, %v6366_v49 }
0x1782   : > { %v6378_v18 = vadd.f32 %v6372_v43, %v6353_v4 }
0x1784   : > { %v8696_v62 = vpop.eup %8695  ;;  %v6384_v21 = vmul.f32 0.7978846, %v6378_v18 }
0x1785   : > { %v6395_v59 = vadd.f32 1.0, %v8696_v62 }
0x1786   : > { %8697 = vtanh.f32 %v6384_v21 }
0x1787   : > { %v6401_v14 = vmul.f32 0.5, %v6395_v59 }
0x1789   : > { %v6407_v7 = vmul.f32 %v6401_v14, %v6350_v1 }
0x178b   : > { %7656 = vmatmul.msk.f32.gmra.mxu1 %vm4198_vm9, %v6407_v7 }
0x178c   : > { %v8698_v22 = vpop.eup %8697 }
0x178d   : > { %v6396_v12 = vadd.f32 1.0, %v8698_v22 }
0x178f   : > { %v6402_v24 = vmul.f32 0.5, %v6396_v12 }
0x1791   : > { %v6408_v55 = vmul.f32 %v6402_v24, %v6353_v4 }
0x1792   : > { %v6460_v26 = vpop.f32.mrf.mxu1 }
0x1793   : > { %v6461_v44 = vadd.f32 %v8578_v47, %v6460_v26  ;;  %7657 = vmatmul.msk.f32.gmra.mxu1 %vm4198_vm9, %v6408_v55 }
0x1795   : > { %v6480_v29 = vadd.f32 %v6461_v44, %v13229_v46 }
0x1797   : > { %v6486_v53 = vsel %vm149_vm0, %v6480_v29, 0.0 }
0x1798   : > { %6487 = vadd.xlane.f32.xlu1 %v6486_v53 }
0x17a2   : > { %v6463_v11 = vpop.f32.mrf.mxu1 }
0x17a3   : > { %v6464_v48 = vadd.f32 %v8578_v47, %v6463_v11 }
0x17a5   : > { %v6481_v38 = vadd.f32 %v6464_v48, %v13236_v17 }
0x17a7   : > { %v6489_v35 = vsel %vm149_vm0, %v6481_v38, 0.0 }
0x17a8   : > { %6490 = vadd.xlane.f32.xlu2 %v6489_v35 }
0x17c2   : > { %v6466_v9 = vpop.f32.mrf.mxu1 }
0x17c3   : > { %v6467_v39 = vadd.f32 %v8578_v47, %v6466_v9 }
0x17c5   : > { %v6482_v2 = vadd.f32 %v6467_v39, %v13245_v37 }
0x17c7   : > { %v6492_v30 = vsel %vm149_vm0, %v6482_v2, 0.0 }
0x17c8   : > { %6493 = vadd.xlane.f32.xlu0 %v6492_v30 }
0x17d2   : > { %v6469_v19 = vpop.f32.mrf.mxu1 }
0x17d3   : > { %v6470_v8 = vadd.f32 %v8578_v47, %v6469_v19 }
0x17d5   : > { %v6483_v46 = vadd.f32 %v6470_v8, %v13252_v28 }
0x17d7   : > { %v6495_v25 = vsel %vm149_vm0, %v6483_v46, 0.0 }
0x17d8   : > { %6496 = vadd.xlane.f32.xlu1 %v6495_v25 }
0x1808   : > { %v6472_v42 = vpop.f32.mrf.mxu1 }
0x1809   : > { %v6473_v40 = vadd.f32 %v8578_v47, %v6472_v42 }
0x180b   : > { %v6488_v17 = vpop.xlane.xlu1 %6487  ;;  %v6484_v16 = vadd.f32 %v6473_v40, %v13274_v32 }
0x180c   : > { %v6504_v10 = vmul.f32 %v6488_v17, %v11619_v33 }
0x180d   : > { %v6498_v51 = vsel %vm149_vm0, %v6484_v16, 0.0 }
0x180e   : > { %v6510_v37 = vsub.f32 %v6480_v29, %v6504_v10  ;;  %6499 = vadd.xlane.f32.xlu2 %v6498_v51 }
0x1810   : > { %v6475_v41 = vpop.f32.mrf.mxu1  ;;  %v6516_v34 = vmul.f32 %v6510_v37, %v6510_v37 }
0x1811   : > { %v6476_v52 = vadd.f32 %v8578_v47, %v6475_v41 }
0x1812   : > { %v6522_v61 = vsel %vm149_vm0, %v6516_v34, 0.0 }
0x1813   : > { %v6485_v28 = vadd.f32 %v6476_v52, %v13289_v31  ;;  %6523 = vadd.xlane.f32.xlu1 %v6522_v61 }
0x1815   : > { %v6501_v45 = vsel %vm149_vm0, %v6485_v28, 0.0 }
0x1816   : > { %6502 = vadd.xlane.f32.xlu0 %v6501_v45 }
0x181b   : > { %v6491_v6 = vpop.xlane.xlu2 %6490 }
0x181c   : > { %v6505_v32 = vmul.f32 %v6491_v6, %v11619_v33 }
0x181e   : > { %v13329_v60 = vsub.f32 %v6481_v38, %v6505_v32  ;;  %v7659_v38 = vld [vmem:[%s7145_s0 + $0x4] sm:$0x3] }
0x181f   : > { %v13367_v19 = vperm.slane %v7659_v38, 1 }
0x1820   : > { %v6517_v13 = vmul.f32 %v13329_v60, %v13329_v60 }
0x1822   : > { %v6525_v27 = vsel %vm149_vm0, %v6517_v13, 0.0 }
0x1823   : > { %6526 = vadd.xlane.f32.xlu2 %v6525_v27 }
0x183b   : > { %v6494_v1 = vpop.xlane.xlu0 %6493 }
0x183c   : > { %v6506_v15 = vmul.f32 %v6494_v1, %v11619_v33 }
0x183e   : > { %v13335_v57 = vsub.f32 %v6482_v2, %v6506_v15  ;;  %v13365_v2 = vperm.slane %v7659_v38, 0 }
0x1840   : > { %v6518_v31 = vmul.f32 %v13335_v57, %v13335_v57 }
0x1842   : > { %v6528_v50 = vsel %vm149_vm0, %v6518_v31, 0.0 }
0x1843   : > { %6529 = vadd.xlane.f32.xlu0 %v6528_v50 }
0x184b   : > { %v6497_v5 = vpop.xlane.xlu1 %6496 }
0x184c   : > { %v6507_v4 = vmul.f32 %v6497_v5, %v11619_v33 }
0x184e   : > { %v13341_v23 = vsub.f32 %v6483_v46, %v6507_v4 }
0x1850   : > { %v6519_v56 = vmul.f32 %v13341_v23, %v13341_v23 }
0x1852   : > { %v6531_v20 = vsel %vm149_vm0, %v6519_v56, 0.0 }
0x1853   : > { %6532 = vadd.xlane.f32.xlu1 %v6531_v20 }
0x1881   : > { %v6500_v49 = vpop.xlane.xlu2 %6499 }
0x1882   : > { %v6508_v43 = vmul.f32 %v6500_v49, %v11619_v33 }
0x1884   : > { %v13347_v18 = vsub.f32 %v6484_v16, %v6508_v43 }
0x1886   : > { %v6524_v62 = vpop.xlane.xlu1 %6523  ;;  %v6520_v21 = vmul.f32 %v13347_v18, %v13347_v18 }
0x1887   : > { %v6540_v59 = vmul.f32 %v6524_v62, %v11619_v33 }
0x1888   : > { %v6534_v14 = vsel %vm149_vm0, %v6520_v21, 0.0 }
0x1889   : > { %v6546_v7 = vadd.f32 1e-05, %v6540_v59  ;;  %6535 = vadd.xlane.f32.xlu2 %v6534_v14  ;;  %v6503_v22 = vpop.xlane.xlu0 %6502 }
0x188a   : > { %v6509_v12 = vmul.f32 %v6503_v22, %v11619_v33 }
0x188b   : > { %8699 = vrsqrt.f32 %v6546_v7  ;;  %vm6558_vm11 = vweird.f32 %v6546_v7 }
0x188c   : > { %v13354_v47 = vsub.f32 %v6485_v28, %v6509_v12 }
0x188e   : > { %v6521_v24 = vmul.f32 %v13354_v47, %v13354_v47 }
0x1890   : > { %v6537_v55 = vsel %vm149_vm0, %v6521_v24, 0.0 }
0x1891   : > { %v8700_v26 = vpop.eup %8699  ;;  %6538 = vadd.xlane.f32.xlu0 %v6537_v55 }
0x1892   : > { %v6553_v44 = vmul.f32 %v8700_v26, %v6546_v7  ;;  %vm6559_vm10 = vweird.f32 %v8700_v26 }
0x1893   : > { %vm6560_vm12 = vmor %vm6558_vm11, %vm6559_vm10 }
0x1894   : > { %v6554_v29 = vmul.f32 %v8700_v26, %v6553_v44 }
0x1896   : > { %v6555_v53 = vmul.f32 0.5, %v6554_v29  ;;  %v6527_v11 = vpop.xlane.xlu2 %6526 }
0x1897   : > { %v6541_v48 = vmul.f32 %v6527_v11, %v11619_v33 }
0x1898   : > { %v6556_v35 = vsub.f32 1.5, %v6555_v53 }
0x1899   : > { %v6547_v9 = vadd.f32 1e-05, %v6541_v48 }
0x189a   : > { %v6557_v39 = vmul.f32 %v8700_v26, %v6556_v35 }
0x189b   : > { %8701 = vrsqrt.f32 %v6547_v9  ;;  %vm6568_vm14 = vweird.f32 %v6547_v9 }
0x189c   : > { %v6561_v30 = vsel %vm6560_vm12, %v8700_v26, %v6557_v39 }
0x189d   : > { %v6612_v8 = vmul.f32 %v6561_v30, %v6510_v37 }
0x189f   : > { %v6619_v46 = vmul.f32 %v13365_v2, %v6612_v8 }
0x18a1   : > { %v8702_v25 = vpop.eup %8701  ;;  %v13371_v21 = vadd.f32 %v13367_v19, %v6619_v46  }
0x18a2   : > { %v6563_v40 = vmul.f32 %v8702_v25, %v6547_v9  ;;  %vm6569_vm13 = vweird.f32 %v8702_v25 }
0x18a3   : > { %v14122_v42 = vmov %v13371_v21  ;;  %vm6570_vm15 = vmor %vm6568_vm14, %vm6569_vm13 }
0x18a4   : > { %v6564_v17 = vmul.f32 %v8702_v25, %v6563_v40 }
0x18a6   : > { %v6565_v16 = vmul.f32 0.5, %v6564_v17 }
0x18a8   : > { %v6566_v10 = vsub.f32 1.5, %v6565_v16 }
0x18aa   : > { %v6567_v51 = vmul.f32 %v8702_v25, %v6566_v10 }
0x18ac   : > { %v6571_v41 = vsel %vm6570_vm15, %v8702_v25, %v6567_v51 }
0x18ad   : > { %v6613_v34 = vmul.f32 %v6571_v41, %v13329_v60 }
0x18af   : > { %v6620_v52 = vmul.f32 %v13365_v2, %v6613_v34 }
0x18b1   : > { %v13376_v16 = vadd.f32 %v13367_v19, %v6620_v52  }
0x18b6   : > { %v6530_v37 = vpop.xlane.xlu0 %6529 }
0x18b7   : > { %v6542_v61 = vmul.f32 %v6530_v37, %v11619_v33  ;;  %v6652_v37 = vld [vmem:[%s13786_s16 + $0x28] sm:$0xff] (%p4790_p1) }
0x18b9   : > { %v6548_v28 = vadd.f32 1e-05, %v6542_v61  ;;  %v8716_v61 = vld [vmem:[%s13787_s17] ss:$0 sm:$0xff] (%p4790_p1) }
0x18bb   : > { %8703 = vrsqrt.f32 %v6548_v28  ;;  %vm6578_vm5 = vweird.f32 %v6548_v28 }
0x18c1   : > { %v8704_v45 = vpop.eup %8703 }
0x18c2   : > { %v6573_v6 = vmul.f32 %v8704_v45, %v6548_v28  ;;  %vm6579_vm2 = vweird.f32 %v8704_v45 }
0x18c3   : > { %vm6580_vm6 = vmor %vm6578_vm5, %vm6579_vm2  ;;  %vm6635_vm5 = vcmask (%p4790_p1), 1041409  }
0x18c4   : > { %v6574_v32 = vmul.f32 %v8704_v45, %v6573_v6 }
0x18c6   : > { %v6575_v13 = vmul.f32 0.5, %v6574_v32  ;;  %v6533_v27 = vpop.xlane.xlu1 %6532 }
0x18c7   : > { %v6543_v1 = vmul.f32 %v6533_v27, %v11619_v33 }
0x18c8   : > { %v6576_v15 = vsub.f32 1.5, %v6575_v13 }
0x18c9   : > { %v6549_v60 = vadd.f32 1e-05, %v6543_v1 }
0x18ca   : > { %v6577_v31 = vmul.f32 %v8704_v45, %v6576_v15 }
0x18cb   : > { %8705 = vrsqrt.f32 %v6549_v60  ;;  %vm6588_vm8 = vweird.f32 %v6549_v60 }
0x18cc   : > { %v6581_v50 = vsel %vm6580_vm6, %v8704_v45, %v6577_v31  ;;  %vm7092_vm6 = vcmask (%p4790_p1), 547840  }
0x18cd   : > { %v6614_v5 = vmul.f32 %v6581_v50, %v13335_v57 }
0x18cf   : > { %v6621_v4 = vmul.f32 %v13365_v2, %v6614_v5  ;;  %v6729_v5 = vld [vmem:[%s13788_s18 + $0x38] sm:$0xff] (%p4790_p1) }
0x18d0   :  { %6770 = vmatpush.msra.mxu2 (%p4790_p1), %v6729_v5  ;;  %v6801_v5 = vld [vmem:[%s13790_s20 + $0x28] sm:$0xff] (%p4790_p1) }
0x18d1   : > { %v8706_v56 = vpop.eup %8705  ;;  %v6628_v45 = vadd.f32 %v13367_v19, %v6621_v4   ;;  %v6728_v4 = vld [vmem:[%s13788_s18 + $0x30] sm:$0xff] (%p4790_p1) }
0x18d2   : > { %v6583_v20 = vmul.f32 %v8706_v56, %v6549_v60  ;;  %vm6589_vm7 = vweird.f32 %v8706_v56  ;;  %6750 = vmatpush.msra.mxu1 (%p4790_p1), %v6728_v4  ;;  %v6818_v4 = vld [vmem:[%s13790_s20 + $0xb0] sm:$0xff] (%p4790_p1) }
0x18d3   : > { %vm6590_vm10 = vmor %vm6588_vm8, %vm6589_vm7  ;;  %vm7094_vm7 = vcmask (%p4790_p1), 580608   ;;  %vm7096_vm8 = vcmask (%p4790_p1), 613376  }
0x18d4   : > { %v6584_v49 = vmul.f32 %v8706_v56, %v6583_v20  ;;  %v6726_v20 = vld [vmem:[%s13788_s18 + $0x20] sm:$0xff] (%p4790_p1) }
0x18d5   :  { %6751 = vmatpush.msra.mxu1 (%p4790_p1), %v6726_v20  ;;  %v6953_v20 = vld [vmem:[%s13794_s24 + $0x38] sm:$0xff] (%p4790_p1) }
0x18d6   : > { %v6585_v43 = vmul.f32 0.5, %v6584_v49  ;;  %v6725_v49 = vld [vmem:[%s13788_s18 + $0x18] sm:$0xff] (%p4790_p1) }
0x18d8   : > { %v6586_v62 = vsub.f32 1.5, %v6585_v43  ;;  %v6724_v43 = vld [vmem:[%s13788_s18 + $0x10] sm:$0xff] (%p4790_p1) }
0x18d9   :  { %6752 = vmatpush.msra.mxu1 (%p4790_p1), %v6724_v43 }
0x18da   : > { %v6587_v21 = vmul.f32 %v8706_v56, %v6586_v62  ;;  %v6723_v62 = vld [vmem:[%s13788_s18 + $0x8] sm:$0xff] (%p4790_p1) }
0x18dc   : > { %v6591_v59 = vsel %vm6590_vm10, %v8706_v56, %v6587_v21  ;;  %v14124_v21 = vmov %v14122_v42  ;;  %v6727_v56 = vld [vmem:[%s13788_s18 + $0x28] sm:$0xff] (%p4790_p1)  ;;  %vm7098_vm10 = vcmask (%p4790_p1), 621568  }
0x18dd   : > { %v6615_v14 = vmul.f32 %v6591_v59, %v13341_v23  ;;  %6771 = vmatpush.msra.mxu2 (%p4790_p1), %v6727_v56  ;;  %v6722_v21 = vld [vmem:[%s13788_s18] sm:$0xff] (%p4790_p1)  ;;  %v6879_v59 = vld [vmem:[%s13792_s22 + $0x38] sm:$0xff] (%p4790_p1) }
0x18de   :  { %6920 = vmatpush.msra.mxu0 (%p4790_p1), %v6879_v59  ;;  %6753 = vmatpush.msra.mxu1 (%p4790_p1), %v6722_v21  ;;  %v6817_v21 = vld [vmem:[%s13790_s20 + $0xa8] sm:$0xff] (%p4790_p1) }
0x18df   : > { %v6622_v7 = vmul.f32 %v13365_v2, %v6615_v14  ;;  %6772 = vmatpush.msra.mxu2 (%p4790_p1), %v6725_v49  ;;  %v6878_v14 = vld [vmem:[%s13792_s22 + $0x30] sm:$0xff] (%p4790_p1) }
0x18e0   :  { %v6972_v49 = vld [vmem:[%s13794_s24 + $0xd0] sm:$0xff] (%p4790_p1) }
0x18e1   : > { %v6629_v57 = vadd.f32 %v13367_v19, %v6622_v7   ;;  %v6877_v7 = vld [vmem:[%s13792_s22 + $0x28] sm:$0xff] (%p4790_p1)  ;;  %6773 = vmatpush.msra.mxu2 (%p4790_p1), %v6723_v62  ;;  %v6800_v62 = vld [vmem:[%s13790_s20 + $0x20] sm:$0xff] (%p4790_p1) }
0x18e2   :  { %6921 = vmatpush.msra.mxu0 (%p4790_p1), %v6877_v7  ;;  %v6952_v7 = vld [vmem:[%s13794_s24 + $0x30] sm:$0xff] (%p4790_p1) }
0x18e3   : > { %v14123_v52 = vmov %v6629_v57  ;;  %6900 = vmatpush.msrb.mxu2 (%p4790_p1), %v6878_v14 }
0x18fc   : > { %v6536_v22 = vpop.xlane.xlu2 %6535 }
0x18fd   : > { %v6544_v12 = vmul.f32 %v6536_v22, %v11619_v33  ;;  %v6875_v22 = vld [vmem:[%s13792_s22 + $0x18] sm:$0xff] (%p4790_p1) }
0x18fe   :  { %6922 = vmatpush.msra.mxu0 (%p4790_p1), %v6875_v22 }
0x18ff   : > { %v6550_v24 = vadd.f32 1e-05, %v6544_v12  ;;  %v6874_v12 = vld [vmem:[%s13792_s22 + $0x10] sm:$0xff] (%p4790_p1) }
0x1901   : > { %8707 = vrsqrt.f32 %v6550_v24  ;;  %vm6598_vm12 = vweird.f32 %v6550_v24 }
0x1904   : > { %v6539_v55 = vpop.xlane.xlu0 %6538 }
0x1905   : > { %v6545_v26 = vmul.f32 %v6539_v55, %v11619_v33  ;;  %v6651_v33 = vld [vmem:[%s13786_s16 + $0x20] sm:$0xff] (%p4790_p1) }
0x1906   :  { %v6872_v55 = vld [vmem:[%s13792_s22] sm:$0xff] (%p4790_p1) }
0x1907   : > { %v8708_v44 = vpop.eup %8707  ;;  %v6551_v29 = vadd.f32 1e-05, %v6545_v26  ;;  %v6696_v26 = vlaneseq (%p4790_p1) }
0x1908   : > { %v6593_v53 = vmul.f32 %v8708_v44, %v6550_v24  ;;  %vm6599_vm11 = vweird.f32 %v8708_v44  ;;  %v6873_v24 = vld [vmem:[%s13792_s22 + $0x8] sm:$0xff] (%p4790_p1) }
0x1909   : > { %8709 = vrsqrt.f32 %v6551_v29  ;;  %vm6600_vm13 = vmor %vm6598_vm12, %vm6599_vm11  ;;  %vm6608_vm15 = vweird.f32 %v6551_v29  ;;  %6923 = vmatpush.msra.mxu0 (%p4790_p1), %v6873_v24  ;;  %v6799_v24 = vld [vmem:[%s13790_s20 + $0x18] sm:$0xff] (%p4790_p1) }
0x190a   : > { %v6594_v11 = vmul.f32 %v8708_v44, %v6593_v53 }
0x190c   : > { %v6595_v48 = vmul.f32 0.5, %v6594_v11 }
0x190e   : > { %v6596_v38 = vsub.f32 1.5, %v6595_v48 }
0x190f   : > { %v8710_v23 = vpop.eup %8709 }
0x1910   : > { %v6597_v35 = vmul.f32 %v8708_v44, %v6596_v38  ;;  %v6603_v9 = vmul.f32 %v8710_v23, %v6551_v29  ;;  %vm6609_vm14 = vweird.f32 %v8710_v23 }
0x1911   : > { %vm6610_vm2 = vmor %vm6608_vm15, %vm6609_vm14 }
0x1912   : > { %v6601_v39 = vsel %vm6600_vm13, %v8708_v44, %v6597_v35  ;;  %v6604_v30 = vmul.f32 %v8710_v23, %v6603_v9  ;;  %v13511_v44 = vand.u32 (%p4790_p1), 127, %v6696_v26  ;;  %v6810_v35 = vld [vmem:[%s13790_s20 + $0x70] sm:$0xff] (%p4790_p1)  ;;  %v6809_v9 = vld [vmem:[%s13790_s20 + $0x68] sm:$0xff] (%p4790_p1)  ;;  %v6816_v26 = vld [vmem:[%s13790_s20 + $0xa0] sm:$0xff] (%p4790_p1) }
0x1913   : > { %v6616_v8 = vmul.f32 %v6601_v39, %v13347_v18  ;;  %v6640_v18 = vrot.slane (%p4790_p1), %v6629_v57, 7  ;;  %v6876_v57 = vld [vmem:[%s13792_s22 + $0x20] sm:$0xff] (%p4790_p1)  ;;  %v6827_v39 = vld [vmem:[%s13790_s20 + $0xf8] sm:$0xff] (%p4790_p1)  ;;  %s8977_s22 = smov (%p4790_p1), 119  }
0x1914   : > { %v6605_v46 = vmul.f32 0.5, %v6604_v30  ;;  %6901 = vmatpush.msrb.mxu2 (%p4790_p1), %v6876_v57  ;;  %v6826_v30 = vld [vmem:[%s13790_s20 + $0xf0] sm:$0xff] (%p4790_p1)  ;;  %6852 = vmatpush.msrb.mxu1 (%p4790_p1), %v6827_v39  ;;  %v6971_v57 = vld [vmem:[%s13794_s24 + $0xc8] sm:$0xff] (%p4790_p1)  ;;  %v6815_v39 = vld [vmem:[%s13790_s20 + $0x98] sm:$0xff] (%p4790_p1) }
0x1915   : > { %v6623_v25 = vmul.f32 %v13365_v2, %v6616_v8  ;;  %v6961_v8 = vld [vmem:[%s13794_s24 + $0x78] sm:$0xff] (%p4790_p1) }
0x1916   : > { %v6606_v40 = vsub.f32 1.5, %v6605_v46  ;;  %6902 = vmatpush.msrb.mxu2 (%p4790_p1), %v6874_v12  ;;  %v6808_v46 = vld [vmem:[%s13790_s20 + $0x60] sm:$0xff] (%p4790_p1)  ;;  %6853 = vmatpush.msrb.mxu1 (%p4790_p1), %v6826_v30 }
0x1917   : > { %v6630_v17 = vadd.f32 %v13367_v19, %v6623_v25   ;;  %v6825_v25 = vld [vmem:[%s13790_s20 + $0xe8] sm:$0xff] (%p4790_p1) }
0x1918   : > { %v6607_v10 = vmul.f32 %v8710_v23, %v6606_v40  ;;  %6903 = vmatpush.msrb.mxu2 (%p4790_p1), %v6872_v55  ;;  %v6960_v40 = vld [vmem:[%s13794_s24 + $0x70] sm:$0xff] (%p4790_p1)  ;;  %6854 = vmatpush.msrb.mxu1 (%p4790_p1), %v6825_v25 }
0x191a   : > { %v6611_v51 = vsel %vm6610_vm2, %v8710_v23, %v6607_v10  ;;  %v6811_v23 = vld [vmem:[%s13790_s20 + $0x78] sm:$0xff] (%p4790_p1)  ;;  %v6959_v10 = vld [vmem:[%s13794_s24 + $0x68] sm:$0xff] (%p4790_p1) }
0x191b   : > { %v6617_v41 = vmul.f32 %v6611_v51, %v13354_v47  ;;  %4792 = sbr.rel (!%p4790_p1) target bundleno = 3588 (0xe04), region = 173  ;;  %v6654_v47 = vld [vmem:[%s13786_s16 + $0x38] sm:$0xff] (%p4790_p1) }
0x191c   :  { %6671 = vmatpush.msra.mxu3 (%p4790_p1), %v6654_v47  ;;  %v6807_v51 = vld [vmem:[%s13790_s20 + $0x58] sm:$0xff] (%p4790_p1)  ;;  %v13567_v47 = vld [vmem:[%s13789_s19] sm:$0x3] (%p4790_p1) }
0x191d   : > { %v6624_v34 = vmul.f32 %v13365_v2, %v6617_v41  ;;  %v6653_v2 = vld [vmem:[%s13786_s16 + $0x30] sm:$0xff] (%p4790_p1)  ;;  %v6824_v41 = vld [vmem:[%s13790_s20 + $0xe0] sm:$0xff] (%p4790_p1) }
0x191e   :  { %6672 = vmatpush.msra.mxu3 (%p4790_p1), %v6653_v2  ;;  %6855 = vmatpush.msrb.mxu1 (%p4790_p1), %v6824_v41  ;;  %v6805_v2 = vld [vmem:[%s13790_s20 + $0x48] sm:$0xff] (%p4790_p1)  ;;  %v6814_v41 = vld [vmem:[%s13790_s20 + $0x90] sm:$0xff] (%p4790_p1) }
0x191f   : > { %v6631_v50 = vadd.f32 %v13367_v19, %v6624_v34   ;;  %v13419_v19 = vsel (%p4790_p1), %vm6635_vm5, %v6640_v18, %v14122_v42  ;;  %v6634_v42 = vrot.slane (%p4790_p1), %v14098_v54, 7  ;;  %v6806_v34 = vld [vmem:[%s13790_s20 + $0x50] sm:$0xff] (%p4790_p1)  ;;  %v6823_v18 = vld [vmem:[%s13790_s20 + $0xd8] sm:$0xff] (%p4790_p1) }
0x1920   :  { %6642 = vrot.lane.b32.xlu0 %v13419_v19, %s8968_s26  ;;  %6673 = vmatpush.msra.mxu3 %v6652_v37  ;;  %v6958_v37 = vld [vmem:[%s13794_s24 + $0x60] sm:$0xff]  ;;  %s8982_s26 = smov 64  }
0x1921   :  { %v6636_v17 = vsel %vm6635_vm5, %v6634_v42, %v14097_v3  ;;  %7665 = vmatmul.msk.f32.vlgmr.msra.gmra.mxu0 %vm149_vm0, %v13419_v19  ;;  %6856 = vmatpush.msrb.mxu1 %v6823_v18  ;;  %v6976_v42 = vld [vmem:[%s13794_s24 + $0xf0] sm:$0xff] }
0x1922   :  { %6674 = vmatpush.msra.mxu3 %v6651_v33  ;;  %7663 = vmatmul.msk.f32.vlgmr.msra.gmra.mxu2 %vm149_vm0, %v6636_v17  ;;  %v6957_v33 = vld [vmem:[%s13794_s24 + $0x58] sm:$0xff]  ;;  %v6968_v18 = vld [vmem:[%s13794_s24 + $0xb0] sm:$0xff] }
0x1923   :  { %7662 = vmatmul.msk.f32.vlgmr.msra.gmra.mxu1 %vm149_vm0, %v6636_v17  ;;  %6982 = vmatpush.msra.mxu2 %v6961_v8  ;;  %v6950_v8 = vld [vmem:[%s13794_s24 + $0x20] sm:$0xff] }
0x1924   :  { %6675 = vmatpush.msra.mxu3 %v6650_v0  ;;  %v6977_v0 = vld [vmem:[%s13794_s24 + $0xf8] sm:$0xff] }
0x1925   :  { %6983 = vmatpush.msra.mxu2 %v6960_v40  ;;  %7002 = vmatpush.msrb.mxu0 %v6977_v0 }
0x1926   :  { %6676 = vmatpush.msra.mxu3 %v6649_v58  ;;  %v6732_v58 = vperm.slane %v13567_v47, 0 }
0x1927   :  { %6984 = vmatpush.msra.mxu2 %v6959_v10  ;;  %7003 = vmatpush.msrb.mxu0 %v6976_v42 }
0x1928   :  { %6677 = vmatpush.msra.mxu3 %v6648_v36  ;;  %v6804_v36 = vld [vmem:[%s13790_s20 + $0x40] sm:$0xff] }
0x1929   :  { %6985 = vmatpush.msra.mxu2 %v6958_v37  ;;  %v6813_v37 = vld [vmem:[%s13790_s20 + $0x88] sm:$0xff] }
0x192a   :  { %6678 = vmatpush.msra.mxu3 %v6647_v63  ;;  %7664 = vmatmul.msk.f32.vlgmr.msrb.gmra.mxu2 %vm149_vm0, %v13419_v19  ;;  %v6822_v19 = vld [vmem:[%s13790_s20 + $0xd0] sm:$0xff]  ;;  %v6821_v63 = vld [vmem:[%s13790_s20 + $0xc8] sm:$0xff] }
0x192b   :  { %6857 = vmatpush.msrb.mxu1 %v6822_v19  ;;  %6986 = vmatpush.msra.mxu2 %v6957_v33  ;;  %v6796_v19 = vld [vmem:[%s13790_s20] sm:$0xff] }
0x192c   :  { %6832 = vmatpush.msrb.mxu3 %v6811_v23 }
0x192d   :  { %6858 = vmatpush.msrb.mxu1 %v6821_v63 }
0x192e   :  { %6833 = vmatpush.msrb.mxu3 %v6810_v35  ;;  %v6798_v35 = vld [vmem:[%s13790_s20 + $0x10] sm:$0xff] }
0x1930   :  { %6834 = vmatpush.msrb.mxu3 %v6809_v9 }
0x1932   :  { %6835 = vmatpush.msrb.mxu3 %v6808_v46  ;;  %v6969_v46 = vld [vmem:[%s13794_s24 + $0xb8] sm:$0xff] }
0x1934   :  { %6836 = vmatpush.msrb.mxu3 %v6807_v51 }
0x1936   :  { %6837 = vmatpush.msrb.mxu3 %v6806_v34  ;;  %v6949_v34 = vld [vmem:[%s13794_s24 + $0x18] sm:$0xff] }
0x1938   :  { %6838 = vmatpush.msrb.mxu3 %v6805_v2 }
0x193a   :  { %6839 = vmatpush.msrb.mxu3 %v6804_v36  ;;  %v6948_v36 = vld [vmem:[%s13794_s24 + $0x10] sm:$0xff] }
0x1992   :  { %v6643_v16 = vpop.permute.xlu0 %6642 }
0x1993   :  { %v13444_v52 = vsel %vm149_vm0, %v6636_v17, %v6643_v16  ;;  %v6956_v17 = vld [vmem:[%s13794_s24 + $0x50] sm:$0xff]  ;;  %v6803_v16 = vld [vmem:[%s13790_s20 + $0x38] sm:$0xff] }
0x1994   :  { %7660 = vmatmul.msk.f32.vlgmr.msra.gmra.mxu3 %vm4198_vm9, %v13444_v52  ;;  %6987 = vmatpush.msra.mxu2 %v6956_v17  ;;  %v6812_v17 = vld [vmem:[%s13790_s20 + $0x80] sm:$0xff] }
0x1995   :  { %6840 = vmatpush.msrb.mxu3 %v6803_v16  ;;  %v6967_v16 = vld [vmem:[%s13794_s24 + $0xa8] sm:$0xff] }
0x199e   :  { %v6925_v14 = vpop.f32.mrf.mxu0 }
0x19a5   :  { %v6775_v59 = vpop.f32.mrf.mxu2 }
0x1a17   :  { %v6680_v28 = vpop.f32.mrf.mxu3 }
0x1a18   :  { %v6681_v45 = vadd.f32 %v8716_v61, %v6680_v28  ;;  %v6820_v61 = vld [vmem:[%s13790_s20 + $0xc0] sm:$0xff]  ;;  %v6975_v28 = vld [vmem:[%s13794_s24 + $0xe8] sm:$0xff] }
0x1a19   :  { %7004 = vmatpush.msrb.mxu0 %v6975_v28  ;;  %6859 = vmatpush.msrb.mxu1 %v6820_v61 }
0x1a1a   :  { %v6684_v6 = vsel %vm6683_vm1, %v6681_v45, -inf }
0x1a1b   :  { %6685 = vmax.xlane.f32.xlu0 %v6684_v6  ;;  %v6955_v6 = vld [vmem:[%s13794_s24 + $0x48] sm:$0xff] }
0x1a1c   :  { %6988 = vmatpush.msra.mxu2 %v6955_v6 }
0x1a8e   :  { %v6686_v54 = vpop.xlane.xlu0 %6685 }
0x1a8f   :  { %v6687_v32 = vsub.f32 %v6681_v45, %v6686_v54  ;;  %v6755_v45 = vpop.f32.mrf.mxu1  ;;  %v6974_v54 = vld [vmem:[%s13794_s24 + $0xe0] sm:$0xff] }
0x1a90   :  { %7005 = vmatpush.msrb.mxu0 %v6974_v54  ;;  %v6966_v54 = vld [vmem:[%s13794_s24 + $0xa0] sm:$0xff] }
0x1a91   :  { %v6688_v3 = vmul.f32 1.442695, %v6687_v32 }
0x1a93   :  { %8719 = vpow2.f32 %v6688_v3  ;;  %v6802_v3 = vld [vmem:[%s13790_s20 + $0x30] sm:$0xff] }
0x1a94   :  { %6841 = vmatpush.msrb.mxu3 %v6802_v3  ;;  %v6946_v3 = vld [vmem:[%s13794_s24] sm:$0xff] }
0x1a96   :  { %6842 = vmatpush.msrb.mxu3 %v6801_v5  ;;  %v6964_v5 = vld [vmem:[%s13794_s24 + $0x90] sm:$0xff] }
0x1a98   :  { %6843 = vmatpush.msrb.mxu3 %v6800_v62 }
0x1a99   :  { %v8720_v13 = vpop.eup %8719 }
0x1a9a   :  { %v6690_v27 = vsel %vm6683_vm1, %v8720_v13, 0.0  ;;  %v6819_v13 = vld [vmem:[%s13790_s20 + $0xb8] sm:$0xff]  ;;  %6844 = vmatpush.msrb.mxu3 %v6799_v24 }
0x1a9b   :  { %6691 = vadd.xlane.f32.xlu1 %v6690_v27  ;;  %v13623_v27 = vld [vmem:[%s13793_s23] sm:$0x3]  ;;  %6860 = vmatpush.msrb.mxu1 %v6819_v13 }
0x1a9c   :  { %v6883_v56 = vperm.slane %v13623_v27, 1  ;;  %v6882_v40 = vperm.slane %v13623_v27, 0  ;;  %6845 = vmatpush.msrb.mxu3 %v6798_v35  ;;  %v8970_v35 = vmov 1  }
0x1a9d   :  { %6861 = vmatpush.msrb.mxu1 %v6818_v4  ;;  %8711 = vset.pattern.permute.xlu1 %v8970_v35 }
0x1a9e   :  { %v13665_v55 = vadd.f32 %v6925_v14, %v6883_v56 }
0x1a9f   :  { %6862 = vmatpush.msrb.mxu1 %v6817_v21  ;;  %v6962_v21 = vld [vmem:[%s13794_s24 + $0x80] sm:$0xff] }
0x1aa0   :  { %v6929_v9 = vmul.f32 %v13665_v55, %v13665_v55 }
0x1aa1   :  { %6863 = vmatpush.msrb.mxu1 %v6816_v26 }
0x1aa2   :  { %v6931_v10 = vmul.f32 %v6929_v9, %v13665_v55  ;;  %v8971_v9 = vmov 3  }
0x1aa3   :  { %6864 = vmatpush.msrb.mxu1 %v6815_v39  ;;  %8715 = vset.pattern.permute.xlu0 %v8971_v9 }
0x1aa4   :  { %v6933_v2 = vmul.f32 0.044715, %v6931_v10  ;;  %v8717_v10 = vld [vmem:[%s13791_s21] ss:$0 sm:$0xff]  ;;  %s8975_s21 = smov 124  }
0x1aa5   :  { %6865 = vmatpush.msrb.mxu1 %v6814_v41 }
0x1aa6   :  { %v6935_v28 = vadd.f32 %v6933_v2, %v13665_v55 }
0x1aa7   :  { %6866 = vmatpush.msrb.mxu1 %v6813_v37 }
0x1aa8   :  { %v6937_v13 = vmul.f32 0.7978846, %v6935_v28 }
0x1aa9   :  { %6867 = vmatpush.msrb.mxu1 %v6812_v17 }
0x1b0e   :  { %v6692_v1 = vpop.xlane.xlu1 %6691 }
0x1b0f   :  { %8721 = vlog2.f32 %v6692_v1  ;;  %v6954_v1 = vld [vmem:[%s13794_s24 + $0x40] sm:$0xff] }
0x1b10   :  { %6989 = vmatpush.msra.mxu2 %v6954_v1 }
0x1b12   :  { %6990 = vmatpush.msra.mxu2 %v6953_v20  ;;  %v6963_v20 = vld [vmem:[%s13794_s24 + $0x88] sm:$0xff] }
0x1b14   :  { %6991 = vmatpush.msra.mxu2 %v6952_v7 }
0x1b15   :  { %v8722_v15 = vpop.eup %8721 }
0x1b16   :  { %v6694_v60 = vmul.f32 0.6931472, %v8722_v15  ;;  %v6973_v15 = vld [vmem:[%s13794_s24 + $0xd8] sm:$0xff] }
0x1b17   :  { %7006 = vmatpush.msrb.mxu0 %v6973_v15  ;;  %v6965_v15 = vld [vmem:[%s13794_s24 + $0x98] sm:$0xff] }
0x1b18   :  { %v13453_v31 = vsub.f32 %v6687_v32, %v6694_v60  ;;  %v13612_v32 = vadd.f32 %v6755_v45, %v6732_v58  ;;  %v6905_v58 = vpop.f32.mrf.mxu2 }
0x1b19   :  { %7007 = vmatpush.msrb.mxu0 %v6972_v49  ;;  %v6906_v42 = vadd.f32 %v6905_v58, %v6882_v40  ;;  %v8973_v40 = vmov 0  }
0x1b1a   :  { %v6698_v50 = vsel %vm6683_vm1, %v13453_v31, -inf  ;;  %v6778_v60 = vmul.f32 %v13612_v32, %v13612_v32 }
0x1b1b   :  { %6699 = vmax.xlane.f32.xlu1 %v6698_v50  ;;  %v6733_v50 = vperm.slane %v13567_v47, 1  ;;  %7008 = vmatpush.msrb.mxu0 %v6971_v57  ;;  %v6928_v45 = vmul.f32 %v6906_v42, %v6906_v42 }
0x1b1c   :  { %v6780_v43 = vmul.f32 %v6778_v60, %v13612_v32 }
0x1b1d   :  { %v13660_v12 = vadd.f32 %v6775_v59, %v6733_v50  ;;  %v6930_v1 = vmul.f32 %v6928_v45, %v6906_v42 }
0x1b1e   :  { %v6782_v22 = vmul.f32 0.044715, %v6780_v43 }
0x1b1f   :  { %v6779_v23 = vmul.f32 %v13660_v12, %v13660_v12  ;;  %v6932_v50 = vmul.f32 0.044715, %v6930_v1 }
0x1b21   :  { %v6781_v25 = vmul.f32 %v6779_v23, %v13660_v12  ;;  %v6934_v56 = vadd.f32 %v6932_v50, %v6906_v42  ;;  %v8969_v23 = vmov 2  }
0x1b22   :  { %8712 = vset.pattern.permute.xlu2 %v8969_v23 }
0x1b23   :  { %v6783_v47 = vmul.f32 0.044715, %v6781_v25  ;;  %v6936_v62 = vmul.f32 0.7978846, %v6934_v56 }
0x1b25   :  { %v6785_v63 = vadd.f32 %v6783_v47, %v13660_v12 }
0x1b27   :  { %v6787_v6 = vmul.f32 0.7978846, %v6785_v63 }
0x1b8e   :  { %v6700_v29 = vpop.xlane.xlu1 %6699 }
0x1b8f   :  { %vm6701_vm3 = vcmp.ge.f32.partialorder %v13453_v31, %v6700_v29  ;;  %v6951_v29 = vld [vmem:[%s13794_s24 + $0x28] sm:$0xff] }
0x1b90   :  { %v6702_v53 = vsel %vm6701_vm3, %v13511_v44, 4  ;;  %6992 = vmatpush.msra.mxu2 %v6951_v29 }
0x1b91   :  { %v13516_v11 = vsel %vm6683_vm1, %v6702_v53, 2147483647  ;;  %v6970_v53 = vld [vmem:[%s13794_s24 + $0xc0] sm:$0xff] }
0x1b92   :  { %v6705_v48 = vshra.s32 %v13516_v11, 16  ;;  %v6704_v30 = vand.u32 65535, %v13516_v11  ;;  %v6797_v11 = vld [vmem:[%s13790_s20 + $0x8] sm:$0xff]  ;;  %7009 = vmatpush.msrb.mxu0 %v6970_v53  ;;  %6993 = vmatpush.msra.mxu2 %v6950_v8 }
0x1b93   :  { %6846 = vmatpush.msrb.mxu3 %v6797_v11 }
0x1b94   :  { %v13519_v38 = vcvt.s32.f32 %v6705_v48  ;;  %v6784_v48 = vadd.f32 %v6782_v22, %v13612_v32  ;;  %7010 = vmatpush.msrb.mxu0 %v6969_v46  ;;  %v6706_v0 = vcvt.s32.f32 %v6704_v30  ;;  %6994 = vmatpush.msra.mxu2 %v6949_v34 }
0x1b95   :  { %6847 = vmatpush.msrb.mxu3 %v6796_v19 }
0x1b96   :  { %6708 = vmin.xlane.f32.xlu2 %v13519_v38  ;;  %v6786_v51 = vmul.f32 0.7978846, %v6784_v48  ;;  %7011 = vmatpush.msrb.mxu0 %v6968_v18 }
0x1b97   :  { %6995 = vmatpush.msra.mxu2 %v6948_v36 }
0x1b98   :  { %8723 = vtanh.f32 %v6786_v51  ;;  %7012 = vmatpush.msrb.mxu0 %v6967_v16 }
0x1b99   :  { %8725 = vtanh.f32 %v6787_v6 }
0x1b9a   :  { %7013 = vmatpush.msrb.mxu0 %v6966_v54  ;;  %8727 = vtanh.f32 %v6937_v13 }
0x1b9b   :  { %8729 = vtanh.f32 %v6936_v62 }
0x1b9c   :  { %7014 = vmatpush.msrb.mxu0 %v6965_v15 }
0x1b9e   :  { %v8724_v27 = vpop.eup %8723  ;;  %7015 = vmatpush.msrb.mxu0 %v6964_v5 }
0x1b9f   :  { %v6790_v60 = vadd.f32 1.0, %v8724_v27  ;;  %v8726_v43 = vpop.eup %8725 }
0x1ba0   :  { %v8728_v59 = vpop.eup %8727  ;;  %v6791_v14 = vadd.f32 1.0, %v8726_v43  ;;  %7016 = vmatpush.msrb.mxu0 %v6963_v20 }
0x1ba1   :  { %v6792_v4 = vmul.f32 0.5, %v6790_v60  ;;  %v6941_v7 = vadd.f32 1.0, %v8728_v59  ;;  %v8730_v26 = vpop.eup %8729 }
0x1ba2   :  { %v6793_v57 = vmul.f32 0.5, %v6791_v14  ;;  %7017 = vmatpush.msrb.mxu0 %v6962_v21  ;;  %v6940_v29 = vadd.f32 1.0, %v8730_v26 }
0x1ba3   :  { %v6794_v49 = vmul.f32 %v6792_v4, %v13612_v32  ;;  %v6943_v22 = vmul.f32 0.5, %v6941_v7 }
0x1ba4   :  { %v6795_v24 = vmul.f32 %v6793_v57, %v13660_v12  ;;  %v6942_v53 = vmul.f32 0.5, %v6940_v29 }
0x1ba5   :  { %6848 = vmatmul.f32.vlgmr.msrb.gmra.mxu3 %v6794_v49  ;;  %v6945_v32 = vmul.f32 %v6943_v22, %v13665_v55  ;;  %v8972_v55 = vmov 0.0  }
0x1ba6   :  { %6868 = vmatmul.f32.vlgmr.msrb.gmra.mxu1 %v6795_v24  ;;  %v6944_v48 = vmul.f32 %v6942_v53, %v6906_v42 }
0x1ba7   :  { %7018 = vmatmul.f32.vlgmr.msrb.gmra.mxu0 %v6945_v32 }
0x1c09   :  { %v13715_v33 = vpop.xlane.xlu2 %6708 }
0x1c0a   :  { %vm6710_vm0 = vcmp.eq.f32.partialorder %v13519_v38, %v13715_v33  ;;  %v6947_v38 = vld [vmem:[%s13794_s24 + $0x8] sm:$0xff]  ;;  %v6715_v39 = vcvt.f32.s32 %v13715_v33 }
0x1c0b   :  { %v6711_v61 = vsel %vm6710_vm0, %v6706_v0, inf  ;;  %6996 = vmatpush.msra.mxu2 %v6947_v38 }
0x1c0c   :  { %6712 = vmin.xlane.f32.xlu2 %v6711_v61  ;;  %v6716_v8 = vshll.u32 %v6715_v39, 16 }
0x1c0d   :  { %6997 = vmatpush.msra.mxu2 %v6946_v3 }
0x1c0e   :  { %6998 = vmatmul.f32.vlgmr.msra.gmra.mxu2 %v6944_v48 }
0x1c23   :  { %v6869_v41 = vpop.f32.mrf.mxu1 }
0x1c24   :  { %v7019_v37 = vpop.f32.mrf.mxu0 }
0x1c28   :  { %v6849_v11 = vpop.f32.mrf.mxu3 }
0x1c29   :  { %v6850_v51 = vadd.f32 %v8717_v10, %v6849_v11 }
0x1c2b   :  { %v6870_v34 = vadd.f32 %v6869_v41, %v6850_v51 }
0x1c7f   :  { %v6713_v30 = vpop.xlane.xlu2 %6712 }
0x1c80   :  { %v6714_v12 = vcvt.f32.s32 %v6713_v30 }
0x1c82   :  { %v13755_v46 = vadd.s32 %v6716_v8, %v6714_v12 }
0x1c84   :  { %vm6718_vm4 = vcmp.eq.s32.totalorder %v13511_v44, %v13755_v46  ;;  %v8718_v44 = vld [vmem:[%s14125_s25] ss:$0 sm:$0xff]  ;;  %v6721_v49 = vcvt.s32.f32 %v13755_v46 }
0x1c85   :  { %v7661_v25 = vsel %vm6718_vm4, 1.0, %v8972_v55 }
0x1c86   :  { %7048 = vperm.xlu2 %8712, %v7661_v25   ;;  %7032 = vperm.xlu1 %8711, %v7661_v25  }
0x1c8e   :  { %8713 = vset.pattern.permute.xlu2 %v8971_v9  ;;  %8714 = vset.pattern.permute.xlu1 %v8973_v40 }
0x1c8f   :  { %7064 = vperm.xlu2 %8713, %v7661_v25   ;;  %7024 = vperm.xlu1 %8714, %v7661_v25  }
0x1c91   :  { %v6999_v2 = vpop.f32.mrf.mxu2 }
0x1c92   :  { %v7000_v19 = vadd.f32 %v8718_v44, %v6999_v2 }
0x1c94   :  { %v7020_v33 = vadd.f32 %v7019_v37, %v7000_v19 }
0x1ce0   :  { %v7049_v18 = vpop.permute.xlu2 %7048 }
0x1ce1   :  { %v7051_v47 = vmul.f32 %v7049_v18, %v6870_v34  ;;  %v7057_v42 = vmul.f32 %v7049_v18, %v7020_v33 }
0x1ce3   :  { %7053 = vrot.lane.b32.xlu0 %v7051_v47, %s8974_s3 }
0x1ce9   :  { %v7065_v63 = vpop.permute.xlu2 %7064 }
0x1cea   :  { %v7067_v17 = vmul.f32 %v7065_v63, %v6870_v34  ;;  %v7073_v16 = vmul.f32 %v7065_v63, %v7020_v33 }
0x1cf8   :  { %v7033_v0 = vpop.permute.xlu1 %7032 }
0x1cf9   :  { %v7035_v58 = vmul.f32 %v7033_v0, %v6870_v34  ;;  %v7041_v36 = vmul.f32 %v7033_v0, %v7020_v33 }
0x1cfb   :  { %7043 = vrot.lane.b32.xlu1 %v7041_v36, %s8975_s21  ;;  %7037 = vrot.lane.b32.xlu2 %v7035_v58, %s8976_s10 }
0x1d01   :  { %v7025_v28 = vpop.permute.xlu1 %7024 }
0x1d02   :  { %v7029_v45 = vmul.f32 %v7025_v28, %v7020_v33  ;;  %v7027_v54 = vmul.f32 %v7025_v28, %v6870_v34 }
0x1d03   :  { %7069 = vrot.lane.b32.xlu1 %v7067_v17, %s8977_s22  ;;  %7059 = vrot.lane.b32.xlu2 %v7057_v42, %s8978_s13 }
0x1d0b   :  { %7075 = vrot.lane.b32.xlu2 %v7073_v16, %s8979_s4 }
0x1d13   :  { %7088 = vrot.lane.b32.xlu2 %v13453_v31, %s8980_s2 }
0x1d55   :  { %v7038_v61 = vpop.permute.xlu2 %7037  ;;  %v7054_v60 = vpop.permute.xlu0 %7053 }
0x1d56   :  { %v7040_v13 = vadd.f32 %v7038_v61, %v7027_v54 }
0x1d58   :  { %v7056_v50 = vadd.f32 %v7054_v60, %v7040_v13 }
0x1d5d   :  { %v7060_v38 = vpop.permute.xlu2 %7059 }
0x1d65   :  { %v7076_v1 = vpop.permute.xlu2 %7075 }
0x1d6d   :  { %v7044_v6 = vpop.permute.xlu1 %7043  ;;  %v7089_v43 = vpop.permute.xlu2 %7088 }
0x1d6e   :  { %v7046_v3 = vadd.f32 %v7044_v6, %v7029_v45 }
0x1d70   :  { %v7062_v27 = vadd.f32 %v7060_v38, %v7046_v3 }
0x1d72   :  { %v7078_v15 = vadd.f32 %v7076_v1, %v7062_v27 }
0x1d74   :  { %7084 = vrot.lane.b32.xlu0 %v7078_v15, %s8981_s7 }
0x1d75   :  { %v7070_v5 = vpop.permute.xlu1 %7069 }
0x1d76   :  { %v7072_v4 = vadd.f32 %v7070_v5, %v7056_v50 }
0x1d78   :  { %7080 = vrot.lane.b32.xlu1 %v7072_v4, %s8982_s26 }
0x1de6   :  { %v7085_v56 = vpop.permute.xlu0 %7084 }
0x1dea   :  { %v7081_v31 = vpop.permute.xlu1 %7080 }
0x1deb   :  { %v7091_v20 = vsel %vm4198_vm9, %v13444_v52, %v7081_v31 }
0x1dec   :  { %v7093_v62 = vsel %vm7092_vm6, %v7091_v20, %v7085_v56 }
0x1ded   :  { %v7095_v21 = vsel %vm7094_vm7, %v7093_v62, %v7089_v43 }
0x1dee   :  { %v7097_v59 = vsel %vm7096_vm8, %v7095_v21, %v6721_v49 }
0x1def   :  { %v7099_v14 = vsel %vm7098_vm10, %v7097_v59, 0.0 }
0x1df0   :  { %7100 = vst [vmem:[%s14126_s28] sm:$0x3] %v7099_v14 }

</bundles_post_ra>
